<compile_context>
chip_gen: v6e
topology: v6e:2x2x1
jax: 0.10.0
libtpu: 0.0.40
codegen_flags: <defaults>
</compile_context>

<pallas_src>
import jax
import jax.numpy as jnp
from jax.experimental import pallas as pl
from jax.experimental.pallas import tpu as pltpu


# ---------------------------------------------------------------------------
# Fused encoder kernel: one grid step = one bidirectional LSTM layer
# ---------------------------------------------------------------------------
def _make_encoder_kernel(seq_len, batch, hidden, emb_dim):
    S, B, H, E = seq_len, batch, hidden, emb_dim
    G4 = 4 * H  # per-direction gate width

    def sigmoid(x):
        # sigmoid(x) = 0.5 * tanh(0.5 x) + 0.5  -> single EUP op per gate
        return 0.5 * jnp.tanh(0.5 * x) + 0.5

    def cell(g, c_prev):
        # H = 128 -> every slice is a full 128-lane slab (unmasked ops)
        i = sigmoid(g[:, 0 * H:1 * H])
        f = sigmoid(g[:, 1 * H:2 * H])
        gg = jnp.tanh(g[:, 2 * H:3 * H])
        o = sigmoid(g[:, 3 * H:4 * H])
        c = f * c_prev + i * gg
        h = o * jnp.tanh(c)
        return h, c

    def kernel(x_ref, h0_ref, c0_ref, wih_ref, whh_ref, b_ref,
               out_ref, hn_ref, cn_ref, gx_sc, act_sc):
        layer = pl.program_id(0)
        bias = b_ref[0]                                     # (1, 8H) f32

        # ---- hoisted input projection, both directions fused:
        #      (S*B, Din) @ (Din, 8H)  + combined bias   (bf16 x bf16 -> f32)
        @pl.when(layer == 0)
        def _():
            x_flat = x_ref[...].reshape(S * B, E).astype(jnp.bfloat16)
            gx = jnp.dot(x_flat, wih_ref[0, 0:E, :],
                         preferred_element_type=jnp.float32) + bias
            gx_sc[...] = gx.reshape(S, B, 8 * H)

        @pl.when(layer != 0)
        def _():
            prev = act_sc[...].reshape(S * B, 2 * H).astype(jnp.bfloat16)
            gx = jnp.dot(prev, wih_ref[0],
                         preferred_element_type=jnp.float32) + bias
            gx_sc[...] = gx.reshape(S, B, 8 * H)

        # ---- serial recurrence: fwd and bwd directions share the time loop
        def step(t, carry):
            h_f, c_f, h_b, c_b = carry
            rt = S - 1 - t                                  # backward index
            gf = gx_sc[t, :, 0:G4] + jnp.dot(
                h_f.astype(jnp.bfloat16), whh_ref[0, :, 0:G4],
                preferred_element_type=jnp.float32)
            gb = gx_sc[rt, :, G4:] + jnp.dot(
                h_b.astype(jnp.bfloat16), whh_ref[0, :, G4:],
                preferred_element_type=jnp.float32)
            h_f, c_f = cell(gf, c_f)
            h_b, c_b = cell(gb, c_b)
            # direct, lane-aligned stores into the (S, B, 2H) layer output
            act_sc[t, :, 0:H] = h_f
            act_sc[rt, :, H:2 * H] = h_b
            return h_f, c_f, h_b, c_b

        init = (h0_ref[0], c0_ref[0], h0_ref[1], c0_ref[1])
        h_f, c_f, h_b, c_b = jax.lax.fori_loop(0, S, step, init, unroll=True)

        # final states: written once per layer (per-layer output block)
        hn_ref[0] = h_f
        cn_ref[0] = c_f
        hn_ref[1] = h_b
        cn_ref[1] = c_b

        # last layer: single copy of the resident activation slab to the output
        @pl.when(layer == pl.num_programs(0) - 1)
        def _():
            out_ref[...] = act_sc[...]

    return kernel


def encoder_forward(params, tokens, hidden_h, hidden_c):
    """tokens: (B, S) int32 -> (output (S, B, 2H), hn (2L, B, H), cn (2L, B, H))."""
    n_layers = len(params["layers"])
    emb = jnp.take(params["embedding"], tokens, axis=0)      # (B, S, E)
    x = jnp.transpose(emb, (1, 0, 2)).astype(jnp.float32)    # (S, B, E)
    S, B, E = x.shape
    H = hidden_h.shape[-1]

    # ---- stack per-layer weights (bf16), gate order [i, f, g, o],
    #      fwd/bwd concatenated on the lane dim, layer-0 W_ih zero-padded.
    wih_l, whh_l, b_l = [], [], []
    for layer in range(n_layers):
        (wih_f, whh_f, b_f), (wih_b, whh_b, b_b) = params["layers"][layer]
        wih_cat = jnp.concatenate([wih_f, wih_b], axis=1)     # (Din, 8H)
        if wih_cat.shape[0] < 2 * H:
            wih_cat = jnp.pad(wih_cat, ((0, 2 * H - wih_cat.shape[0]), (0, 0)))
        wih_l.append(wih_cat)
        whh_l.append(jnp.concatenate([whh_f, whh_b], axis=1))  # (H, 8H)
        b_l.append(jnp.concatenate([b_f, b_b], axis=1))        # (1, 8H)
    wih_all = jnp.stack(wih_l).astype(jnp.bfloat16)            # (L, 2H, 8H)
    whh_all = jnp.stack(whh_l).astype(jnp.bfloat16)            # (L, H, 8H)
    b_all = jnp.stack(b_l).astype(jnp.float32)                 # (L, 1, 8H)

    in_specs = [
        pl.BlockSpec((S, B, E), lambda l: (0, 0, 0)),           # x (resident)
        pl.BlockSpec((2, B, H), lambda l: (l, 0, 0)),           # h0 per layer
        pl.BlockSpec((2, B, H), lambda l: (l, 0, 0)),           # c0 per layer
        pl.BlockSpec((1, 2 * H, 8 * H), lambda l: (l, 0, 0)),   # W_ih per layer
        pl.BlockSpec((1, H, 8 * H), lambda l: (l, 0, 0)),       # W_hh per layer
        pl.BlockSpec((1, 1, 8 * H), lambda l: (l, 0, 0)),       # bias per layer
    ]
    out_shape = (jax.ShapeDtypeStruct((S, B, 2 * H), jnp.float32),
                 jax.ShapeDtypeStruct((2 * n_layers, B, H), jnp.float32),
                 jax.ShapeDtypeStruct((2 * n_layers, B, H), jnp.float32))
    out_specs = (pl.BlockSpec((S, B, 2 * H), lambda l: (0, 0, 0)),
                 pl.BlockSpec((2, B, H), lambda l: (l, 0, 0)),
                 pl.BlockSpec((2, B, H), lambda l: (l, 0, 0)))

    scratch = [pltpu.VMEM((S, B, 8 * H), jnp.float32),  # hoisted x@W_ih (fwd|bwd)
               pltpu.VMEM((S, B, 2 * H), jnp.float32)]  # inter-layer activations

    kernel = _make_encoder_kernel(S, B, H, E)
    return pl.pallas_call(
        kernel,
        grid=(n_layers,),
        in_specs=in_specs,
        out_specs=out_specs,
        out_shape=out_shape,
        scratch_shapes=scratch,
        compiler_params=pltpu.CompilerParams(
            dimension_semantics=("arbitrary",),
            vmem_limit_bytes=32 * 1024 * 1024,
        ),
    )(x, hidden_h, hidden_c, wih_all, whh_all, b_all)


# ---------------------------------------------------------------------------
# Parameter setup (deterministic, matches nn.Embedding / nn.LSTM shapes)
# ---------------------------------------------------------------------------
def init_encoder_params(key, vocab, embedding_dim, enc_units, hidden_sz, n_layers):
    assert embedding_dim == enc_units, "nn.LSTM input_size must match embedding_dim"
    params = {}
    key, k_emb = jax.random.split(key)
    params["embedding"] = 0.1 * jax.random.normal(
        k_emb, (vocab, embedding_dim), jnp.float32)
    scale = 1.0 / float(hidden_sz) ** 0.5
    layers = []
    for layer in range(n_layers):
        din = enc_units if layer == 0 else 2 * hidden_sz
        dirs = []
        for _ in range(2):  # forward, backward
            key, k1, k2, k3, k4 = jax.random.split(key, 5)
            wih = jax.random.uniform(k1, (din, 4 * hidden_sz), jnp.float32, -scale, scale)
            whh = jax.random.uniform(k2, (hidden_sz, 4 * hidden_sz), jnp.float32, -scale, scale)
            b_ih = jax.random.uniform(k3, (4 * hidden_sz,), jnp.float32, -scale, scale)
            b_hh = jax.random.uniform(k4, (4 * hidden_sz,), jnp.float32, -scale, scale)
            dirs.append((wih, whh, (b_ih + b_hh)[None, :]))
        layers.append(tuple(dirs))
    params["layers"] = layers
    return params


# ---------------------------------------------------------------------------
# Pure-JAX f32 reference (for correctness check of the Pallas encoder)
# ---------------------------------------------------------------------------
def _ref_lstm_dir(x_seq, wih, whh, b, h0, c0):
    H = h0.shape[-1]

    def step(carry, x_t):
        h, c = carry
        gates = x_t @ wih + h @ whh + b[0]
        i = jax.nn.sigmoid(gates[:, 0 * H:1 * H])
        f = jax.nn.sigmoid(gates[:, 1 * H:2 * H])
        g = jnp.tanh(gates[:, 2 * H:3 * H])
        o = jax.nn.sigmoid(gates[:, 3 * H:4 * H])
        c = f * c + i * g
        h = o * jnp.tanh(c)
        return (h, c), h

    (hn, cn), out = jax.lax.scan(step, (h0, c0), x_seq)
    return out, hn, cn


def _ref_encoder(params, tokens, hidden_h, hidden_c, n_layers):
    emb = jnp.take(params["embedding"], tokens, axis=0)
    x = jnp.transpose(emb, (1, 0, 2))
    layer_in = x
    hns, cns = [], []
    for layer in range(n_layers):
        (wih_f, whh_f, b_f), (wih_b, whh_b, b_b) = params["layers"][layer]
        out_f, hn_f, cn_f = _ref_lstm_dir(
            layer_in, wih_f, whh_f, b_f, hidden_h[2 * layer], hidden_c[2 * layer])
        out_b_rev, hn_b, cn_b = _ref_lstm_dir(
            layer_in[::-1], wih_b, whh_b, b_b,
            hidden_h[2 * layer + 1], hidden_c[2 * layer + 1])
        layer_in = jnp.concatenate([out_f, out_b_rev[::-1]], axis=-1)
        hns += [hn_f, hn_b]
        cns += [cn_f, cn_b]
    return layer_in, jnp.stack(hns), jnp.stack(cns)


if __name__ == "__main__":
    vocab = 50
    embedding_dim = enc_units = 64
    hidden_sz = 128          # module default; keeps gate slices/stores 128-lane aligned
    n_layers = 3
    B, S = 8, 8

    key = jax.random.PRNGKey(0)
    k_tok, k_par = jax.random.split(key)
    tokens = jax.random.randint(k_tok, (B, S), 0, vocab, dtype=jnp.int32)
    params = init_encoder_params(k_par, vocab, embedding_dim, enc_units,
                                 hidden_sz, n_layers)
    # matches Encoder.initialize_hidden_state: (2 * n_layers, B, hidden_sz)
    hidden_h = jnp.zeros((2 * n_layers, B, hidden_sz), jnp.float32)
    hidden_c = jnp.zeros((2 * n_layers, B, hidden_sz), jnp.float32)

    output, hn, cn = encoder_forward(params, tokens, hidden_h, hidden_c)
    jax.block_until_ready((output, hn, cn))

    ref_out, ref_hn, ref_cn = _ref_encoder(params, tokens, hidden_h, hidden_c, n_layers)
    assert output.shape == (S, B, 2 * hidden_sz)
    assert hn.shape == (2 * n_layers, B, hidden_sz)
    assert cn.shape == (2 * n_layers, B, hidden_sz)
    # bf16 matmul operands (f32 accumulate) -> loosened tolerance vs f32 reference
    tol = dict(atol=2e-2, rtol=2e-2)
    assert jnp.allclose(output, ref_out, **tol), "output mismatch"
    assert jnp.allclose(hn, ref_hn, **tol), "hn mismatch"
    assert jnp.allclose(cn, ref_cn, **tol), "cn mismatch"

    print("KERNEL_OK")
</pallas_src>

<mosaic_0001>
module attributes {stable_mosaic.version = 11 : i64} {
  func.func @kernel(%arg0: i32, %arg1: memref<8x8x64xf32, #tpu.memory_space<vmem>>, %arg2: memref<2x8x128xf32, #tpu.memory_space<vmem>>, %arg3: memref<2x8x128xf32, #tpu.memory_space<vmem>>, %arg4: memref<1x256x1024xbf16, #tpu.memory_space<vmem>>, %arg5: memref<1x128x1024xbf16, #tpu.memory_space<vmem>>, %arg6: memref<1x1x1024xf32, #tpu.memory_space<vmem>>, %arg7: memref<8x8x256xf32, #tpu.memory_space<vmem>>, %arg8: memref<2x8x128xf32, #tpu.memory_space<vmem>>, %arg9: memref<2x8x128xf32, #tpu.memory_space<vmem>>, %arg10: memref<8x8x1024xf32, #tpu.memory_space<vmem>>, %arg11: memref<8x8x256xf32, #tpu.memory_space<vmem>>) attributes {dimension_semantics = [#tpu.dimension_semantics<arbitrary>], iteration_bounds = array<i64: 3>, scalar_prefetch = 0 : i64, scratch_operands = 2 : i64, tpu.core_type = #tpu.core_type<tc>, window_params = [{pipeline_mode = #tpu.pipeline_mode<synchronous>, transform_indices = @transform_0, window_bounds = array<i64: 8, 8, 64>}, {transform_indices = @transform_1, window_bounds = array<i64: 2, 8, 128>}, {transform_indices = @transform_2, window_bounds = array<i64: 2, 8, 128>}, {transform_indices = @transform_3, window_bounds = array<i64: 1, 256, 1024>}, {transform_indices = @transform_4, window_bounds = array<i64: 1, 128, 1024>}, {transform_indices = @transform_5, window_bounds = array<i64: 1, 1, 1024>}, {pipeline_mode = #tpu.pipeline_mode<synchronous>, transform_indices = @transform_6, window_bounds = array<i64: 8, 8, 256>}, {transform_indices = @transform_7, window_bounds = array<i64: 2, 8, 128>}, {transform_indices = @transform_8, window_bounds = array<i64: 2, 8, 128>}]} {
    %c0 = arith.constant 0 : index
    %c0_0 = arith.constant 0 : index
    %c0_1 = arith.constant 0 : index
    %0 = vector.load %arg6[%c0, %c0_0, %c0_1] : memref<1x1x1024xf32, #tpu.memory_space<vmem>>, vector<1x1x1024xf32>
    %1 = vector.shape_cast %0 : vector<1x1x1024xf32> to vector<1x1024xf32>
    %c0_i32 = arith.constant 0 : i32
    %2 = arith.cmpi eq, %arg0, %c0_i32 : i32
    %3 = arith.extui %2 : i1 to i32
    %c0_i32_2 = arith.constant 0 : i32
    %4 = arith.cmpi ne, %3, %c0_i32_2 : i32
    scf.if %4 {
      %c0_308 = arith.constant 0 : index
      %c0_309 = arith.constant 0 : index
      %c0_310 = arith.constant 0 : index
      %727 = vector.load %arg1[%c0_308, %c0_309, %c0_310] : memref<8x8x64xf32, #tpu.memory_space<vmem>>, vector<8x8x64xf32>
      %728 = vector.shape_cast %727 : vector<8x8x64xf32> to vector<64x64xf32>
      %729 = arith.truncf %728 : vector<64x64xf32> to vector<64x64xbf16>
      %c0_311 = arith.constant 0 : index
      %c0_312 = arith.constant 0 : index
      %c0_313 = arith.constant 0 : index
      %730 = vector.load %arg4[%c0_311, %c0_312, %c0_313] : memref<1x256x1024xbf16, #tpu.memory_space<vmem>>, vector<1x64x1024xbf16>
      %731 = vector.shape_cast %730 : vector<1x64x1024xbf16> to vector<64x1024xbf16>
      %cst_314 = arith.constant dense<0.000000e+00> : vector<64x1024xf32>
      %732 = tpu.matmul %729, %731, %cst_314 {dimension_numbers = #tpu.dot_dimension_numbers<[1], [0], [0], [1], [0, 0, 1, 1], [], []>} : vector<64x64xbf16>, vector<64x1024xbf16>, vector<64x1024xf32> -> vector<64x1024xf32>
      %733 = vector.broadcast %1 : vector<1x1024xf32> to vector<64x1024xf32>
      %734 = arith.addf %732, %733 : vector<64x1024xf32>
      %735 = vector.shape_cast %734 : vector<64x1024xf32> to vector<8x8x1024xf32>
      %c0_315 = arith.constant 0 : index
      %c0_316 = arith.constant 0 : index
      %c0_317 = arith.constant 0 : index
      %736 = vector.load %arg10[%c0_315, %c0_316, %c0_317] : memref<8x8x1024xf32, #tpu.memory_space<vmem>>, vector<8x8x1024xf32>
      tpu.vector_store %arg10[%c0_315, %c0_316, %c0_317], %735 {strides = array<i32>} : memref<8x8x1024xf32, #tpu.memory_space<vmem>>, vector<8x8x1024xf32>,
    } else {
    }
    %c0_i32_3 = arith.constant 0 : i32
    %5 = arith.cmpi ne, %arg0, %c0_i32_3 : i32
    %6 = arith.extui %5 : i1 to i32
    %c0_i32_4 = arith.constant 0 : i32
    %7 = arith.cmpi ne, %6, %c0_i32_4 : i32
    scf.if %7 {
      %c0_308 = arith.constant 0 : index
      %c0_309 = arith.constant 0 : index
      %c0_310 = arith.constant 0 : index
      %727 = vector.load %arg11[%c0_308, %c0_309, %c0_310] : memref<8x8x256xf32, #tpu.memory_space<vmem>>, vector<8x8x256xf32>
      %728 = vector.shape_cast %727 : vector<8x8x256xf32> to vector<64x256xf32>
      %729 = arith.truncf %728 : vector<64x256xf32> to vector<64x256xbf16>
      %c0_311 = arith.constant 0 : index
      %c0_312 = arith.constant 0 : index
      %c0_313 = arith.constant 0 : index
      %730 = vector.load %arg4[%c0_311, %c0_312, %c0_313] : memref<1x256x1024xbf16, #tpu.memory_space<vmem>>, vector<1x256x1024xbf16>
      %731 = vector.shape_cast %730 : vector<1x256x1024xbf16> to vector<256x1024xbf16>
      %cst_314 = arith.constant dense<0.000000e+00> : vector<64x1024xf32>
      %732 = tpu.matmul %729, %731, %cst_314 {dimension_numbers = #tpu.dot_dimension_numbers<[1], [0], [0], [1], [0, 0, 1, 1], [], []>} : vector<64x256xbf16>, vector<256x1024xbf16>, vector<64x1024xf32> -> vector<64x1024xf32>
      %733 = vector.broadcast %1 : vector<1x1024xf32> to vector<64x1024xf32>
      %734 = arith.addf %732, %733 : vector<64x1024xf32>
      %735 = vector.shape_cast %734 : vector<64x1024xf32> to vector<8x8x1024xf32>
      %c0_315 = arith.constant 0 : index
      %c0_316 = arith.constant 0 : index
      %c0_317 = arith.constant 0 : index
      %736 = vector.load %arg10[%c0_315, %c0_316, %c0_317] : memref<8x8x1024xf32, #tpu.memory_space<vmem>>, vector<8x8x1024xf32>
      tpu.vector_store %arg10[%c0_315, %c0_316, %c0_317], %735 {strides = array<i32>} : memref<8x8x1024xf32, #tpu.memory_space<vmem>>, vector<8x8x1024xf32>,
    } else {
    }
    %c0_5 = arith.constant 0 : index
    %c0_6 = arith.constant 0 : index
    %c0_7 = arith.constant 0 : index
    %8 = vector.load %arg2[%c0_5, %c0_6, %c0_7] : memref<2x8x128xf32, #tpu.memory_space<vmem>>, vector<1x8x128xf32>
    %9 = vector.shape_cast %8 : vector<1x8x128xf32> to vector<8x128xf32>
    %c0_8 = arith.constant 0 : index
    %c0_9 = arith.constant 0 : index
    %c0_10 = arith.constant 0 : index
    %10 = vector.load %arg3[%c0_8, %c0_9, %c0_10] : memref<2x8x128xf32, #tpu.memory_space<vmem>>, vector<1x8x128xf32>
    %11 = vector.shape_cast %10 : vector<1x8x128xf32> to vector<8x128xf32>
    %c1 = arith.constant 1 : index
    %c0_11 = arith.constant 0 : index
    %c0_12 = arith.constant 0 : index
    %12 = vector.load %arg2[%c1, %c0_11, %c0_12] : memref<2x8x128xf32, #tpu.memory_space<vmem>>, vector<1x8x128xf32>
    %13 = vector.shape_cast %12 : vector<1x8x128xf32> to vector<8x128xf32>
    %c1_13 = arith.constant 1 : index
    %c0_14 = arith.constant 0 : index
    %c0_15 = arith.constant 0 : index
    %14 = vector.load %arg3[%c1_13, %c0_14, %c0_15] : memref<2x8x128xf32, #tpu.memory_space<vmem>>, vector<1x8x128xf32>
    %15 = vector.shape_cast %14 : vector<1x8x128xf32> to vector<8x128xf32>
    %c0_i32_16 = arith.constant 0 : i32
    %c7_i32 = arith.constant 7 : i32
    %16 = arith.subi %c7_i32, %c0_i32_16 : i32
    %17 = arith.index_cast %c0_i32_16 : i32 to index
    %c0_17 = arith.constant 0 : index
    %c0_18 = arith.constant 0 : index
    %18 = vector.load %arg10[%17, %c0_17, %c0_18] : memref<8x8x1024xf32, #tpu.memory_space<vmem>>, vector<1x8x512xf32>
    %19 = vector.shape_cast %18 : vector<1x8x512xf32> to vector<8x512xf32>
    %20 = arith.truncf %9 : vector<8x128xf32> to vector<8x128xbf16>
    %c0_19 = arith.constant 0 : index
    %c0_20 = arith.constant 0 : index
    %c0_21 = arith.constant 0 : index
    %21 = vector.load %arg5[%c0_19, %c0_20, %c0_21] : memref<1x128x1024xbf16, #tpu.memory_space<vmem>>, vector<1x128x512xbf16>
    %22 = vector.shape_cast %21 : vector<1x128x512xbf16> to vector<128x512xbf16>
    %cst = arith.constant dense<0.000000e+00> : vector<8x512xf32>
    %23 = tpu.matmul %20, %22, %cst {dimension_numbers = #tpu.dot_dimension_numbers<[1], [0], [0], [1], [0, 0, 1, 1], [], []>} : vector<8x128xbf16>, vector<128x512xbf16>, vector<8x512xf32> -> vector<8x512xf32>
    %24 = arith.addf %19, %23 : vector<8x512xf32>
    %25 = arith.index_cast %16 : i32 to index
    %c0_22 = arith.constant 0 : index
    %c512 = arith.constant 512 : index
    %26 = vector.load %arg10[%25, %c0_22, %c512] : memref<8x8x1024xf32, #tpu.memory_space<vmem>>, vector<1x8x512xf32>
    %27 = vector.shape_cast %26 : vector<1x8x512xf32> to vector<8x512xf32>
    %28 = arith.truncf %13 : vector<8x128xf32> to vector<8x128xbf16>
    %c0_23 = arith.constant 0 : index
    %c0_24 = arith.constant 0 : index
    %c512_25 = arith.constant 512 : index
    %29 = vector.load %arg5[%c0_23, %c0_24, %c512_25] : memref<1x128x1024xbf16, #tpu.memory_space<vmem>>, vector<1x128x512xbf16>
    %30 = vector.shape_cast %29 : vector<1x128x512xbf16> to vector<128x512xbf16>
    %cst_26 = arith.constant dense<0.000000e+00> : vector<8x512xf32>
    %31 = tpu.matmul %28, %30, %cst_26 {dimension_numbers = #tpu.dot_dimension_numbers<[1], [0], [0], [1], [0, 0, 1, 1], [], []>} : vector<8x128xbf16>, vector<128x512xbf16>, vector<8x512xf32> -> vector<8x512xf32>
    %32 = arith.addf %27, %31 : vector<8x512xf32>
    %33 = vector.extract_strided_slice %24 {offsets = [0, 0], sizes = [8, 128], strides = [1, 1]} : vector<8x512xf32> to vector<8x128xf32>
    %cst_27 = arith.constant 5.000000e-01 : f32
    %34 = vector.broadcast %cst_27 : f32 to vector<8x128xf32>
    %35 = arith.mulf %34, %33 : vector<8x128xf32>
    %36 = math.tanh %35 : vector<8x128xf32>
    %cst_28 = arith.constant 5.000000e-01 : f32
    %37 = vector.broadcast %cst_28 : f32 to vector<8x128xf32>
    %38 = arith.mulf %37, %36 : vector<8x128xf32>
    %cst_29 = arith.constant 5.000000e-01 : f32
    %39 = vector.broadcast %cst_29 : f32 to vector<8x128xf32>
    %40 = arith.addf %38, %39 : vector<8x128xf32>
    %41 = vector.extract_strided_slice %24 {offsets = [0, 128], sizes = [8, 128], strides = [1, 1]} : vector<8x512xf32> to vector<8x128xf32>
    %cst_30 = arith.constant 5.000000e-01 : f32
    %42 = vector.broadcast %cst_30 : f32 to vector<8x128xf32>
    %43 = arith.mulf %42, %41 : vector<8x128xf32>
    %44 = math.tanh %43 : vector<8x128xf32>
    %cst_31 = arith.constant 5.000000e-01 : f32
    %45 = vector.broadcast %cst_31 : f32 to vector<8x128xf32>
    %46 = arith.mulf %45, %44 : vector<8x128xf32>
    %cst_32 = arith.constant 5.000000e-01 : f32
    %47 = vector.broadcast %cst_32 : f32 to vector<8x128xf32>
    %48 = arith.addf %46, %47 : vector<8x128xf32>
    %49 = vector.extract_strided_slice %24 {offsets = [0, 256], sizes = [8, 128], strides = [1, 1]} : vector<8x512xf32> to vector<8x128xf32>
    %50 = math.tanh %49 : vector<8x128xf32>
    %51 = vector.extract_strided_slice %24 {offsets = [0, 384], sizes = [8, 128], strides = [1, 1]} : vector<8x512xf32> to vector<8x128xf32>
    %cst_33 = arith.constant 5.000000e-01 : f32
    %52 = vector.broadcast %cst_33 : f32 to vector<8x128xf32>
    %53 = arith.mulf %52, %51 : vector<8x128xf32>
    %54 = math.tanh %53 : vector<8x128xf32>
    %cst_34 = arith.constant 5.000000e-01 : f32
    %55 = vector.broadcast %cst_34 : f32 to vector<8x128xf32>
    %56 = arith.mulf %55, %54 : vector<8x128xf32>
    %cst_35 = arith.constant 5.000000e-01 : f32
    %57 = vector.broadcast %cst_35 : f32 to vector<8x128xf32>
    %58 = arith.addf %56, %57 : vector<8x128xf32>
    %59 = arith.mulf %48, %11 : vector<8x128xf32>
    %60 = arith.mulf %40, %50 : vector<8x128xf32>
    %61 = arith.addf %59, %60 : vector<8x128xf32>
    %62 = math.tanh %61 : vector<8x128xf32>
    %63 = arith.mulf %58, %62 : vector<8x128xf32>
    %64 = vector.extract_strided_slice %32 {offsets = [0, 0], sizes = [8, 128], strides = [1, 1]} : vector<8x512xf32> to vector<8x128xf32>
    %cst_36 = arith.constant 5.000000e-01 : f32
    %65 = vector.broadcast %cst_36 : f32 to vector<8x128xf32>
    %66 = arith.mulf %65, %64 : vector<8x128xf32>
    %67 = math.tanh %66 : vector<8x128xf32>
    %cst_37 = arith.constant 5.000000e-01 : f32
    %68 = vector.broadcast %cst_37 : f32 to vector<8x128xf32>
    %69 = arith.mulf %68, %67 : vector<8x128xf32>
    %cst_38 = arith.constant 5.000000e-01 : f32
    %70 = vector.broadcast %cst_38 : f32 to vector<8x128xf32>
    %71 = arith.addf %69, %70 : vector<8x128xf32>
    %72 = vector.extract_strided_slice %32 {offsets = [0, 128], sizes = [8, 128], strides = [1, 1]} : vector<8x512xf32> to vector<8x128xf32>
    %cst_39 = arith.constant 5.000000e-01 : f32
    %73 = vector.broadcast %cst_39 : f32 to vector<8x128xf32>
    %74 = arith.mulf %73, %72 : vector<8x128xf32>
    %75 = math.tanh %74 : vector<8x128xf32>
    %cst_40 = arith.constant 5.000000e-01 : f32
    %76 = vector.broadcast %cst_40 : f32 to vector<8x128xf32>
    %77 = arith.mulf %76, %75 : vector<8x128xf32>
    %cst_41 = arith.constant 5.000000e-01 : f32
    %78 = vector.broadcast %cst_41 : f32 to vector<8x128xf32>
    %79 = arith.addf %77, %78 : vector<8x128xf32>
    %80 = vector.extract_strided_slice %32 {offsets = [0, 256], sizes = [8, 128], strides = [1, 1]} : vector<8x512xf32> to vector<8x128xf32>
    %81 = math.tanh %80 : vector<8x128xf32>
    %82 = vector.extract_strided_slice %32 {offsets = [0, 384], sizes = [8, 128], strides = [1, 1]} : vector<8x512xf32> to vector<8x128xf32>
    %cst_42 = arith.constant 5.000000e-01 : f32
    %83 = vector.broadcast %cst_42 : f32 to vector<8x128xf32>
    %84 = arith.mulf %83, %82 : vector<8x128xf32>
    %85 = math.tanh %84 : vector<8x128xf32>
    %cst_43 = arith.constant 5.000000e-01 : f32
    %86 = vector.broadcast %cst_43 : f32 to vector<8x128xf32>
    %87 = arith.mulf %86, %85 : vector<8x128xf32>
    %cst_44 = arith.constant 5.000000e-01 : f32
    %88 = vector.broadcast %cst_44 : f32 to vector<8x128xf32>
    %89 = arith.addf %87, %88 : vector<8x128xf32>
    %90 = arith.mulf %79, %15 : vector<8x128xf32>
    %91 = arith.mulf %71, %81 : vector<8x128xf32>
    %92 = arith.addf %90, %91 : vector<8x128xf32>
    %93 = math.tanh %92 : vector<8x128xf32>
    %94 = arith.mulf %89, %93 : vector<8x128xf32>
    %95 = arith.index_cast %c0_i32_16 : i32 to index
    %c0_45 = arith.constant 0 : index
    %c0_46 = arith.constant 0 : index
    %96 = vector.load %arg11[%95, %c0_45, %c0_46] : memref<8x8x256xf32, #tpu.memory_space<vmem>>, vector<1x8x128xf32>
    %97 = vector.shape_cast %96 : vector<1x8x128xf32> to vector<8x128xf32>
    %98 = vector.shape_cast %63 : vector<8x128xf32> to vector<1x8x128xf32>
    tpu.vector_store %arg11[%95, %c0_45, %c0_46], %98 {strides = array<i32>} : memref<8x8x256xf32, #tpu.memory_space<vmem>>, vector<1x8x128xf32>,
    %99 = arith.index_cast %16 : i32 to index
    %c0_47 = arith.constant 0 : index
    %c128 = arith.constant 128 : index
    %100 = vector.load %arg11[%99, %c0_47, %c128] : memref<8x8x256xf32, #tpu.memory_space<vmem>>, vector<1x8x128xf32>
    %101 = vector.shape_cast %100 : vector<1x8x128xf32> to vector<8x128xf32>
    %102 = vector.shape_cast %94 : vector<8x128xf32> to vector<1x8x128xf32>
    tpu.vector_store %arg11[%99, %c0_47, %c128], %102 {strides = array<i32>} : memref<8x8x256xf32, #tpu.memory_space<vmem>>, vector<1x8x128xf32>,
    %c1_i32 = arith.constant 1 : i32
    %c7_i32_48 = arith.constant 7 : i32
    %103 = arith.subi %c7_i32_48, %c1_i32 : i32
    %104 = arith.index_cast %c1_i32 : i32 to index
    %c0_49 = arith.constant 0 : index
    %c0_50 = arith.constant 0 : index
    %105 = vector.load %arg10[%104, %c0_49, %c0_50] : memref<8x8x1024xf32, #tpu.memory_space<vmem>>, vector<1x8x512xf32>
    %106 = vector.shape_cast %105 : vector<1x8x512xf32> to vector<8x512xf32>
    %107 = arith.truncf %63 : vector<8x128xf32> to vector<8x128xbf16>
    %c0_51 = arith.constant 0 : index
    %c0_52 = arith.constant 0 : index
    %c0_53 = arith.constant 0 : index
    %108 = vector.load %arg5[%c0_51, %c0_52, %c0_53] : memref<1x128x1024xbf16, #tpu.memory_space<vmem>>, vector<1x128x512xbf16>
    %109 = vector.shape_cast %108 : vector<1x128x512xbf16> to vector<128x512xbf16>
    %cst_54 = arith.constant dense<0.000000e+00> : vector<8x512xf32>
    %110 = tpu.matmul %107, %109, %cst_54 {dimension_numbers = #tpu.dot_dimension_numbers<[1], [0], [0], [1], [0, 0, 1, 1], [], []>} : vector<8x128xbf16>, vector<128x512xbf16>, vector<8x512xf32> -> vector<8x512xf32>
    %111 = arith.addf %106, %110 : vector<8x512xf32>
    %112 = arith.index_cast %103 : i32 to index
    %c0_55 = arith.constant 0 : index
    %c512_56 = arith.constant 512 : index
    %113 = vector.load %arg10[%112, %c0_55, %c512_56] : memref<8x8x1024xf32, #tpu.memory_space<vmem>>, vector<1x8x512xf32>
    %114 = vector.shape_cast %113 : vector<1x8x512xf32> to vector<8x512xf32>
    %115 = arith.truncf %94 : vector<8x128xf32> to vector<8x128xbf16>
    %c0_57 = arith.constant 0 : index
    %c0_58 = arith.constant 0 : index
    %c512_59 = arith.constant 512 : index
    %116 = vector.load %arg5[%c0_57, %c0_58, %c512_59] : memref<1x128x1024xbf16, #tpu.memory_space<vmem>>, vector<1x128x512xbf16>
    %117 = vector.shape_cast %116 : vector<1x128x512xbf16> to vector<128x512xbf16>
    %cst_60 = arith.constant dense<0.000000e+00> : vector<8x512xf32>
    %118 = tpu.matmul %115, %117, %cst_60 {dimension_numbers = #tpu.dot_dimension_numbers<[1], [0], [0], [1], [0, 0, 1, 1], [], []>} : vector<8x128xbf16>, vector<128x512xbf16>, vector<8x512xf32> -> vector<8x512xf32>
    %119 = arith.addf %114, %118 : vector<8x512xf32>
    %120 = vector.extract_strided_slice %111 {offsets = [0, 0], sizes = [8, 128], strides = [1, 1]} : vector<8x512xf32> to vector<8x128xf32>
    %cst_61 = arith.constant 5.000000e-01 : f32
    %121 = vector.broadcast %cst_61 : f32 to vector<8x128xf32>
    %122 = arith.mulf %121, %120 : vector<8x128xf32>
    %123 = math.tanh %122 : vector<8x128xf32>
    %cst_62 = arith.constant 5.000000e-01 : f32
    %124 = vector.broadcast %cst_62 : f32 to vector<8x128xf32>
    %125 = arith.mulf %124, %123 : vector<8x128xf32>
    %cst_63 = arith.constant 5.000000e-01 : f32
    %126 = vector.broadcast %cst_63 : f32 to vector<8x128xf32>
    %127 = arith.addf %125, %126 : vector<8x128xf32>
    %128 = vector.extract_strided_slice %111 {offsets = [0, 128], sizes = [8, 128], strides = [1, 1]} : vector<8x512xf32> to vector<8x128xf32>
    %cst_64 = arith.constant 5.000000e-01 : f32
    %129 = vector.broadcast %cst_64 : f32 to vector<8x128xf32>
    %130 = arith.mulf %129, %128 : vector<8x128xf32>
    %131 = math.tanh %130 : vector<8x128xf32>
    %cst_65 = arith.constant 5.000000e-01 : f32
    %132 = vector.broadcast %cst_65 : f32 to vector<8x128xf32>
    %133 = arith.mulf %132, %131 : vector<8x128xf32>
    %cst_66 = arith.constant 5.000000e-01 : f32
    %134 = vector.broadcast %cst_66 : f32 to vector<8x128xf32>
    %135 = arith.addf %133, %134 : vector<8x128xf32>
    %136 = vector.extract_strided_slice %111 {offsets = [0, 256], sizes = [8, 128], strides = [1, 1]} : vector<8x512xf32> to vector<8x128xf32>
    %137 = math.tanh %136 : vector<8x128xf32>
    %138 = vector.extract_strided_slice %111 {offsets = [0, 384], sizes = [8, 128], strides = [1, 1]} : vector<8x512xf32> to vector<8x128xf32>
    %cst_67 = arith.constant 5.000000e-01 : f32
    %139 = vector.broadcast %cst_67 : f32 to vector<8x128xf32>
    %140 = arith.mulf %139, %138 : vector<8x128xf32>
    %141 = math.tanh %140 : vector<8x128xf32>
    %cst_68 = arith.constant 5.000000e-01 : f32
    %142 = vector.broadcast %cst_68 : f32 to vector<8x128xf32>
    %143 = arith.mulf %142, %141 : vector<8x128xf32>
    %cst_69 = arith.constant 5.000000e-01 : f32
    %144 = vector.broadcast %cst_69 : f32 to vector<8x128xf32>
    %145 = arith.addf %143, %144 : vector<8x128xf32>
    %146 = arith.mulf %135, %61 : vector<8x128xf32>
    %147 = arith.mulf %127, %137 : vector<8x128xf32>
    %148 = arith.addf %146, %147 : vector<8x128xf32>
    %149 = math.tanh %148 : vector<8x128xf32>
    %150 = arith.mulf %145, %149 : vector<8x128xf32>
    %151 = vector.extract_strided_slice %119 {offsets = [0, 0], sizes = [8, 128], strides = [1, 1]} : vector<8x512xf32> to vector<8x128xf32>
    %cst_70 = arith.constant 5.000000e-01 : f32
    %152 = vector.broadcast %cst_70 : f32 to vector<8x128xf32>
    %153 = arith.mulf %152, %151 : vector<8x128xf32>
    %154 = math.tanh %153 : vector<8x128xf32>
    %cst_71 = arith.constant 5.000000e-01 : f32
    %155 = vector.broadcast %cst_71 : f32 to vector<8x128xf32>
    %156 = arith.mulf %155, %154 : vector<8x128xf32>
    %cst_72 = arith.constant 5.000000e-01 : f32
    %157 = vector.broadcast %cst_72 : f32 to vector<8x128xf32>
    %158 = arith.addf %156, %157 : vector<8x128xf32>
    %159 = vector.extract_strided_slice %119 {offsets = [0, 128], sizes = [8, 128], strides = [1, 1]} : vector<8x512xf32> to vector<8x128xf32>
    %cst_73 = arith.constant 5.000000e-01 : f32
    %160 = vector.broadcast %cst_73 : f32 to vector<8x128xf32>
    %161 = arith.mulf %160, %159 : vector<8x128xf32>
    %162 = math.tanh %161 : vector<8x128xf32>
    %cst_74 = arith.constant 5.000000e-01 : f32
    %163 = vector.broadcast %cst_74 : f32 to vector<8x128xf32>
    %164 = arith.mulf %163, %162 : vector<8x128xf32>
    %cst_75 = arith.constant 5.000000e-01 : f32
    %165 = vector.broadcast %cst_75 : f32 to vector<8x128xf32>
    %166 = arith.addf %164, %165 : vector<8x128xf32>
    %167 = vector.extract_strided_slice %119 {offsets = [0, 256], sizes = [8, 128], strides = [1, 1]} : vector<8x512xf32> to vector<8x128xf32>
    %168 = math.tanh %167 : vector<8x128xf32>
    %169 = vector.extract_strided_slice %119 {offsets = [0, 384], sizes = [8, 128], strides = [1, 1]} : vector<8x512xf32> to vector<8x128xf32>
    %cst_76 = arith.constant 5.000000e-01 : f32
    %170 = vector.broadcast %cst_76 : f32 to vector<8x128xf32>
    %171 = arith.mulf %170, %169 : vector<8x128xf32>
    %172 = math.tanh %171 : vector<8x128xf32>
    %cst_77 = arith.constant 5.000000e-01 : f32
    %173 = vector.broadcast %cst_77 : f32 to vector<8x128xf32>
    %174 = arith.mulf %173, %172 : vector<8x128xf32>
    %cst_78 = arith.constant 5.000000e-01 : f32
    %175 = vector.broadcast %cst_78 : f32 to vector<8x128xf32>
    %176 = arith.addf %174, %175 : vector<8x128xf32>
    %177 = arith.mulf %166, %92 : vector<8x128xf32>
    %178 = arith.mulf %158, %168 : vector<8x128xf32>
    %179 = arith.addf %177, %178 : vector<8x128xf32>
    %180 = math.tanh %179 : vector<8x128xf32>
    %181 = arith.mulf %176, %180 : vector<8x128xf32>
    %182 = arith.index_cast %c1_i32 : i32 to index
    %c0_79 = arith.constant 0 : index
    %c0_80 = arith.constant 0 : index
    %183 = vector.load %arg11[%182, %c0_79, %c0_80] : memref<8x8x256xf32, #tpu.memory_space<vmem>>, vector<1x8x128xf32>
    %184 = vector.shape_cast %183 : vector<1x8x128xf32> to vector<8x128xf32>
    %185 = vector.shape_cast %150 : vector<8x128xf32> to vector<1x8x128xf32>
    tpu.vector_store %arg11[%182, %c0_79, %c0_80], %185 {strides = array<i32>} : memref<8x8x256xf32, #tpu.memory_space<vmem>>, vector<1x8x128xf32>,
    %186 = arith.index_cast %103 : i32 to index
    %c0_81 = arith.constant 0 : index
    %c128_82 = arith.constant 128 : index
    %187 = vector.load %arg11[%186, %c0_81, %c128_82] : memref<8x8x256xf32, #tpu.memory_space<vmem>>, vector<1x8x128xf32>
    %188 = vector.shape_cast %187 : vector<1x8x128xf32> to vector<8x128xf32>
    %189 = vector.shape_cast %181 : vector<8x128xf32> to vector<1x8x128xf32>
    tpu.vector_store %arg11[%186, %c0_81, %c128_82], %189 {strides = array<i32>} : memref<8x8x256xf32, #tpu.memory_space<vmem>>, vector<1x8x128xf32>,
    %c2_i32 = arith.constant 2 : i32
    %c7_i32_83 = arith.constant 7 : i32
    %190 = arith.subi %c7_i32_83, %c2_i32 : i32
    %191 = arith.index_cast %c2_i32 : i32 to index
    %c0_84 = arith.constant 0 : index
    %c0_85 = arith.constant 0 : index
    %192 = vector.load %arg10[%191, %c0_84, %c0_85] : memref<8x8x1024xf32, #tpu.memory_space<vmem>>, vector<1x8x512xf32>
    %193 = vector.shape_cast %192 : vector<1x8x512xf32> to vector<8x512xf32>
    %194 = arith.truncf %150 : vector<8x128xf32> to vector<8x128xbf16>
    %c0_86 = arith.constant 0 : index
    %c0_87 = arith.constant 0 : index
    %c0_88 = arith.constant 0 : index
    %195 = vector.load %arg5[%c0_86, %c0_87, %c0_88] : memref<1x128x1024xbf16, #tpu.memory_space<vmem>>, vector<1x128x512xbf16>
    %196 = vector.shape_cast %195 : vector<1x128x512xbf16> to vector<128x512xbf16>
    %cst_89 = arith.constant dense<0.000000e+00> : vector<8x512xf32>
    %197 = tpu.matmul %194, %196, %cst_89 {dimension_numbers = #tpu.dot_dimension_numbers<[1], [0], [0], [1], [0, 0, 1, 1], [], []>} : vector<8x128xbf16>, vector<128x512xbf16>, vector<8x512xf32> -> vector<8x512xf32>
    %198 = arith.addf %193, %197 : vector<8x512xf32>
    %199 = arith.index_cast %190 : i32 to index
    %c0_90 = arith.constant 0 : index
    %c512_91 = arith.constant 512 : index
    %200 = vector.load %arg10[%199, %c0_90, %c512_91] : memref<8x8x1024xf32, #tpu.memory_space<vmem>>, vector<1x8x512xf32>
    %201 = vector.shape_cast %200 : vector<1x8x512xf32> to vector<8x512xf32>
    %202 = arith.truncf %181 : vector<8x128xf32> to vector<8x128xbf16>
    %c0_92 = arith.constant 0 : index
    %c0_93 = arith.constant 0 : index
    %c512_94 = arith.constant 512 : index
    %203 = vector.load %arg5[%c0_92, %c0_93, %c512_94] : memref<1x128x1024xbf16, #tpu.memory_space<vmem>>, vector<1x128x512xbf16>
    %204 = vector.shape_cast %203 : vector<1x128x512xbf16> to vector<128x512xbf16>
    %cst_95 = arith.constant dense<0.000000e+00> : vector<8x512xf32>
    %205 = tpu.matmul %202, %204, %cst_95 {dimension_numbers = #tpu.dot_dimension_numbers<[1], [0], [0], [1], [0, 0, 1, 1], [], []>} : vector<8x128xbf16>, vector<128x512xbf16>, vector<8x512xf32> -> vector<8x512xf32>
    %206 = arith.addf %201, %205 : vector<8x512xf32>
    %207 = vector.extract_strided_slice %198 {offsets = [0, 0], sizes = [8, 128], strides = [1, 1]} : vector<8x512xf32> to vector<8x128xf32>
    %cst_96 = arith.constant 5.000000e-01 : f32
    %208 = vector.broadcast %cst_96 : f32 to vector<8x128xf32>
    %209 = arith.mulf %208, %207 : vector<8x128xf32>
    %210 = math.tanh %209 : vector<8x128xf32>
    %cst_97 = arith.constant 5.000000e-01 : f32
    %211 = vector.broadcast %cst_97 : f32 to vector<8x128xf32>
    %212 = arith.mulf %211, %210 : vector<8x128xf32>
    %cst_98 = arith.constant 5.000000e-01 : f32
    %213 = vector.broadcast %cst_98 : f32 to vector<8x128xf32>
    %214 = arith.addf %212, %213 : vector<8x128xf32>
    %215 = vector.extract_strided_slice %198 {offsets = [0, 128], sizes = [8, 128], strides = [1, 1]} : vector<8x512xf32> to vector<8x128xf32>
    %cst_99 = arith.constant 5.000000e-01 : f32
    %216 = vector.broadcast %cst_99 : f32 to vector<8x128xf32>
    %217 = arith.mulf %216, %215 : vector<8x128xf32>
    %218 = math.tanh %217 : vector<8x128xf32>
    %cst_100 = arith.constant 5.000000e-01 : f32
    %219 = vector.broadcast %cst_100 : f32 to vector<8x128xf32>
    %220 = arith.mulf %219, %218 : vector<8x128xf32>
    %cst_101 = arith.constant 5.000000e-01 : f32
    %221 = vector.broadcast %cst_101 : f32 to vector<8x128xf32>
    %222 = arith.addf %220, %221 : vector<8x128xf32>
    %223 = vector.extract_strided_slice %198 {offsets = [0, 256], sizes = [8, 128], strides = [1, 1]} : vector<8x512xf32> to vector<8x128xf32>
    %224 = math.tanh %223 : vector<8x128xf32>
    %225 = vector.extract_strided_slice %198 {offsets = [0, 384], sizes = [8, 128], strides = [1, 1]} : vector<8x512xf32> to vector<8x128xf32>
    %cst_102 = arith.constant 5.000000e-01 : f32
    %226 = vector.broadcast %cst_102 : f32 to vector<8x128xf32>
    %227 = arith.mulf %226, %225 : vector<8x128xf32>
    %228 = math.tanh %227 : vector<8x128xf32>
    %cst_103 = arith.constant 5.000000e-01 : f32
    %229 = vector.broadcast %cst_103 : f32 to vector<8x128xf32>
    %230 = arith.mulf %229, %228 : vector<8x128xf32>
    %cst_104 = arith.constant 5.000000e-01 : f32
    %231 = vector.broadcast %cst_104 : f32 to vector<8x128xf32>
    %232 = arith.addf %230, %231 : vector<8x128xf32>
    %233 = arith.mulf %222, %148 : vector<8x128xf32>
    %234 = arith.mulf %214, %224 : vector<8x128xf32>
    %235 = arith.addf %233, %234 : vector<8x128xf32>
    %236 = math.tanh %235 : vector<8x128xf32>
    %237 = arith.mulf %232, %236 : vector<8x128xf32>
    %238 = vector.extract_strided_slice %206 {offsets = [0, 0], sizes = [8, 128], strides = [1, 1]} : vector<8x512xf32> to vector<8x128xf32>
    %cst_105 = arith.constant 5.000000e-01 : f32
    %239 = vector.broadcast %cst_105 : f32 to vector<8x128xf32>
    %240 = arith.mulf %239, %238 : vector<8x128xf32>
    %241 = math.tanh %240 : vector<8x128xf32>
    %cst_106 = arith.constant 5.000000e-01 : f32
    %242 = vector.broadcast %cst_106 : f32 to vector<8x128xf32>
    %243 = arith.mulf %242, %241 : vector<8x128xf32>
    %cst_107 = arith.constant 5.000000e-01 : f32
    %244 = vector.broadcast %cst_107 : f32 to vector<8x128xf32>
    %245 = arith.addf %243, %244 : vector<8x128xf32>
    %246 = vector.extract_strided_slice %206 {offsets = [0, 128], sizes = [8, 128], strides = [1, 1]} : vector<8x512xf32> to vector<8x128xf32>
    %cst_108 = arith.constant 5.000000e-01 : f32
    %247 = vector.broadcast %cst_108 : f32 to vector<8x128xf32>
    %248 = arith.mulf %247, %246 : vector<8x128xf32>
    %249 = math.tanh %248 : vector<8x128xf32>
    %cst_109 = arith.constant 5.000000e-01 : f32
    %250 = vector.broadcast %cst_109 : f32 to vector<8x128xf32>
    %251 = arith.mulf %250, %249 : vector<8x128xf32>
    %cst_110 = arith.constant 5.000000e-01 : f32
    %252 = vector.broadcast %cst_110 : f32 to vector<8x128xf32>
    %253 = arith.addf %251, %252 : vector<8x128xf32>
    %254 = vector.extract_strided_slice %206 {offsets = [0, 256], sizes = [8, 128], strides = [1, 1]} : vector<8x512xf32> to vector<8x128xf32>
    %255 = math.tanh %254 : vector<8x128xf32>
    %256 = vector.extract_strided_slice %206 {offsets = [0, 384], sizes = [8, 128], strides = [1, 1]} : vector<8x512xf32> to vector<8x128xf32>
    %cst_111 = arith.constant 5.000000e-01 : f32
    %257 = vector.broadcast %cst_111 : f32 to vector<8x128xf32>
    %258 = arith.mulf %257, %256 : vector<8x128xf32>
    %259 = math.tanh %258 : vector<8x128xf32>
    %cst_112 = arith.constant 5.000000e-01 : f32
    %260 = vector.broadcast %cst_112 : f32 to vector<8x128xf32>
    %261 = arith.mulf %260, %259 : vector<8x128xf32>
    %cst_113 = arith.constant 5.000000e-01 : f32
    %262 = vector.broadcast %cst_113 : f32 to vector<8x128xf32>
    %263 = arith.addf %261, %262 : vector<8x128xf32>
    %264 = arith.mulf %253, %179 : vector<8x128xf32>
    %265 = arith.mulf %245, %255 : vector<8x128xf32>
    %266 = arith.addf %264, %265 : vector<8x128xf32>
    %267 = math.tanh %266 : vector<8x128xf32>
    %268 = arith.mulf %263, %267 : vector<8x128xf32>
    %269 = arith.index_cast %c2_i32 : i32 to index
    %c0_114 = arith.constant 0 : index
    %c0_115 = arith.constant 0 : index
    %270 = vector.load %arg11[%269, %c0_114, %c0_115] : memref<8x8x256xf32, #tpu.memory_space<vmem>>, vector<1x8x128xf32>
    %271 = vector.shape_cast %270 : vector<1x8x128xf32> to vector<8x128xf32>
    %272 = vector.shape_cast %237 : vector<8x128xf32> to vector<1x8x128xf32>
    tpu.vector_store %arg11[%269, %c0_114, %c0_115], %272 {strides = array<i32>} : memref<8x8x256xf32, #tpu.memory_space<vmem>>, vector<1x8x128xf32>,
    %273 = arith.index_cast %190 : i32 to index
    %c0_116 = arith.constant 0 : index
    %c128_117 = arith.constant 128 : index
    %274 = vector.load %arg11[%273, %c0_116, %c128_117] : memref<8x8x256xf32, #tpu.memory_space<vmem>>, vector<1x8x128xf32>
    %275 = vector.shape_cast %274 : vector<1x8x128xf32> to vector<8x128xf32>
    %276 = vector.shape_cast %268 : vector<8x128xf32> to vector<1x8x128xf32>
    tpu.vector_store %arg11[%273, %c0_116, %c128_117], %276 {strides = array<i32>} : memref<8x8x256xf32, #tpu.memory_space<vmem>>, vector<1x8x128xf32>,
    %c3_i32 = arith.constant 3 : i32
    %c7_i32_118 = arith.constant 7 : i32
    %277 = arith.subi %c7_i32_118, %c3_i32 : i32
    %278 = arith.index_cast %c3_i32 : i32 to index
    %c0_119 = arith.constant 0 : index
    %c0_120 = arith.constant 0 : index
    %279 = vector.load %arg10[%278, %c0_119, %c0_120] : memref<8x8x1024xf32, #tpu.memory_space<vmem>>, vector<1x8x512xf32>
    %280 = vector.shape_cast %279 : vector<1x8x512xf32> to vector<8x512xf32>
    %281 = arith.truncf %237 : vector<8x128xf32> to vector<8x128xbf16>
    %c0_121 = arith.constant 0 : index
    %c0_122 = arith.constant 0 : index
    %c0_123 = arith.constant 0 : index
    %282 = vector.load %arg5[%c0_121, %c0_122, %c0_123] : memref<1x128x1024xbf16, #tpu.memory_space<vmem>>, vector<1x128x512xbf16>
    %283 = vector.shape_cast %282 : vector<1x128x512xbf16> to vector<128x512xbf16>
    %cst_124 = arith.constant dense<0.000000e+00> : vector<8x512xf32>
    %284 = tpu.matmul %281, %283, %cst_124 {dimension_numbers = #tpu.dot_dimension_numbers<[1], [0], [0], [1], [0, 0, 1, 1], [], []>} : vector<8x128xbf16>, vector<128x512xbf16>, vector<8x512xf32> -> vector<8x512xf32>
    %285 = arith.addf %280, %284 : vector<8x512xf32>
    %286 = arith.index_cast %277 : i32 to index
    %c0_125 = arith.constant 0 : index
    %c512_126 = arith.constant 512 : index
    %287 = vector.load %arg10[%286, %c0_125, %c512_126] : memref<8x8x1024xf32, #tpu.memory_space<vmem>>, vector<1x8x512xf32>
    %288 = vector.shape_cast %287 : vector<1x8x512xf32> to vector<8x512xf32>
    %289 = arith.truncf %268 : vector<8x128xf32> to vector<8x128xbf16>
    %c0_127 = arith.constant 0 : index
    %c0_128 = arith.constant 0 : index
    %c512_129 = arith.constant 512 : index
    %290 = vector.load %arg5[%c0_127, %c0_128, %c512_129] : memref<1x128x1024xbf16, #tpu.memory_space<vmem>>, vector<1x128x512xbf16>
    %291 = vector.shape_cast %290 : vector<1x128x512xbf16> to vector<128x512xbf16>
    %cst_130 = arith.constant dense<0.000000e+00> : vector<8x512xf32>
    %292 = tpu.matmul %289, %291, %cst_130 {dimension_numbers = #tpu.dot_dimension_numbers<[1], [0], [0], [1], [0, 0, 1, 1], [], []>} : vector<8x128xbf16>, vector<128x512xbf16>, vector<8x512xf32> -> vector<8x512xf32>
    %293 = arith.addf %288, %292 : vector<8x512xf32>
    %294 = vector.extract_strided_slice %285 {offsets = [0, 0], sizes = [8, 128], strides = [1, 1]} : vector<8x512xf32> to vector<8x128xf32>
    %cst_131 = arith.constant 5.000000e-01 : f32
    %295 = vector.broadcast %cst_131 : f32 to vector<8x128xf32>
    %296 = arith.mulf %295, %294 : vector<8x128xf32>
    %297 = math.tanh %296 : vector<8x128xf32>
    %cst_132 = arith.constant 5.000000e-01 : f32
    %298 = vector.broadcast %cst_132 : f32 to vector<8x128xf32>
    %299 = arith.mulf %298, %297 : vector<8x128xf32>
    %cst_133 = arith.constant 5.000000e-01 : f32
    %300 = vector.broadcast %cst_133 : f32 to vector<8x128xf32>
    %301 = arith.addf %299, %300 : vector<8x128xf32>
    %302 = vector.extract_strided_slice %285 {offsets = [0, 128], sizes = [8, 128], strides = [1, 1]} : vector<8x512xf32> to vector<8x128xf32>
    %cst_134 = arith.constant 5.000000e-01 : f32
    %303 = vector.broadcast %cst_134 : f32 to vector<8x128xf32>
    %304 = arith.mulf %303, %302 : vector<8x128xf32>
    %305 = math.tanh %304 : vector<8x128xf32>
    %cst_135 = arith.constant 5.000000e-01 : f32
    %306 = vector.broadcast %cst_135 : f32 to vector<8x128xf32>
    %307 = arith.mulf %306, %305 : vector<8x128xf32>
    %cst_136 = arith.constant 5.000000e-01 : f32
    %308 = vector.broadcast %cst_136 : f32 to vector<8x128xf32>
    %309 = arith.addf %307, %308 : vector<8x128xf32>
    %310 = vector.extract_strided_slice %285 {offsets = [0, 256], sizes = [8, 128], strides = [1, 1]} : vector<8x512xf32> to vector<8x128xf32>
    %311 = math.tanh %310 : vector<8x128xf32>
    %312 = vector.extract_strided_slice %285 {offsets = [0, 384], sizes = [8, 128], strides = [1, 1]} : vector<8x512xf32> to vector<8x128xf32>
    %cst_137 = arith.constant 5.000000e-01 : f32
    %313 = vector.broadcast %cst_137 : f32 to vector<8x128xf32>
    %314 = arith.mulf %313, %312 : vector<8x128xf32>
    %315 = math.tanh %314 : vector<8x128xf32>
    %cst_138 = arith.constant 5.000000e-01 : f32
    %316 = vector.broadcast %cst_138 : f32 to vector<8x128xf32>
    %317 = arith.mulf %316, %315 : vector<8x128xf32>
    %cst_139 = arith.constant 5.000000e-01 : f32
    %318 = vector.broadcast %cst_139 : f32 to vector<8x128xf32>
    %319 = arith.addf %317, %318 : vector<8x128xf32>
    %320 = arith.mulf %309, %235 : vector<8x128xf32>
    %321 = arith.mulf %301, %311 : vector<8x128xf32>
    %322 = arith.addf %320, %321 : vector<8x128xf32>
    %323 = math.tanh %322 : vector<8x128xf32>
    %324 = arith.mulf %319, %323 : vector<8x128xf32>
    %325 = vector.extract_strided_slice %293 {offsets = [0, 0], sizes = [8, 128], strides = [1, 1]} : vector<8x512xf32> to vector<8x128xf32>
    %cst_140 = arith.constant 5.000000e-01 : f32
    %326 = vector.broadcast %cst_140 : f32 to vector<8x128xf32>
    %327 = arith.mulf %326, %325 : vector<8x128xf32>
    %328 = math.tanh %327 : vector<8x128xf32>
    %cst_141 = arith.constant 5.000000e-01 : f32
    %329 = vector.broadcast %cst_141 : f32 to vector<8x128xf32>
    %330 = arith.mulf %329, %328 : vector<8x128xf32>
    %cst_142 = arith.constant 5.000000e-01 : f32
    %331 = vector.broadcast %cst_142 : f32 to vector<8x128xf32>
    %332 = arith.addf %330, %331 : vector<8x128xf32>
    %333 = vector.extract_strided_slice %293 {offsets = [0, 128], sizes = [8, 128], strides = [1, 1]} : vector<8x512xf32> to vector<8x128xf32>
    %cst_143 = arith.constant 5.000000e-01 : f32
    %334 = vector.broadcast %cst_143 : f32 to vector<8x128xf32>
    %335 = arith.mulf %334, %333 : vector<8x128xf32>
    %336 = math.tanh %335 : vector<8x128xf32>
    %cst_144 = arith.constant 5.000000e-01 : f32
    %337 = vector.broadcast %cst_144 : f32 to vector<8x128xf32>
    %338 = arith.mulf %337, %336 : vector<8x128xf32>
    %cst_145 = arith.constant 5.000000e-01 : f32
    %339 = vector.broadcast %cst_145 : f32 to vector<8x128xf32>
    %340 = arith.addf %338, %339 : vector<8x128xf32>
    %341 = vector.extract_strided_slice %293 {offsets = [0, 256], sizes = [8, 128], strides = [1, 1]} : vector<8x512xf32> to vector<8x128xf32>
    %342 = math.tanh %341 : vector<8x128xf32>
    %343 = vector.extract_strided_slice %293 {offsets = [0, 384], sizes = [8, 128], strides = [1, 1]} : vector<8x512xf32> to vector<8x128xf32>
    %cst_146 = arith.constant 5.000000e-01 : f32
    %344 = vector.broadcast %cst_146 : f32 to vector<8x128xf32>
    %345 = arith.mulf %344, %343 : vector<8x128xf32>
    %346 = math.tanh %345 : vector<8x128xf32>
    %cst_147 = arith.constant 5.000000e-01 : f32
    %347 = vector.broadcast %cst_147 : f32 to vector<8x128xf32>
    %348 = arith.mulf %347, %346 : vector<8x128xf32>
    %cst_148 = arith.constant 5.000000e-01 : f32
    %349 = vector.broadcast %cst_148 : f32 to vector<8x128xf32>
    %350 = arith.addf %348, %349 : vector<8x128xf32>
    %351 = arith.mulf %340, %266 : vector<8x128xf32>
    %352 = arith.mulf %332, %342 : vector<8x128xf32>
    %353 = arith.addf %351, %352 : vector<8x128xf32>
    %354 = math.tanh %353 : vector<8x128xf32>
    %355 = arith.mulf %350, %354 : vector<8x128xf32>
    %356 = arith.index_cast %c3_i32 : i32 to index
    %c0_149 = arith.constant 0 : index
    %c0_150 = arith.constant 0 : index
    %357 = vector.load %arg11[%356, %c0_149, %c0_150] : memref<8x8x256xf32, #tpu.memory_space<vmem>>, vector<1x8x128xf32>
    %358 = vector.shape_cast %357 : vector<1x8x128xf32> to vector<8x128xf32>
    %359 = vector.shape_cast %324 : vector<8x128xf32> to vector<1x8x128xf32>
    tpu.vector_store %arg11[%356, %c0_149, %c0_150], %359 {strides = array<i32>} : memref<8x8x256xf32, #tpu.memory_space<vmem>>, vector<1x8x128xf32>,
    %360 = arith.index_cast %277 : i32 to index
    %c0_151 = arith.constant 0 : index
    %c128_152 = arith.constant 128 : index
    %361 = vector.load %arg11[%360, %c0_151, %c128_152] : memref<8x8x256xf32, #tpu.memory_space<vmem>>, vector<1x8x128xf32>
    %362 = vector.shape_cast %361 : vector<1x8x128xf32> to vector<8x128xf32>
    %363 = vector.shape_cast %355 : vector<8x128xf32> to vector<1x8x128xf32>
    tpu.vector_store %arg11[%360, %c0_151, %c128_152], %363 {strides = array<i32>} : memref<8x8x256xf32, #tpu.memory_space<vmem>>, vector<1x8x128xf32>,
    %c4_i32 = arith.constant 4 : i32
    %c7_i32_153 = arith.constant 7 : i32
    %364 = arith.subi %c7_i32_153, %c4_i32 : i32
    %365 = arith.index_cast %c4_i32 : i32 to index
    %c0_154 = arith.constant 0 : index
    %c0_155 = arith.constant 0 : index
    %366 = vector.load %arg10[%365, %c0_154, %c0_155] : memref<8x8x1024xf32, #tpu.memory_space<vmem>>, vector<1x8x512xf32>
    %367 = vector.shape_cast %366 : vector<1x8x512xf32> to vector<8x512xf32>
    %368 = arith.truncf %324 : vector<8x128xf32> to vector<8x128xbf16>
    %c0_156 = arith.constant 0 : index
    %c0_157 = arith.constant 0 : index
    %c0_158 = arith.constant 0 : index
    %369 = vector.load %arg5[%c0_156, %c0_157, %c0_158] : memref<1x128x1024xbf16, #tpu.memory_space<vmem>>, vector<1x128x512xbf16>
    %370 = vector.shape_cast %369 : vector<1x128x512xbf16> to vector<128x512xbf16>
    %cst_159 = arith.constant dense<0.000000e+00> : vector<8x512xf32>
    %371 = tpu.matmul %368, %370, %cst_159 {dimension_numbers = #tpu.dot_dimension_numbers<[1], [0], [0], [1], [0, 0, 1, 1], [], []>} : vector<8x128xbf16>, vector<128x512xbf16>, vector<8x512xf32> -> vector<8x512xf32>
    %372 = arith.addf %367, %371 : vector<8x512xf32>
    %373 = arith.index_cast %364 : i32 to index
    %c0_160 = arith.constant 0 : index
    %c512_161 = arith.constant 512 : index
    %374 = vector.load %arg10[%373, %c0_160, %c512_161] : memref<8x8x1024xf32, #tpu.memory_space<vmem>>, vector<1x8x512xf32>
    %375 = vector.shape_cast %374 : vector<1x8x512xf32> to vector<8x512xf32>
    %376 = arith.truncf %355 : vector<8x128xf32> to vector<8x128xbf16>
    %c0_162 = arith.constant 0 : index
    %c0_163 = arith.constant 0 : index
    %c512_164 = arith.constant 512 : index
    %377 = vector.load %arg5[%c0_162, %c0_163, %c512_164] : memref<1x128x1024xbf16, #tpu.memory_space<vmem>>, vector<1x128x512xbf16>
    %378 = vector.shape_cast %377 : vector<1x128x512xbf16> to vector<128x512xbf16>
    %cst_165 = arith.constant dense<0.000000e+00> : vector<8x512xf32>
    %379 = tpu.matmul %376, %378, %cst_165 {dimension_numbers = #tpu.dot_dimension_numbers<[1], [0], [0], [1], [0, 0, 1, 1], [], []>} : vector<8x128xbf16>, vector<128x512xbf16>, vector<8x512xf32> -> vector<8x512xf32>
    %380 = arith.addf %375, %379 : vector<8x512xf32>
    %381 = vector.extract_strided_slice %372 {offsets = [0, 0], sizes = [8, 128], strides = [1, 1]} : vector<8x512xf32> to vector<8x128xf32>
    %cst_166 = arith.constant 5.000000e-01 : f32
    %382 = vector.broadcast %cst_166 : f32 to vector<8x128xf32>
    %383 = arith.mulf %382, %381 : vector<8x128xf32>
    %384 = math.tanh %383 : vector<8x128xf32>
    %cst_167 = arith.constant 5.000000e-01 : f32
    %385 = vector.broadcast %cst_167 : f32 to vector<8x128xf32>
    %386 = arith.mulf %385, %384 : vector<8x128xf32>
    %cst_168 = arith.constant 5.000000e-01 : f32
    %387 = vector.broadcast %cst_168 : f32 to vector<8x128xf32>
    %388 = arith.addf %386, %387 : vector<8x128xf32>
    %389 = vector.extract_strided_slice %372 {offsets = [0, 128], sizes = [8, 128], strides = [1, 1]} : vector<8x512xf32> to vector<8x128xf32>
    %cst_169 = arith.constant 5.000000e-01 : f32
    %390 = vector.broadcast %cst_169 : f32 to vector<8x128xf32>
    %391 = arith.mulf %390, %389 : vector<8x128xf32>
    %392 = math.tanh %391 : vector<8x128xf32>
    %cst_170 = arith.constant 5.000000e-01 : f32
    %393 = vector.broadcast %cst_170 : f32 to vector<8x128xf32>
    %394 = arith.mulf %393, %392 : vector<8x128xf32>
    %cst_171 = arith.constant 5.000000e-01 : f32
    %395 = vector.broadcast %cst_171 : f32 to vector<8x128xf32>
    %396 = arith.addf %394, %395 : vector<8x128xf32>
    %397 = vector.extract_strided_slice %372 {offsets = [0, 256], sizes = [8, 128], strides = [1, 1]} : vector<8x512xf32> to vector<8x128xf32>
    %398 = math.tanh %397 : vector<8x128xf32>
    %399 = vector.extract_strided_slice %372 {offsets = [0, 384], sizes = [8, 128], strides = [1, 1]} : vector<8x512xf32> to vector<8x128xf32>
    %cst_172 = arith.constant 5.000000e-01 : f32
    %400 = vector.broadcast %cst_172 : f32 to vector<8x128xf32>
    %401 = arith.mulf %400, %399 : vector<8x128xf32>
    %402 = math.tanh %401 : vector<8x128xf32>
    %cst_173 = arith.constant 5.000000e-01 : f32
    %403 = vector.broadcast %cst_173 : f32 to vector<8x128xf32>
    %404 = arith.mulf %403, %402 : vector<8x128xf32>
    %cst_174 = arith.constant 5.000000e-01 : f32
    %405 = vector.broadcast %cst_174 : f32 to vector<8x128xf32>
    %406 = arith.addf %404, %405 : vector<8x128xf32>
    %407 = arith.mulf %396, %322 : vector<8x128xf32>
    %408 = arith.mulf %388, %398 : vector<8x128xf32>
    %409 = arith.addf %407, %408 : vector<8x128xf32>
    %410 = math.tanh %409 : vector<8x128xf32>
    %411 = arith.mulf %406, %410 : vector<8x128xf32>
    %412 = vector.extract_strided_slice %380 {offsets = [0, 0], sizes = [8, 128], strides = [1, 1]} : vector<8x512xf32> to vector<8x128xf32>
    %cst_175 = arith.constant 5.000000e-01 : f32
    %413 = vector.broadcast %cst_175 : f32 to vector<8x128xf32>
    %414 = arith.mulf %413, %412 : vector<8x128xf32>
    %415 = math.tanh %414 : vector<8x128xf32>
    %cst_176 = arith.constant 5.000000e-01 : f32
    %416 = vector.broadcast %cst_176 : f32 to vector<8x128xf32>
    %417 = arith.mulf %416, %415 : vector<8x128xf32>
    %cst_177 = arith.constant 5.000000e-01 : f32
    %418 = vector.broadcast %cst_177 : f32 to vector<8x128xf32>
    %419 = arith.addf %417, %418 : vector<8x128xf32>
    %420 = vector.extract_strided_slice %380 {offsets = [0, 128], sizes = [8, 128], strides = [1, 1]} : vector<8x512xf32> to vector<8x128xf32>
    %cst_178 = arith.constant 5.000000e-01 : f32
    %421 = vector.broadcast %cst_178 : f32 to vector<8x128xf32>
    %422 = arith.mulf %421, %420 : vector<8x128xf32>
    %423 = math.tanh %422 : vector<8x128xf32>
    %cst_179 = arith.constant 5.000000e-01 : f32
    %424 = vector.broadcast %cst_179 : f32 to vector<8x128xf32>
    %425 = arith.mulf %424, %423 : vector<8x128xf32>
    %cst_180 = arith.constant 5.000000e-01 : f32
    %426 = vector.broadcast %cst_180 : f32 to vector<8x128xf32>
    %427 = arith.addf %425, %426 : vector<8x128xf32>
    %428 = vector.extract_strided_slice %380 {offsets = [0, 256], sizes = [8, 128], strides = [1, 1]} : vector<8x512xf32> to vector<8x128xf32>
    %429 = math.tanh %428 : vector<8x128xf32>
    %430 = vector.extract_strided_slice %380 {offsets = [0, 384], sizes = [8, 128], strides = [1, 1]} : vector<8x512xf32> to vector<8x128xf32>
    %cst_181 = arith.constant 5.000000e-01 : f32
    %431 = vector.broadcast %cst_181 : f32 to vector<8x128xf32>
    %432 = arith.mulf %431, %430 : vector<8x128xf32>
    %433 = math.tanh %432 : vector<8x128xf32>
    %cst_182 = arith.constant 5.000000e-01 : f32
    %434 = vector.broadcast %cst_182 : f32 to vector<8x128xf32>
    %435 = arith.mulf %434, %433 : vector<8x128xf32>
    %cst_183 = arith.constant 5.000000e-01 : f32
    %436 = vector.broadcast %cst_183 : f32 to vector<8x128xf32>
    %437 = arith.addf %435, %436 : vector<8x128xf32>
    %438 = arith.mulf %427, %353 : vector<8x128xf32>
    %439 = arith.mulf %419, %429 : vector<8x128xf32>
    %440 = arith.addf %438, %439 : vector<8x128xf32>
    %441 = math.tanh %440 : vector<8x128xf32>
    %442 = arith.mulf %437, %441 : vector<8x128xf32>
    %443 = arith.index_cast %c4_i32 : i32 to index
    %c0_184 = arith.constant 0 : index
    %c0_185 = arith.constant 0 : index
    %444 = vector.load %arg11[%443, %c0_184, %c0_185] : memref<8x8x256xf32, #tpu.memory_space<vmem>>, vector<1x8x128xf32>
    %445 = vector.shape_cast %444 : vector<1x8x128xf32> to vector<8x128xf32>
    %446 = vector.shape_cast %411 : vector<8x128xf32> to vector<1x8x128xf32>
    tpu.vector_store %arg11[%443, %c0_184, %c0_185], %446 {strides = array<i32>} : memref<8x8x256xf32, #tpu.memory_space<vmem>>, vector<1x8x128xf32>,
    %447 = arith.index_cast %364 : i32 to index
    %c0_186 = arith.constant 0 : index
    %c128_187 = arith.constant 128 : index
    %448 = vector.load %arg11[%447, %c0_186, %c128_187] : memref<8x8x256xf32, #tpu.memory_space<vmem>>, vector<1x8x128xf32>
    %449 = vector.shape_cast %448 : vector<1x8x128xf32> to vector<8x128xf32>
    %450 = vector.shape_cast %442 : vector<8x128xf32> to vector<1x8x128xf32>
    tpu.vector_store %arg11[%447, %c0_186, %c128_187], %450 {strides = array<i32>} : memref<8x8x256xf32, #tpu.memory_space<vmem>>, vector<1x8x128xf32>,
    %c5_i32 = arith.constant 5 : i32
    %c7_i32_188 = arith.constant 7 : i32
    %451 = arith.subi %c7_i32_188, %c5_i32 : i32
    %452 = arith.index_cast %c5_i32 : i32 to index
    %c0_189 = arith.constant 0 : index
    %c0_190 = arith.constant 0 : index
    %453 = vector.load %arg10[%452, %c0_189, %c0_190] : memref<8x8x1024xf32, #tpu.memory_space<vmem>>, vector<1x8x512xf32>
    %454 = vector.shape_cast %453 : vector<1x8x512xf32> to vector<8x512xf32>
    %455 = arith.truncf %411 : vector<8x128xf32> to vector<8x128xbf16>
    %c0_191 = arith.constant 0 : index
    %c0_192 = arith.constant 0 : index
    %c0_193 = arith.constant 0 : index
    %456 = vector.load %arg5[%c0_191, %c0_192, %c0_193] : memref<1x128x1024xbf16, #tpu.memory_space<vmem>>, vector<1x128x512xbf16>
    %457 = vector.shape_cast %456 : vector<1x128x512xbf16> to vector<128x512xbf16>
    %cst_194 = arith.constant dense<0.000000e+00> : vector<8x512xf32>
    %458 = tpu.matmul %455, %457, %cst_194 {dimension_numbers = #tpu.dot_dimension_numbers<[1], [0], [0], [1], [0, 0, 1, 1], [], []>} : vector<8x128xbf16>, vector<128x512xbf16>, vector<8x512xf32> -> vector<8x512xf32>
    %459 = arith.addf %454, %458 : vector<8x512xf32>
    %460 = arith.index_cast %451 : i32 to index
    %c0_195 = arith.constant 0 : index
    %c512_196 = arith.constant 512 : index
    %461 = vector.load %arg10[%460, %c0_195, %c512_196] : memref<8x8x1024xf32, #tpu.memory_space<vmem>>, vector<1x8x512xf32>
    %462 = vector.shape_cast %461 : vector<1x8x512xf32> to vector<8x512xf32>
    %463 = arith.truncf %442 : vector<8x128xf32> to vector<8x128xbf16>
    %c0_197 = arith.constant 0 : index
    %c0_198 = arith.constant 0 : index
    %c512_199 = arith.constant 512 : index
    %464 = vector.load %arg5[%c0_197, %c0_198, %c512_199] : memref<1x128x1024xbf16, #tpu.memory_space<vmem>>, vector<1x128x512xbf16>
    %465 = vector.shape_cast %464 : vector<1x128x512xbf16> to vector<128x512xbf16>
    %cst_200 = arith.constant dense<0.000000e+00> : vector<8x512xf32>
    %466 = tpu.matmul %463, %465, %cst_200 {dimension_numbers = #tpu.dot_dimension_numbers<[1], [0], [0], [1], [0, 0, 1, 1], [], []>} : vector<8x128xbf16>, vector<128x512xbf16>, vector<8x512xf32> -> vector<8x512xf32>
    %467 = arith.addf %462, %466 : vector<8x512xf32>
    %468 = vector.extract_strided_slice %459 {offsets = [0, 0], sizes = [8, 128], strides = [1, 1]} : vector<8x512xf32> to vector<8x128xf32>
    %cst_201 = arith.constant 5.000000e-01 : f32
    %469 = vector.broadcast %cst_201 : f32 to vector<8x128xf32>
    %470 = arith.mulf %469, %468 : vector<8x128xf32>
    %471 = math.tanh %470 : vector<8x128xf32>
    %cst_202 = arith.constant 5.000000e-01 : f32
    %472 = vector.broadcast %cst_202 : f32 to vector<8x128xf32>
    %473 = arith.mulf %472, %471 : vector<8x128xf32>
    %cst_203 = arith.constant 5.000000e-01 : f32
    %474 = vector.broadcast %cst_203 : f32 to vector<8x128xf32>
    %475 = arith.addf %473, %474 : vector<8x128xf32>
    %476 = vector.extract_strided_slice %459 {offsets = [0, 128], sizes = [8, 128], strides = [1, 1]} : vector<8x512xf32> to vector<8x128xf32>
    %cst_204 = arith.constant 5.000000e-01 : f32
    %477 = vector.broadcast %cst_204 : f32 to vector<8x128xf32>
    %478 = arith.mulf %477, %476 : vector<8x128xf32>
    %479 = math.tanh %478 : vector<8x128xf32>
    %cst_205 = arith.constant 5.000000e-01 : f32
    %480 = vector.broadcast %cst_205 : f32 to vector<8x128xf32>
    %481 = arith.mulf %480, %479 : vector<8x128xf32>
    %cst_206 = arith.constant 5.000000e-01 : f32
    %482 = vector.broadcast %cst_206 : f32 to vector<8x128xf32>
    %483 = arith.addf %481, %482 : vector<8x128xf32>
    %484 = vector.extract_strided_slice %459 {offsets = [0, 256], sizes = [8, 128], strides = [1, 1]} : vector<8x512xf32> to vector<8x128xf32>
    %485 = math.tanh %484 : vector<8x128xf32>
    %486 = vector.extract_strided_slice %459 {offsets = [0, 384], sizes = [8, 128], strides = [1, 1]} : vector<8x512xf32> to vector<8x128xf32>
    %cst_207 = arith.constant 5.000000e-01 : f32
    %487 = vector.broadcast %cst_207 : f32 to vector<8x128xf32>
    %488 = arith.mulf %487, %486 : vector<8x128xf32>
    %489 = math.tanh %488 : vector<8x128xf32>
    %cst_208 = arith.constant 5.000000e-01 : f32
    %490 = vector.broadcast %cst_208 : f32 to vector<8x128xf32>
    %491 = arith.mulf %490, %489 : vector<8x128xf32>
    %cst_209 = arith.constant 5.000000e-01 : f32
    %492 = vector.broadcast %cst_209 : f32 to vector<8x128xf32>
    %493 = arith.addf %491, %492 : vector<8x128xf32>
    %494 = arith.mulf %483, %409 : vector<8x128xf32>
    %495 = arith.mulf %475, %485 : vector<8x128xf32>
    %496 = arith.addf %494, %495 : vector<8x128xf32>
    %497 = math.tanh %496 : vector<8x128xf32>
    %498 = arith.mulf %493, %497 : vector<8x128xf32>
    %499 = vector.extract_strided_slice %467 {offsets = [0, 0], sizes = [8, 128], strides = [1, 1]} : vector<8x512xf32> to vector<8x128xf32>
    %cst_210 = arith.constant 5.000000e-01 : f32
    %500 = vector.broadcast %cst_210 : f32 to vector<8x128xf32>
    %501 = arith.mulf %500, %499 : vector<8x128xf32>
    %502 = math.tanh %501 : vector<8x128xf32>
    %cst_211 = arith.constant 5.000000e-01 : f32
    %503 = vector.broadcast %cst_211 : f32 to vector<8x128xf32>
    %504 = arith.mulf %503, %502 : vector<8x128xf32>
    %cst_212 = arith.constant 5.000000e-01 : f32
    %505 = vector.broadcast %cst_212 : f32 to vector<8x128xf32>
    %506 = arith.addf %504, %505 : vector<8x128xf32>
    %507 = vector.extract_strided_slice %467 {offsets = [0, 128], sizes = [8, 128], strides = [1, 1]} : vector<8x512xf32> to vector<8x128xf32>
    %cst_213 = arith.constant 5.000000e-01 : f32
    %508 = vector.broadcast %cst_213 : f32 to vector<8x128xf32>
    %509 = arith.mulf %508, %507 : vector<8x128xf32>
    %510 = math.tanh %509 : vector<8x128xf32>
    %cst_214 = arith.constant 5.000000e-01 : f32
    %511 = vector.broadcast %cst_214 : f32 to vector<8x128xf32>
    %512 = arith.mulf %511, %510 : vector<8x128xf32>
    %cst_215 = arith.constant 5.000000e-01 : f32
    %513 = vector.broadcast %cst_215 : f32 to vector<8x128xf32>
    %514 = arith.addf %512, %513 : vector<8x128xf32>
    %515 = vector.extract_strided_slice %467 {offsets = [0, 256], sizes = [8, 128], strides = [1, 1]} : vector<8x512xf32> to vector<8x128xf32>
    %516 = math.tanh %515 : vector<8x128xf32>
    %517 = vector.extract_strided_slice %467 {offsets = [0, 384], sizes = [8, 128], strides = [1, 1]} : vector<8x512xf32> to vector<8x128xf32>
    %cst_216 = arith.constant 5.000000e-01 : f32
    %518 = vector.broadcast %cst_216 : f32 to vector<8x128xf32>
    %519 = arith.mulf %518, %517 : vector<8x128xf32>
    %520 = math.tanh %519 : vector<8x128xf32>
    %cst_217 = arith.constant 5.000000e-01 : f32
    %521 = vector.broadcast %cst_217 : f32 to vector<8x128xf32>
    %522 = arith.mulf %521, %520 : vector<8x128xf32>
    %cst_218 = arith.constant 5.000000e-01 : f32
    %523 = vector.broadcast %cst_218 : f32 to vector<8x128xf32>
    %524 = arith.addf %522, %523 : vector<8x128xf32>
    %525 = arith.mulf %514, %440 : vector<8x128xf32>
    %526 = arith.mulf %506, %516 : vector<8x128xf32>
    %527 = arith.addf %525, %526 : vector<8x128xf32>
    %528 = math.tanh %527 : vector<8x128xf32>
    %529 = arith.mulf %524, %528 : vector<8x128xf32>
    %530 = arith.index_cast %c5_i32 : i32 to index
    %c0_219 = arith.constant 0 : index
    %c0_220 = arith.constant 0 : index
    %531 = vector.load %arg11[%530, %c0_219, %c0_220] : memref<8x8x256xf32, #tpu.memory_space<vmem>>, vector<1x8x128xf32>
    %532 = vector.shape_cast %531 : vector<1x8x128xf32> to vector<8x128xf32>
    %533 = vector.shape_cast %498 : vector<8x128xf32> to vector<1x8x128xf32>
    tpu.vector_store %arg11[%530, %c0_219, %c0_220], %533 {strides = array<i32>} : memref<8x8x256xf32, #tpu.memory_space<vmem>>, vector<1x8x128xf32>,
    %534 = arith.index_cast %451 : i32 to index
    %c0_221 = arith.constant 0 : index
    %c128_222 = arith.constant 128 : index
    %535 = vector.load %arg11[%534, %c0_221, %c128_222] : memref<8x8x256xf32, #tpu.memory_space<vmem>>, vector<1x8x128xf32>
    %536 = vector.shape_cast %535 : vector<1x8x128xf32> to vector<8x128xf32>
    %537 = vector.shape_cast %529 : vector<8x128xf32> to vector<1x8x128xf32>
    tpu.vector_store %arg11[%534, %c0_221, %c128_222], %537 {strides = array<i32>} : memref<8x8x256xf32, #tpu.memory_space<vmem>>, vector<1x8x128xf32>,
    %c6_i32 = arith.constant 6 : i32
    %c7_i32_223 = arith.constant 7 : i32
    %538 = arith.subi %c7_i32_223, %c6_i32 : i32
    %539 = arith.index_cast %c6_i32 : i32 to index
    %c0_224 = arith.constant 0 : index
    %c0_225 = arith.constant 0 : index
    %540 = vector.load %arg10[%539, %c0_224, %c0_225] : memref<8x8x1024xf32, #tpu.memory_space<vmem>>, vector<1x8x512xf32>
    %541 = vector.shape_cast %540 : vector<1x8x512xf32> to vector<8x512xf32>
    %542 = arith.truncf %498 : vector<8x128xf32> to vector<8x128xbf16>
    %c0_226 = arith.constant 0 : index
    %c0_227 = arith.constant 0 : index
    %c0_228 = arith.constant 0 : index
    %543 = vector.load %arg5[%c0_226, %c0_227, %c0_228] : memref<1x128x1024xbf16, #tpu.memory_space<vmem>>, vector<1x128x512xbf16>
    %544 = vector.shape_cast %543 : vector<1x128x512xbf16> to vector<128x512xbf16>
    %cst_229 = arith.constant dense<0.000000e+00> : vector<8x512xf32>
    %545 = tpu.matmul %542, %544, %cst_229 {dimension_numbers = #tpu.dot_dimension_numbers<[1], [0], [0], [1], [0, 0, 1, 1], [], []>} : vector<8x128xbf16>, vector<128x512xbf16>, vector<8x512xf32> -> vector<8x512xf32>
    %546 = arith.addf %541, %545 : vector<8x512xf32>
    %547 = arith.index_cast %538 : i32 to index
    %c0_230 = arith.constant 0 : index
    %c512_231 = arith.constant 512 : index
    %548 = vector.load %arg10[%547, %c0_230, %c512_231] : memref<8x8x1024xf32, #tpu.memory_space<vmem>>, vector<1x8x512xf32>
    %549 = vector.shape_cast %548 : vector<1x8x512xf32> to vector<8x512xf32>
    %550 = arith.truncf %529 : vector<8x128xf32> to vector<8x128xbf16>
    %c0_232 = arith.constant 0 : index
    %c0_233 = arith.constant 0 : index
    %c512_234 = arith.constant 512 : index
    %551 = vector.load %arg5[%c0_232, %c0_233, %c512_234] : memref<1x128x1024xbf16, #tpu.memory_space<vmem>>, vector<1x128x512xbf16>
    %552 = vector.shape_cast %551 : vector<1x128x512xbf16> to vector<128x512xbf16>
    %cst_235 = arith.constant dense<0.000000e+00> : vector<8x512xf32>
    %553 = tpu.matmul %550, %552, %cst_235 {dimension_numbers = #tpu.dot_dimension_numbers<[1], [0], [0], [1], [0, 0, 1, 1], [], []>} : vector<8x128xbf16>, vector<128x512xbf16>, vector<8x512xf32> -> vector<8x512xf32>
    %554 = arith.addf %549, %553 : vector<8x512xf32>
    %555 = vector.extract_strided_slice %546 {offsets = [0, 0], sizes = [8, 128], strides = [1, 1]} : vector<8x512xf32> to vector<8x128xf32>
    %cst_236 = arith.constant 5.000000e-01 : f32
    %556 = vector.broadcast %cst_236 : f32 to vector<8x128xf32>
    %557 = arith.mulf %556, %555 : vector<8x128xf32>
    %558 = math.tanh %557 : vector<8x128xf32>
    %cst_237 = arith.constant 5.000000e-01 : f32
    %559 = vector.broadcast %cst_237 : f32 to vector<8x128xf32>
    %560 = arith.mulf %559, %558 : vector<8x128xf32>
    %cst_238 = arith.constant 5.000000e-01 : f32
    %561 = vector.broadcast %cst_238 : f32 to vector<8x128xf32>
    %562 = arith.addf %560, %561 : vector<8x128xf32>
    %563 = vector.extract_strided_slice %546 {offsets = [0, 128], sizes = [8, 128], strides = [1, 1]} : vector<8x512xf32> to vector<8x128xf32>
    %cst_239 = arith.constant 5.000000e-01 : f32
    %564 = vector.broadcast %cst_239 : f32 to vector<8x128xf32>
    %565 = arith.mulf %564, %563 : vector<8x128xf32>
    %566 = math.tanh %565 : vector<8x128xf32>
    %cst_240 = arith.constant 5.000000e-01 : f32
    %567 = vector.broadcast %cst_240 : f32 to vector<8x128xf32>
    %568 = arith.mulf %567, %566 : vector<8x128xf32>
    %cst_241 = arith.constant 5.000000e-01 : f32
    %569 = vector.broadcast %cst_241 : f32 to vector<8x128xf32>
    %570 = arith.addf %568, %569 : vector<8x128xf32>
    %571 = vector.extract_strided_slice %546 {offsets = [0, 256], sizes = [8, 128], strides = [1, 1]} : vector<8x512xf32> to vector<8x128xf32>
    %572 = math.tanh %571 : vector<8x128xf32>
    %573 = vector.extract_strided_slice %546 {offsets = [0, 384], sizes = [8, 128], strides = [1, 1]} : vector<8x512xf32> to vector<8x128xf32>
    %cst_242 = arith.constant 5.000000e-01 : f32
    %574 = vector.broadcast %cst_242 : f32 to vector<8x128xf32>
    %575 = arith.mulf %574, %573 : vector<8x128xf32>
    %576 = math.tanh %575 : vector<8x128xf32>
    %cst_243 = arith.constant 5.000000e-01 : f32
    %577 = vector.broadcast %cst_243 : f32 to vector<8x128xf32>
    %578 = arith.mulf %577, %576 : vector<8x128xf32>
    %cst_244 = arith.constant 5.000000e-01 : f32
    %579 = vector.broadcast %cst_244 : f32 to vector<8x128xf32>
    %580 = arith.addf %578, %579 : vector<8x128xf32>
    %581 = arith.mulf %570, %496 : vector<8x128xf32>
    %582 = arith.mulf %562, %572 : vector<8x128xf32>
    %583 = arith.addf %581, %582 : vector<8x128xf32>
    %584 = math.tanh %583 : vector<8x128xf32>
    %585 = arith.mulf %580, %584 : vector<8x128xf32>
    %586 = vector.extract_strided_slice %554 {offsets = [0, 0], sizes = [8, 128], strides = [1, 1]} : vector<8x512xf32> to vector<8x128xf32>
    %cst_245 = arith.constant 5.000000e-01 : f32
    %587 = vector.broadcast %cst_245 : f32 to vector<8x128xf32>
    %588 = arith.mulf %587, %586 : vector<8x128xf32>
    %589 = math.tanh %588 : vector<8x128xf32>
    %cst_246 = arith.constant 5.000000e-01 : f32
    %590 = vector.broadcast %cst_246 : f32 to vector<8x128xf32>
    %591 = arith.mulf %590, %589 : vector<8x128xf32>
    %cst_247 = arith.constant 5.000000e-01 : f32
    %592 = vector.broadcast %cst_247 : f32 to vector<8x128xf32>
    %593 = arith.addf %591, %592 : vector<8x128xf32>
    %594 = vector.extract_strided_slice %554 {offsets = [0, 128], sizes = [8, 128], strides = [1, 1]} : vector<8x512xf32> to vector<8x128xf32>
    %cst_248 = arith.constant 5.000000e-01 : f32
    %595 = vector.broadcast %cst_248 : f32 to vector<8x128xf32>
    %596 = arith.mulf %595, %594 : vector<8x128xf32>
    %597 = math.tanh %596 : vector<8x128xf32>
    %cst_249 = arith.constant 5.000000e-01 : f32
    %598 = vector.broadcast %cst_249 : f32 to vector<8x128xf32>
    %599 = arith.mulf %598, %597 : vector<8x128xf32>
    %cst_250 = arith.constant 5.000000e-01 : f32
    %600 = vector.broadcast %cst_250 : f32 to vector<8x128xf32>
    %601 = arith.addf %599, %600 : vector<8x128xf32>
    %602 = vector.extract_strided_slice %554 {offsets = [0, 256], sizes = [8, 128], strides = [1, 1]} : vector<8x512xf32> to vector<8x128xf32>
    %603 = math.tanh %602 : vector<8x128xf32>
    %604 = vector.extract_strided_slice %554 {offsets = [0, 384], sizes = [8, 128], strides = [1, 1]} : vector<8x512xf32> to vector<8x128xf32>
    %cst_251 = arith.constant 5.000000e-01 : f32
    %605 = vector.broadcast %cst_251 : f32 to vector<8x128xf32>
    %606 = arith.mulf %605, %604 : vector<8x128xf32>
    %607 = math.tanh %606 : vector<8x128xf32>
    %cst_252 = arith.constant 5.000000e-01 : f32
    %608 = vector.broadcast %cst_252 : f32 to vector<8x128xf32>
    %609 = arith.mulf %608, %607 : vector<8x128xf32>
    %cst_253 = arith.constant 5.000000e-01 : f32
    %610 = vector.broadcast %cst_253 : f32 to vector<8x128xf32>
    %611 = arith.addf %609, %610 : vector<8x128xf32>
    %612 = arith.mulf %601, %527 : vector<8x128xf32>
    %613 = arith.mulf %593, %603 : vector<8x128xf32>
    %614 = arith.addf %612, %613 : vector<8x128xf32>
    %615 = math.tanh %614 : vector<8x128xf32>
    %616 = arith.mulf %611, %615 : vector<8x128xf32>
    %617 = arith.index_cast %c6_i32 : i32 to index
    %c0_254 = arith.constant 0 : index
    %c0_255 = arith.constant 0 : index
    %618 = vector.load %arg11[%617, %c0_254, %c0_255] : memref<8x8x256xf32, #tpu.memory_space<vmem>>, vector<1x8x128xf32>
    %619 = vector.shape_cast %618 : vector<1x8x128xf32> to vector<8x128xf32>
    %620 = vector.shape_cast %585 : vector<8x128xf32> to vector<1x8x128xf32>
    tpu.vector_store %arg11[%617, %c0_254, %c0_255], %620 {strides = array<i32>} : memref<8x8x256xf32, #tpu.memory_space<vmem>>, vector<1x8x128xf32>,
    %621 = arith.index_cast %538 : i32 to index
    %c0_256 = arith.constant 0 : index
    %c128_257 = arith.constant 128 : index
    %622 = vector.load %arg11[%621, %c0_256, %c128_257] : memref<8x8x256xf32, #tpu.memory_space<vmem>>, vector<1x8x128xf32>
    %623 = vector.shape_cast %622 : vector<1x8x128xf32> to vector<8x128xf32>
    %624 = vector.shape_cast %616 : vector<8x128xf32> to vector<1x8x128xf32>
    tpu.vector_store %arg11[%621, %c0_256, %c128_257], %624 {strides = array<i32>} : memref<8x8x256xf32, #tpu.memory_space<vmem>>, vector<1x8x128xf32>,
    %c7_i32_258 = arith.constant 7 : i32
    %c7_i32_259 = arith.constant 7 : i32
    %625 = arith.subi %c7_i32_259, %c7_i32_258 : i32
    %626 = arith.index_cast %c7_i32_258 : i32 to index
    %c0_260 = arith.constant 0 : index
    %c0_261 = arith.constant 0 : index
    %627 = vector.load %arg10[%626, %c0_260, %c0_261] : memref<8x8x1024xf32, #tpu.memory_space<vmem>>, vector<1x8x512xf32>
    %628 = vector.shape_cast %627 : vector<1x8x512xf32> to vector<8x512xf32>
    %629 = arith.truncf %585 : vector<8x128xf32> to vector<8x128xbf16>
    %c0_262 = arith.constant 0 : index
    %c0_263 = arith.constant 0 : index
    %c0_264 = arith.constant 0 : index
    %630 = vector.load %arg5[%c0_262, %c0_263, %c0_264] : memref<1x128x1024xbf16, #tpu.memory_space<vmem>>, vector<1x128x512xbf16>
    %631 = vector.shape_cast %630 : vector<1x128x512xbf16> to vector<128x512xbf16>
    %cst_265 = arith.constant dense<0.000000e+00> : vector<8x512xf32>
    %632 = tpu.matmul %629, %631, %cst_265 {dimension_numbers = #tpu.dot_dimension_numbers<[1], [0], [0], [1], [0, 0, 1, 1], [], []>} : vector<8x128xbf16>, vector<128x512xbf16>, vector<8x512xf32> -> vector<8x512xf32>
    %633 = arith.addf %628, %632 : vector<8x512xf32>
    %634 = arith.index_cast %625 : i32 to index
    %c0_266 = arith.constant 0 : index
    %c512_267 = arith.constant 512 : index
    %635 = vector.load %arg10[%634, %c0_266, %c512_267] : memref<8x8x1024xf32, #tpu.memory_space<vmem>>, vector<1x8x512xf32>
    %636 = vector.shape_cast %635 : vector<1x8x512xf32> to vector<8x512xf32>
    %637 = arith.truncf %616 : vector<8x128xf32> to vector<8x128xbf16>
    %c0_268 = arith.constant 0 : index
    %c0_269 = arith.constant 0 : index
    %c512_270 = arith.constant 512 : index
    %638 = vector.load %arg5[%c0_268, %c0_269, %c512_270] : memref<1x128x1024xbf16, #tpu.memory_space<vmem>>, vector<1x128x512xbf16>
    %639 = vector.shape_cast %638 : vector<1x128x512xbf16> to vector<128x512xbf16>
    %cst_271 = arith.constant dense<0.000000e+00> : vector<8x512xf32>
    %640 = tpu.matmul %637, %639, %cst_271 {dimension_numbers = #tpu.dot_dimension_numbers<[1], [0], [0], [1], [0, 0, 1, 1], [], []>} : vector<8x128xbf16>, vector<128x512xbf16>, vector<8x512xf32> -> vector<8x512xf32>
    %641 = arith.addf %636, %640 : vector<8x512xf32>
    %642 = vector.extract_strided_slice %633 {offsets = [0, 0], sizes = [8, 128], strides = [1, 1]} : vector<8x512xf32> to vector<8x128xf32>
    %cst_272 = arith.constant 5.000000e-01 : f32
    %643 = vector.broadcast %cst_272 : f32 to vector<8x128xf32>
    %644 = arith.mulf %643, %642 : vector<8x128xf32>
    %645 = math.tanh %644 : vector<8x128xf32>
    %cst_273 = arith.constant 5.000000e-01 : f32
    %646 = vector.broadcast %cst_273 : f32 to vector<8x128xf32>
    %647 = arith.mulf %646, %645 : vector<8x128xf32>
    %cst_274 = arith.constant 5.000000e-01 : f32
    %648 = vector.broadcast %cst_274 : f32 to vector<8x128xf32>
    %649 = arith.addf %647, %648 : vector<8x128xf32>
    %650 = vector.extract_strided_slice %633 {offsets = [0, 128], sizes = [8, 128], strides = [1, 1]} : vector<8x512xf32> to vector<8x128xf32>
    %cst_275 = arith.constant 5.000000e-01 : f32
    %651 = vector.broadcast %cst_275 : f32 to vector<8x128xf32>
    %652 = arith.mulf %651, %650 : vector<8x128xf32>
    %653 = math.tanh %652 : vector<8x128xf32>
    %cst_276 = arith.constant 5.000000e-01 : f32
    %654 = vector.broadcast %cst_276 : f32 to vector<8x128xf32>
    %655 = arith.mulf %654, %653 : vector<8x128xf32>
    %cst_277 = arith.constant 5.000000e-01 : f32
    %656 = vector.broadcast %cst_277 : f32 to vector<8x128xf32>
    %657 = arith.addf %655, %656 : vector<8x128xf32>
    %658 = vector.extract_strided_slice %633 {offsets = [0, 256], sizes = [8, 128], strides = [1, 1]} : vector<8x512xf32> to vector<8x128xf32>
    %659 = math.tanh %658 : vector<8x128xf32>
    %660 = vector.extract_strided_slice %633 {offsets = [0, 384], sizes = [8, 128], strides = [1, 1]} : vector<8x512xf32> to vector<8x128xf32>
    %cst_278 = arith.constant 5.000000e-01 : f32
    %661 = vector.broadcast %cst_278 : f32 to vector<8x128xf32>
    %662 = arith.mulf %661, %660 : vector<8x128xf32>
    %663 = math.tanh %662 : vector<8x128xf32>
    %cst_279 = arith.constant 5.000000e-01 : f32
    %664 = vector.broadcast %cst_279 : f32 to vector<8x128xf32>
    %665 = arith.mulf %664, %663 : vector<8x128xf32>
    %cst_280 = arith.constant 5.000000e-01 : f32
    %666 = vector.broadcast %cst_280 : f32 to vector<8x128xf32>
    %667 = arith.addf %665, %666 : vector<8x128xf32>
    %668 = arith.mulf %657, %583 : vector<8x128xf32>
    %669 = arith.mulf %649, %659 : vector<8x128xf32>
    %670 = arith.addf %668, %669 : vector<8x128xf32>
    %671 = math.tanh %670 : vector<8x128xf32>
    %672 = arith.mulf %667, %671 : vector<8x128xf32>
    %673 = vector.extract_strided_slice %641 {offsets = [0, 0], sizes = [8, 128], strides = [1, 1]} : vector<8x512xf32> to vector<8x128xf32>
    %cst_281 = arith.constant 5.000000e-01 : f32
    %674 = vector.broadcast %cst_281 : f32 to vector<8x128xf32>
    %675 = arith.mulf %674, %673 : vector<8x128xf32>
    %676 = math.tanh %675 : vector<8x128xf32>
    %cst_282 = arith.constant 5.000000e-01 : f32
    %677 = vector.broadcast %cst_282 : f32 to vector<8x128xf32>
    %678 = arith.mulf %677, %676 : vector<8x128xf32>
    %cst_283 = arith.constant 5.000000e-01 : f32
    %679 = vector.broadcast %cst_283 : f32 to vector<8x128xf32>
    %680 = arith.addf %678, %679 : vector<8x128xf32>
    %681 = vector.extract_strided_slice %641 {offsets = [0, 128], sizes = [8, 128], strides = [1, 1]} : vector<8x512xf32> to vector<8x128xf32>
    %cst_284 = arith.constant 5.000000e-01 : f32
    %682 = vector.broadcast %cst_284 : f32 to vector<8x128xf32>
    %683 = arith.mulf %682, %681 : vector<8x128xf32>
    %684 = math.tanh %683 : vector<8x128xf32>
    %cst_285 = arith.constant 5.000000e-01 : f32
    %685 = vector.broadcast %cst_285 : f32 to vector<8x128xf32>
    %686 = arith.mulf %685, %684 : vector<8x128xf32>
    %cst_286 = arith.constant 5.000000e-01 : f32
    %687 = vector.broadcast %cst_286 : f32 to vector<8x128xf32>
    %688 = arith.addf %686, %687 : vector<8x128xf32>
    %689 = vector.extract_strided_slice %641 {offsets = [0, 256], sizes = [8, 128], strides = [1, 1]} : vector<8x512xf32> to vector<8x128xf32>
    %690 = math.tanh %689 : vector<8x128xf32>
    %691 = vector.extract_strided_slice %641 {offsets = [0, 384], sizes = [8, 128], strides = [1, 1]} : vector<8x512xf32> to vector<8x128xf32>
    %cst_287 = arith.constant 5.000000e-01 : f32
    %692 = vector.broadcast %cst_287 : f32 to vector<8x128xf32>
    %693 = arith.mulf %692, %691 : vector<8x128xf32>
    %694 = math.tanh %693 : vector<8x128xf32>
    %cst_288 = arith.constant 5.000000e-01 : f32
    %695 = vector.broadcast %cst_288 : f32 to vector<8x128xf32>
    %696 = arith.mulf %695, %694 : vector<8x128xf32>
    %cst_289 = arith.constant 5.000000e-01 : f32
    %697 = vector.broadcast %cst_289 : f32 to vector<8x128xf32>
    %698 = arith.addf %696, %697 : vector<8x128xf32>
    %699 = arith.mulf %688, %614 : vector<8x128xf32>
    %700 = arith.mulf %680, %690 : vector<8x128xf32>
    %701 = arith.addf %699, %700 : vector<8x128xf32>
    %702 = math.tanh %701 : vector<8x128xf32>
    %703 = arith.mulf %698, %702 : vector<8x128xf32>
    %704 = arith.index_cast %c7_i32_258 : i32 to index
    %c0_290 = arith.constant 0 : index
    %c0_291 = arith.constant 0 : index
    %705 = vector.load %arg11[%704, %c0_290, %c0_291] : memref<8x8x256xf32, #tpu.memory_space<vmem>>, vector<1x8x128xf32>
    %706 = vector.shape_cast %705 : vector<1x8x128xf32> to vector<8x128xf32>
    %707 = vector.shape_cast %672 : vector<8x128xf32> to vector<1x8x128xf32>
    tpu.vector_store %arg11[%704, %c0_290, %c0_291], %707 {strides = array<i32>} : memref<8x8x256xf32, #tpu.memory_space<vmem>>, vector<1x8x128xf32>,
    %708 = arith.index_cast %625 : i32 to index
    %c0_292 = arith.constant 0 : index
    %c128_293 = arith.constant 128 : index
    %709 = vector.load %arg11[%708, %c0_292, %c128_293] : memref<8x8x256xf32, #tpu.memory_space<vmem>>, vector<1x8x128xf32>
    %710 = vector.shape_cast %709 : vector<1x8x128xf32> to vector<8x128xf32>
    %711 = vector.shape_cast %703 : vector<8x128xf32> to vector<1x8x128xf32>
    tpu.vector_store %arg11[%708, %c0_292, %c128_293], %711 {strides = array<i32>} : memref<8x8x256xf32, #tpu.memory_space<vmem>>, vector<1x8x128xf32>,
    %c8_i32 = arith.constant 8 : i32
    %c0_294 = arith.constant 0 : index
    %c0_295 = arith.constant 0 : index
    %c0_296 = arith.constant 0 : index
    %712 = vector.load %arg8[%c0_294, %c0_295, %c0_296] : memref<2x8x128xf32, #tpu.memory_space<vmem>>, vector<1x8x128xf32>
    %713 = vector.shape_cast %712 : vector<1x8x128xf32> to vector<8x128xf32>
    %714 = vector.shape_cast %672 : vector<8x128xf32> to vector<1x8x128xf32>
    tpu.vector_store %arg8[%c0_294, %c0_295, %c0_296], %714 {strides = array<i32>} : memref<2x8x128xf32, #tpu.memory_space<vmem>>, vector<1x8x128xf32>,
    %c0_297 = arith.constant 0 : index
    %c0_298 = arith.constant 0 : index
    %c0_299 = arith.constant 0 : index
    %715 = vector.load %arg9[%c0_297, %c0_298, %c0_299] : memref<2x8x128xf32, #tpu.memory_space<vmem>>, vector<1x8x128xf32>
    %716 = vector.shape_cast %715 : vector<1x8x128xf32> to vector<8x128xf32>
    %717 = vector.shape_cast %670 : vector<8x128xf32> to vector<1x8x128xf32>
    tpu.vector_store %arg9[%c0_297, %c0_298, %c0_299], %717 {strides = array<i32>} : memref<2x8x128xf32, #tpu.memory_space<vmem>>, vector<1x8x128xf32>,
    %c1_300 = arith.constant 1 : index
    %c0_301 = arith.constant 0 : index
    %c0_302 = arith.constant 0 : index
    %718 = vector.load %arg8[%c1_300, %c0_301, %c0_302] : memref<2x8x128xf32, #tpu.memory_space<vmem>>, vector<1x8x128xf32>
    %719 = vector.shape_cast %718 : vector<1x8x128xf32> to vector<8x128xf32>
    %720 = vector.shape_cast %703 : vector<8x128xf32> to vector<1x8x128xf32>
    tpu.vector_store %arg8[%c1_300, %c0_301, %c0_302], %720 {strides = array<i32>} : memref<2x8x128xf32, #tpu.memory_space<vmem>>, vector<1x8x128xf32>,
    %c1_303 = arith.constant 1 : index
    %c0_304 = arith.constant 0 : index
    %c0_305 = arith.constant 0 : index
    %721 = vector.load %arg9[%c1_303, %c0_304, %c0_305] : memref<2x8x128xf32, #tpu.memory_space<vmem>>, vector<1x8x128xf32>
    %722 = vector.shape_cast %721 : vector<1x8x128xf32> to vector<8x128xf32>
    %723 = vector.shape_cast %701 : vector<8x128xf32> to vector<1x8x128xf32>
    tpu.vector_store %arg9[%c1_303, %c0_304, %c0_305], %723 {strides = array<i32>} : memref<2x8x128xf32, #tpu.memory_space<vmem>>, vector<1x8x128xf32>,
    %c2_i32_306 = arith.constant 2 : i32
    %724 = arith.cmpi eq, %arg0, %c2_i32_306 : i32
    %725 = arith.extui %724 : i1 to i32
    %c0_i32_307 = arith.constant 0 : i32
    %726 = arith.cmpi ne, %725, %c0_i32_307 : i32
    scf.if %726 {
      %c0_308 = arith.constant 0 : index
      %c0_309 = arith.constant 0 : index
      %c0_310 = arith.constant 0 : index
      %727 = vector.load %arg11[%c0_308, %c0_309, %c0_310] : memref<8x8x256xf32, #tpu.memory_space<vmem>>, vector<8x8x256xf32>
      %c0_311 = arith.constant 0 : index
      %c0_312 = arith.constant 0 : index
      %c0_313 = arith.constant 0 : index
      %728 = vector.load %arg7[%c0_311, %c0_312, %c0_313] : memref<8x8x256xf32, #tpu.memory_space<vmem>>, vector<8x8x256xf32>
      tpu.vector_store %arg7[%c0_311, %c0_312, %c0_313], %727 {strides = array<i32>} : memref<8x8x256xf32, #tpu.memory_space<vmem>>, vector<8x8x256xf32>,
    } else {
    }
    return
  }
  func.func @transform_0(%arg0: i32) -> (i32, i32, i32) {
    %c0_i32 = arith.constant 0 : i32
    %c0_i32_0 = arith.constant 0 : i32
    %c0_i32_1 = arith.constant 0 : i32
    %c0_i32_2 = arith.constant 0 : i32
    return %c0_i32, %c0_i32_0, %c0_i32_1 : i32, i32, i32
  }
  func.func @transform_1(%arg0: i32) -> (i32, i32, i32) {
    %c0_i32 = arith.constant 0 : i32
    %c0_i32_0 = arith.constant 0 : i32
    %c0_i32_1 = arith.constant 0 : i32
    return %arg0, %c0_i32, %c0_i32_0 : i32, i32, i32
  }
  func.func @transform_2(%arg0: i32) -> (i32, i32, i32) {
    %c0_i32 = arith.constant 0 : i32
    %c0_i32_0 = arith.constant 0 : i32
    %c0_i32_1 = arith.constant 0 : i32
    return %arg0, %c0_i32, %c0_i32_0 : i32, i32, i32
  }
  func.func @transform_3(%arg0: i32) -> (i32, i32, i32) {
    %c0_i32 = arith.constant 0 : i32
    %c0_i32_0 = arith.constant 0 : i32
    %c0_i32_1 = arith.constant 0 : i32
    return %arg0, %c0_i32, %c0_i32_0 : i32, i32, i32
  }
  func.func @transform_4(%arg0: i32) -> (i32, i32, i32) {
    %c0_i32 = arith.constant 0 : i32
    %c0_i32_0 = arith.constant 0 : i32
    %c0_i32_1 = arith.constant 0 : i32
    return %arg0, %c0_i32, %c0_i32_0 : i32, i32, i32
  }
  func.func @transform_5(%arg0: i32) -> (i32, i32, i32) {
    %c0_i32 = arith.constant 0 : i32
    %c0_i32_0 = arith.constant 0 : i32
    %c0_i32_1 = arith.constant 0 : i32
    return %arg0, %c0_i32, %c0_i32_0 : i32, i32, i32
  }
  func.func @transform_6(%arg0: i32) -> (i32, i32, i32) {
    %c0_i32 = arith.constant 0 : i32
    %c0_i32_0 = arith.constant 0 : i32
    %c0_i32_1 = arith.constant 0 : i32
    %c0_i32_2 = arith.constant 0 : i32
    return %c0_i32, %c0_i32_0, %c0_i32_1 : i32, i32, i32
  }
  func.func @transform_7(%arg0: i32) -> (i32, i32, i32) {
    %c0_i32 = arith.constant 0 : i32
    %c0_i32_0 = arith.constant 0 : i32
    %c0_i32_1 = arith.constant 0 : i32
    return %arg0, %c0_i32, %c0_i32_0 : i32, i32, i32
  }
  func.func @transform_8(%arg0: i32) -> (i32, i32, i32) {
    %c0_i32 = arith.constant 0 : i32
    %c0_i32_0 = arith.constant 0 : i32
    %c0_i32_1 = arith.constant 0 : i32
    return %arg0, %c0_i32, %c0_i32_0 : i32, i32, i32
  }
}

</mosaic_0001>

<bundles_post_ra>
// kernel: tpu_custom_call.1
= control target key start
LH: loop header
LB: loop body
LE: loop exit
PB: predicated region body
PF: predicated region fallthrough
CT: control target
= control target key end

     0   :  { %s11070_s0 = inlined_call_operand.hbm [shape: f32[8,8,64], index: 0, kind: input, shape index: {}]   ;;  %s11071_s1 = inlined_call_operand.hbm [shape: f32[6,8,128], index: 1, kind: input, shape index: {}]   ;;  %s11072_s2 = inlined_call_operand.hbm [shape: f32[6,8,128], index: 2, kind: input, shape index: {}]   ;;  %s11073_s3 = inlined_call_operand.hbm [shape: bf16[3,256,1024], index: 3, kind: input, shape index: {}]   ;;  %s11074_s4 = inlined_call_operand.hbm [shape: bf16[3,128,1024], index: 4, kind: input, shape index: {}]   ;;  %s11075_s5 = inlined_call_operand.hbm [shape: f32[3,1,1024], index: 5, kind: input, shape index: {}]   ;;  %s11076_s6 = inlined_call_operand.hbm [shape: f32[8,8,256], index: 6, kind: output, shape index: {0}]   ;;  %s11077_s7 = inlined_call_operand.hbm [shape: f32[6,8,128], index: 7, kind: output, shape index: {1}]   ;;  %s11078_s8 = inlined_call_operand.hbm [shape: f32[6,8,128], index: 8, kind: output, shape index: {2}]  }
   0x1   :  { %11146 = sst [smem:[#allocation41_spill]] %s11071_s1 }
   0x2   :  { %11147 = sst [smem:[#allocation42_spill]] %s11072_s2 }
   0x3   :  { %11148 = sst [smem:[#allocation43_spill]] %s11073_s3 }
   0x4   :  { %14 = vsyncpa [#allocation5], 0 }
   0x5   :  { %15 = vsyncpa [#allocation8], 0 }
   0x6   :  { %17 = vsyncpa [#allocation8 + $0x1], 0 }
   0x7   :  { %18 = vsyncpa [#allocation11], 0 }
   0x8   :  { %20 = vsyncpa [#allocation11 + $0x1], 0 }
   0x9   :  { %21 = vsyncpa [#allocation14], 0 }
   0xa   :  { %23 = vsyncpa [#allocation14 + $0x1], 0 }
   0xb   :  { %24 = vsyncpa [#allocation6], 0 }
   0xc   :  { %25 = vsyncpa [#allocation17], 0 }
   0xd   :  { %27 = vsyncpa [#allocation17 + $0x1], 0  ;;  %s8830_s27 = smov 0   ;;  %s8832_s28 = smov 0  }
   0xe   :  { %s8834_s29 = smov 0   ;;  %s8836_s30 = smov 0  }
   0xf LB: > { %11149 = sst [smem:[#allocation25_spill]] %s8760_s29  ;;  %s8851_s9 = sadd.s32 1, %s8764_s30   ;;  %s8764_s30 = sphi %s8836_s30, %s11280_s30   ;;  %s8760_s29 = sphi %s8834_s29, %s11282_s29   ;;  %s8756_s28 = sphi %s8832_s28, %s11284_s28   ;;  %s8752_s27 = sphi %s8830_s27, %s11283_s27  }
  0x10   : > { %11150 = sst [smem:[#allocation26_spill]] %s8851_s9  ;;  %s61_s10 = sadd.s32 1, %s8760_s29 }
  0x11   : > { %s58_s11 = ssub.s32 %s8764_s30, %s8851_s9  ;;  %p11080_p0 = scmp.ne.s32.totalorder %s8760_s29, %s8756_s28 }
  0x12   : > { %p59_p1 = scmp.eq.s32.totalorder %s58_s11, 0  ;;  %p69_p2 = scmp.eq.s32.totalorder %s8764_s30, 0 }
  0x13   : > { %p8259_p4 = scmp.lt.s32.totalorder %s8764_s30, 3  ;;  %s11079_s13 = sand.u32 1, %s8764_s30  }
  0x14   : > { %s8860_s12 = scalar_select %p59_p1, %s8760_s29, %s61_s10  }
  0x15   : > { %p70_p3 = por %p69_p2, %p11080_p0  ;;  %s8868_s14 = sand.u32 1, %s8760_s29  }
  0x16   : > { %11151 = sst [smem:[#allocation27_spill]] %s8860_s12  ;;  %s7473_s15 = sshll.u32 %s8868_s14, 4 }
  0x17   : > { %s8202_s16 = sshll.u32 %s8764_s30, 8  ;;  %s11152_s1 = sld [smem:[#allocation41_spill]] }
  0x18   : > { %s292_s20 = scalar_lea.vmem [#allocation7], %s7473_s15  ;;  %p8879_p5 = pnand %p8259_p4, %p70_p3 }
  0x19   : > { %s299_s21 = sshll.u32 %s292_s20, 4  ;;  %s11154_s2 = sld [smem:[#allocation42_spill]]  ;;  %s8883_s21 = int_to_ptr.vmem [resolvable:$true] %s299_s21 }
  0x1a   : > { %s8892_s26 = scalar_lea.sflag [#allocation8], %s11079_s13  ;;  %p8898_p7 = pneg %p8879_p5 }
  0x1d   : > { %s8875_s19 = scalar_lea.hbm %s11152_s1, %s8202_s16  ;;  %s8473_s20 = scalar_lea.hbm %s11152_s1, 768 }
  0x1e   : > { %s8468_s10 = scalar_lea.hbm %s8875_s19, 256  ;;  %p8474_p10 = scmp.lt.s32.totalorder %s8875_s19, %s11152_s1 }
  0x1f   : > { %s8888_s25 = scalar_lea.hbm %s11154_s2, %s8202_s16  ;;  %p8469_p6 = scmp.ne.s32.totalorder %s8875_s19, %s8468_s10 }
  0x20   : > { %p8475_p11 = scmp.lt.s32.totalorder %s8473_s20, %s8468_s10 }
  0x21   : > { %p8471_p8 = pnand %p8898_p7, %p8469_p6 }
  0x22   : > { %p8476_p12 = por %p8475_p11, %p8474_p10 }
  0x23   : > { %p8472_p9 = pneg %p8471_p8 }
  0x25   : > { %p8477_p13 = pnand %p8476_p12, %p8472_p9 }
  0x27   : > { %8480 = shalt.err (!%p8477_p13)
}
  0x28   : > { %s8481_s24 = scalar_lea.vmem %s8883_s21, 256  ;;  %s8766_s13 = smov [#allocation7]  }
  0x29   : > { %p8482_p1 = scmp.ne.s32.totalorder %s8883_s21, %s8481_s24  ;;  %s8486_s17 = sshll.u32 %s8766_s13, 4  ;;  %s8487_s17 = int_to_ptr.vmem [resolvable:$false] %s8486_s17 }
  0x2a   : > { %s8488_s18 = scalar_lea.vmem %s8487_s17, 512  ;;  %p8489_p4 = scmp.lt.s32.totalorder %s8883_s21, %s8487_s17 }
  0x2b   : > { %p8484_p2 = pnand %p8482_p1, %p8898_p7  ;;  %p8490_p6 = scmp.lt.s32.totalorder %s8488_s18, %s8481_s24 }
  0x2d   : > { %p8485_p3 = pneg %p8484_p2  ;;  %p8491_p8 = por %p8490_p6, %p8489_p4 }
  0x2f   : > { %p8492_p0 = pnand %p8491_p8, %p8485_p3 }
  0x31   : > { %8495 = shalt.err (!%p8492_p0)
}
  0x32   : > { %s11083_s10 = smov 128   ;;  %s11089_s20 = smov 8  }
  0x33   : > { %8238 = dma.hbm_to_vmem [thread:$0]  (!%p8879_p5), %s8875_s19, 256, %s8883_s21, %s8892_s26, %s11083_s10, %s11083_s10, %s11089_s20  }
  0x34   : > { %s313_s13 = scalar_lea.vmem [#allocation9], %s7473_s15  ;;  %s7479_s23 = sshll.u32 %s8868_s14, 10 }
  0x35   : > { %s320_s16 = sshll.u32 %s313_s13, 4  ;;  %s8204_s24 = sshll.u32 %s8764_s30, 14  ;;  %s8926_s16 = int_to_ptr.vmem [resolvable:$true] %s320_s16 }
  0x36   : > { %s11156_s3 = sld [smem:[#allocation43_spill]]  ;;  %s334_s12 = scalar_lea.vmem [#allocation10], %s7479_s23 }
  0x37   : > { %s341_s9 = sshll.u32 %s334_s12, 4  ;;  %s11157_s19 = sand.u32 1, %s8764_s30   ;;  %s8935_s9 = int_to_ptr.vmem [resolvable:$true] %s341_s9 }
  0x38   : > { %s8939_s21 = scalar_lea.sflag [#allocation11], %s11157_s19 }
  0x3c   : > { %s8933_s1 = scalar_lea.hbm %s11156_s3, %s8204_s24  ;;  %s8501_s24 = scalar_lea.hbm %s11156_s3, 49152 }
  0x3d   : > { %s8496_s15 = scalar_lea.hbm %s8933_s1, 16384  ;;  %p8502_p11 = scmp.lt.s32.totalorder %s8933_s1, %s11156_s3 }
  0x3e   : > { %p8497_p0 = scmp.ne.s32.totalorder %s8933_s1, %s8496_s15  ;;  %p8503_p12 = scmp.lt.s32.totalorder %s8501_s24, %s8496_s15 }
  0x40   : > { %p8499_p9 = pnand %p8497_p0, %p8898_p7  ;;  %p8504_p13 = por %p8503_p12, %p8502_p11 }
  0x42   : > { %p8500_p10 = pneg %p8499_p9 }
  0x44   : > { %p8505_p1 = pnand %p8504_p13, %p8500_p10 }
  0x46   : > { %8508 = shalt.err (!%p8505_p1)
}
  0x47   : > { %s8509_s12 = scalar_lea.vmem %s8935_s9, 16384  ;;  %s8769_s23 = smov [#allocation10]  }
  0x48   : > { %p8510_p2 = scmp.ne.s32.totalorder %s8935_s9, %s8509_s12  ;;  %s8514_s10 = sshll.u32 %s8769_s23, 4  ;;  %s8515_s10 = int_to_ptr.vmem [resolvable:$false] %s8514_s10 }
  0x49   : > { %s8516_s19 = scalar_lea.vmem %s8515_s10, 32768  ;;  %p8517_p6 = scmp.lt.s32.totalorder %s8935_s9, %s8515_s10 }
  0x4a   : > { %p8512_p3 = pnand %p8510_p2, %p8898_p7  ;;  %p8518_p8 = scmp.lt.s32.totalorder %s8516_s19, %s8509_s12 }
  0x4c   : > { %p8513_p4 = pneg %p8512_p3  ;;  %p8519_p0 = por %p8518_p8, %p8517_p6 }
  0x4e   : > { %p8520_p9 = pnand %p8519_p0, %p8513_p4 }
  0x50   : > { %8523 = shalt.err (!%p8520_p9)
}
  0x51   : > { %s11087_s15 = smov 512   ;;  %s11088_s13 = smov 32  }
  0x52   : > { %8244 = dma.hbm_to_vmem [thread:$0]  (!%p8879_p5), %s8933_s1, 16384, %s8935_s9, %s8939_s21, %s11087_s15, %s11087_s15, %s11088_s13  }
  0x53   : > { %s8966_s24 = sadd.s32 4294967295, %s8764_s30   ;;  %s11086_s17 = sadd.s32 4294967294, %s8764_s30  }
  0x54   : > { %p74_p10 = scmp.ne.s32.totalorder %s8756_s28, %s8752_s27  ;;  %p11091_p11 = scmp.eq.s32.totalorder %s8966_s24, 0 }
  0x55   : > { %p11085_p12 = scmp.eq.s32.totalorder %s8966_s24, 2  ;;  %p229_p13 = scmp.eq.s32.totalorder %s11086_s17, 2 }
  0x56   : > { %p7470_p1 = scmp.ge.s32.totalorder %s8764_s30, 1  ;;  %p8978_p2 = por %p11091_p11, %p74_p10 }
  0x57   : > { %p11159_p3 = scmp.ne.s32.totalorder %s8760_s29, %s8756_s28  ;;  %p8991_p6 = por %p229_p13, %p74_p10 }
  0x58   : > { %s11158_s1 = scalar_select %p8978_p2, 1, 0 }
  0x59   : > { %p8987_p4 = por %p11085_p12, %p11159_p3  ;;  %p262_p8 = scmp.lt.s32.totalorder %s8764_s30, 4 }
  0x5a   : > { %s11161_s27 = scalar_select %p8991_p6, 1, 0 }
  0x5b   : > { %s11160_s9 = scalar_select %p8987_p4, 1, 0 }
  0x5c   : > { %p8997_p9 = pnand %p7470_p1, %p262_p8  ;;  %s8772_s12 = smov [#allocation4]  }
  0x5d   : > { %s274_s23 = sshll.u32 %s8772_s12, 4  ;;  %s8524_s19 = scalar_lea.hbm %s8888_s25, 256  ;;  %s9001_s23 = int_to_ptr.vmem [resolvable:$true] %s274_s23 }
  0x5e   : > { %s11162_s18 = scalar_select %p8997_p9, 1, 0 }
  0x5f   : > { %p8525_p12 = scmp.ne.s32.totalorder %s8888_s25, %s8524_s19  ;;  %s8529_s13 = scalar_lea.hbm %s11154_s2, 768 }
  0x60   : > { %p8530_p1 = scmp.lt.s32.totalorder %s8888_s25, %s11154_s2  ;;  %p8531_p8 = scmp.lt.s32.totalorder %s8529_s13, %s8524_s19 }
  0x61   : > { %p8527_p10 = pnand %p8525_p12, %p8898_p7 }
  0x62   : > { %p8532_p0 = por %p8531_p8, %p8530_p1 }
  0x63   : > { %p8528_p13 = pneg %p8527_p10 }
  0x65   : > { %p8533_p11 = pnand %p8532_p0, %p8528_p13 }
  0x67   : > { %8536 = shalt.err (!%p8533_p11)
}
  0x68   : > { %s8537_s12 = scalar_lea.vmem %s8926_s16, 256  ;;  %s8773_s10 = smov [#allocation9]  }
  0x69   : > { %p8538_p3 = scmp.ne.s32.totalorder %s8926_s16, %s8537_s12  ;;  %s8542_s15 = sshll.u32 %s8773_s10, 4  ;;  %s8543_s15 = int_to_ptr.vmem [resolvable:$false] %s8542_s15 }
  0x6a   : > { %s8544_s17 = scalar_lea.vmem %s8543_s15, 512  ;;  %p8545_p6 = scmp.lt.s32.totalorder %s8926_s16, %s8543_s15 }
  0x6b   : > { %p8540_p12 = pnand %p8538_p3, %p8898_p7  ;;  %p8546_p4 = scmp.lt.s32.totalorder %s8544_s17, %s8537_s12 }
  0x6d   : > { %p8541_p10 = pneg %p8540_p12  ;;  %p8547_p2 = por %p8546_p4, %p8545_p6 }
  0x6f   : > { %p8548_p9 = pnand %p8547_p2, %p8541_p10 }
  0x71   : > { %8551 = shalt.err (!%p8548_p9)
}
  0x72   : > { %s11163_s3 = smov 8   ;;  %s11164_s20 = smov 128  }
  0x73   : > { %8241 = dma.hbm_to_vmem [thread:$0]  (!%p8879_p5), %s8888_s25, 256, %s8926_s16, %s8892_s26, %s11164_s20, %s11164_s20, %s11163_s3  }
  0x74   : > { %p11165_p11 = scmp.eq.s32.totalorder %s8966_s24, 0  ;;  %p11166_p4 = scmp.ne.s32.totalorder %s11162_s18, 0 }
  0x75   : > { %s8205_s10 = sshll.u32 %s8764_s30, 13  ;;  %s11169_s17 = sshll.u32 %s8868_s14, 9 }
  0x76   : > { %p11167_p2 = pneg %p11166_p4  ;;  %s9043_s15 = scalar_lea.hbm %s11074_s4, %s8205_s10 }
  0x77   : > { %s355_s2 = scalar_lea.vmem [#allocation12], %s11169_s17  ;;  %s8563_s25 = scalar_lea.vmem %s9001_s23, 1024 }
  0x78   : > { %p9035_p6 = pnand %p11167_p2, %p11165_p11  ;;  %s362_s29 = sshll.u32 %s355_s2, 4  ;;  %s9047_s29 = int_to_ptr.vmem [resolvable:$true] %s362_s29 }
  0x79   : > { %p8564_p9 = scmp.ne.s32.totalorder %s9001_s23, %s8563_s25  ;;  %p8571_p1 = scmp.lt.s32.totalorder %s9001_s23, %s9001_s23 }
  0x7a   : > { %p8554_p0 = pneg %p9035_p6  ;;  %p8572_p8 = scmp.lt.s32.totalorder %s8563_s25, %s8563_s25 }
  0x7c   : > { %p8566_p3 = pnand %p8564_p9, %p8554_p0  ;;  %p8573_p12 = por %p8572_p8, %p8571_p1 }
  0x7e   : > { %p8567_p13 = pneg %p8566_p3 }
  0x80   : > { %p8574_p10 = pnand %p8573_p12, %p8567_p13 }
  0x82   : > { %8577 = shalt.err (!%p8574_p10)
}
  0x83   : > { %8234 = dma.hbm_to_vmem [thread:$0]  (!%p9035_p6), %s11070_s0, 1024, %s9001_s23, [#allocation5], %s11164_s20, %s11164_s20, %s11163_s3  }
  0x84   : > { %s8578_s16 = scalar_lea.hbm %s9043_s15, 8192  ;;  %s8583_s13 = scalar_lea.hbm %s11074_s4, 24576 }
  0x85   : > { %p8579_p11 = scmp.ne.s32.totalorder %s9043_s15, %s8578_s16  ;;  %p8584_p9 = scmp.lt.s32.totalorder %s9043_s15, %s11074_s4 }
  0x86   : > { %p8585_p3 = scmp.lt.s32.totalorder %s8583_s13, %s8578_s16 }
  0x87   : > { %p8581_p2 = pnand %p8579_p11, %p8898_p7 }
  0x88   : > { %p8586_p13 = por %p8585_p3, %p8584_p9 }
  0x89   : > { %p8582_p0 = pneg %p8581_p2 }
  0x8b   : > { %p8587_p1 = pnand %p8586_p13, %p8582_p0 }
  0x8d   : > { %8590 = shalt.err (!%p8587_p1)
}
  0x8e   : > { %s8591_s23 = scalar_lea.vmem %s9047_s29, 8192  ;;  %s8774_s3 = smov [#allocation12]  }
  0x8f   : > { %p8592_p6 = scmp.ne.s32.totalorder %s9047_s29, %s8591_s23  ;;  %s8596_s20 = sshll.u32 %s8774_s3, 4  ;;  %s8597_s20 = int_to_ptr.vmem [resolvable:$false] %s8596_s20 }
  0x90   : > { %s8598_s25 = scalar_lea.vmem %s8597_s20, 16384  ;;  %p8599_p10 = scmp.lt.s32.totalorder %s9047_s29, %s8597_s20 }
  0x91   : > { %p8594_p8 = pnand %p8592_p6, %p8898_p7  ;;  %p8600_p11 = scmp.lt.s32.totalorder %s8598_s25, %s8591_s23 }
  0x93   : > { %p8595_p12 = pneg %p8594_p8  ;;  %p8601_p2 = por %p8600_p11, %p8599_p10 }
  0x95   : > { %p8602_p4 = pnand %p8601_p2, %p8595_p12 }
  0x97   : > { %8605 = shalt.err (!%p8602_p4)
}
  0x98   : > { %s11170_s2 = smov 32   ;;  %s11171_s26 = smov 512  }
  0x99   : > { %8247 = dma.hbm_to_vmem [thread:$0]  (!%p8879_p5), %s9043_s15, 8192, %s9047_s29, %s8939_s21, %s11171_s26, %s11171_s26, %s11170_s2  }
  0x9a   : > { %s7485_s16 = sshll.u32 %s8868_s14, 3  ;;  %s8206_s10 = sshll.u32 %s8764_s30, 7 }
  0x9b   : > { %s9093_s12 = scalar_lea.hbm %s11075_s5, %s8206_s10  ;;  %s376_s17 = scalar_lea.vmem [#allocation13], %s7485_s16 }
  0x9c   : > { %s384_s23 = sshll.u32 %s376_s17, 4  ;;  %s373_s3 = scalar_lea.sflag [#allocation14], %s8868_s14  ;;  %s385_s23 = int_to_ptr.vmem [resolvable:$true] %s384_s23 }
  0x9d   : > { %s8606_s20 = scalar_lea.hbm %s9093_s12, 128  ;;  %s8611_s15 = scalar_lea.hbm %s11075_s5, 384 }
  0x9e   : > { %p8607_p4 = scmp.ne.s32.totalorder %s9093_s12, %s8606_s20  ;;  %p8612_p3 = scmp.lt.s32.totalorder %s9093_s12, %s11075_s5 }
  0x9f   : > { %p8613_p13 = scmp.lt.s32.totalorder %s8611_s15, %s8606_s20 }
  0xa0   : > { %p8609_p0 = pnand %p8607_p4, %p8898_p7 }
  0xa1   : > { %p8614_p1 = por %p8613_p13, %p8612_p3 }
  0xa2   : > { %p8610_p9 = pneg %p8609_p0 }
  0xa4   : > { %p8615_p6 = pnand %p8614_p1, %p8610_p9 }
  0xa6   : > { %8618 = shalt.err (!%p8615_p6)
}
  0xa7   : > { %s8619_s26 = scalar_lea.vmem %s385_s23, 128  ;;  %s8775_s14 = smov [#allocation13]  }
  0xa8   : > { %p8620_p8 = scmp.ne.s32.totalorder %s385_s23, %s8619_s26  ;;  %s8624_s16 = sshll.u32 %s8775_s14, 4  ;;  %s8625_s16 = int_to_ptr.vmem [resolvable:$false] %s8624_s16 }
  0xa9   : > { %s8626_s10 = scalar_lea.vmem %s8625_s16, 256  ;;  %p8627_p11 = scmp.lt.s32.totalorder %s385_s23, %s8625_s16 }
  0xaa   : > { %p8622_p12 = pnand %p8620_p8, %p8898_p7  ;;  %p8628_p2 = scmp.lt.s32.totalorder %s8626_s10, %s8619_s26 }
  0xac   : > { %p8623_p10 = pneg %p8622_p12  ;;  %p8629_p4 = por %p8628_p2, %p8627_p11 }
  0xae   : > { %p8630_p0 = pnand %p8629_p4, %p8623_p10 }
  0xb0   : > { %8633 = shalt.err (!%p8630_p0)
}
  0xb1   : > { %8250 = dma.hbm_to_vmem [thread:$0]  (!%p8879_p5), %s9093_s12, 128, %s385_s23, %s373_s3  }
  0xb2   : > { %p11172_p9 = scmp.ne.s32.totalorder %s11162_s18, 0 }
  0xb4   : > { %393 = sbr.rel (%p11172_p9) target bundleno = 2906 (0xb5a), region = 44 }
  0xb9   : > { %p11173_p3 = scmp.eq.s32.totalorder %s8966_s24, 0 }
  0xbb   : > { %8727 = dma.done.wait (%p11173_p3), [#allocation5], 1024   ;;  %p11174_p7 = pmov %p11173_p3 }
  0xbc   : > { %s9119_s11 = sand.u32 1, %s8966_s24   ;;  %s401_s19 = sand.u32 1, %s8756_s28  }
  0xbd   : > { %8729 = vsyncadd (%p11174_p7), [#allocation5], 4294966272  ;;  %s9122_s13 = sshll.u32 %s401_s19, 4  ;;  %s400_s22 = scalar_lea.sflag [#allocation8], %s9119_s11 }
  0xbe   : > { %s403_s12 = scalar_lea.vmem [#allocation7], %s9122_s13  ;;  %p11175_p5 = scmp.ne.s32.totalorder %s11158_s1, 0 }
  0xc0   : > { %8731 = dma.done.wait (%p11175_p5), %s400_s22, 512  }
  0xc1   : > { %8733 = vsyncadd (%p11175_p5), %s400_s22, 4294966784  ;;  %s7492_s18 = sshll.u32 %s401_s19, 10  ;;  %s412_s17 = scalar_lea.vmem [#allocation9], %s9122_s13 }
  0xc2   : > { %s418_s23 = scalar_lea.sflag [#allocation11], %s9119_s11  ;;  %s9132_s3 = scalar_lea.vmem [#allocation10], %s7492_s18 }
  0xc3   : > { %8735 = dma.done.wait (%p11175_p5), %s418_s23, 24576  }
  0xc4   : > { %8737 = vsyncadd (%p11175_p5), %s418_s23, 4294942720  ;;  %s7493_s20 = sshll.u32 %s401_s19, 9  ;;  %s7494_s29 = sshll.u32 %s401_s19, 3 }
  0xc5   : > { %s9138_s21 = scalar_lea.vmem [#allocation12], %s7493_s20  ;;  %s436_s15 = scalar_lea.sflag [#allocation14], %s401_s19 }
  0xc6   : > { %s439_s25 = scalar_lea.vmem [#allocation13], %s7494_s29 }
  0xc7   : > { %8739 = dma.done.wait (%p11175_p5), %s436_s15, 128  }
  0xc8   : > { %8741 = vsyncadd (%p11175_p5), %s436_s15, 4294967168  ;;  %v9144_v0 = vld [vmem:[%s439_s25] sm:$0xff]  ;;  %s9147_s2 = scalar_lea.vmem [#allocation16], %s9122_s13  ;;  %s9150_s26 = scalar_lea.vmem [#allocation18], %s9122_s13 }
  0xc9   : > { %p11176_p13 = scmp.ne.s32.totalorder %s8966_s24, 0 }
  0xcb   : > { %506 = sbr.rel (%p11176_p13) target bundleno = 486 (0x1e6), region = 72 }
  0xd0   : > { %v543_v1 = vld [vmem:[%s9132_s3 + $0xc0] sm:$0xff]  ;;  %v544_v3 = vld [vmem:[%s9132_s3 + $0xc8] sm:$0xff]  ;;  %v8776_v9 = vmov 0   ;;  %v545_v32 = vld [vmem:[%s9132_s3 + $0xd0] sm:$0xff]  ;;  %vm752_vm0 = vcmask 523264  }
  0xd1   : > { %v547_v2 = vld [vmem:[%s9132_s3 + $0xe0] sm:$0xff]  ;;  %v548_v5 = vld [vmem:[%s9132_s3 + $0xe8] sm:$0xff]  ;;  %797 = vmatprep.mubr.bf16.mxu0 %v8776_v9  ;;  %870 = vmatprep.mubr.bf16.mxu1 %v8776_v9  ;;  %v549_v33 = vld [vmem:[%s9132_s3 + $0xf0] sm:$0xff] }
  0xd2   : > { %v7523_v4 = vcombine.high %v543_v1, %v547_v2  ;;  %v7522_v6 = vcombine.low %v543_v1, %v547_v2  ;;  %v535_v7 = vld [vmem:[%s9132_s3 + $0x80] sm:$0xff]  ;;  %v7525_v10 = vcombine.high %v544_v3, %v548_v5  ;;  %v7524_v11 = vcombine.low %v544_v3, %v548_v5  ;;  %v536_v13 = vld [vmem:[%s9132_s3 + $0x88] sm:$0xff]  ;;  %v546_v34 = vld [vmem:[%s9132_s3 + $0xd8] sm:$0xff] }
  0xd3   : > { %v539_v8 = vld [vmem:[%s9132_s3 + $0xa0] sm:$0xff]  ;;  %v540_v14 = vld [vmem:[%s9132_s3 + $0xa8] sm:$0xff]  ;;  %v550_v35 = vld [vmem:[%s9132_s3 + $0xf8] sm:$0xff]  ;;  %v7527_v40 = vcombine.high %v545_v32, %v549_v33  ;;  %v7526_v45 = vcombine.low %v545_v32, %v549_v33 }
  0xd4   : > { %v7515_v12 = vcombine.high %v535_v7, %v539_v8  ;;  %v527_v15 = vld [vmem:[%s9132_s3 + $0x40] sm:$0xff]  ;;  %773 = vmatprep.subr.bf16.mxu0 %v7523_v4  ;;  %v7517_v16 = vcombine.high %v536_v13, %v540_v14  ;;  %v528_v18 = vld [vmem:[%s9132_s3 + $0x48] sm:$0xff]  ;;  %846 = vmatprep.subr.bf16.mxu1 %v7525_v10  ;;  %v7514_v20 = vcombine.low %v535_v7, %v539_v8  ;;  %v537_v43 = vld [vmem:[%s9132_s3 + $0x90] sm:$0xff] }
  0xd5   : > { %v531_v17 = vld [vmem:[%s9132_s3 + $0x60] sm:$0xff]  ;;  %v532_v19 = vld [vmem:[%s9132_s3 + $0x68] sm:$0xff]  ;;  %774 = vmatpush1.bf16.msra.mxu0 %v7522_v6  ;;  %847 = vmatpush1.bf16.msra.mxu1 %v7524_v11  ;;  %v7516_v21 = vcombine.low %v536_v13, %v540_v14  ;;  %v7529_v41 = vcombine.high %v546_v34, %v550_v35  ;;  %v541_v44 = vld [vmem:[%s9132_s3 + $0xb0] sm:$0xff]  ;;  %v7528_v48 = vcombine.low %v546_v34, %v550_v35 }
  0xd6   : > { %775 = vmatprep.subr.bf16.mxu0 %v7515_v12  ;;  %v7507_v22 = vcombine.high %v527_v15, %v531_v17  ;;  %848 = vmatprep.subr.bf16.mxu1 %v7517_v16  ;;  %v7509_v23 = vcombine.high %v528_v18, %v532_v19  ;;  %v519_v24 = vld [vmem:[%s9132_s3] sm:$0xff]  ;;  %v520_v26 = vld [vmem:[%s9132_s3 + $0x8] sm:$0xff]  ;;  %v7506_v28 = vcombine.low %v527_v15, %v531_v17  ;;  %v538_v46 = vld [vmem:[%s9132_s3 + $0x98] sm:$0xff]  ;;  %v552_v16 = vlaneseq }
  0xd7   : > { %v523_v25 = vld [vmem:[%s9132_s3 + $0x20] sm:$0xff]  ;;  %v524_v27 = vld [vmem:[%s9132_s3 + $0x28] sm:$0xff]  ;;  %v7508_v29 = vcombine.low %v528_v18, %v532_v19  ;;  %v542_v47 = vld [vmem:[%s9132_s3 + $0xb8] sm:$0xff]  ;;  %v7519_v49 = vcombine.high %v537_v43, %v541_v44  ;;  %v7518_v57 = vcombine.low %v537_v43, %v541_v44 }
  0xd8   : > { %v7499_v30 = vcombine.high %v519_v24, %v523_v25  ;;  %v7501_v31 = vcombine.high %v520_v26, %v524_v27  ;;  %v7498_v36 = vcombine.low %v519_v24, %v523_v25  ;;  %v507_v37 = vld [vmem:[#allocation4] sm:$0xff]  ;;  %v508_v38 = vld [vmem:[#allocation4 + $0x8] sm:$0xff]  ;;  %v7500_v39 = vcombine.low %v520_v26, %v524_v27  ;;  %v529_v50 = vld [vmem:[%s9132_s3 + $0x50] sm:$0xff] }
  0xd9   : > { %776 = vmatpush1.bf16.msra.mxu0 %v7514_v20  ;;  %849 = vmatpush1.bf16.msra.mxu1 %v7516_v21  ;;  %v9176_v42 = vpack.c.bf16 %v508_v38, %v507_v37  ;;  %v533_v51 = vld [vmem:[%s9132_s3 + $0x70] sm:$0xff]  ;;  %v7521_v52 = vcombine.high %v538_v46, %v542_v47  ;;  %v530_v53 = vld [vmem:[%s9132_s3 + $0x58] sm:$0xff]  ;;  %v7520_v58 = vcombine.low %v538_v46, %v542_v47  ;;  %v511_v7 = vld [vmem:[#allocation4 + $0x20] sm:$0xff]  ;;  %v9224_v17 = vshrl.u32 %v552_v16, 7 }
  0xda   : > { %777 = vmatprep.subr.bf16.mxu0 %v7507_v22  ;;  %850 = vmatprep.subr.bf16.mxu1 %v7509_v23  ;;  %v534_v54 = vld [vmem:[%s9132_s3 + $0x78] sm:$0xff]  ;;  %v509_v55 = vld [vmem:[#allocation4 + $0x10] sm:$0xff]  ;;  %v7511_v59 = vcombine.high %v529_v50, %v533_v51  ;;  %v7510_v3 = vcombine.low %v529_v50, %v533_v51  ;;  %v512_v8 = vld [vmem:[#allocation4 + $0x28] sm:$0xff] }
  0xdb   : > { %v510_v56 = vld [vmem:[#allocation4 + $0x18] sm:$0xff]  ;;  %v7513_v60 = vcombine.high %v530_v53, %v534_v54  ;;  %v521_v62 = vld [vmem:[%s9132_s3 + $0x10] sm:$0xff]  ;;  %v7512_v4 = vcombine.low %v530_v53, %v534_v54  ;;  %v517_v12 = vpack.c.bf16 %v512_v8, %v511_v7  ;;  %v554_v18 = vsub.s32 0, %v9224_v17 }
  0xdc   : > { %v516_v61 = vpack.c.bf16 %v510_v56, %v509_v55  ;;  %v525_v63 = vld [vmem:[%s9132_s3 + $0x30] sm:$0xff]  ;;  %v522_v1 = vld [vmem:[%s9132_s3 + $0x18] sm:$0xff]  ;;  %v562_v19 = vsub.s32 2, %v9224_v17  ;;  %v558_v20 = vsub.s32 1, %v9224_v17  ;;  %v566_v21 = vsub.s32 3, %v9224_v17 }
  0xdd   : > { %778 = vmatpush1.bf16.msra.mxu0 %v7506_v28  ;;  %851 = vmatpush1.bf16.msra.mxu1 %v7508_v29  ;;  %v526_v2 = vld [vmem:[%s9132_s3 + $0x38] sm:$0xff]  ;;  %v7503_v5 = vcombine.high %v521_v62, %v525_v63  ;;  %v7502_v10 = vcombine.low %v521_v62, %v525_v63  ;;  %v513_v13 = vld [vmem:[#allocation4 + $0x30] sm:$0xff]  ;;  %v9231_v22 = vrot.slane %v9144_v0, %v554_v18  ;;  %v578_v18 = vsub.s32 6, %v9224_v17 }
  0xde   : > { %779 = vmatprep.subr.bf16.mxu0 %v7499_v30  ;;  %852 = vmatprep.subr.bf16.mxu1 %v7501_v31  ;;  %v7505_v6 = vcombine.high %v522_v1, %v526_v2  ;;  %v7504_v11 = vcombine.low %v522_v1, %v526_v2  ;;  %v514_v14 = vld [vmem:[#allocation4 + $0x38] sm:$0xff]  ;;  %v9237_v23 = vrot.slane %v9144_v0, %v558_v20 }
  0xdf   : > { %v518_v15 = vpack.c.bf16 %v514_v14, %v513_v13  ;;  %v9240_v25 = vrot.slane %v9144_v0, %v566_v21  ;;  %v570_v14 = vsub.s32 4, %v9224_v17  ;;  %v574_v21 = vsub.s32 5, %v9224_v17 }
  0xe1   : > { %780 = vmatpush1.bf16.msra.mxu0 %v7498_v36  ;;  %853 = vmatpush1.bf16.msra.mxu1 %v7500_v39 }
  0xe2   : > { %919 = vmatprep.subr.bf16.mxu0 %v7527_v40  ;;  %992 = vmatprep.subr.bf16.mxu1 %v7529_v41 }
  0xe4   : > { %7530 = vmatmul.mubr.msk.bf16.vlgmr.msra.gmra.mxu0 %vm752_vm0, %v9176_v42  ;;  %7534 = vmatmul.mubr.msk.bf16.vlgmr.msra.gmra.mxu1 %vm752_vm0, %v9176_v42 }
  0xe5   : > { %920 = vmatpush1.bf16.msra.mxu0 %v7526_v45  ;;  %993 = vmatpush1.bf16.msra.mxu1 %v7528_v48 }
  0xe6   : > { %807 = vmatprep.mubr.bf16.mxu0 %v8776_v9  ;;  %880 = vmatprep.mubr.bf16.mxu1 %v8776_v9 }
  0xe7   : > { %921 = vmatprep.subr.bf16.mxu0 %v7519_v49  ;;  %994 = vmatprep.subr.bf16.mxu1 %v7521_v52 }
  0xe9   : > { %922 = vmatpush1.bf16.msra.mxu0 %v7518_v57  ;;  %995 = vmatpush1.bf16.msra.mxu1 %v7520_v58 }
  0xea   : > { %923 = vmatprep.subr.bf16.mxu0 %v7511_v59  ;;  %996 = vmatprep.subr.bf16.mxu1 %v7513_v60 }
  0xec   : > { %7531 = vmatmul.mubr.msk.bf16.gmra.mxu0 %vm752_vm0, %v516_v61  ;;  %7535 = vmatmul.mubr.msk.bf16.gmra.mxu1 %vm752_vm0, %v516_v61 }
  0xed   : > { %817 = vmatprep.mubr.bf16.mxu0 %v8776_v9  ;;  %890 = vmatprep.mubr.bf16.mxu1 %v8776_v9 }
  0xee   : > { %924 = vmatpush1.bf16.msra.mxu0 %v7510_v3  ;;  %997 = vmatpush1.bf16.msra.mxu1 %v7512_v4 }
  0xef   : > { %925 = vmatprep.subr.bf16.mxu0 %v7503_v5  ;;  %998 = vmatprep.subr.bf16.mxu1 %v7505_v6 }
  0xf2   : > { %926 = vmatpush1.bf16.msra.mxu0 %v7502_v10  ;;  %999 = vmatpush1.bf16.msra.mxu1 %v7504_v11 }
  0xf4   : > { %7532 = vmatmul.mubr.msk.bf16.gmra.mxu0 %vm752_vm0, %v517_v12  ;;  %7536 = vmatmul.mubr.msk.bf16.gmra.mxu1 %vm752_vm0, %v517_v12 }
  0xf5   : > { %827 = vmatprep.mubr.bf16.mxu0 %v8776_v9  ;;  %900 = vmatprep.mubr.bf16.mxu1 %v8776_v9 }
  0xfc   : > { %7533 = vmatmul.mubr.msk.bf16.gmra.mxu0 %vm752_vm0, %v518_v15  ;;  %7537 = vmatmul.mubr.msk.bf16.gmra.mxu1 %vm752_vm0, %v518_v15 }
  0xfd   : > { %943 = vmatprep.mubr.bf16.mxu0 %v8776_v9  ;;  %1016 = vmatprep.mubr.bf16.mxu1 %v8776_v9 }
 0x104   : > { %7538 = vmatmul.mubr.msk.bf16.vlgmr.msra.gmra.mxu0 %vm752_vm0, %v9176_v42  ;;  %7542 = vmatmul.mubr.msk.bf16.vlgmr.msra.gmra.mxu1 %vm752_vm0, %v9176_v42 }
 0x105   : > { %953 = vmatprep.mubr.bf16.mxu0 %v8776_v9  ;;  %1026 = vmatprep.mubr.bf16.mxu1 %v8776_v9 }
 0x10c   : > { %7539 = vmatmul.mubr.msk.bf16.gmra.mxu0 %vm752_vm0, %v516_v61  ;;  %7543 = vmatmul.mubr.msk.bf16.gmra.mxu1 %vm752_vm0, %v516_v61 }
 0x10d   : > { %963 = vmatprep.mubr.bf16.mxu0 %v8776_v9  ;;  %1036 = vmatprep.mubr.bf16.mxu1 %v8776_v9 }
 0x114   : > { %7540 = vmatmul.mubr.msk.bf16.gmra.mxu0 %vm752_vm0, %v517_v12  ;;  %7544 = vmatmul.mubr.msk.bf16.gmra.mxu1 %vm752_vm0, %v517_v12 }
 0x115   : > { %973 = vmatprep.mubr.bf16.mxu0 %v8776_v9  ;;  %1046 = vmatprep.mubr.bf16.mxu1 %v8776_v9  ;;  %v9234_v9 = vrot.slane %v9144_v0, %v562_v19 }
 0x11c   : > { %7541 = vmatmul.mubr.msk.bf16.gmra.mxu0 %vm752_vm0, %v518_v15  ;;  %7545 = vmatmul.mubr.msk.bf16.gmra.mxu1 %vm752_vm0, %v518_v15 }
 0x1a4   : > { %v799_v24 = vpop.f32.mrf.mxu0  ;;  %v872_v27 = vpop.f32.mrf.mxu1 }
 0x1a5   : > { %v800_v26 = vadd.f32 %v799_v24, %v9231_v22  ;;  %v873_v28 = vadd.f32 %v872_v27, %v9234_v9  ;;  %v582_v27 = vsub.s32 7, %v9224_v17  ;;  %v9284_v17 = vrot.slane %v9144_v0, %v574_v21 }
 0x1a6   : > { %v801_v29 = vpop.f32.mrf.mxu0  ;;  %v874_v31 = vpop.f32.mrf.mxu1 }
 0x1a7   : > { %1057 = vst [vmem:[#allocation2 + $0xb0] sm:$0xff] %v800_v26  ;;  %v802_v30 = vadd.f32 %v801_v29, %v9237_v23  ;;  %1059 = vst [vmem:[#allocation2 + $0xd8] sm:$0xff] %v873_v28  ;;  %v875_v32 = vadd.f32 %v874_v31, %v9240_v25 }
 0x1a8   : > { %v803_v33 = vpop.f32.mrf.mxu0  ;;  %v876_v35 = vpop.f32.mrf.mxu1 }
 0x1a9   : > { %1058 = vst [vmem:[#allocation2 + $0x1b0] sm:$0xff] %v802_v30  ;;  %v804_v34 = vadd.f32 %v803_v33, %v9231_v22  ;;  %1060 = vst [vmem:[#allocation2 + $0x18] sm:$0xff] %v875_v32  ;;  %v877_v36 = vadd.f32 %v876_v35, %v9234_v9  ;;  %v9276_v30 = vrot.slane %v9144_v0, %v570_v14 }
 0x1aa   : > { %v805_v37 = vpop.f32.mrf.mxu0  ;;  %v878_v39 = vpop.f32.mrf.mxu1  ;;  %v9280_v33 = vrot.slane %v9144_v0, %v578_v18 }
 0x1ab   : > { %1065 = vst [vmem:[#allocation2 + $0x180] sm:$0xff] %v804_v34  ;;  %v806_v38 = vadd.f32 %v805_v37, %v9237_v23  ;;  %1067 = vst [vmem:[#allocation2 + $0x118] sm:$0xff] %v877_v36  ;;  %v879_v40 = vadd.f32 %v878_v39, %v9240_v25  ;;  %v9288_v37 = vrot.slane %v9144_v0, %v582_v27 }
 0x1ac   : > { %v809_v41 = vpop.f32.mrf.mxu0  ;;  %v882_v43 = vpop.f32.mrf.mxu1 }
 0x1ad   : > { %1066 = vst [vmem:[#allocation2 + $0x110] sm:$0xff] %v806_v38  ;;  %v810_v42 = vadd.f32 %v809_v41, %v9231_v22  ;;  %1068 = vst [vmem:[#allocation2 + $0x98] sm:$0xff] %v879_v40  ;;  %v883_v44 = vadd.f32 %v882_v43, %v9234_v9 }
 0x1ae   : > { %v811_v45 = vpop.f32.mrf.mxu0  ;;  %v884_v47 = vpop.f32.mrf.mxu1 }
 0x1af   : > { %1073 = vst [vmem:[#allocation2 + $0xe0] sm:$0xff] %v810_v42  ;;  %v812_v46 = vadd.f32 %v811_v45, %v9237_v23  ;;  %1075 = vst [vmem:[#allocation2 + $0x138] sm:$0xff] %v883_v44  ;;  %v885_v48 = vadd.f32 %v884_v47, %v9240_v25 }
 0x1b0   : > { %v813_v49 = vpop.f32.mrf.mxu0  ;;  %v886_v51 = vpop.f32.mrf.mxu1 }
 0x1b1   : > { %1074 = vst [vmem:[#allocation2 + $0x188] sm:$0xff] %v812_v46  ;;  %v814_v50 = vadd.f32 %v813_v49, %v9231_v22  ;;  %1076 = vst [vmem:[#allocation2 + $0x140] sm:$0xff] %v885_v48  ;;  %v887_v52 = vadd.f32 %v886_v51, %v9234_v9 }
 0x1b2   : > { %v815_v53 = vpop.f32.mrf.mxu0  ;;  %v888_v55 = vpop.f32.mrf.mxu1 }
 0x1b3   : > { %1081 = vst [vmem:[#allocation2 + $0x1e8] sm:$0xff] %v814_v50  ;;  %v816_v54 = vadd.f32 %v815_v53, %v9237_v23  ;;  %1083 = vst [vmem:[#allocation2 + $0x160] sm:$0xff] %v887_v52  ;;  %v889_v56 = vadd.f32 %v888_v55, %v9240_v25 }
 0x1b4   : > { %v819_v57 = vpop.f32.mrf.mxu0  ;;  %v892_v59 = vpop.f32.mrf.mxu1 }
 0x1b5   : > { %1082 = vst [vmem:[#allocation2 + $0xf8] sm:$0xff] %v816_v54  ;;  %v820_v58 = vadd.f32 %v819_v57, %v9231_v22  ;;  %1084 = vst [vmem:[#allocation2 + $0x30] sm:$0xff] %v889_v56  ;;  %v893_v60 = vadd.f32 %v892_v59, %v9234_v9 }
 0x1b6   : > { %v821_v61 = vpop.f32.mrf.mxu0  ;;  %v894_v63 = vpop.f32.mrf.mxu1 }
 0x1b7   : > { %1089 = vst [vmem:[#allocation2 + $0x148] sm:$0xff] %v820_v58  ;;  %v822_v62 = vadd.f32 %v821_v61, %v9237_v23  ;;  %1091 = vst [vmem:[#allocation2 + $0x100] sm:$0xff] %v893_v60  ;;  %v895_v1 = vadd.f32 %v894_v63, %v9240_v25 }
 0x1b8   : > { %v823_v2 = vpop.f32.mrf.mxu0  ;;  %v896_v4 = vpop.f32.mrf.mxu1 }
 0x1b9   : > { %1090 = vst [vmem:[#allocation2 + $0x1d0] sm:$0xff] %v822_v62  ;;  %v824_v3 = vadd.f32 %v823_v2, %v9231_v22  ;;  %1092 = vst [vmem:[#allocation2 + $0xc8] sm:$0xff] %v895_v1  ;;  %v897_v5 = vadd.f32 %v896_v4, %v9234_v9 }
 0x1ba   : > { %v825_v6 = vpop.f32.mrf.mxu0  ;;  %v898_v8 = vpop.f32.mrf.mxu1 }
 0x1bb   : > { %1097 = vst [vmem:[#allocation2 + $0x1a0] sm:$0xff] %v824_v3  ;;  %v826_v7 = vadd.f32 %v825_v6, %v9237_v23  ;;  %1099 = vst [vmem:[#allocation2 + $0xe8] sm:$0xff] %v897_v5  ;;  %v899_v10 = vadd.f32 %v898_v8, %v9240_v25 }
 0x1bc   : > { %v829_v11 = vpop.f32.mrf.mxu0  ;;  %v902_v13 = vpop.f32.mrf.mxu1 }
 0x1bd   : > { %1098 = vst [vmem:[#allocation2 + $0x1f0] sm:$0xff] %v826_v7  ;;  %v830_v12 = vadd.f32 %v829_v11, %v9231_v22  ;;  %1100 = vst [vmem:[#allocation2 + $0x78] sm:$0xff] %v899_v10  ;;  %v903_v15 = vadd.f32 %v902_v13, %v9234_v9 }
 0x1be   : > { %v831_v16 = vpop.f32.mrf.mxu0  ;;  %v904_v20 = vpop.f32.mrf.mxu1 }
 0x1bf   : > { %1105 = vst [vmem:[#allocation2 + $0xb8] sm:$0xff] %v830_v12  ;;  %v832_v19 = vadd.f32 %v831_v16, %v9237_v23  ;;  %1107 = vst [vmem:[#allocation2 + $0xa8] sm:$0xff] %v903_v15  ;;  %v905_v24 = vadd.f32 %v904_v20, %v9240_v25 }
 0x1c0   : > { %v833_v26 = vpop.f32.mrf.mxu0  ;;  %v906_v29 = vpop.f32.mrf.mxu1 }
 0x1c1   : > { %1106 = vst [vmem:[#allocation2 + $0x88] sm:$0xff] %v832_v19  ;;  %v834_v28 = vadd.f32 %v833_v26, %v9231_v22  ;;  %1108 = vst [vmem:[#allocation2 + $0x1c8] sm:$0xff] %v905_v24  ;;  %v907_v31 = vadd.f32 %v906_v29, %v9234_v9 }
 0x1c2   : > { %v835_v32 = vpop.f32.mrf.mxu0  ;;  %v908_v35 = vpop.f32.mrf.mxu1 }
 0x1c3   : > { %1113 = vst [vmem:[#allocation2 + $0x198] sm:$0xff] %v834_v28  ;;  %v836_v34 = vadd.f32 %v835_v32, %v9237_v23  ;;  %1115 = vst [vmem:[#allocation2 + $0xc0] sm:$0xff] %v907_v31  ;;  %v909_v22 = vadd.f32 %v908_v35, %v9240_v25 }
 0x1c4   : > { %v945_v36 = vpop.f32.mrf.mxu0  ;;  %v1018_v38 = vpop.f32.mrf.mxu1 }
 0x1c5   : > { %1114 = vst [vmem:[#allocation2 + $0x38] sm:$0xff] %v836_v34  ;;  %v946_v9 = vadd.f32 %v945_v36, %v9276_v30  ;;  %1116 = vst [vmem:[#allocation2 + $0x1c0] sm:$0xff] %v909_v22  ;;  %v1019_v39 = vadd.f32 %v1018_v38, %v9280_v33 }
 0x1c6   : > { %v947_v40 = vpop.f32.mrf.mxu0  ;;  %v1020_v41 = vpop.f32.mrf.mxu1 }
 0x1c7   : > { %1061 = vst [vmem:[#allocation2 + $0x50] sm:$0xff] %v946_v9  ;;  %v948_v23 = vadd.f32 %v947_v40, %v9284_v17  ;;  %1063 = vst [vmem:[#allocation2 + $0x130] sm:$0xff] %v1019_v39  ;;  %v1021_v42 = vadd.f32 %v1020_v41, %v9288_v37 }
 0x1c8   : > { %v949_v25 = vpop.f32.mrf.mxu0  ;;  %v1022_v44 = vpop.f32.mrf.mxu1 }
 0x1c9   : > { %1062 = vst [vmem:[#allocation2 + $0x168] sm:$0xff] %v948_v23  ;;  %v950_v43 = vadd.f32 %v949_v25, %v9276_v30  ;;  %1064 = vst [vmem:[#allocation2 + $0x48] sm:$0xff] %v1021_v42  ;;  %v1023_v45 = vadd.f32 %v1022_v44, %v9280_v33 }
 0x1ca   : > { %v951_v46 = vpop.f32.mrf.mxu0  ;;  %v1024_v48 = vpop.f32.mrf.mxu1 }
 0x1cb   : > { %1069 = vst [vmem:[#allocation2 + $0x120] sm:$0xff] %v950_v43  ;;  %v952_v47 = vadd.f32 %v951_v46, %v9284_v17  ;;  %1071 = vst [vmem:[#allocation2 + $0x108] sm:$0xff] %v1023_v45  ;;  %v1025_v49 = vadd.f32 %v1024_v48, %v9288_v37 }
 0x1cc   : > { %v955_v50 = vpop.f32.mrf.mxu0  ;;  %v1028_v52 = vpop.f32.mrf.mxu1 }
 0x1cd   : > { %1070 = vst [vmem:[#allocation2 + $0x150] sm:$0xff] %v952_v47  ;;  %v956_v51 = vadd.f32 %v955_v50, %v9276_v30  ;;  %1072 = vst [vmem:[#allocation2 + $0x60] sm:$0xff] %v1025_v49  ;;  %v1029_v53 = vadd.f32 %v1028_v52, %v9280_v33 }
 0x1ce   : > { %v957_v54 = vpop.f32.mrf.mxu0  ;;  %v1030_v56 = vpop.f32.mrf.mxu1 }
 0x1cf   : > { %1077 = vst [vmem:[#allocation2 + $0x80] sm:$0xff] %v956_v51  ;;  %v958_v55 = vadd.f32 %v957_v54, %v9284_v17  ;;  %1079 = vst [vmem:[#allocation2 + $0x1b8] sm:$0xff] %v1029_v53  ;;  %v1031_v57 = vadd.f32 %v1030_v56, %v9288_v37 }
 0x1d0   : > { %v959_v58 = vpop.f32.mrf.mxu0  ;;  %v1032_v60 = vpop.f32.mrf.mxu1 }
 0x1d1   : > { %1078 = vst [vmem:[#allocation2 + $0x1a8] sm:$0xff] %v958_v55  ;;  %v960_v59 = vadd.f32 %v959_v58, %v9276_v30  ;;  %1080 = vst [vmem:[#allocation2 + $0x28] sm:$0xff] %v1031_v57  ;;  %v1033_v61 = vadd.f32 %v1032_v60, %v9280_v33 }
 0x1d2   : > { %v961_v62 = vpop.f32.mrf.mxu0  ;;  %v1034_v1 = vpop.f32.mrf.mxu1 }
 0x1d3   : > { %1085 = vst [vmem:[#allocation2 + $0x1e0] sm:$0xff] %v960_v59  ;;  %v962_v63 = vadd.f32 %v961_v62, %v9284_v17  ;;  %1087 = vst [vmem:[#allocation2 + $0xf0] sm:$0xff] %v1033_v61  ;;  %v1035_v2 = vadd.f32 %v1034_v1, %v9288_v37 }
 0x1d4   : > { %v965_v3 = vpop.f32.mrf.mxu0  ;;  %v1038_v5 = vpop.f32.mrf.mxu1 }
 0x1d5   : > { %1086 = vst [vmem:[#allocation2] sm:$0xff] %v962_v63  ;;  %v966_v4 = vadd.f32 %v965_v3, %v9276_v30  ;;  %1088 = vst [vmem:[#allocation2 + $0x8] sm:$0xff] %v1035_v2  ;;  %v1039_v6 = vadd.f32 %v1038_v5, %v9280_v33 }
 0x1d6   : > { %v967_v7 = vpop.f32.mrf.mxu0  ;;  %v1040_v10 = vpop.f32.mrf.mxu1 }
 0x1d7   : > { %1093 = vst [vmem:[#allocation2 + $0x40] sm:$0xff] %v966_v4  ;;  %v968_v8 = vadd.f32 %v967_v7, %v9284_v17  ;;  %1095 = vst [vmem:[#allocation2 + $0x20] sm:$0xff] %v1039_v6  ;;  %v1041_v11 = vadd.f32 %v1040_v10, %v9288_v37 }
 0x1d8   : > { %v969_v12 = vpop.f32.mrf.mxu0  ;;  %v1042_v14 = vpop.f32.mrf.mxu1 }
 0x1d9   : > { %1094 = vst [vmem:[#allocation2 + $0x1f8] sm:$0xff] %v968_v8  ;;  %v970_v13 = vadd.f32 %v969_v12, %v9276_v30  ;;  %1096 = vst [vmem:[#allocation2 + $0x128] sm:$0xff] %v1041_v11  ;;  %v1043_v15 = vadd.f32 %v1042_v14, %v9280_v33 }
 0x1da   : > { %v971_v16 = vpop.f32.mrf.mxu0  ;;  %v1044_v19 = vpop.f32.mrf.mxu1 }
 0x1db   : > { %1101 = vst [vmem:[#allocation2 + $0x70] sm:$0xff] %v970_v13  ;;  %v972_v18 = vadd.f32 %v971_v16, %v9284_v17  ;;  %1103 = vst [vmem:[#allocation2 + $0x1d8] sm:$0xff] %v1043_v15  ;;  %v1045_v20 = vadd.f32 %v1044_v19, %v9288_v37 }
 0x1dc   : > { %v975_v21 = vpop.f32.mrf.mxu0  ;;  %v1048_v26 = vpop.f32.mrf.mxu1 }
 0x1dd   : > { %1102 = vst [vmem:[#allocation2 + $0x90] sm:$0xff] %v972_v18  ;;  %v976_v24 = vadd.f32 %v975_v21, %v9276_v30  ;;  %1104 = vst [vmem:[#allocation2 + $0xd0] sm:$0xff] %v1045_v20  ;;  %v1049_v27 = vadd.f32 %v1048_v26, %v9280_v33 }
 0x1de   : > { %v977_v28 = vpop.f32.mrf.mxu0  ;;  %v1050_v31 = vpop.f32.mrf.mxu1 }
 0x1df   : > { %1109 = vst [vmem:[#allocation2 + $0x170] sm:$0xff] %v976_v24  ;;  %v978_v29 = vadd.f32 %v977_v28, %v9284_v17  ;;  %1111 = vst [vmem:[#allocation2 + $0x68] sm:$0xff] %v1049_v27  ;;  %v1051_v32 = vadd.f32 %v1050_v31, %v9288_v37 }
 0x1e0   : > { %v979_v34 = vpop.f32.mrf.mxu0  ;;  %v1052_v22 = vpop.f32.mrf.mxu1 }
 0x1e1   : > { %1110 = vst [vmem:[#allocation2 + $0x178] sm:$0xff] %v978_v29  ;;  %v980_v35 = vadd.f32 %v979_v34, %v9276_v30  ;;  %1112 = vst [vmem:[#allocation2 + $0x190] sm:$0xff] %v1051_v32  ;;  %v1053_v36 = vadd.f32 %v1052_v22, %v9280_v33 }
 0x1e2   : > { %v981_v9 = vpop.f32.mrf.mxu0  ;;  %v1054_v39 = vpop.f32.mrf.mxu1 }
 0x1e3   : > { %1117 = vst [vmem:[#allocation2 + $0x158] sm:$0xff] %v980_v35  ;;  %v982_v38 = vadd.f32 %v981_v9, %v9284_v17  ;;  %1119 = vst [vmem:[#allocation2 + $0x58] sm:$0xff] %v1053_v36  ;;  %v1055_v40 = vadd.f32 %v1054_v39, %v9288_v37 }
 0x1e5   : > { %1118 = vst [vmem:[#allocation2 + $0x10] sm:$0xff] %v982_v38  ;;  %1120 = vst [vmem:[#allocation2 + $0xa0] sm:$0xff] %v1055_v40 }
 0x1e6 PF: > { %p11177_p1 = scmp.eq.s32.totalorder %s8966_s24, 0 }
 0x1e8   : > { %1124 = sbr.rel (%p11177_p1) target bundleno = 851 (0x353), region = 76 }
 0x1ed   : > { %v1205_v30 = vld [vmem:[%s9132_s3 + $0x1c0] sm:$0xff]  ;;  %v1206_v17 = vld [vmem:[%s9132_s3 + $0x1c8] sm:$0xff]  ;;  %v1126_v31 = vld [vmem:[#allocation3 + $0x50] sm:$0xff] }
 0x1ee   : > { %v1209_v33 = vld [vmem:[%s9132_s3 + $0x1e0] sm:$0xff]  ;;  %v1210_v23 = vld [vmem:[%s9132_s3 + $0x1e8] sm:$0xff] }
 0x1ef   : > { %v7604_v37 = vcombine.high %v1205_v30, %v1209_v33  ;;  %v7603_v41 = vcombine.low %v1205_v30, %v1209_v33  ;;  %v1197_v42 = vld [vmem:[%s9132_s3 + $0x180] sm:$0xff]  ;;  %v7606_v43 = vcombine.high %v1206_v17, %v1210_v23  ;;  %v7605_v44 = vcombine.low %v1206_v17, %v1210_v23  ;;  %v1198_v46 = vld [vmem:[%s9132_s3 + $0x188] sm:$0xff] }
 0x1f0   : > { %v1201_v25 = vld [vmem:[%s9132_s3 + $0x1a0] sm:$0xff]  ;;  %v1202_v47 = vld [vmem:[%s9132_s3 + $0x1a8] sm:$0xff] }
 0x1f1   : > { %v7596_v45 = vcombine.high %v1197_v42, %v1201_v25  ;;  %v1189_v48 = vld [vmem:[%s9132_s3 + $0x140] sm:$0xff]  ;;  %1958 = vmatprep.subr.bf16.mxu0 %v7604_v37  ;;  %v7598_v49 = vcombine.high %v1198_v46, %v1202_v47  ;;  %v1190_v51 = vld [vmem:[%s9132_s3 + $0x148] sm:$0xff]  ;;  %2031 = vmatprep.subr.bf16.mxu1 %v7606_v43  ;;  %v7595_v53 = vcombine.low %v1197_v42, %v1201_v25 }
 0x1f2   : > { %v1193_v50 = vld [vmem:[%s9132_s3 + $0x160] sm:$0xff]  ;;  %v1194_v52 = vld [vmem:[%s9132_s3 + $0x168] sm:$0xff]  ;;  %1959 = vmatpush1.bf16.msra.mxu0 %v7603_v41  ;;  %2032 = vmatpush1.bf16.msra.mxu1 %v7605_v44  ;;  %v7597_v54 = vcombine.low %v1198_v46, %v1202_v47 }
 0x1f3   : > { %1960 = vmatprep.subr.bf16.mxu0 %v7596_v45  ;;  %v7588_v55 = vcombine.high %v1189_v48, %v1193_v50  ;;  %2033 = vmatprep.subr.bf16.mxu1 %v7598_v49  ;;  %v7590_v56 = vcombine.high %v1190_v51, %v1194_v52  ;;  %v1181_v57 = vld [vmem:[%s9132_s3 + $0x100] sm:$0xff]  ;;  %v1182_v59 = vld [vmem:[%s9132_s3 + $0x108] sm:$0xff]  ;;  %v7587_v61 = vcombine.low %v1189_v48, %v1193_v50 }
 0x1f4   : > { %v1185_v58 = vld [vmem:[%s9132_s3 + $0x120] sm:$0xff]  ;;  %v1186_v60 = vld [vmem:[%s9132_s3 + $0x128] sm:$0xff]  ;;  %v7589_v62 = vcombine.low %v1190_v51, %v1194_v52 }
 0x1f5   : > { %v7580_v63 = vcombine.high %v1181_v57, %v1185_v58  ;;  %v7582_v1 = vcombine.high %v1182_v59, %v1186_v60  ;;  %v1173_v2 = vld [vmem:[%s9132_s3 + $0xc0] sm:$0xff]  ;;  %v1174_v4 = vld [vmem:[%s9132_s3 + $0xc8] sm:$0xff]  ;;  %v7579_v6 = vcombine.low %v1181_v57, %v1185_v58  ;;  %v7581_v7 = vcombine.low %v1182_v59, %v1186_v60 }
 0x1f6   : > { %1961 = vmatpush1.bf16.msra.mxu0 %v7595_v53  ;;  %2034 = vmatpush1.bf16.msra.mxu1 %v7597_v54  ;;  %v1177_v3 = vld [vmem:[%s9132_s3 + $0xe0] sm:$0xff]  ;;  %v1178_v5 = vld [vmem:[%s9132_s3 + $0xe8] sm:$0xff] }
 0x1f7   : > { %1962 = vmatprep.subr.bf16.mxu0 %v7588_v55  ;;  %2035 = vmatprep.subr.bf16.mxu1 %v7590_v56  ;;  %v7572_v8 = vcombine.high %v1173_v2, %v1177_v3  ;;  %v7574_v10 = vcombine.high %v1174_v4, %v1178_v5  ;;  %v1165_v11 = vld [vmem:[%s9132_s3 + $0x80] sm:$0xff]  ;;  %v1166_v13 = vld [vmem:[%s9132_s3 + $0x88] sm:$0xff]  ;;  %v7571_v15 = vcombine.low %v1173_v2, %v1177_v3 }
 0x1f8   : > { %v1169_v12 = vld [vmem:[%s9132_s3 + $0xa0] sm:$0xff]  ;;  %v1170_v14 = vld [vmem:[%s9132_s3 + $0xa8] sm:$0xff]  ;;  %v7573_v16 = vcombine.low %v1174_v4, %v1178_v5 }
 0x1f9   : > { %v7564_v18 = vcombine.high %v1165_v11, %v1169_v12  ;;  %v7566_v19 = vcombine.high %v1166_v13, %v1170_v14  ;;  %v1157_v20 = vld [vmem:[%s9132_s3 + $0x40] sm:$0xff]  ;;  %v1158_v24 = vld [vmem:[%s9132_s3 + $0x48] sm:$0xff]  ;;  %v7563_v27 = vcombine.low %v1165_v11, %v1169_v12  ;;  %v7565_v28 = vcombine.low %v1166_v13, %v1170_v14 }
 0x1fa   : > { %1963 = vmatpush1.bf16.msra.mxu0 %v7587_v61  ;;  %2036 = vmatpush1.bf16.msra.mxu1 %v7589_v62  ;;  %v1161_v21 = vld [vmem:[%s9132_s3 + $0x60] sm:$0xff]  ;;  %v1162_v26 = vld [vmem:[%s9132_s3 + $0x68] sm:$0xff] }
 0x1fb   : > { %1964 = vmatprep.subr.bf16.mxu0 %v7580_v63  ;;  %2037 = vmatprep.subr.bf16.mxu1 %v7582_v1  ;;  %v7556_v29 = vcombine.high %v1157_v20, %v1161_v21  ;;  %v1128_v32 = vld [vmem:[#allocation3 + $0x60] sm:$0xff]  ;;  %v7558_v34 = vcombine.high %v1158_v24, %v1162_v26  ;;  %v1150_v9 = vld [vmem:[%s9132_s3 + $0x8] sm:$0xff]  ;;  %v7555_v39 = vcombine.low %v1157_v20, %v1161_v21 }
 0x1fc   : > { %v1149_v35 = vld [vmem:[%s9132_s3] sm:$0xff]  ;;  %v9354_v36 = vpack.c.bf16 %v1128_v32, %v1126_v31  ;;  %v1154_v38 = vld [vmem:[%s9132_s3 + $0x28] sm:$0xff]  ;;  %v7557_v40 = vcombine.low %v1158_v24, %v1162_v26 }
 0x1fd   : > { %v1153_v22 = vld [vmem:[%s9132_s3 + $0x20] sm:$0xff]  ;;  %v7550_v33 = vcombine.high %v1150_v9, %v1154_v38  ;;  %v1270_v23 = vld [vmem:[%s9132_s3 + $0x3c8] sm:$0xff]  ;;  %v7549_v25 = vcombine.low %v1150_v9, %v1154_v38 }
 0x1fe   : > { %1965 = vmatpush1.bf16.msra.mxu0 %v7579_v6  ;;  %2038 = vmatpush1.bf16.msra.mxu1 %v7581_v7  ;;  %v7548_v30 = vcombine.high %v1149_v35, %v1153_v22  ;;  %v1269_v17 = vld [vmem:[%s9132_s3 + $0x3c0] sm:$0xff]  ;;  %v1274_v41 = vld [vmem:[%s9132_s3 + $0x3e8] sm:$0xff]  ;;  %v7547_v42 = vcombine.low %v1149_v35, %v1153_v22 }
 0x1ff   : > { %1966 = vmatprep.subr.bf16.mxu0 %v7572_v8  ;;  %2039 = vmatprep.subr.bf16.mxu1 %v7574_v10  ;;  %v1273_v37 = vld [vmem:[%s9132_s3 + $0x3e0] sm:$0xff]  ;;  %v7670_v44 = vcombine.high %v1270_v23, %v1274_v41  ;;  %v1262_v47 = vld [vmem:[%s9132_s3 + $0x388] sm:$0xff]  ;;  %v7669_v50 = vcombine.low %v1270_v23, %v1274_v41  ;;  %v1207_v23 = vld [vmem:[%s9132_s3 + $0x1d0] sm:$0xff] }
 0x200   : > { %1990 = vmatprep.mubr.bf16.mxu0 %v9354_v36  ;;  %2063 = vmatprep.mubr.bf16.mxu1 %v9354_v36  ;;  %v7668_v43 = vcombine.high %v1269_v17, %v1273_v37  ;;  %v1261_v45 = vld [vmem:[%s9132_s3 + $0x380] sm:$0xff]  ;;  %v1266_v48 = vld [vmem:[%s9132_s3 + $0x3a8] sm:$0xff]  ;;  %v7667_v49 = vcombine.low %v1269_v17, %v1273_v37  ;;  %v1211_v41 = vld [vmem:[%s9132_s3 + $0x1f0] sm:$0xff] }
 0x201   : > { %v1265_v46 = vld [vmem:[%s9132_s3 + $0x3a0] sm:$0xff]  ;;  %v7662_v52 = vcombine.high %v1262_v47, %v1266_v48  ;;  %v1254_v55 = vld [vmem:[%s9132_s3 + $0x348] sm:$0xff]  ;;  %v7661_v58 = vcombine.low %v1262_v47, %v1266_v48  ;;  %v7608_v47 = vcombine.high %v1207_v23, %v1211_v41 }
 0x202   : > { %1967 = vmatpush1.bf16.msra.mxu0 %v7571_v15  ;;  %2040 = vmatpush1.bf16.msra.mxu1 %v7573_v16  ;;  %v7660_v51 = vcombine.high %v1261_v45, %v1265_v46  ;;  %v1253_v53 = vld [vmem:[%s9132_s3 + $0x340] sm:$0xff]  ;;  %v1258_v56 = vld [vmem:[%s9132_s3 + $0x368] sm:$0xff]  ;;  %v7659_v57 = vcombine.low %v1261_v45, %v1265_v46  ;;  %v1127_v45 = vld [vmem:[#allocation3 + $0x70] sm:$0xff] }
 0x203   : > { %1968 = vmatprep.subr.bf16.mxu0 %v7564_v18  ;;  %2041 = vmatprep.subr.bf16.mxu1 %v7566_v19  ;;  %v1257_v54 = vld [vmem:[%s9132_s3 + $0x360] sm:$0xff]  ;;  %v7654_v60 = vcombine.high %v1254_v55, %v1258_v56  ;;  %v1246_v63 = vld [vmem:[%s9132_s3 + $0x308] sm:$0xff]  ;;  %v7653_v3 = vcombine.low %v1254_v55, %v1258_v56  ;;  %v1132_v55 = vld [vmem:[#allocation3 + $0x30] sm:$0xff]  ;;  %v7607_v56 = vcombine.low %v1207_v23, %v1211_v41 }
 0x204   : > { %v7652_v59 = vcombine.high %v1253_v53, %v1257_v54  ;;  %v1245_v61 = vld [vmem:[%s9132_s3 + $0x300] sm:$0xff]  ;;  %v1250_v1 = vld [vmem:[%s9132_s3 + $0x328] sm:$0xff]  ;;  %v7651_v2 = vcombine.low %v1253_v53, %v1257_v54  ;;  %v1204_v53 = vld [vmem:[%s9132_s3 + $0x1b8] sm:$0xff] }
 0x205   : > { %v1249_v62 = vld [vmem:[%s9132_s3 + $0x320] sm:$0xff]  ;;  %v7646_v5 = vcombine.high %v1246_v63, %v1250_v1  ;;  %v1238_v8 = vld [vmem:[%s9132_s3 + $0x2c8] sm:$0xff]  ;;  %v7645_v12 = vcombine.low %v1246_v63, %v1250_v1  ;;  %v1130_v54 = vld [vmem:[#allocation3 + $0x58] sm:$0xff] }
 0x206   : > { %1969 = vmatpush1.bf16.msra.mxu0 %v7563_v27  ;;  %2042 = vmatpush1.bf16.msra.mxu1 %v7565_v28  ;;  %v7644_v4 = vcombine.high %v1245_v61, %v1249_v62  ;;  %v1237_v6 = vld [vmem:[%s9132_s3 + $0x2c0] sm:$0xff]  ;;  %v1242_v10 = vld [vmem:[%s9132_s3 + $0x2e8] sm:$0xff]  ;;  %v7643_v11 = vcombine.low %v1245_v61, %v1249_v62  ;;  %v1195_v61 = vld [vmem:[%s9132_s3 + $0x170] sm:$0xff]  ;;  %v9404_v62 = vpack.c.bf16 %v1132_v55, %v1130_v54 }
 0x207   : > { %1970 = vmatprep.subr.bf16.mxu0 %v7556_v29  ;;  %2043 = vmatprep.subr.bf16.mxu1 %v7558_v34  ;;  %v1241_v7 = vld [vmem:[%s9132_s3 + $0x2e0] sm:$0xff]  ;;  %v7638_v14 = vcombine.high %v1238_v8, %v1242_v10  ;;  %v1230_v18 = vld [vmem:[%s9132_s3 + $0x288] sm:$0xff]  ;;  %v7637_v21 = vcombine.low %v1238_v8, %v1242_v10  ;;  %v1192_v63 = vld [vmem:[%s9132_s3 + $0x158] sm:$0xff] }
 0x208   : > { %v7636_v13 = vcombine.high %v1237_v6, %v1241_v7  ;;  %v1229_v15 = vld [vmem:[%s9132_s3 + $0x280] sm:$0xff]  ;;  %v1234_v19 = vld [vmem:[%s9132_s3 + $0x2a8] sm:$0xff]  ;;  %v7635_v20 = vcombine.low %v1237_v6, %v1241_v7  ;;  %v1196_v1 = vld [vmem:[%s9132_s3 + $0x178] sm:$0xff] }
 0x209   : > { %v1233_v16 = vld [vmem:[%s9132_s3 + $0x2a0] sm:$0xff]  ;;  %v7630_v26 = vcombine.high %v1230_v18, %v1234_v19  ;;  %v1222_v29 = vld [vmem:[%s9132_s3 + $0x248] sm:$0xff]  ;;  %v7629_v34 = vcombine.low %v1230_v18, %v1234_v19  ;;  %v7594_v7 = vcombine.high %v1192_v63, %v1196_v1  ;;  %v1183_v8 = vld [vmem:[%s9132_s3 + $0x110] sm:$0xff]  ;;  %v7593_v18 = vcombine.low %v1192_v63, %v1196_v1 }
 0x20a   : > { %1971 = vmatpush1.bf16.msra.mxu0 %v7555_v39  ;;  %2044 = vmatpush1.bf16.msra.mxu1 %v7557_v40  ;;  %v7628_v24 = vcombine.high %v1229_v15, %v1233_v16  ;;  %v1221_v27 = vld [vmem:[%s9132_s3 + $0x240] sm:$0xff]  ;;  %v1226_v31 = vld [vmem:[%s9132_s3 + $0x268] sm:$0xff]  ;;  %v7627_v32 = vcombine.low %v1229_v15, %v1233_v16  ;;  %v1187_v10 = vld [vmem:[%s9132_s3 + $0x130] sm:$0xff] }
 0x20b   : > { %1972 = vmatprep.subr.bf16.mxu0 %v7548_v30  ;;  %2045 = vmatprep.subr.bf16.mxu1 %v7550_v33  ;;  %v1225_v28 = vld [vmem:[%s9132_s3 + $0x260] sm:$0xff]  ;;  %v7622_v22 = vcombine.high %v1222_v29, %v1226_v31  ;;  %v1214_v39 = vld [vmem:[%s9132_s3 + $0x208] sm:$0xff]  ;;  %v7621_v33 = vcombine.low %v1222_v29, %v1226_v31  ;;  %v7584_v19 = vcombine.high %v1183_v8, %v1187_v10  ;;  %v1151_v54 = vld [vmem:[%s9132_s3 + $0x10] sm:$0xff] }
 0x20c   : > { %v7620_v35 = vcombine.high %v1221_v27, %v1225_v28  ;;  %v1213_v9 = vld [vmem:[%s9132_s3 + $0x200] sm:$0xff]  ;;  %v1218_v40 = vld [vmem:[%s9132_s3 + $0x228] sm:$0xff]  ;;  %v7619_v30 = vcombine.low %v1221_v27, %v1225_v28  ;;  %v1176_v27 = vld [vmem:[%s9132_s3 + $0xd8] sm:$0xff]  ;;  %v7583_v29 = vcombine.low %v1183_v8, %v1187_v10 }
 0x20d   : > { %v1217_v38 = vld [vmem:[%s9132_s3 + $0x220] sm:$0xff]  ;;  %v7614_v37 = vcombine.high %v1214_v39, %v1218_v40  ;;  %v7613_v46 = vcombine.low %v1214_v39, %v1218_v40  ;;  %v1180_v28 = vld [vmem:[%s9132_s3 + $0xf8] sm:$0xff]  ;;  %v1133_v31 = vld [vmem:[#allocation3 + $0x48] sm:$0xff] }
 0x20e   : > { %1973 = vmatpush1.bf16.msra.mxu0 %v7547_v42  ;;  %2046 = vmatpush1.bf16.msra.mxu1 %v7549_v25  ;;  %v7612_v17 = vcombine.high %v1213_v9, %v1217_v38  ;;  %v1208_v42 = vld [vmem:[%s9132_s3 + $0x1d8] sm:$0xff]  ;;  %v1136_v15 = vld [vmem:[#allocation3 + $0x40] sm:$0xff]  ;;  %v7577_v23 = vcombine.low %v1176_v27, %v1180_v28  ;;  %v1155_v55 = vld [vmem:[%s9132_s3 + $0x30] sm:$0xff] }
 0x20f   : > { %1974 = vmatprep.subr.bf16.mxu0 %v7668_v43  ;;  %2047 = vmatprep.subr.bf16.mxu1 %v7670_v44  ;;  %v1212_v25 = vld [vmem:[%s9132_s3 + $0x1f8] sm:$0xff]  ;;  %v7611_v43 = vcombine.low %v1213_v9, %v1217_v38  ;;  %v1125_v44 = vld [vmem:[#allocation3 + $0x68] sm:$0xff]  ;;  %v1167_v9 = vld [vmem:[%s9132_s3 + $0x90] sm:$0xff] }
 0x210   : > { %v7610_v48 = vcombine.high %v1208_v42, %v1212_v25  ;;  %v1171_v38 = vld [vmem:[%s9132_s3 + $0xb0] sm:$0xff]  ;;  %v1168_v39 = vld [vmem:[%s9132_s3 + $0x98] sm:$0xff] }
 0x211   : > { %v1172_v40 = vld [vmem:[%s9132_s3 + $0xb8] sm:$0xff]  ;;  %v7568_v41 = vcombine.high %v1167_v9, %v1171_v38  ;;  %v1271_v1 = vld [vmem:[%s9132_s3 + $0x3d0] sm:$0xff] }
 0x212   : > { %1975 = vmatpush2.bf16.msra.mxu0 %v7667_v49  ;;  %2048 = vmatpush2.bf16.msra.mxu1 %v7669_v50  ;;  %v1199_v49 = vld [vmem:[%s9132_s3 + $0x190] sm:$0xff] }
 0x213   : > { %1976 = vmatprep.subr.bf16.mxu0 %v7660_v51  ;;  %2049 = vmatprep.subr.bf16.mxu1 %v7662_v52  ;;  %v1203_v50 = vld [vmem:[%s9132_s3 + $0x1b0] sm:$0xff]  ;;  %v1200_v51 = vld [vmem:[%s9132_s3 + $0x198] sm:$0xff]  ;;  %v9399_v52 = vpack.c.bf16 %v1127_v45, %v1125_v44 }
 0x214   : > { %v1160_v45 = vld [vmem:[%s9132_s3 + $0x58] sm:$0xff]  ;;  %v1263_v10 = vld [vmem:[%s9132_s3 + $0x390] sm:$0xff] }
 0x216   : > { %1977 = vmatpush2.bf16.msra.mxu0 %v7659_v57  ;;  %2050 = vmatpush2.bf16.msra.mxu1 %v7661_v58  ;;  %v7609_v57 = vcombine.low %v1208_v42, %v1212_v25  ;;  %v7600_v58 = vcombine.high %v1199_v49, %v1203_v50  ;;  %v7570_v42 = vcombine.high %v1168_v39, %v1172_v40  ;;  %v1159_v25 = vld [vmem:[%s9132_s3 + $0x50] sm:$0xff] }
 0x217   : > { %1978 = vmatprep.subr.bf16.mxu0 %v7652_v59  ;;  %2051 = vmatprep.subr.bf16.mxu1 %v7654_v60  ;;  %v7602_v59 = vcombine.high %v1200_v51, %v1204_v53  ;;  %v1191_v60 = vld [vmem:[%s9132_s3 + $0x150] sm:$0xff] }
 0x218   : > { %v7592_v6 = vcombine.high %v1191_v60, %v1195_v61  ;;  %v7591_v16 = vcombine.low %v1191_v60, %v1195_v61  ;;  %v7552_v61 = vcombine.high %v1151_v54, %v1155_v55 }
 0x21a   : > { %1979 = vmatpush2.bf16.msra.mxu0 %v7651_v2  ;;  %2052 = vmatpush2.bf16.msra.mxu1 %v7653_v3  ;;  %v7599_v2 = vcombine.low %v1199_v49, %v1203_v50  ;;  %v1129_v3 = vld [vmem:[#allocation3 + $0x8] sm:$0xff]  ;;  %v1139_v49 = vld [vmem:[#allocation3 + $0x38] sm:$0xff]  ;;  %v7569_v50 = vcombine.low %v1168_v39, %v1172_v40 }
 0x21b   : > { %1980 = vmatprep.subr.bf16.mxu0 %v7644_v4  ;;  %2053 = vmatprep.subr.bf16.mxu1 %v7646_v5  ;;  %v1131_v4 = vld [vmem:[#allocation3 + $0x18] sm:$0xff]  ;;  %v7601_v5 = vcombine.low %v1200_v51, %v1204_v53 }
 0x21e   : > { %1981 = vmatpush2.bf16.msra.mxu0 %v7643_v11  ;;  %2054 = vmatpush2.bf16.msra.mxu1 %v7645_v12  ;;  %v1184_v11 = vld [vmem:[%s9132_s3 + $0x118] sm:$0xff] }
 0x21f   : > { %1982 = vmatprep.subr.bf16.mxu0 %v7636_v13  ;;  %2055 = vmatprep.subr.bf16.mxu1 %v7638_v14  ;;  %v1188_v12 = vld [vmem:[%s9132_s3 + $0x138] sm:$0xff]  ;;  %v9416_v13 = vpack.c.bf16 %v1131_v4, %v1129_v3  ;;  %v1134_v14 = vld [vmem:[#allocation3 + $0x20] sm:$0xff] }
 0x220   : > { %v1272_v3 = vld [vmem:[%s9132_s3 + $0x3d8] sm:$0xff] }
 0x221   : > { %v1276_v4 = vld [vmem:[%s9132_s3 + $0x3f8] sm:$0xff] }
 0x222   : > { %1983 = vmatpush2.bf16.msra.mxu0 %v7635_v20  ;;  %2056 = vmatpush2.bf16.msra.mxu1 %v7637_v21  ;;  %v7586_v20 = vcombine.high %v1184_v11, %v1188_v12  ;;  %v1175_v21 = vld [vmem:[%s9132_s3 + $0xd0] sm:$0xff]  ;;  %v7674_v8 = vcombine.high %v1272_v3, %v1276_v4 }
 0x223   : > { %1984 = vmatprep.subr.bf16.mxu0 %v7628_v24  ;;  %2057 = vmatprep.subr.bf16.mxu1 %v7630_v26  ;;  %v1179_v24 = vld [vmem:[%s9132_s3 + $0xf0] sm:$0xff]  ;;  %v9420_v26 = vpack.c.bf16 %v1136_v15, %v1134_v14  ;;  %v1268_v14 = vld [vmem:[%s9132_s3 + $0x3b8] sm:$0xff] }
 0x226   : > { %1985 = vmatpush2.bf16.msra.mxu0 %v7627_v32  ;;  %2058 = vmatpush2.bf16.msra.mxu1 %v7629_v34  ;;  %v1135_v32 = vld [vmem:[#allocation3 + $0x10] sm:$0xff]  ;;  %v7585_v34 = vcombine.low %v1184_v11, %v1188_v12  ;;  %v1264_v12 = vld [vmem:[%s9132_s3 + $0x398] sm:$0xff] }
 0x227   : > { %1986 = vmatprep.subr.bf16.mxu0 %v7620_v35  ;;  %2059 = vmatprep.subr.bf16.mxu1 %v7622_v22  ;;  %v7576_v35 = vcombine.high %v1175_v21, %v1179_v24  ;;  %v7578_v22 = vcombine.high %v1176_v27, %v1180_v28  ;;  %v1267_v11 = vld [vmem:[%s9132_s3 + $0x3b0] sm:$0xff]  ;;  %v1260_v27 = vld [vmem:[%s9132_s3 + $0x378] sm:$0xff] }
 0x228   : > { %v7663_v28 = vcombine.low %v1263_v10, %v1267_v11 }
 0x22a   : > { %1987 = vmatpush2.bf16.msra.mxu0 %v7619_v30  ;;  %2060 = vmatpush2.bf16.msra.mxu1 %v7621_v33  ;;  %v9432_v30 = vpack.c.bf16 %v1135_v32, %v1133_v31  ;;  %v1138_v33 = vld [vmem:[#allocation3 + $0x78] sm:$0xff]  ;;  %v1247_v32 = vld [vmem:[%s9132_s3 + $0x310] sm:$0xff] }
 0x22b   : > { %1988 = vmatprep.subr.bf16.mxu0 %v7612_v17  ;;  %2061 = vmatprep.subr.bf16.mxu1 %v7614_v37  ;;  %v1140_v17 = vld [vmem:[#allocation3 + $0x28] sm:$0xff]  ;;  %v7575_v37 = vcombine.low %v1175_v21, %v1179_v24  ;;  %v1259_v21 = vld [vmem:[%s9132_s3 + $0x370] sm:$0xff]  ;;  %v1256_v24 = vld [vmem:[%s9132_s3 + $0x358] sm:$0xff] }
 0x22c   : > { %v9436_v44 = vpack.c.bf16 %v1140_v17, %v1138_v33  ;;  %v7658_v31 = vcombine.high %v1256_v24, %v1260_v27  ;;  %v1239_v33 = vld [vmem:[%s9132_s3 + $0x2d0] sm:$0xff] }
 0x22d   : > { %v1243_v17 = vld [vmem:[%s9132_s3 + $0x2f0] sm:$0xff] }
 0x22e   : > { %1989 = vmatpush2.bf16.msra.mxu0 %v7611_v43  ;;  %2062 = vmatpush2.bf16.msra.mxu1 %v7613_v46  ;;  %v1163_v43 = vld [vmem:[%s9132_s3 + $0x70] sm:$0xff]  ;;  %v1164_v46 = vld [vmem:[%s9132_s3 + $0x78] sm:$0xff] }
 0x22f   : > { %2104 = vmatprep.subr.bf16.mxu0 %v7608_v47  ;;  %2177 = vmatprep.subr.bf16.mxu1 %v7610_v48  ;;  %v7567_v47 = vcombine.low %v1167_v9, %v1171_v38  ;;  %v1137_v48 = vld [vmem:[#allocation3] sm:$0xff]  ;;  %v7560_v51 = vcombine.high %v1159_v25, %v1163_v43  ;;  %v7562_v53 = vcombine.high %v1160_v45, %v1164_v46 }
 0x230   : > { %v7561_v60 = vcombine.low %v1160_v45, %v1164_v46  ;;  %v7657_v38 = vcombine.low %v1256_v24, %v1260_v27  ;;  %v1231_v45 = vld [vmem:[%s9132_s3 + $0x290] sm:$0xff] }
 0x231   : > { %1991 = vmatmul.mubr.bf16.vlgmr.msra.gmra.mxu0 %v9399_v52  ;;  %2064 = vmatmul.mubr.bf16.vlgmr.msra.gmra.mxu1 %v9399_v52  ;;  %v1235_v46 = vld [vmem:[%s9132_s3 + $0x2b0] sm:$0xff] }
 0x232   : > { %2105 = vmatpush1.bf16.msra.mxu0 %v7607_v56  ;;  %2178 = vmatpush1.bf16.msra.mxu1 %v7609_v57  ;;  %v1152_v56 = vld [vmem:[%s9132_s3 + $0x18] sm:$0xff] }
 0x233   : > { %2106 = vmatprep.subr.bf16.mxu0 %v7600_v58  ;;  %2179 = vmatprep.subr.bf16.mxu1 %v7602_v59  ;;  %v1156_v57 = vld [vmem:[%s9132_s3 + $0x38] sm:$0xff]  ;;  %v9448_v58 = vpack.c.bf16 %v1139_v49, %v1137_v48  ;;  %v7559_v59 = vcombine.low %v1159_v25, %v1163_v43  ;;  %v7640_v25 = vcombine.high %v1239_v33, %v1243_v17 }
 0x234   : > { %2000 = vmatprep.mubr.bf16.mxu0 %v9404_v62  ;;  %2073 = vmatprep.mubr.bf16.mxu1 %v9404_v62  ;;  %v7554_v63 = vcombine.high %v1152_v56, %v1156_v57  ;;  %v1236_v48 = vld [vmem:[%s9132_s3 + $0x2b8] sm:$0xff]  ;;  %v7639_v49 = vcombine.low %v1239_v33, %v1243_v17 }
 0x236   : > { %2107 = vmatpush1.bf16.msra.mxu0 %v7599_v2  ;;  %2180 = vmatpush1.bf16.msra.mxu1 %v7601_v5  ;;  %v1275_v2 = vld [vmem:[%s9132_s3 + $0x3f0] sm:$0xff]  ;;  %v7551_v5 = vcombine.low %v1151_v54, %v1155_v55 }
 0x237   : > { %2108 = vmatprep.subr.bf16.mxu0 %v7592_v6  ;;  %2181 = vmatprep.subr.bf16.mxu1 %v7594_v7  ;;  %v7553_v6 = vcombine.low %v1152_v56, %v1156_v57  ;;  %v7672_v7 = vcombine.high %v1271_v1, %v1275_v2  ;;  %v7671_v15 = vcombine.low %v1271_v1, %v1275_v2  ;;  %v1223_v54 = vld [vmem:[%s9132_s3 + $0x250] sm:$0xff]  ;;  %v1224_v56 = vld [vmem:[%s9132_s3 + $0x258] sm:$0xff] }
 0x238   : > { %v1227_v55 = vld [vmem:[%s9132_s3 + $0x270] sm:$0xff]  ;;  %v1228_v57 = vld [vmem:[%s9132_s3 + $0x278] sm:$0xff] }
 0x239   : > { %2001 = vmatmul.mubr.bf16.gmra.mxu0 %v9416_v13  ;;  %2074 = vmatmul.mubr.bf16.gmra.mxu1 %v9416_v13  ;;  %v1215_v1 = vld [vmem:[%s9132_s3 + $0x210] sm:$0xff] }
 0x23a   : > { %2109 = vmatpush1.bf16.msra.mxu0 %v7591_v16  ;;  %2182 = vmatpush1.bf16.msra.mxu1 %v7593_v18  ;;  %v7673_v16 = vcombine.low %v1272_v3, %v1276_v4  ;;  %v7664_v18 = vcombine.high %v1263_v10, %v1267_v11  ;;  %v1219_v2 = vld [vmem:[%s9132_s3 + $0x230] sm:$0xff]  ;;  %v1216_v3 = vld [vmem:[%s9132_s3 + $0x218] sm:$0xff] }
 0x23b   : > { %2110 = vmatprep.subr.bf16.mxu0 %v7584_v19  ;;  %2183 = vmatprep.subr.bf16.mxu1 %v7586_v20  ;;  %v7666_v19 = vcombine.high %v1264_v12, %v1268_v14  ;;  %v1255_v20 = vld [vmem:[%s9132_s3 + $0x350] sm:$0xff]  ;;  %v1220_v4 = vld [vmem:[%s9132_s3 + $0x238] sm:$0xff]  ;;  %v7615_v10 = vcombine.low %v1215_v1, %v1219_v2 }
 0x23c   : > { %2010 = vmatprep.mubr.bf16.mxu0 %v9420_v26  ;;  %2083 = vmatprep.mubr.bf16.mxu1 %v9420_v26  ;;  %v7655_v9 = vcombine.low %v1255_v20, %v1259_v21  ;;  %v7617_v11 = vcombine.low %v1216_v3, %v1220_v4 }
 0x23e   : > { %2111 = vmatpush1.bf16.msra.mxu0 %v7583_v29  ;;  %2184 = vmatpush1.bf16.msra.mxu1 %v7585_v34  ;;  %v7656_v29 = vcombine.high %v1255_v20, %v1259_v21  ;;  %v1251_v34 = vld [vmem:[%s9132_s3 + $0x330] sm:$0xff] }
 0x23f   : > { %2112 = vmatprep.subr.bf16.mxu0 %v7576_v35  ;;  %2185 = vmatprep.subr.bf16.mxu1 %v7578_v22  ;;  %v1248_v35 = vld [vmem:[%s9132_s3 + $0x318] sm:$0xff]  ;;  %v7648_v39 = vcombine.high %v1247_v32, %v1251_v34 }
 0x240   : > { %v1252_v22 = vld [vmem:[%s9132_s3 + $0x338] sm:$0xff] }
 0x241   : > { %2011 = vmatmul.mubr.bf16.gmra.mxu0 %v9432_v30  ;;  %2084 = vmatmul.mubr.bf16.gmra.mxu1 %v9432_v30  ;;  %v7650_v40 = vcombine.high %v1248_v35, %v1252_v22 }
 0x242   : > { %2113 = vmatpush1.bf16.msra.mxu0 %v7575_v37  ;;  %2186 = vmatpush1.bf16.msra.mxu1 %v7577_v23  ;;  %v1240_v37 = vld [vmem:[%s9132_s3 + $0x2d8] sm:$0xff] }
 0x243   : > { %2114 = vmatprep.subr.bf16.mxu0 %v7568_v41  ;;  %2187 = vmatprep.subr.bf16.mxu1 %v7570_v42  ;;  %v1244_v23 = vld [vmem:[%s9132_s3 + $0x2f8] sm:$0xff]  ;;  %v7647_v41 = vcombine.low %v1247_v32, %v1251_v34  ;;  %v7649_v42 = vcombine.low %v1248_v35, %v1252_v22 }
 0x244   : > { %2020 = vmatprep.mubr.bf16.mxu0 %v9436_v44  ;;  %2093 = vmatprep.mubr.bf16.mxu1 %v9436_v44  ;;  %v7642_v43 = vcombine.high %v1240_v37, %v1244_v23 }
 0x246   : > { %2115 = vmatpush1.bf16.msra.mxu0 %v7567_v47  ;;  %2188 = vmatpush1.bf16.msra.mxu1 %v7569_v50  ;;  %v1232_v47 = vld [vmem:[%s9132_s3 + $0x298] sm:$0xff]  ;;  %v7641_v50 = vcombine.low %v1240_v37, %v1244_v23 }
 0x247   : > { %2116 = vmatprep.subr.bf16.mxu0 %v7560_v51  ;;  %2189 = vmatprep.subr.bf16.mxu1 %v7562_v53  ;;  %v7632_v51 = vcombine.high %v1231_v45, %v1235_v46  ;;  %v7634_v53 = vcombine.high %v1232_v47, %v1236_v48 }
 0x249   : > { %2021 = vmatmul.mubr.bf16.gmra.mxu0 %v9448_v58  ;;  %2094 = vmatmul.mubr.bf16.gmra.mxu1 %v9448_v58 }
 0x24a   : > { %2117 = vmatpush1.bf16.msra.mxu0 %v7559_v59  ;;  %2190 = vmatpush1.bf16.msra.mxu1 %v7561_v60  ;;  %v7631_v59 = vcombine.low %v1231_v45, %v1235_v46  ;;  %v7633_v60 = vcombine.low %v1232_v47, %v1236_v48 }
 0x24b   : > { %2118 = vmatprep.subr.bf16.mxu0 %v7552_v61  ;;  %2191 = vmatprep.subr.bf16.mxu1 %v7554_v63  ;;  %v7624_v61 = vcombine.high %v1223_v54, %v1227_v55  ;;  %v7626_v63 = vcombine.high %v1224_v56, %v1228_v57 }
 0x24c   : > { %2136 = vmatprep.mubr.bf16.mxu0 %v9354_v36  ;;  %2209 = vmatprep.mubr.bf16.mxu1 %v9354_v36  ;;  %v7665_v36 = vcombine.low %v1264_v12, %v1268_v14 }
 0x24e   : > { %2119 = vmatpush1.bf16.msra.mxu0 %v7551_v5  ;;  %2192 = vmatpush1.bf16.msra.mxu1 %v7553_v6  ;;  %v7623_v5 = vcombine.low %v1223_v54, %v1227_v55  ;;  %v7625_v6 = vcombine.low %v1224_v56, %v1228_v57 }
 0x24f   : > { %2120 = vmatprep.subr.bf16.mxu0 %v7672_v7  ;;  %2193 = vmatprep.subr.bf16.mxu1 %v7674_v8  ;;  %v7616_v7 = vcombine.high %v1215_v1, %v1219_v2  ;;  %v7618_v8 = vcombine.high %v1216_v3, %v1220_v4 }
 0x252   : > { %2121 = vmatpush2.bf16.msra.mxu0 %v7671_v15  ;;  %2194 = vmatpush2.bf16.msra.mxu1 %v7673_v16 }
 0x253   : > { %2122 = vmatprep.subr.bf16.mxu0 %v7664_v18  ;;  %2195 = vmatprep.subr.bf16.mxu1 %v7666_v19 }
 0x256   : > { %2123 = vmatpush2.bf16.msra.mxu0 %v7663_v28  ;;  %2196 = vmatpush2.bf16.msra.mxu1 %v7665_v36 }
 0x257   : > { %2124 = vmatprep.subr.bf16.mxu0 %v7656_v29  ;;  %2197 = vmatprep.subr.bf16.mxu1 %v7658_v31 }
 0x25a   : > { %2125 = vmatpush2.bf16.msra.mxu0 %v7655_v9  ;;  %2198 = vmatpush2.bf16.msra.mxu1 %v7657_v38 }
 0x25b   : > { %2126 = vmatprep.subr.bf16.mxu0 %v7648_v39  ;;  %2199 = vmatprep.subr.bf16.mxu1 %v7650_v40 }
 0x25e   : > { %2127 = vmatpush2.bf16.msra.mxu0 %v7647_v41  ;;  %2200 = vmatpush2.bf16.msra.mxu1 %v7649_v42 }
 0x25f   : > { %2128 = vmatprep.subr.bf16.mxu0 %v7640_v25  ;;  %2201 = vmatprep.subr.bf16.mxu1 %v7642_v43 }
 0x262   : > { %2129 = vmatpush2.bf16.msra.mxu0 %v7639_v49  ;;  %2202 = vmatpush2.bf16.msra.mxu1 %v7641_v50 }
 0x263   : > { %2130 = vmatprep.subr.bf16.mxu0 %v7632_v51  ;;  %2203 = vmatprep.subr.bf16.mxu1 %v7634_v53 }
 0x266   : > { %2131 = vmatpush2.bf16.msra.mxu0 %v7631_v59  ;;  %2204 = vmatpush2.bf16.msra.mxu1 %v7633_v60 }
 0x267   : > { %2132 = vmatprep.subr.bf16.mxu0 %v7624_v61  ;;  %2205 = vmatprep.subr.bf16.mxu1 %v7626_v63 }
 0x26a   : > { %2133 = vmatpush2.bf16.msra.mxu0 %v7623_v5  ;;  %2206 = vmatpush2.bf16.msra.mxu1 %v7625_v6 }
 0x26b   : > { %2134 = vmatprep.subr.bf16.mxu0 %v7616_v7  ;;  %2207 = vmatprep.subr.bf16.mxu1 %v7618_v8 }
 0x26e   : > { %2135 = vmatpush2.bf16.msra.mxu0 %v7615_v10  ;;  %2208 = vmatpush2.bf16.msra.mxu1 %v7617_v11 }
 0x271   : > { %2137 = vmatmul.mubr.bf16.vlgmr.msra.gmra.mxu0 %v9399_v52  ;;  %2210 = vmatmul.mubr.bf16.vlgmr.msra.gmra.mxu1 %v9399_v52  ;;  %v1278_v52 = vlaneseq }
 0x272   : > { %2146 = vmatprep.mubr.bf16.mxu0 %v9404_v62  ;;  %2219 = vmatprep.mubr.bf16.mxu1 %v9404_v62 }
 0x273   : > { %v9500_v62 = vshrl.u32 %v1278_v52, 7 }
 0x275   : > { %v1288_v12 = vsub.s32 2, %v9500_v62  ;;  %v1292_v14 = vsub.s32 3, %v9500_v62 }
 0x277   : > { %v9516_v16 = vrot.slane %v9144_v0, %v1292_v14 }
 0x279   : > { %2147 = vmatmul.mubr.bf16.gmra.mxu0 %v9416_v13  ;;  %2220 = vmatmul.mubr.bf16.gmra.mxu1 %v9416_v13  ;;  %v1280_v13 = vsub.s32 0, %v9500_v62 }
 0x27a   : > { %2156 = vmatprep.mubr.bf16.mxu0 %v9420_v26  ;;  %2229 = vmatprep.mubr.bf16.mxu1 %v9420_v26  ;;  %v1284_v26 = vsub.s32 1, %v9500_v62 }
 0x27c   : > { %v9513_v15 = vrot.slane %v9144_v0, %v1284_v26 }
 0x281   : > { %2157 = vmatmul.mubr.bf16.gmra.mxu0 %v9432_v30  ;;  %2230 = vmatmul.mubr.bf16.gmra.mxu1 %v9432_v30  ;;  %v9507_v30 = vrot.slane %v9144_v0, %v1280_v13 }
 0x282   : > { %2166 = vmatprep.mubr.bf16.mxu0 %v9436_v44  ;;  %2239 = vmatprep.mubr.bf16.mxu1 %v9436_v44  ;;  %v9510_v44 = vrot.slane %v9144_v0, %v1288_v12 }
 0x289   : > { %2167 = vmatmul.mubr.bf16.gmra.mxu0 %v9448_v58  ;;  %2240 = vmatmul.mubr.bf16.gmra.mxu1 %v9448_v58 }
 0x2f1   : > { %v1992_v58 = vpop.f32.mrf.mxu0  ;;  %v2065_v19 = vpop.f32.mrf.mxu1 }
 0x2f2   : > { %v1993_v18 = vadd.f32 %v1992_v58, %v9507_v30  ;;  %v2066_v20 = vadd.f32 %v2065_v19, %v9510_v44 }
 0x2f3   : > { %v1994_v21 = vpop.f32.mrf.mxu0  ;;  %v2067_v27 = vpop.f32.mrf.mxu1 }
 0x2f4   : > { %2250 = vst [vmem:[#allocation2 + $0xb0] sm:$0xff] %v1993_v18  ;;  %v1995_v24 = vadd.f32 %v1994_v21, %v9513_v15  ;;  %2252 = vst [vmem:[#allocation2 + $0xd8] sm:$0xff] %v2066_v20  ;;  %v2068_v28 = vadd.f32 %v2067_v27, %v9516_v16  ;;  %v1296_v27 = vsub.s32 4, %v9500_v62 }
 0x2f5   : > { %v1996_v36 = vpop.f32.mrf.mxu0  ;;  %v2069_v31 = vpop.f32.mrf.mxu1 }
 0x2f6   : > { %2251 = vst [vmem:[#allocation2 + $0x1b0] sm:$0xff] %v1995_v24  ;;  %v1997_v29 = vadd.f32 %v1996_v36, %v9507_v30  ;;  %2253 = vst [vmem:[#allocation2 + $0x18] sm:$0xff] %v2068_v28  ;;  %v2070_v32 = vadd.f32 %v2069_v31, %v9510_v44  ;;  %v1304_v28 = vsub.s32 6, %v9500_v62  ;;  %v1308_v36 = vsub.s32 7, %v9500_v62 }
 0x2f7   : > { %v1998_v34 = vpop.f32.mrf.mxu0  ;;  %v2071_v22 = vpop.f32.mrf.mxu1 }
 0x2f8   : > { %2258 = vst [vmem:[#allocation2 + $0x180] sm:$0xff] %v1997_v29  ;;  %v1999_v35 = vadd.f32 %v1998_v34, %v9513_v15  ;;  %2260 = vst [vmem:[#allocation2 + $0x118] sm:$0xff] %v2070_v32  ;;  %v2072_v9 = vadd.f32 %v2071_v22, %v9516_v16  ;;  %v9558_v29 = vrot.slane %v9144_v0, %v1304_v28 }
 0x2f9   : > { %v2002_v38 = vpop.f32.mrf.mxu0  ;;  %v2075_v40 = vpop.f32.mrf.mxu1  ;;  %v9564_v31 = vrot.slane %v9144_v0, %v1308_v36 }
 0x2fa   : > { %2259 = vst [vmem:[#allocation2 + $0x110] sm:$0xff] %v1999_v35  ;;  %v2003_v39 = vadd.f32 %v2002_v38, %v9507_v30  ;;  %2261 = vst [vmem:[#allocation2 + $0x98] sm:$0xff] %v2072_v9  ;;  %v2076_v33 = vadd.f32 %v2075_v40, %v9510_v44 }
 0x2fb   : > { %v2004_v17 = vpop.f32.mrf.mxu0  ;;  %v2077_v23 = vpop.f32.mrf.mxu1 }
 0x2fc   : > { %2266 = vst [vmem:[#allocation2 + $0xe0] sm:$0xff] %v2003_v39  ;;  %v2005_v37 = vadd.f32 %v2004_v17, %v9513_v15  ;;  %2268 = vst [vmem:[#allocation2 + $0x138] sm:$0xff] %v2076_v33  ;;  %v2078_v41 = vadd.f32 %v2077_v23, %v9516_v16 }
 0x2fd   : > { %v2006_v42 = vpop.f32.mrf.mxu0  ;;  %v2079_v43 = vpop.f32.mrf.mxu1 }
 0x2fe   : > { %2267 = vst [vmem:[#allocation2 + $0x188] sm:$0xff] %v2005_v37  ;;  %v2007_v25 = vadd.f32 %v2006_v42, %v9507_v30  ;;  %2269 = vst [vmem:[#allocation2 + $0x140] sm:$0xff] %v2078_v41  ;;  %v2080_v45 = vadd.f32 %v2079_v43, %v9510_v44 }
 0x2ff   : > { %v2008_v46 = vpop.f32.mrf.mxu0  ;;  %v2081_v48 = vpop.f32.mrf.mxu1 }
 0x300   : > { %2274 = vst [vmem:[#allocation2 + $0x1e8] sm:$0xff] %v2007_v25  ;;  %v2009_v47 = vadd.f32 %v2008_v46, %v9513_v15  ;;  %2276 = vst [vmem:[#allocation2 + $0x160] sm:$0xff] %v2080_v45  ;;  %v2082_v49 = vadd.f32 %v2081_v48, %v9516_v16 }
 0x301   : > { %v2012_v50 = vpop.f32.mrf.mxu0  ;;  %v2085_v53 = vpop.f32.mrf.mxu1 }
 0x302   : > { %2275 = vst [vmem:[#allocation2 + $0xf8] sm:$0xff] %v2009_v47  ;;  %v2013_v51 = vadd.f32 %v2012_v50, %v9507_v30  ;;  %2277 = vst [vmem:[#allocation2 + $0x30] sm:$0xff] %v2082_v49  ;;  %v2086_v54 = vadd.f32 %v2085_v53, %v9510_v44 }
 0x303   : > { %v2014_v55 = vpop.f32.mrf.mxu0  ;;  %v2087_v57 = vpop.f32.mrf.mxu1 }
 0x304   : > { %2282 = vst [vmem:[#allocation2 + $0x148] sm:$0xff] %v2013_v51  ;;  %v2015_v56 = vadd.f32 %v2014_v55, %v9513_v15  ;;  %2284 = vst [vmem:[#allocation2 + $0x100] sm:$0xff] %v2086_v54  ;;  %v2088_v59 = vadd.f32 %v2087_v57, %v9516_v16 }
 0x305   : > { %v2016_v60 = vpop.f32.mrf.mxu0  ;;  %v2089_v63 = vpop.f32.mrf.mxu1 }
 0x306   : > { %2283 = vst [vmem:[#allocation2 + $0x1d0] sm:$0xff] %v2015_v56  ;;  %v2017_v61 = vadd.f32 %v2016_v60, %v9507_v30  ;;  %2285 = vst [vmem:[#allocation2 + $0xc8] sm:$0xff] %v2088_v59  ;;  %v2090_v1 = vadd.f32 %v2089_v63, %v9510_v44 }
 0x307   : > { %v2018_v2 = vpop.f32.mrf.mxu0  ;;  %v2091_v4 = vpop.f32.mrf.mxu1 }
 0x308   : > { %2290 = vst [vmem:[#allocation2 + $0x1a0] sm:$0xff] %v2017_v61  ;;  %v2019_v3 = vadd.f32 %v2018_v2, %v9513_v15  ;;  %2292 = vst [vmem:[#allocation2 + $0xe8] sm:$0xff] %v2090_v1  ;;  %v2092_v5 = vadd.f32 %v2091_v4, %v9516_v16 }
 0x309   : > { %v2022_v6 = vpop.f32.mrf.mxu0  ;;  %v2095_v8 = vpop.f32.mrf.mxu1 }
 0x30a   : > { %2291 = vst [vmem:[#allocation2 + $0x1f0] sm:$0xff] %v2019_v3  ;;  %v2023_v7 = vadd.f32 %v2022_v6, %v9507_v30  ;;  %2293 = vst [vmem:[#allocation2 + $0x78] sm:$0xff] %v2092_v5  ;;  %v2096_v10 = vadd.f32 %v2095_v8, %v9510_v44 }
 0x30b   : > { %v2024_v11 = vpop.f32.mrf.mxu0  ;;  %v2097_v13 = vpop.f32.mrf.mxu1 }
 0x30c   : > { %2298 = vst [vmem:[#allocation2 + $0xb8] sm:$0xff] %v2023_v7  ;;  %v2025_v52 = vadd.f32 %v2024_v11, %v9513_v15  ;;  %2300 = vst [vmem:[#allocation2 + $0xa8] sm:$0xff] %v2096_v10  ;;  %v2098_v12 = vadd.f32 %v2097_v13, %v9516_v16 }
 0x30d   : > { %v2026_v26 = vpop.f32.mrf.mxu0  ;;  %v2099_v58 = vpop.f32.mrf.mxu1 }
 0x30e   : > { %2299 = vst [vmem:[#allocation2 + $0x88] sm:$0xff] %v2025_v52  ;;  %v2027_v14 = vadd.f32 %v2026_v26, %v9507_v30  ;;  %2301 = vst [vmem:[#allocation2 + $0x1c8] sm:$0xff] %v2098_v12  ;;  %v2100_v18 = vadd.f32 %v2099_v58, %v9510_v44  ;;  %v1300_v30 = vsub.s32 5, %v9500_v62  ;;  %v9555_v44 = vrot.slane %v9144_v0, %v1296_v27 }
 0x30f   : > { %v2028_v19 = vpop.f32.mrf.mxu0  ;;  %v2101_v21 = vpop.f32.mrf.mxu1 }
 0x310   : > { %2306 = vst [vmem:[#allocation2 + $0x198] sm:$0xff] %v2027_v14  ;;  %v2029_v20 = vadd.f32 %v2028_v19, %v9513_v15  ;;  %2308 = vst [vmem:[#allocation2 + $0xc0] sm:$0xff] %v2100_v18  ;;  %v2102_v24 = vadd.f32 %v2101_v21, %v9516_v16  ;;  %v9561_v15 = vrot.slane %v9144_v0, %v1300_v30 }
 0x312   : > { %2307 = vst [vmem:[#allocation2 + $0x38] sm:$0xff] %v2029_v20  ;;  %2309 = vst [vmem:[#allocation2 + $0x1c0] sm:$0xff] %v2102_v24 }
 0x331   : > { %v2138_v16 = vpop.f32.mrf.mxu0  ;;  %v2211_v34 = vpop.f32.mrf.mxu1 }
 0x332   : > { %v2139_v32 = vadd.f32 %v2138_v16, %v9555_v44  ;;  %v2212_v35 = vadd.f32 %v2211_v34, %v9558_v29 }
 0x333   : > { %v2140_v22 = vpop.f32.mrf.mxu0  ;;  %v2213_v9 = vpop.f32.mrf.mxu1 }
 0x334   : > { %2254 = vst [vmem:[#allocation2 + $0x50] sm:$0xff] %v2139_v32  ;;  %v2141_v62 = vadd.f32 %v2140_v22, %v9561_v15  ;;  %2256 = vst [vmem:[#allocation2 + $0x130] sm:$0xff] %v2212_v35  ;;  %v2214_v38 = vadd.f32 %v2213_v9, %v9564_v31 }
 0x335   : > { %v2142_v39 = vpop.f32.mrf.mxu0  ;;  %v2215_v33 = vpop.f32.mrf.mxu1 }
 0x336   : > { %2255 = vst [vmem:[#allocation2 + $0x168] sm:$0xff] %v2141_v62  ;;  %v2143_v40 = vadd.f32 %v2142_v39, %v9555_v44  ;;  %2257 = vst [vmem:[#allocation2 + $0x48] sm:$0xff] %v2214_v38  ;;  %v2216_v0 = vadd.f32 %v2215_v33, %v9558_v29 }
 0x337   : > { %v2144_v17 = vpop.f32.mrf.mxu0  ;;  %v2217_v23 = vpop.f32.mrf.mxu1 }
 0x338   : > { %2262 = vst [vmem:[#allocation2 + $0x120] sm:$0xff] %v2143_v40  ;;  %v2145_v37 = vadd.f32 %v2144_v17, %v9561_v15  ;;  %2264 = vst [vmem:[#allocation2 + $0x108] sm:$0xff] %v2216_v0  ;;  %v2218_v41 = vadd.f32 %v2217_v23, %v9564_v31 }
 0x339   : > { %v2148_v42 = vpop.f32.mrf.mxu0  ;;  %v2221_v43 = vpop.f32.mrf.mxu1 }
 0x33a   : > { %2263 = vst [vmem:[#allocation2 + $0x150] sm:$0xff] %v2145_v37  ;;  %v2149_v25 = vadd.f32 %v2148_v42, %v9555_v44  ;;  %2265 = vst [vmem:[#allocation2 + $0x60] sm:$0xff] %v2218_v41  ;;  %v2222_v45 = vadd.f32 %v2221_v43, %v9558_v29 }
 0x33b   : > { %v2150_v46 = vpop.f32.mrf.mxu0  ;;  %v2223_v48 = vpop.f32.mrf.mxu1 }
 0x33c   : > { %2270 = vst [vmem:[#allocation2 + $0x80] sm:$0xff] %v2149_v25  ;;  %v2151_v47 = vadd.f32 %v2150_v46, %v9561_v15  ;;  %2272 = vst [vmem:[#allocation2 + $0x1b8] sm:$0xff] %v2222_v45  ;;  %v2224_v49 = vadd.f32 %v2223_v48, %v9564_v31 }
 0x33d   : > { %v2152_v50 = vpop.f32.mrf.mxu0  ;;  %v2225_v53 = vpop.f32.mrf.mxu1 }
 0x33e   : > { %2271 = vst [vmem:[#allocation2 + $0x1a8] sm:$0xff] %v2151_v47  ;;  %v2153_v51 = vadd.f32 %v2152_v50, %v9555_v44  ;;  %2273 = vst [vmem:[#allocation2 + $0x28] sm:$0xff] %v2224_v49  ;;  %v2226_v54 = vadd.f32 %v2225_v53, %v9558_v29 }
 0x33f   : > { %v2154_v55 = vpop.f32.mrf.mxu0  ;;  %v2227_v57 = vpop.f32.mrf.mxu1 }
 0x340   : > { %2278 = vst [vmem:[#allocation2 + $0x1e0] sm:$0xff] %v2153_v51  ;;  %v2155_v56 = vadd.f32 %v2154_v55, %v9561_v15  ;;  %2280 = vst [vmem:[#allocation2 + $0xf0] sm:$0xff] %v2226_v54  ;;  %v2228_v59 = vadd.f32 %v2227_v57, %v9564_v31 }
 0x341   : > { %v2158_v60 = vpop.f32.mrf.mxu0  ;;  %v2231_v63 = vpop.f32.mrf.mxu1 }
 0x342   : > { %2279 = vst [vmem:[#allocation2] sm:$0xff] %v2155_v56  ;;  %v2159_v61 = vadd.f32 %v2158_v60, %v9555_v44  ;;  %2281 = vst [vmem:[#allocation2 + $0x8] sm:$0xff] %v2228_v59  ;;  %v2232_v1 = vadd.f32 %v2231_v63, %v9558_v29 }
 0x343   : > { %v2160_v2 = vpop.f32.mrf.mxu0  ;;  %v2233_v4 = vpop.f32.mrf.mxu1 }
 0x344   : > { %2286 = vst [vmem:[#allocation2 + $0x40] sm:$0xff] %v2159_v61  ;;  %v2161_v3 = vadd.f32 %v2160_v2, %v9561_v15  ;;  %2288 = vst [vmem:[#allocation2 + $0x20] sm:$0xff] %v2232_v1  ;;  %v2234_v5 = vadd.f32 %v2233_v4, %v9564_v31 }
 0x345   : > { %v2162_v6 = vpop.f32.mrf.mxu0  ;;  %v2235_v8 = vpop.f32.mrf.mxu1 }
 0x346   : > { %2287 = vst [vmem:[#allocation2 + $0x1f8] sm:$0xff] %v2161_v3  ;;  %v2163_v7 = vadd.f32 %v2162_v6, %v9555_v44  ;;  %2289 = vst [vmem:[#allocation2 + $0x128] sm:$0xff] %v2234_v5  ;;  %v2236_v10 = vadd.f32 %v2235_v8, %v9558_v29 }
 0x347   : > { %v2164_v11 = vpop.f32.mrf.mxu0  ;;  %v2237_v13 = vpop.f32.mrf.mxu1 }
 0x348   : > { %2294 = vst [vmem:[#allocation2 + $0x70] sm:$0xff] %v2163_v7  ;;  %v2165_v52 = vadd.f32 %v2164_v11, %v9561_v15  ;;  %2296 = vst [vmem:[#allocation2 + $0x1d8] sm:$0xff] %v2236_v10  ;;  %v2238_v12 = vadd.f32 %v2237_v13, %v9564_v31 }
 0x349   : > { %v2168_v26 = vpop.f32.mrf.mxu0  ;;  %v2241_v58 = vpop.f32.mrf.mxu1 }
 0x34a   : > { %2295 = vst [vmem:[#allocation2 + $0x90] sm:$0xff] %v2165_v52  ;;  %v2169_v14 = vadd.f32 %v2168_v26, %v9555_v44  ;;  %2297 = vst [vmem:[#allocation2 + $0xd0] sm:$0xff] %v2238_v12  ;;  %v2242_v18 = vadd.f32 %v2241_v58, %v9558_v29 }
 0x34b   : > { %v2170_v19 = vpop.f32.mrf.mxu0  ;;  %v2243_v21 = vpop.f32.mrf.mxu1 }
 0x34c   : > { %2302 = vst [vmem:[#allocation2 + $0x170] sm:$0xff] %v2169_v14  ;;  %v2171_v20 = vadd.f32 %v2170_v19, %v9561_v15  ;;  %2304 = vst [vmem:[#allocation2 + $0x68] sm:$0xff] %v2242_v18  ;;  %v2244_v24 = vadd.f32 %v2243_v21, %v9564_v31 }
 0x34d   : > { %v2172_v27 = vpop.f32.mrf.mxu0  ;;  %v2245_v30 = vpop.f32.mrf.mxu1 }
 0x34e   : > { %2303 = vst [vmem:[#allocation2 + $0x178] sm:$0xff] %v2171_v20  ;;  %v2173_v28 = vadd.f32 %v2172_v27, %v9555_v44  ;;  %2305 = vst [vmem:[#allocation2 + $0x190] sm:$0xff] %v2244_v24  ;;  %v2246_v36 = vadd.f32 %v2245_v30, %v9558_v29 }
 0x34f   : > { %v2174_v16 = vpop.f32.mrf.mxu0  ;;  %v2247_v34 = vpop.f32.mrf.mxu1 }
 0x350   : > { %2310 = vst [vmem:[#allocation2 + $0x158] sm:$0xff] %v2173_v28  ;;  %v2175_v32 = vadd.f32 %v2174_v16, %v9561_v15  ;;  %2312 = vst [vmem:[#allocation2 + $0x58] sm:$0xff] %v2246_v36  ;;  %v2248_v35 = vadd.f32 %v2247_v34, %v9564_v31 }
 0x352   : > { %2311 = vst [vmem:[#allocation2 + $0x10] sm:$0xff] %v2175_v32  ;;  %2313 = vst [vmem:[#allocation2 + $0xa0] sm:$0xff] %v2248_v35 }
 0x353 PF: > { %v2353_v44 = vld [vmem:[%s9138_s21 + $0x1c0] sm:$0xff]  ;;  %v2354_v22 = vld [vmem:[%s9138_s21 + $0x1c8] sm:$0xff]  ;;  %v11097_v39 = vmov 0   ;;  %v2637_v35 = vld [vmem:[%s9138_s21 + $0x1d0] sm:$0xff]  ;;  %p8191_p6 = scmp.ne.s32.totalorder %s8966_s24, 2 }
 0x354   : > { %v2355_v29 = vld [vmem:[%s9138_s21 + $0x1e0] sm:$0xff]  ;;  %v2356_v31 = vld [vmem:[%s9138_s21 + $0x1e8] sm:$0xff]  ;;  %2549 = vmatprep.mubr.bf16.mxu0 %v11097_v39  ;;  %2590 = vmatprep.mubr.bf16.mxu1 %v11097_v39 }
 0x355   : > { %v9601_v15 = vcombine.high %v2353_v44, %v2355_v29  ;;  %v9603_v62 = vcombine.low %v2353_v44, %v2355_v29  ;;  %v2349_v9 = vld [vmem:[%s9138_s21 + $0x180] sm:$0xff]  ;;  %v9610_v40 = vcombine.high %v2354_v22, %v2356_v31  ;;  %v9612_v33 = vcombine.low %v2354_v22, %v2356_v31  ;;  %v2350_v17 = vld [vmem:[%s9138_s21 + $0x188] sm:$0xff]  ;;  %v2639_v44 = vld [vmem:[%s9138_s21 + $0x1f0] sm:$0xff] }
 0x356   : > { %v2351_v38 = vld [vmem:[%s9138_s21 + $0x1a0] sm:$0xff]  ;;  %v2352_v37 = vld [vmem:[%s9138_s21 + $0x1a8] sm:$0xff]  ;;  %v2638_v29 = vld [vmem:[%s9138_s21 + $0x1d8] sm:$0xff] }
 0x357   : > { %v9614_v0 = vcombine.high %v2349_v9, %v2351_v38  ;;  %v2345_v23 = vld [vmem:[%s9138_s21 + $0x140] sm:$0xff]  ;;  %2517 = vmatprep.subr.bf16.mxu0 %v9601_v15  ;;  %v9620_v41 = vcombine.high %v2350_v17, %v2352_v37  ;;  %v2346_v25 = vld [vmem:[%s9138_s21 + $0x148] sm:$0xff]  ;;  %2558 = vmatprep.subr.bf16.mxu1 %v9610_v40  ;;  %v9627_v45 = vcombine.low %v2349_v9, %v2351_v38  ;;  %v2640_v22 = vld [vmem:[%s9138_s21 + $0x1f8] sm:$0xff] }
 0x358   : > { %v2347_v42 = vld [vmem:[%s9138_s21 + $0x160] sm:$0xff]  ;;  %v2348_v43 = vld [vmem:[%s9138_s21 + $0x168] sm:$0xff]  ;;  %2518 = vmatpush1.bf16.msra.mxu0 %v9603_v62  ;;  %2559 = vmatpush1.bf16.msra.mxu1 %v9612_v33  ;;  %v9631_v46 = vcombine.low %v2350_v17, %v2352_v37  ;;  %v9731_v17 = vcombine.high %v2637_v35, %v2639_v44  ;;  %v9734_v37 = vcombine.high %v2638_v29, %v2640_v22 }
 0x359   : > { %2519 = vmatprep.subr.bf16.mxu0 %v9614_v0  ;;  %v9633_v47 = vcombine.high %v2345_v23, %v2347_v42  ;;  %2560 = vmatprep.subr.bf16.mxu1 %v9620_v41  ;;  %v9636_v48 = vcombine.high %v2346_v25, %v2348_v43  ;;  %v2341_v49 = vld [vmem:[%s9138_s21 + $0x100] sm:$0xff]  ;;  %v2342_v51 = vld [vmem:[%s9138_s21 + $0x108] sm:$0xff]  ;;  %v9643_v54 = vcombine.low %v2345_v23, %v2347_v42  ;;  %v2633_v23 = vld [vmem:[%s9138_s21 + $0x190] sm:$0xff] }
 0x35a   : > { %v2343_v50 = vld [vmem:[%s9138_s21 + $0x120] sm:$0xff]  ;;  %v2344_v53 = vld [vmem:[%s9138_s21 + $0x128] sm:$0xff]  ;;  %v9647_v55 = vcombine.low %v2346_v25, %v2348_v43  ;;  %v2635_v42 = vld [vmem:[%s9138_s21 + $0x1b0] sm:$0xff] }
 0x35b   : > { %v9649_v56 = vcombine.high %v2341_v49, %v2343_v50  ;;  %v9652_v57 = vcombine.high %v2342_v51, %v2344_v53  ;;  %v2337_v59 = vld [vmem:[%s9138_s21 + $0xc0] sm:$0xff]  ;;  %v2338_v61 = vld [vmem:[%s9138_s21 + $0xc8] sm:$0xff]  ;;  %v9659_v1 = vcombine.low %v2341_v49, %v2343_v50  ;;  %v9663_v2 = vcombine.low %v2342_v51, %v2344_v53  ;;  %v2634_v43 = vld [vmem:[%s9138_s21 + $0x198] sm:$0xff] }
 0x35c   : > { %2520 = vmatpush1.bf16.msra.mxu0 %v9627_v45  ;;  %2561 = vmatpush1.bf16.msra.mxu1 %v9631_v46  ;;  %v2339_v60 = vld [vmem:[%s9138_s21 + $0xe0] sm:$0xff]  ;;  %v2340_v63 = vld [vmem:[%s9138_s21 + $0xe8] sm:$0xff]  ;;  %v2636_v49 = vld [vmem:[%s9138_s21 + $0x1b8] sm:$0xff]  ;;  %v9741_v50 = vcombine.low %v2637_v35, %v2639_v44  ;;  %v9745_v51 = vcombine.low %v2638_v29, %v2640_v22  ;;  %v9747_v53 = vcombine.high %v2633_v23, %v2635_v42 }
 0x35d   : > { %2521 = vmatprep.subr.bf16.mxu0 %v9633_v47  ;;  %2562 = vmatprep.subr.bf16.mxu1 %v9636_v48  ;;  %v9665_v3 = vcombine.high %v2337_v59, %v2339_v60  ;;  %v9668_v4 = vcombine.high %v2338_v61, %v2340_v63  ;;  %v2333_v5 = vld [vmem:[%s9138_s21 + $0x80] sm:$0xff]  ;;  %v2334_v7 = vld [vmem:[%s9138_s21 + $0x88] sm:$0xff]  ;;  %v9675_v10 = vcombine.low %v2337_v59, %v2339_v60  ;;  %v2629_v60 = vld [vmem:[%s9138_s21 + $0x150] sm:$0xff] }
 0x35e   : > { %v2335_v6 = vld [vmem:[%s9138_s21 + $0xa0] sm:$0xff]  ;;  %v2336_v8 = vld [vmem:[%s9138_s21 + $0xa8] sm:$0xff]  ;;  %v9679_v11 = vcombine.low %v2338_v61, %v2340_v63  ;;  %v9750_v59 = vcombine.high %v2634_v43, %v2636_v49  ;;  %v2631_v61 = vld [vmem:[%s9138_s21 + $0x170] sm:$0xff] }
 0x35f   : > { %v9681_v52 = vcombine.high %v2333_v5, %v2335_v6  ;;  %v9684_v13 = vcombine.high %v2334_v7, %v2336_v8  ;;  %v2329_v12 = vld [vmem:[%s9138_s21 + $0x40] sm:$0xff]  ;;  %v2330_v14 = vld [vmem:[%s9138_s21 + $0x48] sm:$0xff]  ;;  %v9691_v18 = vcombine.low %v2333_v5, %v2335_v6  ;;  %v9695_v19 = vcombine.low %v2334_v7, %v2336_v8  ;;  %v2630_v63 = vld [vmem:[%s9138_s21 + $0x158] sm:$0xff] }
 0x360   : > { %2522 = vmatpush1.bf16.msra.mxu0 %v9643_v54  ;;  %2563 = vmatpush1.bf16.msra.mxu1 %v9647_v55  ;;  %v2331_v26 = vld [vmem:[%s9138_s21 + $0x60] sm:$0xff]  ;;  %v2332_v58 = vld [vmem:[%s9138_s21 + $0x68] sm:$0xff]  ;;  %v2632_v5 = vld [vmem:[%s9138_s21 + $0x178] sm:$0xff]  ;;  %v9757_v6 = vcombine.low %v2633_v23, %v2635_v42  ;;  %v9761_v7 = vcombine.low %v2634_v43, %v2636_v49  ;;  %v9763_v8 = vcombine.high %v2629_v60, %v2631_v61 }
 0x361   : > { %2523 = vmatprep.subr.bf16.mxu0 %v9649_v56  ;;  %2564 = vmatprep.subr.bf16.mxu1 %v9652_v57  ;;  %v9697_v20 = vcombine.high %v2329_v12, %v2331_v26  ;;  %v9700_v21 = vcombine.high %v2330_v14, %v2332_v58  ;;  %v2325_v24 = vld [vmem:[%s9138_s21] sm:$0xff]  ;;  %v2326_v28 = vld [vmem:[%s9138_s21 + $0x8] sm:$0xff]  ;;  %v9707_v36 = vcombine.low %v2329_v12, %v2331_v26  ;;  %v2625_v26 = vld [vmem:[%s9138_s21 + $0x110] sm:$0xff] }
 0x362   : > { %v2327_v27 = vld [vmem:[%s9138_s21 + $0x20] sm:$0xff]  ;;  %v2328_v30 = vld [vmem:[%s9138_s21 + $0x28] sm:$0xff]  ;;  %v9711_v16 = vcombine.low %v2330_v14, %v2332_v58  ;;  %v9766_v12 = vcombine.high %v2630_v63, %v2632_v5  ;;  %v2627_v14 = vld [vmem:[%s9138_s21 + $0x130] sm:$0xff] }
 0x363   : > { %v9713_v32 = vcombine.high %v2325_v24, %v2327_v27  ;;  %v9716_v34 = vcombine.high %v2326_v28, %v2328_v30  ;;  %v9723_v31 = vcombine.low %v2325_v24, %v2327_v27  ;;  %v2314_v9 = vld [vmem:[%s403_s12] sm:$0xff]  ;;  %v9729_v38 = vcombine.low %v2326_v28, %v2328_v30  ;;  %v2626_v58 = vld [vmem:[%s9138_s21 + $0x118] sm:$0xff] }
 0x364   : > { %2524 = vmatpush1.bf16.msra.mxu0 %v9659_v1  ;;  %2565 = vmatpush1.bf16.msra.mxu1 %v9663_v2  ;;  %v2324_v25 = vpack.c.bf16 %v2314_v9, %v2314_v9  ;;  %v2628_v24 = vld [vmem:[%s9138_s21 + $0x138] sm:$0xff]  ;;  %v9775_v27 = vcombine.low %v2629_v60, %v2631_v61  ;;  %v9779_v28 = vcombine.low %v2630_v63, %v2632_v5  ;;  %v2621_v44 = vld [vmem:[%s9138_s21 + $0xd0] sm:$0xff] }
 0x365   : > { %2525 = vmatprep.subr.bf16.mxu0 %v9665_v3  ;;  %2566 = vmatprep.subr.bf16.mxu1 %v9668_v4  ;;  %v9781_v30 = vcombine.high %v2625_v26, %v2627_v14  ;;  %v9784_v35 = vcombine.high %v2626_v58, %v2628_v24  ;;  %v2623_v29 = vld [vmem:[%s9138_s21 + $0xf0] sm:$0xff]  ;;  %v2622_v22 = vld [vmem:[%s9138_s21 + $0xd8] sm:$0xff]  ;;  %v9791_v23 = vcombine.low %v2625_v26, %v2627_v14 }
 0x366   : > { %v2624_v9 = vld [vmem:[%s9138_s21 + $0xf8] sm:$0xff]  ;;  %v9795_v42 = vcombine.low %v2626_v58, %v2628_v24  ;;  %v2617_v49 = vld [vmem:[%s9138_s21 + $0x90] sm:$0xff]  ;;  %v9807_v5 = vcombine.low %v2621_v44, %v2623_v29 }
 0x367   : > { %11178 = vst [vmem:[#allocation28_spill] sm:$0xff] %v9781_v30  ;;  %11179 = vst [vmem:[#allocation29_spill] sm:$0xff] %v9784_v35  ;;  %v9800_v43 = vcombine.high %v2622_v22, %v2624_v9  ;;  %v2619_v60 = vld [vmem:[%s9138_s21 + $0xb0] sm:$0xff]  ;;  %v2618_v61 = vld [vmem:[%s9138_s21 + $0x98] sm:$0xff]  ;;  %v9811_v26 = vcombine.low %v2622_v22, %v2624_v9 }
 0x368   : > { %2526 = vmatpush1.bf16.msra.mxu0 %v9675_v10  ;;  %2567 = vmatpush1.bf16.msra.mxu1 %v9679_v11  ;;  %11180 = vst [vmem:[#allocation30_spill] sm:$0xff] %v9791_v23  ;;  %11181 = vst [vmem:[#allocation31_spill] sm:$0xff] %v9795_v42  ;;  %v2620_v63 = vld [vmem:[%s9138_s21 + $0xb8] sm:$0xff]  ;;  %v9813_v14 = vcombine.high %v2617_v49, %v2619_v60  ;;  %v2613_v24 = vld [vmem:[%s9138_s21 + $0x50] sm:$0xff] }
 0x369   : > { %2527 = vmatprep.subr.bf16.mxu0 %v9681_v52  ;;  %2568 = vmatprep.subr.bf16.mxu1 %v9684_v13  ;;  %11183 = vst [vmem:[#allocation33_spill] sm:$0xff] %v9800_v43  ;;  %v9816_v58 = vcombine.high %v2618_v61, %v2620_v63  ;;  %v9827_v22 = vcombine.low %v2618_v61, %v2620_v63 }
 0x36b   : > { %11184 = vst [vmem:[#allocation34_spill] sm:$0xff] %v9816_v58 }
 0x36c   : > { %2528 = vmatpush1.bf16.msra.mxu0 %v9691_v18  ;;  %2569 = vmatpush1.bf16.msra.mxu1 %v9695_v19 }
 0x36d   : > { %2529 = vmatprep.subr.bf16.mxu0 %v9697_v20  ;;  %2570 = vmatprep.subr.bf16.mxu1 %v9700_v21 }
 0x370   : > { %2530 = vmatpush1.bf16.msra.mxu0 %v9707_v36  ;;  %2571 = vmatpush1.bf16.msra.mxu1 %v9711_v16 }
 0x371   : > { %2531 = vmatprep.subr.bf16.mxu0 %v9713_v32  ;;  %2572 = vmatprep.subr.bf16.mxu1 %v9716_v34 }
 0x374   : > { %2532 = vmatpush1.bf16.msra.mxu0 %v9723_v31  ;;  %2573 = vmatpush1.bf16.msra.mxu1 %v9729_v38 }
 0x375   : > { %2801 = vmatprep.subr.bf16.mxu0 %v9731_v17  ;;  %2842 = vmatprep.subr.bf16.mxu1 %v9734_v37 }
 0x377   : > { %2550 = vmatmul.mubr.bf16.vlgmr.msra.gmra.mxu0 %v2324_v25  ;;  %2591 = vmatmul.mubr.bf16.vlgmr.msra.gmra.mxu1 %v2324_v25  ;;  %v9797_v25 = vcombine.high %v2621_v44, %v2623_v29  ;;  %v2614_v44 = vld [vmem:[%s9138_s21 + $0x58] sm:$0xff] }
 0x378   : > { %2802 = vmatpush1.bf16.msra.mxu0 %v9741_v50  ;;  %2843 = vmatpush1.bf16.msra.mxu1 %v9745_v51  ;;  %v2616_v29 = vld [vmem:[%s9138_s21 + $0x78] sm:$0xff] }
 0x379   : > { %2803 = vmatprep.subr.bf16.mxu0 %v9747_v53  ;;  %2844 = vmatprep.subr.bf16.mxu1 %v9750_v59  ;;  %11182 = vst [vmem:[#allocation32_spill] sm:$0xff] %v9797_v25 }
 0x37a   : > { %2833 = vmatprep.mubr.bf16.mxu0 %v11097_v39  ;;  %2874 = vmatprep.mubr.bf16.mxu1 %v11097_v39  ;;  %v2615_v39 = vld [vmem:[%s9138_s21 + $0x70] sm:$0xff] }
 0x37b   : > { %v9829_v9 = vcombine.high %v2613_v24, %v2615_v39 }
 0x37c   : > { %2804 = vmatpush1.bf16.msra.mxu0 %v9757_v6  ;;  %2845 = vmatpush1.bf16.msra.mxu1 %v9761_v7 }
 0x37d   : > { %2805 = vmatprep.subr.bf16.mxu0 %v9763_v8  ;;  %2846 = vmatprep.subr.bf16.mxu1 %v9766_v12 }
 0x380   : > { %2806 = vmatpush1.bf16.msra.mxu0 %v9775_v27  ;;  %2847 = vmatpush1.bf16.msra.mxu1 %v9779_v28 }
 0x381   : > { %2807 = vmatprep.subr.bf16.mxu0 %v9781_v30  ;;  %2848 = vmatprep.subr.bf16.mxu1 %v9784_v35  ;;  %v2610_v35 = vld [vmem:[%s9138_s21 + $0x18] sm:$0xff] }
 0x382   : > { %v2612_v30 = vld [vmem:[%s9138_s21 + $0x38] sm:$0xff] }
 0x383   : > { %v9848_v63 = vcombine.high %v2610_v35, %v2612_v30 }
 0x384   : > { %2808 = vmatpush1.bf16.msra.mxu0 %v9791_v23  ;;  %2849 = vmatpush1.bf16.msra.mxu1 %v9795_v42  ;;  %v9823_v42 = vcombine.low %v2617_v49, %v2619_v60  ;;  %v2611_v23 = vld [vmem:[%s9138_s21 + $0x30] sm:$0xff]  ;;  %v9839_v49 = vcombine.low %v2613_v24, %v2615_v39  ;;  %v9843_v60 = vcombine.low %v2614_v44, %v2616_v29 }
 0x385   : > { %2809 = vmatprep.subr.bf16.mxu0 %v9797_v25  ;;  %2850 = vmatprep.subr.bf16.mxu1 %v9800_v43  ;;  %v9832_v43 = vcombine.high %v2614_v44, %v2616_v29  ;;  %v2609_v25 = vld [vmem:[%s9138_s21 + $0x10] sm:$0xff]  ;;  %v9857_v39 = vcombine.low %v2610_v35, %v2612_v30  ;;  %v11186_v30 = vmov 0  }
 0x386   : > { %11185 = vst [vmem:[#allocation35_spill] sm:$0xff] %v9823_v42  ;;  %v9845_v61 = vcombine.high %v2609_v25, %v2611_v23 }
 0x388   : > { %2810 = vmatpush1.bf16.msra.mxu0 %v9807_v5  ;;  %2851 = vmatpush1.bf16.msra.mxu1 %v9811_v26 }
 0x389   : > { %2811 = vmatprep.subr.bf16.mxu0 %v9813_v14  ;;  %2852 = vmatprep.subr.bf16.mxu1 %v9816_v58  ;;  %v9851_v58 = vcombine.low %v2609_v25, %v2611_v23  ;;  %v2606_v25 = vld [vmem:[#allocation2 + $0x58] sm:$0xff] }
 0x38c   : > { %2812 = vmatpush1.bf16.msra.mxu0 %v9823_v42  ;;  %2853 = vmatpush1.bf16.msra.mxu1 %v9827_v22  ;;  %v7675_v42 = vld [vmem:[%s403_s12 + $0x8] sm:$0xff] }
 0x38d   : > { %2813 = vmatprep.subr.bf16.mxu0 %v9829_v9  ;;  %2854 = vmatprep.subr.bf16.mxu1 %v9832_v43  ;;  %v2608_v24 = vpack.c.bf16 %v7675_v42, %v7675_v42 }
 0x390   : > { %2814 = vmatpush1.bf16.msra.mxu0 %v9839_v49  ;;  %2855 = vmatpush1.bf16.msra.mxu1 %v9843_v60 }
 0x391   : > { %2815 = vmatprep.subr.bf16.mxu0 %v9845_v61  ;;  %2856 = vmatprep.subr.bf16.mxu1 %v9848_v63 }
 0x394   : > { %2816 = vmatpush1.bf16.msra.mxu0 %v9851_v58  ;;  %2857 = vmatpush1.bf16.msra.mxu1 %v9857_v39 }
 0x395   : > { %3124 = vmatprep.subr.bf16.mxu0 %v9601_v15  ;;  %3165 = vmatprep.subr.bf16.mxu1 %v9610_v40  ;;  %v2320_v15 = vld [vmem:[#allocation2 + $0xb0] sm:$0xff] }
 0x397   : > { %2834 = vmatmul.mubr.bf16.vlgmr.msra.gmra.mxu0 %v2608_v24  ;;  %2875 = vmatmul.mubr.bf16.vlgmr.msra.gmra.mxu1 %v2608_v24 }
 0x398   : > { %3125 = vmatpush1.bf16.msra.mxu0 %v9603_v62  ;;  %3166 = vmatpush1.bf16.msra.mxu1 %v9612_v33  ;;  %v2322_v62 = vld [vmem:[#allocation2 + $0xd8] sm:$0xff]  ;;  %v2321_v33 = vld [vmem:[#allocation2 + $0x1b0] sm:$0xff] }
 0x399   : > { %3126 = vmatprep.subr.bf16.mxu0 %v9614_v0  ;;  %3167 = vmatprep.subr.bf16.mxu1 %v9620_v41 }
 0x39a   : > { %3156 = vmatprep.mubr.bf16.mxu0 %v11186_v30  ;;  %3197 = vmatprep.mubr.bf16.mxu1 %v11186_v30 }
 0x39c   : > { %3127 = vmatpush1.bf16.msra.mxu0 %v9627_v45  ;;  %3168 = vmatpush1.bf16.msra.mxu1 %v9631_v46 }
 0x39d   : > { %3128 = vmatprep.subr.bf16.mxu0 %v9633_v47  ;;  %3169 = vmatprep.subr.bf16.mxu1 %v9636_v48 }
 0x3a0   : > { %3129 = vmatpush1.bf16.msra.mxu0 %v9643_v54  ;;  %3170 = vmatpush1.bf16.msra.mxu1 %v9647_v55 }
 0x3a1   : > { %3130 = vmatprep.subr.bf16.mxu0 %v9649_v56  ;;  %3171 = vmatprep.subr.bf16.mxu1 %v9652_v57 }
 0x3a4   : > { %3131 = vmatpush1.bf16.msra.mxu0 %v9659_v1  ;;  %3172 = vmatpush1.bf16.msra.mxu1 %v9663_v2 }
 0x3a5   : > { %3132 = vmatprep.subr.bf16.mxu0 %v9665_v3  ;;  %3173 = vmatprep.subr.bf16.mxu1 %v9668_v4  ;;  %v2323_v3 = vld [vmem:[#allocation2 + $0x18] sm:$0xff] }
 0x3a8   : > { %3133 = vmatpush1.bf16.msra.mxu0 %v9675_v10  ;;  %3174 = vmatpush1.bf16.msra.mxu1 %v9679_v11 }
 0x3a9   : > { %3134 = vmatprep.subr.bf16.mxu0 %v9681_v52  ;;  %3175 = vmatprep.subr.bf16.mxu1 %v9684_v13 }
 0x3ac   : > { %3135 = vmatpush1.bf16.msra.mxu0 %v9691_v18  ;;  %3176 = vmatpush1.bf16.msra.mxu1 %v9695_v19 }
 0x3ad   : > { %3136 = vmatprep.subr.bf16.mxu0 %v9697_v20  ;;  %3177 = vmatprep.subr.bf16.mxu1 %v9700_v21  ;;  %v2315_v21 = vld [vmem:[%s412_s17] sm:$0xff] }
 0x3b0   : > { %3137 = vmatpush1.bf16.msra.mxu0 %v9707_v36  ;;  %3178 = vmatpush1.bf16.msra.mxu1 %v9711_v16 }
 0x3b1   : > { %3138 = vmatprep.subr.bf16.mxu0 %v9713_v32  ;;  %3179 = vmatprep.subr.bf16.mxu1 %v9716_v34 }
 0x3b4   : > { %3139 = vmatpush1.bf16.msra.mxu0 %v9723_v31  ;;  %3180 = vmatpush1.bf16.msra.mxu1 %v9729_v38  ;;  %v2604_v31 = vld [vmem:[#allocation2 + $0x158] sm:$0xff] }
 0x3b5   : > { %3408 = vmatprep.subr.bf16.mxu0 %v9731_v17  ;;  %3449 = vmatprep.subr.bf16.mxu1 %v9734_v37  ;;  %v2605_v17 = vld [vmem:[#allocation2 + $0x10] sm:$0xff] }
 0x437   : > { %v2551_v40 = vpop.f32.mrf.mxu0  ;;  %v2592_v41 = vpop.f32.mrf.mxu1 }
 0x438   : > { %v2599_v0 = vadd.f32 %v2551_v40, %v2320_v15  ;;  %v2601_v46 = vadd.f32 %v2592_v41, %v2322_v62 }
 0x439   : > { %v2553_v45 = vpop.f32.mrf.mxu0  ;;  %v2594_v54 = vpop.f32.mrf.mxu1 }
 0x43a   : > { %v2887_v47 = vmul.f32 0.5, %v2599_v0  ;;  %v2600_v48 = vadd.f32 %v2553_v45, %v2321_v33  ;;  %v2602_v4 = vadd.f32 %v2594_v54, %v2323_v3 }
 0x43b   : > { %v2555_v55 = vpop.f32.mrf.mxu0  ;;  %v2596_v57 = vpop.f32.mrf.mxu1 }
 0x43c   : > { %8308 = vtanh.f32 %v2887_v47  ;;  %v2891_v56 = vmul.f32 0.5, %v2600_v48  ;;  %v2896_v10 = vmul.f32 0.5, %v2602_v4  ;;  %v2607_v48 = vld [vmem:[#allocation2 + $0xa0] sm:$0xff] }
 0x43d   : > { %8310 = vtanh.f32 %v2601_v46  ;;  %v2556_v1 = vpop.f32.mrf.mxu0  ;;  %v2597_v2 = vpop.f32.mrf.mxu1 }
 0x43e   : > { %8312 = vtanh.f32 %v2891_v56 }
 0x43f   : > { %8314 = vtanh.f32 %v2896_v10 }
 0x449   : > { %v8309_v11 = vpop.eup %8308 }
 0x44a   : > { %v8311_v52 = vpop.eup %8310  ;;  %v2889_v13 = vmul.f32 0.5, %v8309_v11 }
 0x44b   : > { %v8313_v18 = vpop.eup %8312 }
 0x44c   : > { %v2890_v19 = vadd.f32 0.5, %v2889_v13  ;;  %v2893_v20 = vmul.f32 0.5, %v8313_v18  ;;  %v8315_v23 = vpop.eup %8314  ;;  %v11189_v13 = vld [vmem:[#allocation30_spill] sm:$0xff]  ;;  %v11192_v18 = vld [vmem:[#allocation33_spill] sm:$0xff] }
 0x44d   : > { %v2898_v62 = vmul.f32 0.5, %v8315_v23  ;;  %v3562_v23 = vld [vmem:[%s9138_s21 + $0x160] sm:$0xff] }
 0x44e   : > { %v2894_v36 = vadd.f32 0.5, %v2893_v20  ;;  %v2901_v16 = vmul.f32 %v8311_v52, %v2890_v19  ;;  %v11194_v19 = vld [vmem:[#allocation35_spill] sm:$0xff] }
 0x44f   : > { %v2899_v46 = vadd.f32 0.5, %v2898_v62  ;;  %v3556_v62 = vld [vmem:[%s9138_s21 + $0x100] sm:$0xff] }
 0x450   : > { %v2900_v32 = vmul.f32 %v2894_v36, %v2315_v21  ;;  %v3564_v21 = vld [vmem:[%s9138_s21 + $0x180] sm:$0xff] }
 0x451   : > { %v3566_v36 = vld [vmem:[%s9138_s21 + $0x1a0] sm:$0xff] }
 0x452   : > { %v9900_v34 = vadd.f32 %v2901_v16, %v2900_v32  ;;  %v3565_v16 = vld [vmem:[%s9138_s21 + $0x188] sm:$0xff]  ;;  %v9961_v32 = vcombine.high %v3564_v21, %v3566_v36 }
 0x454   : > { %8316 = vtanh.f32 %v9900_v34 }
 0x457   : > { %v2835_v38 = vpop.f32.mrf.mxu0  ;;  %v2876_v35 = vpop.f32.mrf.mxu1 }
 0x458   : > { %v2883_v37 = vadd.f32 %v2835_v38, %v2604_v31  ;;  %v2885_v33 = vadd.f32 %v2876_v35, %v2606_v25  ;;  %v3567_v31 = vld [vmem:[%s9138_s21 + $0x1a8] sm:$0xff]  ;;  %v9964_v38 = vcombine.low %v3564_v21, %v3566_v36  ;;  %v3560_v35 = vld [vmem:[%s9138_s21 + $0x140] sm:$0xff]  ;;  %v3854_v21 = vld [vmem:[%s9138_s21 + $0x1f0] sm:$0xff] }
 0x459   : > { %v2837_v42 = vpop.f32.mrf.mxu0  ;;  %v2878_v24 = vpop.f32.mrf.mxu1  ;;  %v9977_v25 = vcombine.high %v3560_v35, %v3562_v23  ;;  %v3853_v36 = vld [vmem:[%s9138_s21 + $0x1d8] sm:$0xff] }
 0x45a   : > { %v2905_v44 = vmul.f32 0.5, %v2883_v37  ;;  %v2884_v29 = vadd.f32 %v2837_v42, %v2605_v17  ;;  %v2886_v55 = vadd.f32 %v2878_v24, %v2607_v48  ;;  %v9966_v17 = vcombine.low %v3565_v16, %v3567_v31  ;;  %v3561_v42 = vld [vmem:[%s9138_s21 + $0x148] sm:$0xff]  ;;  %v3552_v48 = vld [vmem:[%s9138_s21 + $0xc0] sm:$0xff] }
 0x45b   : > { %v2839_v15 = vpop.f32.mrf.mxu0  ;;  %v2880_v0 = vpop.f32.mrf.mxu1  ;;  %v9968_v37 = vcombine.high %v3565_v16, %v3567_v31  ;;  %v3855_v31 = vld [vmem:[%s9138_s21 + $0x1f8] sm:$0xff] }
 0x45c   : > { %8318 = vtanh.f32 %v2905_v44  ;;  %v2909_v40 = vmul.f32 0.5, %v2884_v29  ;;  %v2914_v57 = vmul.f32 0.5, %v2886_v55  ;;  %v3563_v44 = vld [vmem:[%s9138_s21 + $0x168] sm:$0xff]  ;;  %v9980_v29 = vcombine.low %v3560_v35, %v3562_v23 }
 0x45d   : > { %v2840_v41 = vpop.f32.mrf.mxu0  ;;  %v2881_v45 = vpop.f32.mrf.mxu1  ;;  %v9982_v24 = vcombine.low %v3561_v42, %v3563_v44  ;;  %v9984_v15 = vcombine.high %v3561_v42, %v3563_v44  ;;  %v3553_v55 = vld [vmem:[%s9138_s21 + $0xc8] sm:$0xff]  ;;  %v10078_v23 = vcombine.low %v3853_v36, %v3855_v31  ;;  %v10080_v42 = vcombine.high %v3853_v36, %v3855_v31  ;;  %v2927_v44 = vld [vmem:[#allocation2 + $0x180] sm:$0xff] }
 0x45e   : > { %8320 = vtanh.f32 %v2909_v40  ;;  %v3558_v40 = vld [vmem:[%s9138_s21 + $0x120] sm:$0xff]  ;;  %v3559_v41 = vld [vmem:[%s9138_s21 + $0x128] sm:$0xff] }
 0x45f   : > { %8322 = vtanh.f32 %v2885_v33  ;;  %v3557_v33 = vld [vmem:[%s9138_s21 + $0x108] sm:$0xff]  ;;  %v9993_v0 = vcombine.high %v3556_v62, %v3558_v40  ;;  %v9996_v45 = vcombine.low %v3556_v62, %v3558_v40 }
 0x460   : > { %8324 = vtanh.f32 %v2914_v57  ;;  %v3555_v57 = vld [vmem:[%s9138_s21 + $0xe8] sm:$0xff] }
 0x461   : > { %v8317_v47 = vpop.eup %8316 }
 0x462   : > { %v2904_v54 = vmul.f32 %v8317_v47, %v2899_v46  ;;  %v9998_v46 = vcombine.low %v3557_v33, %v3559_v41  ;;  %v10000_v47 = vcombine.high %v3557_v33, %v3559_v41  ;;  %v2928_v33 = vld [vmem:[#allocation2 + $0x110] sm:$0xff] }
 0x464   : > { %2923 = vst [vmem:[#allocation3 + $0x68] sm:$0xff] %v2904_v54  ;;  %v2931_v56 = vpack.c.bf16 %v2904_v54, %v2904_v54  ;;  %v3554_v54 = vld [vmem:[%s9138_s21 + $0xe0] sm:$0xff] }
 0x466   : > { %3157 = vmatmul.mubr.bf16.vlgmr.msra.gmra.mxu0 %v2931_v56  ;;  %3198 = vmatmul.mubr.bf16.vlgmr.msra.gmra.mxu1 %v2931_v56  ;;  %v10009_v56 = vcombine.high %v3552_v48, %v3554_v54 }
 0x467   : > { %3409 = vmatpush1.bf16.msra.mxu0 %v9741_v50  ;;  %3450 = vmatpush1.bf16.msra.mxu1 %v9745_v51 }
 0x468   : > { %3410 = vmatprep.subr.bf16.mxu0 %v9747_v53  ;;  %3451 = vmatprep.subr.bf16.mxu1 %v9750_v59  ;;  %v7676_v53 = vld [vmem:[%s412_s17 + $0x8] sm:$0xff] }
 0x469   : > { %v8319_v1 = vpop.eup %8318  ;;  %3440 = vmatprep.mubr.bf16.mxu0 %v11186_v30  ;;  %3481 = vmatprep.mubr.bf16.mxu1 %v11186_v30 }
 0x46a   : > { %v2907_v2 = vmul.f32 0.5, %v8319_v1  ;;  %v10012_v1 = vcombine.low %v3552_v48, %v3554_v54 }
 0x46b   : > { %v8321_v3 = vpop.eup %8320  ;;  %3411 = vmatpush1.bf16.msra.mxu0 %v9757_v6  ;;  %3452 = vmatpush1.bf16.msra.mxu1 %v9761_v7  ;;  %v11187_v6 = vld [vmem:[#allocation28_spill] sm:$0xff]  ;;  %v11188_v7 = vld [vmem:[#allocation29_spill] sm:$0xff] }
 0x46c   : > { %v2908_v50 = vadd.f32 0.5, %v2907_v2  ;;  %v2911_v4 = vmul.f32 0.5, %v8321_v3  ;;  %3412 = vmatprep.subr.bf16.mxu0 %v9763_v8  ;;  %3453 = vmatprep.subr.bf16.mxu1 %v9766_v12  ;;  %v8323_v51 = vpop.eup %8322  ;;  %v11190_v8 = vld [vmem:[#allocation31_spill] sm:$0xff]  ;;  %v11191_v12 = vld [vmem:[#allocation32_spill] sm:$0xff]  ;;  %v10014_v2 = vcombine.low %v3553_v55, %v3555_v57  ;;  %v10016_v3 = vcombine.high %v3553_v55, %v3555_v57 }
 0x46e   : > { %v2912_v59 = vadd.f32 0.5, %v2911_v4  ;;  %v2919_v11 = vmul.f32 %v8323_v51, %v2908_v50  ;;  %v3548_v50 = vld [vmem:[%s9138_s21 + $0x80] sm:$0xff]  ;;  %v3549_v51 = vld [vmem:[%s9138_s21 + $0x88] sm:$0xff] }
 0x46f   : > { %3413 = vmatpush1.bf16.msra.mxu0 %v9775_v27  ;;  %3454 = vmatpush1.bf16.msra.mxu1 %v9779_v28  ;;  %v11193_v27 = vld [vmem:[#allocation34_spill] sm:$0xff]  ;;  %v8325_v28 = vpop.eup %8324 }
 0x470   : > { %v2918_v10 = vmul.f32 %v7676_v53, %v2912_v59  ;;  %3414 = vmatprep.subr.bf16.mxu0 %v11187_v6  ;;  %3455 = vmatprep.subr.bf16.mxu1 %v11188_v7  ;;  %v2916_v20 = vmul.f32 0.5, %v8325_v28  ;;  %v3550_v4 = vld [vmem:[%s9138_s21 + $0xa0] sm:$0xff]  ;;  %v3551_v53 = vld [vmem:[%s9138_s21 + $0xa8] sm:$0xff] }
 0x471   : > { %v10026_v59 = vcombine.low %v3548_v50, %v3550_v4  ;;  %v10032_v6 = vcombine.high %v3549_v51, %v3551_v53  ;;  %v3544_v7 = vld [vmem:[%s9138_s21 + $0x40] sm:$0xff] }
 0x472   : > { %v9919_v52 = vadd.f32 %v2919_v11, %v2918_v10  ;;  %v10028_v10 = vcombine.high %v3548_v50, %v3550_v4  ;;  %v10030_v11 = vcombine.low %v3549_v51, %v3551_v53  ;;  %v2929_v50 = vld [vmem:[#allocation2 + $0x118] sm:$0xff] }
 0x473   : > { %3415 = vmatpush1.bf16.msra.mxu0 %v11189_v13  ;;  %3456 = vmatpush1.bf16.msra.mxu1 %v11190_v8  ;;  %v3546_v13 = vld [vmem:[%s9138_s21 + $0x60] sm:$0xff]  ;;  %v3545_v8 = vld [vmem:[%s9138_s21 + $0x48] sm:$0xff] }
 0x474   : > { %8326 = vtanh.f32 %v9919_v52  ;;  %3416 = vmatprep.subr.bf16.mxu0 %v11191_v12  ;;  %3457 = vmatprep.subr.bf16.mxu1 %v11192_v18  ;;  %v10041_v12 = vcombine.high %v3544_v7, %v3546_v13  ;;  %v3547_v18 = vld [vmem:[%s9138_s21 + $0x68] sm:$0xff] }
 0x475   : > { %v10046_v28 = vcombine.low %v3545_v8, %v3547_v18 }
 0x477   : > { %3417 = vmatpush1.bf16.msra.mxu0 %v9807_v5  ;;  %3458 = vmatpush1.bf16.msra.mxu1 %v9811_v26  ;;  %v2917_v5 = vadd.f32 0.5, %v2916_v20  ;;  %v3540_v20 = vld [vmem:[%s9138_s21] sm:$0xff] }
 0x478   : > { %3418 = vmatprep.subr.bf16.mxu0 %v9813_v14  ;;  %3459 = vmatprep.subr.bf16.mxu1 %v11193_v27  ;;  %v10044_v27 = vcombine.low %v3544_v7, %v3546_v13 }
 0x47b   : > { %3419 = vmatpush1.bf16.msra.mxu0 %v11194_v19  ;;  %3460 = vmatpush1.bf16.msra.mxu1 %v9827_v22  ;;  %v3568_v22 = vld [vmem:[%s9138_s21 + $0x1c0] sm:$0xff]  ;;  %v10048_v19 = vcombine.high %v3545_v8, %v3547_v18  ;;  %v2930_v18 = vld [vmem:[#allocation2 + $0x98] sm:$0xff] }
 0x47c   : > { %3420 = vmatprep.subr.bf16.mxu0 %v9829_v9  ;;  %3461 = vmatprep.subr.bf16.mxu1 %v9832_v43  ;;  %v3570_v9 = vld [vmem:[%s9138_s21 + $0x1e0] sm:$0xff] }
 0x47f   : > { %3421 = vmatpush1.bf16.msra.mxu0 %v9839_v49  ;;  %3462 = vmatpush1.bf16.msra.mxu1 %v9843_v60  ;;  %v3569_v49 = vld [vmem:[%s9138_s21 + $0x1c8] sm:$0xff]  ;;  %v9945_v60 = vcombine.high %v3568_v22, %v3570_v9 }
 0x480   : > { %3422 = vmatprep.subr.bf16.mxu0 %v9845_v61  ;;  %3463 = vmatprep.subr.bf16.mxu1 %v9848_v63  ;;  %v9948_v61 = vcombine.low %v3568_v22, %v3570_v9 }
 0x481   : > { %v8327_v26 = vpop.eup %8326 }
 0x482   : > { %v2922_v14 = vmul.f32 %v8327_v26, %v2917_v5  ;;  %v3542_v5 = vld [vmem:[%s9138_s21 + $0x20] sm:$0xff]  ;;  %v3541_v26 = vld [vmem:[%s9138_s21 + $0x8] sm:$0xff] }
 0x483   : > { %3423 = vmatpush1.bf16.msra.mxu0 %v9851_v58  ;;  %3464 = vmatpush1.bf16.msra.mxu1 %v9857_v39  ;;  %v3571_v58 = vld [vmem:[%s9138_s21 + $0x1e8] sm:$0xff]  ;;  %v10060_v22 = vcombine.low %v3540_v20, %v3542_v5 }
 0x484   : > { %2925 = vst [vmem:[#allocation3 + $0x28] sm:$0xff] %v2922_v14  ;;  %v3215_v43 = vpack.c.bf16 %v2922_v14, %v2922_v14  ;;  %v9950_v63 = vcombine.low %v3569_v49, %v3571_v58  ;;  %v9952_v39 = vcombine.high %v3569_v49, %v3571_v58  ;;  %3732 = vmatprep.subr.bf16.mxu0 %v9945_v60  ;;  %v3852_v58 = vld [vmem:[%s9138_s21 + $0x1d0] sm:$0xff] }
 0x485   : > { %v10057_v14 = vcombine.high %v3540_v20, %v3542_v5  ;;  %v10073_v16 = vcombine.high %v3852_v58, %v3854_v21  ;;  %v10076_v35 = vcombine.low %v3852_v58, %v3854_v21 }
 0x486   : > { %3441 = vmatmul.mubr.bf16.vlgmr.msra.gmra.mxu0 %v3215_v43  ;;  %3482 = vmatmul.mubr.bf16.vlgmr.msra.gmra.mxu1 %v3215_v43  ;;  %v3543_v43 = vld [vmem:[%s9138_s21 + $0x28] sm:$0xff] }
 0x487   : > { %3764 = vmatprep.mubr.bf16.mxu0 %v11186_v30  ;;  %3805 = vmatprep.mubr.bf16.mxu1 %v11186_v30  ;;  %v10062_v9 = vcombine.low %v3541_v26, %v3543_v43  ;;  %v10064_v49 = vcombine.high %v3541_v26, %v3543_v43 }
 0x488   : > { %3773 = vmatprep.subr.bf16.mxu1 %v9952_v39  ;;  %3733 = vmatpush1.bf16.msra.mxu0 %v9948_v61 }
 0x489   : > { %3774 = vmatpush1.bf16.msra.mxu1 %v9950_v63  ;;  %3734 = vmatprep.subr.bf16.mxu0 %v9961_v32 }
 0x48a   : > { %3775 = vmatprep.subr.bf16.mxu1 %v9968_v37 }
 0x48c   : > { %3735 = vmatpush1.bf16.msra.mxu0 %v9964_v38 }
 0x48d   : > { %3776 = vmatpush1.bf16.msra.mxu1 %v9966_v17  ;;  %3736 = vmatprep.subr.bf16.mxu0 %v9977_v25 }
 0x48e   : > { %3777 = vmatprep.subr.bf16.mxu1 %v9984_v15 }
 0x490   : > { %3737 = vmatpush1.bf16.msra.mxu0 %v9980_v29 }
 0x491   : > { %3778 = vmatpush1.bf16.msra.mxu1 %v9982_v24  ;;  %3738 = vmatprep.subr.bf16.mxu0 %v9993_v0 }
 0x492   : > { %3779 = vmatprep.subr.bf16.mxu1 %v10000_v47 }
 0x494   : > { %3739 = vmatpush1.bf16.msra.mxu0 %v9996_v45 }
 0x495   : > { %3780 = vmatpush1.bf16.msra.mxu1 %v9998_v46  ;;  %3740 = vmatprep.subr.bf16.mxu0 %v10009_v56 }
 0x496   : > { %3781 = vmatprep.subr.bf16.mxu1 %v10016_v3 }
 0x498   : > { %3741 = vmatpush1.bf16.msra.mxu0 %v10012_v1 }
 0x499   : > { %3782 = vmatpush1.bf16.msra.mxu1 %v10014_v2  ;;  %3742 = vmatprep.subr.bf16.mxu0 %v10028_v10 }
 0x49a   : > { %3783 = vmatprep.subr.bf16.mxu1 %v10032_v6 }
 0x49c   : > { %3743 = vmatpush1.bf16.msra.mxu0 %v10026_v59 }
 0x49d   : > { %3784 = vmatpush1.bf16.msra.mxu1 %v10030_v11  ;;  %3744 = vmatprep.subr.bf16.mxu0 %v10041_v12 }
 0x49e   : > { %3785 = vmatprep.subr.bf16.mxu1 %v10048_v19 }
 0x4a0   : > { %3745 = vmatpush1.bf16.msra.mxu0 %v10044_v27 }
 0x4a1   : > { %3786 = vmatpush1.bf16.msra.mxu1 %v10046_v28  ;;  %3746 = vmatprep.subr.bf16.mxu0 %v10057_v14 }
 0x4a2   : > { %3787 = vmatprep.subr.bf16.mxu1 %v10064_v49 }
 0x4a4   : > { %3747 = vmatpush1.bf16.msra.mxu0 %v10060_v22 }
 0x4a5   : > { %3788 = vmatpush1.bf16.msra.mxu1 %v10062_v9  ;;  %4016 = vmatprep.subr.bf16.mxu0 %v10073_v16 }
 0x4a6   : > { %4057 = vmatprep.subr.bf16.mxu1 %v10080_v42 }
 0x526   : > { %v3158_v62 = vpop.f32.mrf.mxu0  ;;  %v3199_v40 = vpop.f32.mrf.mxu1 }
 0x527   : > { %v3206_v41 = vadd.f32 %v3158_v62, %v2927_v44  ;;  %v3208_v8 = vadd.f32 %v3199_v40, %v2929_v50  ;;  %v3211_v40 = vld [vmem:[#allocation2 + $0x170] sm:$0xff] }
 0x528   : > { %v3160_v48 = vpop.f32.mrf.mxu0  ;;  %v3201_v54 = vpop.f32.mrf.mxu1 }
 0x529   : > { %v3494_v55 = vmul.f32 0.5, %v3206_v41  ;;  %v3207_v57 = vadd.f32 %v3160_v48, %v2928_v33  ;;  %v3209_v20 = vadd.f32 %v3201_v54, %v2930_v18  ;;  %v3212_v54 = vld [vmem:[#allocation2 + $0x178] sm:$0xff] }
 0x52a   : > { %v3162_v4 = vpop.f32.mrf.mxu0  ;;  %v3203_v51 = vpop.f32.mrf.mxu1 }
 0x52b   : > { %8328 = vtanh.f32 %v3494_v55  ;;  %v3498_v53 = vmul.f32 0.5, %v3207_v57  ;;  %v3503_v5 = vmul.f32 0.5, %v3209_v20 }
 0x52c   : > { %v3163_v7 = vpop.f32.mrf.mxu0  ;;  %v3204_v13 = vpop.f32.mrf.mxu1 }
 0x52d   : > { %8330 = vtanh.f32 %v3498_v53  ;;  %v3213_v13 = vld [vmem:[#allocation2 + $0x68] sm:$0xff] }
 0x52e   : > { %8332 = vtanh.f32 %v3208_v8 }
 0x52f   : > { %8334 = vtanh.f32 %v3503_v5 }
 0x538   : > { %v8329_v26 = vpop.eup %8328 }
 0x539   : > { %v3496_v43 = vmul.f32 0.5, %v8329_v26 }
 0x53a   : > { %v8331_v58 = vpop.eup %8330 }
 0x53b   : > { %v3497_v21 = vadd.f32 0.5, %v3496_v43  ;;  %v3500_v36 = vmul.f32 0.5, %v8331_v58  ;;  %v8333_v44 = vpop.eup %8332 }
 0x53c   : > { %v8335_v50 = vpop.eup %8334 }
 0x53d   : > { %v3501_v31 = vadd.f32 0.5, %v3500_v36  ;;  %v3508_v33 = vmul.f32 %v8333_v44, %v3497_v21  ;;  %v3505_v18 = vmul.f32 0.5, %v8335_v50  ;;  %v3214_v21 = vld [vmem:[#allocation2 + $0x190] sm:$0xff] }
 0x53e   : > { %v3848_v36 = vld [vmem:[%s9138_s21 + $0x190] sm:$0xff] }
 0x53f   : > { %v3507_v62 = vmul.f32 %v3501_v31, %v9900_v34  ;;  %v3506_v58 = vadd.f32 0.5, %v3505_v18  ;;  %v3850_v44 = vld [vmem:[%s9138_s21 + $0x1b0] sm:$0xff] }
 0x540   : > { %v3844_v50 = vld [vmem:[%s9138_s21 + $0x150] sm:$0xff] }
 0x541   : > { %v10085_v41 = vadd.f32 %v3508_v33, %v3507_v62  ;;  %v3849_v62 = vld [vmem:[%s9138_s21 + $0x198] sm:$0xff] }
 0x542   : > { %v3851_v33 = vld [vmem:[%s9138_s21 + $0x1b8] sm:$0xff] }
 0x543   : > { %8336 = vtanh.f32 %v10085_v41 }
 0x546   : > { %v3442_v48 = vpop.f32.mrf.mxu0  ;;  %v3483_v55 = vpop.f32.mrf.mxu1 }
 0x547   : > { %v3490_v57 = vadd.f32 %v3442_v48, %v3211_v40  ;;  %v3492_v43 = vadd.f32 %v3483_v55, %v3213_v13  ;;  %v10094_v55 = vcombine.high %v3849_v62, %v3851_v33  ;;  %v10104_v13 = vcombine.low %v3849_v62, %v3851_v33 }
 0x548   : > { %v3444_v4 = vpop.f32.mrf.mxu0  ;;  %v3485_v51 = vpop.f32.mrf.mxu1 }
 0x549   : > { %v3512_v53 = vmul.f32 0.5, %v3490_v57  ;;  %v3491_v7 = vadd.f32 %v3444_v4, %v3212_v54  ;;  %v3493_v48 = vadd.f32 %v3485_v51, %v3214_v21  ;;  %v10092_v57 = vcombine.high %v3848_v36, %v3850_v44  ;;  %v3846_v4 = vld [vmem:[%s9138_s21 + $0x170] sm:$0xff]  ;;  %11195 = vst [vmem:[#allocation28_spill] sm:$0xff] %v10104_v13 }
 0x54a   : > { %v3446_v34 = vpop.f32.mrf.mxu0  ;;  %v3487_v8 = vpop.f32.mrf.mxu1  ;;  %v10102_v51 = vcombine.low %v3848_v36, %v3850_v44 }
 0x54b   : > { %8338 = vtanh.f32 %v3512_v53  ;;  %v3516_v20 = vmul.f32 0.5, %v3491_v7  ;;  %v3845_v53 = vld [vmem:[%s9138_s21 + $0x158] sm:$0xff]  ;;  %v3521_v34 = vmul.f32 0.5, %v3493_v48  ;;  %v10108_v8 = vcombine.high %v3844_v50, %v3846_v4 }
 0x54c   : > { %v3447_v5 = vpop.f32.mrf.mxu0  ;;  %v3488_v26 = vpop.f32.mrf.mxu1  ;;  %v3847_v7 = vld [vmem:[%s9138_s21 + $0x178] sm:$0xff] }
 0x54d   : > { %8340 = vtanh.f32 %v3516_v20  ;;  %v10110_v18 = vcombine.high %v3845_v53, %v3847_v7  ;;  %v3840_v20 = vld [vmem:[%s9138_s21 + $0x110] sm:$0xff]  ;;  %v10122_v44 = vcombine.low %v3845_v53, %v3847_v7 }
 0x54e   : > { %8342 = vtanh.f32 %v3492_v43  ;;  %v3842_v5 = vld [vmem:[%s9138_s21 + $0x130] sm:$0xff]  ;;  %v3841_v43 = vld [vmem:[%s9138_s21 + $0x118] sm:$0xff] }
 0x54f   : > { %11196 = vst [vmem:[#allocation29_spill] sm:$0xff] %v10110_v18  ;;  %11198 = vst [vmem:[#allocation31_spill] sm:$0xff] %v10122_v44  ;;  %v10124_v62 = vcombine.high %v3840_v20, %v3842_v5  ;;  %8344 = vtanh.f32 %v3521_v34  ;;  %v10136_v7 = vcombine.low %v3840_v20, %v3842_v5  ;;  %v3833_v20 = vld [vmem:[%s9138_s21 + $0x98] sm:$0xff] }
 0x550   : > { %v8337_v31 = vpop.eup %8336  ;;  %v3835_v5 = vld [vmem:[%s9138_s21 + $0xb8] sm:$0xff] }
 0x551   : > { %v3511_v40 = vmul.f32 %v8337_v31, %v3506_v58  ;;  %v3843_v58 = vld [vmem:[%s9138_s21 + $0x138] sm:$0xff]  ;;  %v10120_v31 = vcombine.low %v3844_v50, %v3846_v4  ;;  %11199 = vst [vmem:[#allocation32_spill] sm:$0xff] %v10124_v62  ;;  %11201 = vst [vmem:[#allocation34_spill] sm:$0xff] %v10136_v7 }
 0x552   : > { %v10128_v48 = vcombine.high %v3841_v43, %v3843_v58  ;;  %v3839_v50 = vld [vmem:[%s9138_s21 + $0xf8] sm:$0xff]  ;;  %v10138_v34 = vcombine.low %v3841_v43, %v3843_v58 }
 0x553   : > { %3531 = vst [vmem:[#allocation3 + $0x70] sm:$0xff] %v3511_v40  ;;  %v3539_v54 = vpack.c.bf16 %v3511_v40, %v3511_v40  ;;  %11197 = vst [vmem:[#allocation30_spill] sm:$0xff] %v10120_v31 }
 0x554   : > { %11200 = vst [vmem:[#allocation33_spill] sm:$0xff] %v10128_v48  ;;  %11202 = vst [vmem:[#allocation35_spill] sm:$0xff] %v10138_v34 }
 0x555   : > { %3765 = vmatmul.mubr.bf16.vlgmr.msra.gmra.mxu0 %v3539_v54  ;;  %3806 = vmatmul.mubr.bf16.vlgmr.msra.gmra.mxu1 %v3539_v54  ;;  %v3836_v54 = vld [vmem:[%s9138_s21 + $0xd0] sm:$0xff] }
 0x556   : > { %4017 = vmatpush1.bf16.msra.mxu0 %v10076_v35  ;;  %4058 = vmatpush1.bf16.msra.mxu1 %v10078_v23 }
 0x557   : > { %4018 = vmatprep.subr.bf16.mxu0 %v10092_v57  ;;  %4059 = vmatprep.subr.bf16.mxu1 %v10094_v55 }
 0x558   : > { %v8339_v26 = vpop.eup %8338  ;;  %4048 = vmatprep.mubr.bf16.mxu0 %v11186_v30  ;;  %4089 = vmatprep.mubr.bf16.mxu1 %v11186_v30 }
 0x559   : > { %v3514_v21 = vmul.f32 0.5, %v8339_v26  ;;  %v3838_v26 = vld [vmem:[%s9138_s21 + $0xf0] sm:$0xff] }
 0x55a   : > { %v8341_v36 = vpop.eup %8340  ;;  %4019 = vmatpush1.bf16.msra.mxu0 %v10102_v51  ;;  %4060 = vmatpush1.bf16.msra.mxu1 %v10104_v13  ;;  %v3837_v13 = vld [vmem:[%s9138_s21 + $0xd8] sm:$0xff] }
 0x55b   : > { %v3515_v33 = vadd.f32 0.5, %v3514_v21  ;;  %v3518_v40 = vmul.f32 0.5, %v8341_v36  ;;  %4020 = vmatprep.subr.bf16.mxu0 %v10108_v8  ;;  %4061 = vmatprep.subr.bf16.mxu1 %v10110_v18  ;;  %v8343_v53 = vpop.eup %8342  ;;  %v10140_v21 = vcombine.high %v3836_v54, %v3838_v26  ;;  %v10157_v58 = vcombine.low %v3837_v13, %v3839_v50 }
 0x55d   : > { %v3519_v4 = vadd.f32 0.5, %v3518_v40  ;;  %11203 = vst [vmem:[#allocation36_spill] sm:$0xff] %v10140_v21  ;;  %v3526_v18 = vmul.f32 %v8343_v53, %v3515_v33  ;;  %v10145_v40 = vcombine.high %v3837_v13, %v3839_v50  ;;  %v3830_v53 = vld [vmem:[%s9138_s21 + $0x70] sm:$0xff]  ;;  %v10174_v50 = vcombine.low %v3833_v20, %v3835_v5 }
 0x55e   : > { %4021 = vmatpush1.bf16.msra.mxu0 %v10120_v31  ;;  %4062 = vmatpush1.bf16.msra.mxu1 %v10122_v44  ;;  %v3832_v31 = vld [vmem:[%s9138_s21 + $0x90] sm:$0xff] }
 0x55f   : > { %v3525_v36 = vmul.f32 %v3519_v4, %v9919_v52  ;;  %4022 = vmatprep.subr.bf16.mxu0 %v10124_v62  ;;  %4063 = vmatprep.subr.bf16.mxu1 %v10128_v48  ;;  %11204 = vst [vmem:[#allocation37_spill] sm:$0xff] %v10145_v40  ;;  %v3834_v44 = vld [vmem:[%s9138_s21 + $0xb0] sm:$0xff]  ;;  %v10155_v52 = vcombine.low %v3836_v54, %v3838_v26  ;;  %v3829_v54 = vld [vmem:[%s9138_s21 + $0x58] sm:$0xff]  ;;  %11207 = vst [vmem:[#allocation40_spill] sm:$0xff] %v10174_v50 }
 0x560   : > { %v10162_v33 = vcombine.high %v3832_v31, %v3834_v44  ;;  %v3828_v4 = vld [vmem:[%s9138_s21 + $0x50] sm:$0xff]  ;;  %v3831_v26 = vld [vmem:[%s9138_s21 + $0x78] sm:$0xff]  ;;  %v10172_v13 = vcombine.low %v3832_v31, %v3834_v44 }
 0x561   : > { %v10151_v43 = vadd.f32 %v3526_v18, %v3525_v36  ;;  %v10164_v18 = vcombine.high %v3833_v20, %v3835_v5  ;;  %v10178_v36 = vcombine.high %v3828_v4, %v3830_v53  ;;  %v3825_v48 = vld [vmem:[%s9138_s21 + $0x18] sm:$0xff]  ;;  %v10188_v31 = vcombine.low %v3828_v4, %v3830_v53 }
 0x562   : > { %4023 = vmatpush1.bf16.msra.mxu0 %v10136_v7  ;;  %4064 = vmatpush1.bf16.msra.mxu1 %v10138_v34  ;;  %11206 = vst [vmem:[#allocation39_spill] sm:$0xff] %v10172_v13  ;;  %v8345_v34 = vpop.eup %8344  ;;  %v3826_v7 = vld [vmem:[%s9138_s21 + $0x30] sm:$0xff]  ;;  %v3827_v62 = vld [vmem:[%s9138_s21 + $0x38] sm:$0xff]  ;;  %v10190_v44 = vcombine.low %v3829_v54, %v3831_v26 }
 0x563   : > { %8346 = vtanh.f32 %v10151_v43  ;;  %4024 = vmatprep.subr.bf16.mxu0 %v10140_v21  ;;  %4065 = vmatprep.subr.bf16.mxu1 %v10145_v40  ;;  %11205 = vst [vmem:[#allocation38_spill] sm:$0xff] %v10164_v18  ;;  %v10180_v40 = vcombine.high %v3829_v54, %v3831_v26  ;;  %v3824_v21 = vld [vmem:[%s9138_s21 + $0x10] sm:$0xff]  ;;  %v3523_v20 = vmul.f32 0.5, %v8345_v34 }
 0x564   : > { %v10194_v5 = vcombine.high %v3824_v21, %v3826_v7 }
 0x565   : > { %v3524_v4 = vadd.f32 0.5, %v3523_v20  ;;  %v3821_v20 = vld [vmem:[#allocation2 + $0x1d8] sm:$0xff] }
 0x566   : > { %4025 = vmatpush1.bf16.msra.mxu0 %v10155_v52  ;;  %4066 = vmatpush1.bf16.msra.mxu1 %v10157_v58 }
 0x567   : > { %4026 = vmatprep.subr.bf16.mxu0 %v10162_v33  ;;  %4067 = vmatprep.subr.bf16.mxu1 %v10164_v18  ;;  %v10196_v18 = vcombine.high %v3825_v48, %v3827_v62 }
 0x56a   : > { %4027 = vmatpush1.bf16.msra.mxu0 %v10172_v13  ;;  %4068 = vmatpush1.bf16.msra.mxu1 %v10174_v50  ;;  %v10200_v13 = vcombine.low %v3824_v21, %v3826_v7  ;;  %v10202_v50 = vcombine.low %v3825_v48, %v3827_v62 }
 0x56b   : > { %4028 = vmatprep.subr.bf16.mxu0 %v10178_v36  ;;  %4069 = vmatprep.subr.bf16.mxu1 %v10180_v40 }
 0x56e   : > { %4029 = vmatpush1.bf16.msra.mxu0 %v10188_v31  ;;  %4070 = vmatpush1.bf16.msra.mxu1 %v10190_v44 }
 0x56f   : > { %4030 = vmatprep.subr.bf16.mxu0 %v10194_v5  ;;  %4071 = vmatprep.subr.bf16.mxu1 %v10196_v18 }
 0x570   : > { %v8347_v34 = vpop.eup %8346 }
 0x571   : > { %v3529_v53 = vmul.f32 %v8347_v34, %v3524_v4 }
 0x572   : > { %4031 = vmatpush1.bf16.msra.mxu0 %v10200_v13  ;;  %4072 = vmatpush1.bf16.msra.mxu1 %v10202_v50 }
 0x573   : > { %3533 = vst [vmem:[#allocation3 + $0x78] sm:$0xff] %v3529_v53  ;;  %v3823_v54 = vpack.c.bf16 %v3529_v53, %v3529_v53  ;;  %4340 = vmatprep.subr.bf16.mxu0 %v9945_v60  ;;  %4381 = vmatprep.subr.bf16.mxu1 %v9952_v39  ;;  %v3535_v60 = vld [vmem:[#allocation2 + $0xe0] sm:$0xff]  ;;  %v3536_v39 = vld [vmem:[#allocation2 + $0x188] sm:$0xff] }
 0x575   : > { %4049 = vmatmul.mubr.bf16.vlgmr.msra.gmra.mxu0 %v3823_v54  ;;  %4090 = vmatmul.mubr.bf16.vlgmr.msra.gmra.mxu1 %v3823_v54 }
 0x576   : > { %4341 = vmatpush1.bf16.msra.mxu0 %v9948_v61  ;;  %4382 = vmatpush1.bf16.msra.mxu1 %v9950_v63 }
 0x577   : > { %4342 = vmatprep.subr.bf16.mxu0 %v9961_v32  ;;  %4383 = vmatprep.subr.bf16.mxu1 %v9968_v37 }
 0x578   : > { %4372 = vmatprep.mubr.bf16.mxu0 %v11186_v30  ;;  %4413 = vmatprep.mubr.bf16.mxu1 %v11186_v30 }
 0x57a   : > { %4343 = vmatpush1.bf16.msra.mxu0 %v9964_v38  ;;  %4384 = vmatpush1.bf16.msra.mxu1 %v9966_v17 }
 0x57b   : > { %4344 = vmatprep.subr.bf16.mxu0 %v9977_v25  ;;  %4385 = vmatprep.subr.bf16.mxu1 %v9984_v15 }
 0x57e   : > { %4345 = vmatpush1.bf16.msra.mxu0 %v9980_v29  ;;  %4386 = vmatpush1.bf16.msra.mxu1 %v9982_v24  ;;  %v3537_v29 = vld [vmem:[#allocation2 + $0x138] sm:$0xff] }
 0x57f   : > { %4346 = vmatprep.subr.bf16.mxu0 %v9993_v0  ;;  %4387 = vmatprep.subr.bf16.mxu1 %v10000_v47 }
 0x582   : > { %4347 = vmatpush1.bf16.msra.mxu0 %v9996_v45  ;;  %4388 = vmatpush1.bf16.msra.mxu1 %v9998_v46 }
 0x583   : > { %4348 = vmatprep.subr.bf16.mxu0 %v10009_v56  ;;  %4389 = vmatprep.subr.bf16.mxu1 %v10016_v3  ;;  %v3538_v56 = vld [vmem:[#allocation2 + $0x140] sm:$0xff] }
 0x586   : > { %4349 = vmatpush1.bf16.msra.mxu0 %v10012_v1  ;;  %4390 = vmatpush1.bf16.msra.mxu1 %v10014_v2 }
 0x587   : > { %4350 = vmatprep.subr.bf16.mxu0 %v10028_v10  ;;  %4391 = vmatprep.subr.bf16.mxu1 %v10032_v6 }
 0x58a   : > { %4351 = vmatpush1.bf16.msra.mxu0 %v10026_v59  ;;  %4392 = vmatpush1.bf16.msra.mxu1 %v10030_v11 }
 0x58b   : > { %4352 = vmatprep.subr.bf16.mxu0 %v10041_v12  ;;  %4393 = vmatprep.subr.bf16.mxu1 %v10048_v19 }
 0x58e   : > { %4353 = vmatpush1.bf16.msra.mxu0 %v10044_v27  ;;  %4394 = vmatpush1.bf16.msra.mxu1 %v10046_v28 }
 0x58f   : > { %4354 = vmatprep.subr.bf16.mxu0 %v10057_v14  ;;  %4395 = vmatprep.subr.bf16.mxu1 %v10064_v49 }
 0x592   : > { %4355 = vmatpush1.bf16.msra.mxu0 %v10060_v22  ;;  %4396 = vmatpush1.bf16.msra.mxu1 %v10062_v9  ;;  %v3819_v22 = vld [vmem:[#allocation2 + $0x70] sm:$0xff] }
 0x593   : > { %4624 = vmatprep.subr.bf16.mxu0 %v10073_v16  ;;  %4665 = vmatprep.subr.bf16.mxu1 %v10080_v42  ;;  %v3820_v16 = vld [vmem:[#allocation2 + $0x90] sm:$0xff] }
 0x615   : > { %v3766_v61 = vpop.f32.mrf.mxu0  ;;  %v3807_v63 = vpop.f32.mrf.mxu1 }
 0x616   : > { %v3814_v32 = vadd.f32 %v3766_v61, %v3535_v60  ;;  %v3816_v47 = vadd.f32 %v3807_v63, %v3537_v29 }
 0x617   : > { %v3768_v38 = vpop.f32.mrf.mxu0  ;;  %v3809_v17 = vpop.f32.mrf.mxu1 }
 0x618   : > { %v4102_v37 = vmul.f32 0.5, %v3814_v32  ;;  %v3815_v25 = vadd.f32 %v3768_v38, %v3536_v39  ;;  %v3817_v1 = vadd.f32 %v3809_v17, %v3538_v56  ;;  %v3822_v32 = vld [vmem:[#allocation2 + $0xd0] sm:$0xff] }
 0x619   : > { %v3770_v24 = vpop.f32.mrf.mxu0  ;;  %v3811_v15 = vpop.f32.mrf.mxu1 }
 0x61a   : > { %8348 = vtanh.f32 %v4102_v37  ;;  %v4106_v0 = vmul.f32 0.5, %v3815_v25  ;;  %v4111_v2 = vmul.f32 0.5, %v3817_v1 }
 0x61b   : > { %v3771_v45 = vpop.f32.mrf.mxu0  ;;  %v3812_v46 = vpop.f32.mrf.mxu1 }
 0x61c   : > { %8350 = vtanh.f32 %v4106_v0  ;;  %v11208_v0 = vld [vmem:[#allocation28_spill] sm:$0xff]  ;;  %v11210_v46 = vld [vmem:[#allocation30_spill] sm:$0xff] }
 0x61d   : > { %8352 = vtanh.f32 %v3816_v47  ;;  %v11211_v47 = vld [vmem:[#allocation31_spill] sm:$0xff] }
 0x61e   : > { %8354 = vtanh.f32 %v4111_v2  ;;  %v11212_v2 = vld [vmem:[#allocation32_spill] sm:$0xff] }
 0x627   : > { %v8349_v3 = vpop.eup %8348 }
 0x628   : > { %v4104_v59 = vmul.f32 0.5, %v8349_v3 }
 0x629   : > { %v8351_v10 = vpop.eup %8350 }
 0x62a   : > { %v4105_v11 = vadd.f32 0.5, %v4104_v59  ;;  %v4108_v6 = vmul.f32 0.5, %v8351_v10  ;;  %v8353_v27 = vpop.eup %8352  ;;  %v11214_v59 = vld [vmem:[#allocation34_spill] sm:$0xff]  ;;  %v11216_v10 = vld [vmem:[#allocation36_spill] sm:$0xff] }
 0x62b   : > { %v8355_v62 = vpop.eup %8354 }
 0x62c   : > { %v4109_v12 = vadd.f32 0.5, %v4108_v6  ;;  %v4116_v19 = vmul.f32 %v8353_v27, %v4105_v11  ;;  %v4113_v53 = vmul.f32 0.5, %v8355_v62  ;;  %v11217_v11 = vld [vmem:[#allocation37_spill] sm:$0xff]  ;;  %v11220_v27 = vld [vmem:[#allocation40_spill] sm:$0xff] }
 0x62e   : > { %v4115_v28 = vmul.f32 %v4109_v12, %v10085_v41  ;;  %v4114_v63 = vadd.f32 0.5, %v4113_v53  ;;  %v11219_v12 = vld [vmem:[#allocation39_spill] sm:$0xff] }
 0x630   : > { %v10245_v14 = vadd.f32 %v4116_v19, %v4115_v28 }
 0x632   : > { %8356 = vtanh.f32 %v10245_v14 }
 0x635   : > { %v4050_v9 = vpop.f32.mrf.mxu0  ;;  %v4091_v49 = vpop.f32.mrf.mxu1 }
 0x636   : > { %v4098_v42 = vadd.f32 %v4050_v9, %v3819_v22  ;;  %v4100_v61 = vadd.f32 %v4091_v49, %v3821_v20  ;;  %v4779_v22 = vld [vmem:[%s9138_s21 + $0x180] sm:$0xff]  ;;  %v4780_v49 = vld [vmem:[%s9138_s21 + $0x188] sm:$0xff] }
 0x637   : > { %v4052_v48 = vpop.f32.mrf.mxu0  ;;  %v4093_v7 = vpop.f32.mrf.mxu1  ;;  %v4781_v9 = vld [vmem:[%s9138_s21 + $0x1a0] sm:$0xff]  ;;  %v4776_v20 = vld [vmem:[%s9138_s21 + $0x148] sm:$0xff] }
 0x638   : > { %v4120_v21 = vmul.f32 0.5, %v4098_v42  ;;  %v4099_v26 = vadd.f32 %v4052_v48, %v3820_v16  ;;  %v4101_v17 = vadd.f32 %v4093_v7, %v3822_v32  ;;  %v10305_v16 = vcombine.high %v4779_v22, %v4781_v9  ;;  %v4782_v42 = vld [vmem:[%s9138_s21 + $0x1a8] sm:$0xff] }
 0x639   : > { %v4054_v4 = vpop.f32.mrf.mxu0  ;;  %v4095_v34 = vpop.f32.mrf.mxu1  ;;  %v10308_v62 = vcombine.low %v4779_v22, %v4781_v9  ;;  %v10310_v48 = vcombine.low %v4780_v49, %v4782_v42  ;;  %v10312_v7 = vcombine.high %v4780_v49, %v4782_v42  ;;  %v4774_v32 = vld [vmem:[%s9138_s21 + $0x128] sm:$0xff]  ;;  %v5068_v22 = vld [vmem:[%s9138_s21 + $0x1f0] sm:$0xff]  ;;  %v5067_v9 = vld [vmem:[%s9138_s21 + $0x1d8] sm:$0xff] }
 0x63a   : > { %8358 = vtanh.f32 %v4120_v21  ;;  %v4124_v41 = vmul.f32 0.5, %v4099_v26  ;;  %v4129_v25 = vmul.f32 0.5, %v4101_v17  ;;  %v4775_v21 = vld [vmem:[%s9138_s21 + $0x140] sm:$0xff]  ;;  %v4778_v34 = vld [vmem:[%s9138_s21 + $0x168] sm:$0xff]  ;;  %v5069_v42 = vld [vmem:[%s9138_s21 + $0x1f8] sm:$0xff] }
 0x63b   : > { %v4055_v54 = vpop.f32.mrf.mxu0  ;;  %v4096_v60 = vpop.f32.mrf.mxu1  ;;  %v4777_v26 = vld [vmem:[%s9138_s21 + $0x160] sm:$0xff] }
 0x63c   : > { %8360 = vtanh.f32 %v4124_v41  ;;  %v10321_v4 = vcombine.high %v4775_v21, %v4777_v26  ;;  %v10324_v53 = vcombine.low %v4775_v21, %v4777_v26  ;;  %v10326_v41 = vcombine.low %v4776_v20, %v4778_v34  ;;  %v4771_v60 = vld [vmem:[%s9138_s21 + $0x100] sm:$0xff] }
 0x63d   : > { %8362 = vtanh.f32 %v4100_v61  ;;  %v10328_v54 = vcombine.high %v4776_v20, %v4778_v34  ;;  %v4773_v61 = vld [vmem:[%s9138_s21 + $0x120] sm:$0xff]  ;;  %v10422_v26 = vcombine.low %v5067_v9, %v5069_v42  ;;  %v10424_v20 = vcombine.high %v5067_v9, %v5069_v42  ;;  %v4143_v34 = vld [vmem:[#allocation2 + $0x1e8] sm:$0xff] }
 0x63e   : > { %8364 = vtanh.f32 %v4129_v25  ;;  %v4767_v25 = vld [vmem:[%s9138_s21 + $0xc0] sm:$0xff] }
 0x63f   : > { %v8357_v39 = vpop.eup %8356 }
 0x640   : > { %v4119_v38 = vmul.f32 %v8357_v39, %v4114_v63  ;;  %v4772_v63 = vld [vmem:[%s9138_s21 + $0x108] sm:$0xff]  ;;  %v10337_v39 = vcombine.high %v4771_v60, %v4773_v61 }
 0x641   : > { %v10342_v17 = vcombine.low %v4772_v63, %v4774_v32 }
 0x642   : > { %4139 = vst [vmem:[#allocation3 + $0x8] sm:$0xff] %v4119_v38  ;;  %v4147_v37 = vpack.c.bf16 %v4119_v38, %v4119_v38  ;;  %v10340_v38 = vcombine.low %v4771_v60, %v4773_v61 }
 0x644   : > { %4373 = vmatmul.mubr.bf16.vlgmr.msra.gmra.mxu0 %v4147_v37  ;;  %4414 = vmatmul.mubr.bf16.vlgmr.msra.gmra.mxu1 %v4147_v37  ;;  %v10344_v37 = vcombine.high %v4772_v63, %v4774_v32  ;;  %v4144_v63 = vld [vmem:[#allocation2 + $0xf8] sm:$0xff] }
 0x645   : > { %4625 = vmatpush1.bf16.msra.mxu0 %v10076_v35  ;;  %4666 = vmatpush1.bf16.msra.mxu1 %v10078_v23  ;;  %v11209_v23 = vld [vmem:[#allocation29_spill] sm:$0xff] }
 0x646   : > { %4626 = vmatprep.subr.bf16.mxu0 %v10092_v57  ;;  %4667 = vmatprep.subr.bf16.mxu1 %v10094_v55 }
 0x647   : > { %v8359_v29 = vpop.eup %8358  ;;  %4656 = vmatprep.mubr.bf16.mxu0 %v11186_v30  ;;  %4697 = vmatprep.mubr.bf16.mxu1 %v11186_v30 }
 0x648   : > { %v4122_v24 = vmul.f32 0.5, %v8359_v29  ;;  %v4769_v29 = vld [vmem:[%s9138_s21 + $0xe0] sm:$0xff] }
 0x649   : > { %v8361_v15 = vpop.eup %8360  ;;  %4627 = vmatpush1.bf16.msra.mxu0 %v10102_v51  ;;  %4668 = vmatpush1.bf16.msra.mxu1 %v11208_v0  ;;  %v11213_v51 = vld [vmem:[#allocation33_spill] sm:$0xff]  ;;  %v4770_v0 = vld [vmem:[%s9138_s21 + $0xe8] sm:$0xff] }
 0x64a   : > { %v4123_v45 = vadd.f32 0.5, %v4122_v24  ;;  %v4126_v35 = vmul.f32 0.5, %v8361_v15  ;;  %4628 = vmatprep.subr.bf16.mxu0 %v10108_v8  ;;  %4669 = vmatprep.subr.bf16.mxu1 %v11209_v23  ;;  %v8363_v55 = vpop.eup %8362  ;;  %v11215_v8 = vld [vmem:[#allocation35_spill] sm:$0xff]  ;;  %v10353_v15 = vcombine.high %v4767_v25, %v4769_v29 }
 0x64b   : > { %v8365_v6 = vpop.eup %8364  ;;  %v4768_v24 = vld [vmem:[%s9138_s21 + $0xc8] sm:$0xff] }
 0x64c   : > { %v4127_v57 = vadd.f32 0.5, %v4126_v35  ;;  %v4134_v1 = vmul.f32 %v8363_v55, %v4123_v45  ;;  %v4131_v28 = vmul.f32 0.5, %v8365_v6  ;;  %v10356_v45 = vcombine.low %v4767_v25, %v4769_v29  ;;  %v4765_v55 = vld [vmem:[%s9138_s21 + $0xa0] sm:$0xff] }
 0x64d   : > { %4629 = vmatpush1.bf16.msra.mxu0 %v11210_v46  ;;  %4670 = vmatpush1.bf16.msra.mxu1 %v11211_v47  ;;  %v10358_v35 = vcombine.low %v4768_v24, %v4770_v0  ;;  %v10360_v23 = vcombine.high %v4768_v24, %v4770_v0  ;;  %v4764_v46 = vld [vmem:[%s9138_s21 + $0x88] sm:$0xff] }
 0x64e   : > { %v4133_v56 = vmul.f32 %v4127_v57, %v10151_v43  ;;  %4630 = vmatprep.subr.bf16.mxu0 %v11212_v2  ;;  %4671 = vmatprep.subr.bf16.mxu1 %v11213_v51  ;;  %v11218_v43 = vld [vmem:[#allocation38_spill] sm:$0xff]  ;;  %v4766_v47 = vld [vmem:[%s9138_s21 + $0xa8] sm:$0xff] }
 0x64f   : > { %v4763_v57 = vld [vmem:[%s9138_s21 + $0x80] sm:$0xff]  ;;  %v10374_v2 = vcombine.low %v4764_v46, %v4766_v47  ;;  %v10376_v51 = vcombine.high %v4764_v46, %v4766_v47 }
 0x650   : > { %v10263_v3 = vadd.f32 %v4134_v1, %v4133_v56  ;;  %v10370_v56 = vcombine.low %v4763_v57, %v4765_v55  ;;  %v10372_v1 = vcombine.high %v4763_v57, %v4765_v55  ;;  %v4145_v57 = vld [vmem:[#allocation2 + $0x160] sm:$0xff] }
 0x651   : > { %4631 = vmatpush1.bf16.msra.mxu0 %v11214_v59  ;;  %4672 = vmatpush1.bf16.msra.mxu1 %v11215_v8  ;;  %v4759_v59 = vld [vmem:[%s9138_s21 + $0x40] sm:$0xff] }
 0x652   : > { %8366 = vtanh.f32 %v10263_v3  ;;  %4632 = vmatprep.subr.bf16.mxu0 %v11216_v10  ;;  %4673 = vmatprep.subr.bf16.mxu1 %v11217_v11  ;;  %v4761_v8 = vld [vmem:[%s9138_s21 + $0x60] sm:$0xff]  ;;  %v4760_v10 = vld [vmem:[%s9138_s21 + $0x48] sm:$0xff] }
 0x653   : > { %v10385_v11 = vcombine.high %v4759_v59, %v4761_v8  ;;  %v10388_v6 = vcombine.low %v4759_v59, %v4761_v8 }
 0x655   : > { %4633 = vmatpush1.bf16.msra.mxu0 %v10155_v52  ;;  %4674 = vmatpush1.bf16.msra.mxu1 %v10157_v58  ;;  %v4132_v52 = vadd.f32 0.5, %v4131_v28  ;;  %v4755_v28 = vld [vmem:[%s9138_s21] sm:$0xff] }
 0x656   : > { %4634 = vmatprep.subr.bf16.mxu0 %v10162_v33  ;;  %4675 = vmatprep.subr.bf16.mxu1 %v11218_v43  ;;  %v4762_v43 = vld [vmem:[%s9138_s21 + $0x68] sm:$0xff] }
 0x659   : > { %4635 = vmatpush1.bf16.msra.mxu0 %v11219_v12  ;;  %4676 = vmatpush1.bf16.msra.mxu1 %v11220_v27  ;;  %v10390_v12 = vcombine.low %v4760_v10, %v4762_v43  ;;  %v10392_v27 = vcombine.high %v4760_v10, %v4762_v43  ;;  %v4146_v43 = vld [vmem:[#allocation2 + $0x30] sm:$0xff] }
 0x65a   : > { %4636 = vmatprep.subr.bf16.mxu0 %v10178_v36  ;;  %4677 = vmatprep.subr.bf16.mxu1 %v10180_v40  ;;  %v4783_v36 = vld [vmem:[%s9138_s21 + $0x1c0] sm:$0xff] }
 0x65d   : > { %4637 = vmatpush1.bf16.msra.mxu0 %v10188_v31  ;;  %4678 = vmatpush1.bf16.msra.mxu1 %v10190_v44  ;;  %v4784_v31 = vld [vmem:[%s9138_s21 + $0x1c8] sm:$0xff] }
 0x65e   : > { %4638 = vmatprep.subr.bf16.mxu0 %v10194_v5  ;;  %4679 = vmatprep.subr.bf16.mxu1 %v10196_v18  ;;  %v4785_v18 = vld [vmem:[%s9138_s21 + $0x1e0] sm:$0xff] }
 0x65f   : > { %v8367_v58 = vpop.eup %8366  ;;  %v10289_v44 = vcombine.high %v4783_v36, %v4785_v18  ;;  %v10292_v5 = vcombine.low %v4783_v36, %v4785_v18 }
 0x660   : > { %v4137_v33 = vmul.f32 %v8367_v58, %v4132_v52  ;;  %v4757_v52 = vld [vmem:[%s9138_s21 + $0x20] sm:$0xff]  ;;  %v4756_v58 = vld [vmem:[%s9138_s21 + $0x8] sm:$0xff] }
 0x661   : > { %4639 = vmatpush1.bf16.msra.mxu0 %v10200_v13  ;;  %4680 = vmatpush1.bf16.msra.mxu1 %v10202_v50  ;;  %v4786_v13 = vld [vmem:[%s9138_s21 + $0x1e8] sm:$0xff]  ;;  %v10404_v36 = vcombine.low %v4755_v28, %v4757_v52 }
 0x662   : > { %4141 = vst [vmem:[#allocation3 + $0x40] sm:$0xff] %v4137_v33  ;;  %v4431_v40 = vpack.c.bf16 %v4137_v33, %v4137_v33  ;;  %v10294_v50 = vcombine.low %v4784_v31, %v4786_v13  ;;  %v10296_v19 = vcombine.high %v4784_v31, %v4786_v13  ;;  %4947 = vmatprep.subr.bf16.mxu0 %v10289_v44  ;;  %v5066_v13 = vld [vmem:[%s9138_s21 + $0x1d0] sm:$0xff] }
 0x663   : > { %v10401_v33 = vcombine.high %v4755_v28, %v4757_v52  ;;  %v10417_v49 = vcombine.high %v5066_v13, %v5068_v22  ;;  %v10420_v21 = vcombine.low %v5066_v13, %v5068_v22 }
 0x664   : > { %4657 = vmatmul.mubr.bf16.vlgmr.msra.gmra.mxu0 %v4431_v40  ;;  %4698 = vmatmul.mubr.bf16.vlgmr.msra.gmra.mxu1 %v4431_v40  ;;  %v4758_v40 = vld [vmem:[%s9138_s21 + $0x28] sm:$0xff] }
 0x665   : > { %4979 = vmatprep.mubr.bf16.mxu0 %v11186_v30  ;;  %5020 = vmatprep.mubr.bf16.mxu1 %v11186_v30  ;;  %v10406_v18 = vcombine.low %v4756_v58, %v4758_v40  ;;  %v10408_v31 = vcombine.high %v4756_v58, %v4758_v40 }
 0x666   : > { %4988 = vmatprep.subr.bf16.mxu1 %v10296_v19  ;;  %4948 = vmatpush1.bf16.msra.mxu0 %v10292_v5 }
 0x667   : > { %4989 = vmatpush1.bf16.msra.mxu1 %v10294_v50  ;;  %4949 = vmatprep.subr.bf16.mxu0 %v10305_v16 }
 0x668   : > { %4990 = vmatprep.subr.bf16.mxu1 %v10312_v7 }
 0x66a   : > { %4950 = vmatpush1.bf16.msra.mxu0 %v10308_v62 }
 0x66b   : > { %4991 = vmatpush1.bf16.msra.mxu1 %v10310_v48  ;;  %4951 = vmatprep.subr.bf16.mxu0 %v10321_v4 }
 0x66c   : > { %4992 = vmatprep.subr.bf16.mxu1 %v10328_v54 }
 0x66e   : > { %4952 = vmatpush1.bf16.msra.mxu0 %v10324_v53 }
 0x66f   : > { %4993 = vmatpush1.bf16.msra.mxu1 %v10326_v41  ;;  %4953 = vmatprep.subr.bf16.mxu0 %v10337_v39 }
 0x670   : > { %4994 = vmatprep.subr.bf16.mxu1 %v10344_v37 }
 0x672   : > { %4954 = vmatpush1.bf16.msra.mxu0 %v10340_v38 }
 0x673   : > { %4995 = vmatpush1.bf16.msra.mxu1 %v10342_v17  ;;  %4955 = vmatprep.subr.bf16.mxu0 %v10353_v15 }
 0x674   : > { %4996 = vmatprep.subr.bf16.mxu1 %v10360_v23 }
 0x676   : > { %4956 = vmatpush1.bf16.msra.mxu0 %v10356_v45 }
 0x677   : > { %4997 = vmatpush1.bf16.msra.mxu1 %v10358_v35  ;;  %4957 = vmatprep.subr.bf16.mxu0 %v10372_v1 }
 0x678   : > { %4998 = vmatprep.subr.bf16.mxu1 %v10376_v51 }
 0x67a   : > { %4958 = vmatpush1.bf16.msra.mxu0 %v10370_v56 }
 0x67b   : > { %4999 = vmatpush1.bf16.msra.mxu1 %v10374_v2  ;;  %4959 = vmatprep.subr.bf16.mxu0 %v10385_v11 }
 0x67c   : > { %5000 = vmatprep.subr.bf16.mxu1 %v10392_v27 }
 0x67e   : > { %4960 = vmatpush1.bf16.msra.mxu0 %v10388_v6 }
 0x67f   : > { %5001 = vmatpush1.bf16.msra.mxu1 %v10390_v12  ;;  %4961 = vmatprep.subr.bf16.mxu0 %v10401_v33 }
 0x680   : > { %5002 = vmatprep.subr.bf16.mxu1 %v10408_v31 }
 0x682   : > { %4962 = vmatpush1.bf16.msra.mxu0 %v10404_v36 }
 0x683   : > { %5003 = vmatpush1.bf16.msra.mxu1 %v10406_v18  ;;  %5230 = vmatprep.subr.bf16.mxu0 %v10417_v49 }
 0x684   : > { %5271 = vmatprep.subr.bf16.mxu1 %v10424_v20 }
 0x704   : > { %v4374_v60 = vpop.f32.mrf.mxu0  ;;  %v4415_v61 = vpop.f32.mrf.mxu1 }
 0x705   : > { %v4422_v32 = vadd.f32 %v4374_v60, %v4143_v34  ;;  %v4424_v10 = vadd.f32 %v4415_v61, %v4145_v57  ;;  %v4427_v61 = vld [vmem:[#allocation2 + $0x40] sm:$0xff] }
 0x706   : > { %v4376_v25 = vpop.f32.mrf.mxu0  ;;  %v4417_v29 = vpop.f32.mrf.mxu1 }
 0x707   : > { %v4710_v24 = vmul.f32 0.5, %v4422_v32  ;;  %v4423_v0 = vadd.f32 %v4376_v25, %v4144_v63  ;;  %v4425_v28 = vadd.f32 %v4417_v29, %v4146_v43  ;;  %v4428_v29 = vld [vmem:[#allocation2 + $0x1f8] sm:$0xff] }
 0x708   : > { %v4378_v55 = vpop.f32.mrf.mxu0  ;;  %v4419_v46 = vpop.f32.mrf.mxu1 }
 0x709   : > { %8368 = vtanh.f32 %v4710_v24  ;;  %v4714_v47 = vmul.f32 0.5, %v4423_v0  ;;  %v4719_v52 = vmul.f32 0.5, %v4425_v28 }
 0x70a   : > { %v4379_v59 = vpop.f32.mrf.mxu0  ;;  %v4420_v8 = vpop.f32.mrf.mxu1 }
 0x70b   : > { %8370 = vtanh.f32 %v4714_v47  ;;  %v4429_v8 = vld [vmem:[#allocation2 + $0x20] sm:$0xff] }
 0x70c   : > { %8372 = vtanh.f32 %v4424_v10 }
 0x70d   : > { %8374 = vtanh.f32 %v4719_v52 }
 0x716   : > { %v8369_v58 = vpop.eup %8368 }
 0x717   : > { %v4712_v40 = vmul.f32 0.5, %v8369_v58 }
 0x718   : > { %v8371_v13 = vpop.eup %8370 }
 0x719   : > { %v4713_v22 = vadd.f32 0.5, %v4712_v40  ;;  %v4716_v9 = vmul.f32 0.5, %v8371_v13  ;;  %v8373_v34 = vpop.eup %8372 }
 0x71a   : > { %v8375_v57 = vpop.eup %8374 }
 0x71b   : > { %v4717_v42 = vadd.f32 0.5, %v4716_v9  ;;  %v4724_v63 = vmul.f32 %v8373_v34, %v4713_v22  ;;  %v4721_v43 = vmul.f32 0.5, %v8375_v57  ;;  %v4430_v22 = vld [vmem:[#allocation2 + $0x128] sm:$0xff]  ;;  %v5062_v9 = vld [vmem:[%s9138_s21 + $0x190] sm:$0xff] }
 0x71c   : > { %v5064_v34 = vld [vmem:[%s9138_s21 + $0x1b0] sm:$0xff] }
 0x71d   : > { %v4723_v60 = vmul.f32 %v4717_v42, %v10245_v14  ;;  %v4722_v13 = vadd.f32 0.5, %v4721_v43  ;;  %v5058_v57 = vld [vmem:[%s9138_s21 + $0x150] sm:$0xff] }
 0x71f   : > { %v10429_v32 = vadd.f32 %v4724_v63, %v4723_v60  ;;  %v5063_v60 = vld [vmem:[%s9138_s21 + $0x198] sm:$0xff] }
 0x720   : > { %v5065_v63 = vld [vmem:[%s9138_s21 + $0x1b8] sm:$0xff] }
 0x721   : > { %8376 = vtanh.f32 %v10429_v32 }
 0x724   : > { %v4658_v25 = vpop.f32.mrf.mxu0  ;;  %v4699_v24 = vpop.f32.mrf.mxu1 }
 0x725   : > { %v4706_v0 = vadd.f32 %v4658_v25, %v4427_v61  ;;  %v4708_v40 = vadd.f32 %v4699_v24, %v4429_v8  ;;  %v10438_v24 = vcombine.high %v5063_v60, %v5065_v63  ;;  %v10448_v8 = vcombine.low %v5063_v60, %v5065_v63 }
 0x726   : > { %v4660_v55 = vpop.f32.mrf.mxu0  ;;  %v4701_v46 = vpop.f32.mrf.mxu1 }
 0x727   : > { %v4728_v47 = vmul.f32 0.5, %v4706_v0  ;;  %v4707_v59 = vadd.f32 %v4660_v55, %v4428_v29  ;;  %v4709_v25 = vadd.f32 %v4701_v46, %v4430_v22  ;;  %v10436_v0 = vcombine.high %v5062_v9, %v5064_v34  ;;  %v5060_v55 = vld [vmem:[%s9138_s21 + $0x170] sm:$0xff]  ;;  %11221 = vst [vmem:[#allocation28_spill] sm:$0xff] %v10448_v8 }
 0x728   : > { %v4662_v14 = vpop.f32.mrf.mxu0  ;;  %v4703_v10 = vpop.f32.mrf.mxu1  ;;  %v10446_v46 = vcombine.low %v5062_v9, %v5064_v34 }
 0x729   : > { %8378 = vtanh.f32 %v4728_v47  ;;  %v4732_v28 = vmul.f32 0.5, %v4707_v59  ;;  %v5059_v47 = vld [vmem:[%s9138_s21 + $0x158] sm:$0xff]  ;;  %v4737_v14 = vmul.f32 0.5, %v4709_v25  ;;  %v10452_v10 = vcombine.high %v5058_v57, %v5060_v55 }
 0x72a   : > { %v4663_v52 = vpop.f32.mrf.mxu0  ;;  %v4704_v58 = vpop.f32.mrf.mxu1  ;;  %v5061_v59 = vld [vmem:[%s9138_s21 + $0x178] sm:$0xff] }
 0x72b   : > { %8380 = vtanh.f32 %v4732_v28  ;;  %v10454_v43 = vcombine.high %v5059_v47, %v5061_v59  ;;  %v5054_v28 = vld [vmem:[%s9138_s21 + $0x110] sm:$0xff]  ;;  %v10466_v34 = vcombine.low %v5059_v47, %v5061_v59 }
 0x72c   : > { %8382 = vtanh.f32 %v4708_v40  ;;  %v5056_v52 = vld [vmem:[%s9138_s21 + $0x130] sm:$0xff]  ;;  %v5055_v40 = vld [vmem:[%s9138_s21 + $0x118] sm:$0xff] }
 0x72d   : > { %11222 = vst [vmem:[#allocation29_spill] sm:$0xff] %v10454_v43  ;;  %11224 = vst [vmem:[#allocation31_spill] sm:$0xff] %v10466_v34  ;;  %v10468_v60 = vcombine.high %v5054_v28, %v5056_v52  ;;  %8384 = vtanh.f32 %v4737_v14  ;;  %v10480_v59 = vcombine.low %v5054_v28, %v5056_v52  ;;  %v5047_v28 = vld [vmem:[%s9138_s21 + $0x98] sm:$0xff] }
 0x72e   : > { %v8377_v42 = vpop.eup %8376  ;;  %v5049_v52 = vld [vmem:[%s9138_s21 + $0xb8] sm:$0xff] }
 0x72f   : > { %v4727_v61 = vmul.f32 %v8377_v42, %v4722_v13  ;;  %v5057_v13 = vld [vmem:[%s9138_s21 + $0x138] sm:$0xff]  ;;  %v10464_v42 = vcombine.low %v5058_v57, %v5060_v55  ;;  %11225 = vst [vmem:[#allocation32_spill] sm:$0xff] %v10468_v60  ;;  %11227 = vst [vmem:[#allocation34_spill] sm:$0xff] %v10480_v59 }
 0x730   : > { %v10472_v25 = vcombine.high %v5055_v40, %v5057_v13  ;;  %v5053_v57 = vld [vmem:[%s9138_s21 + $0xf8] sm:$0xff]  ;;  %v10482_v14 = vcombine.low %v5055_v40, %v5057_v13 }
 0x731   : > { %4747 = vst [vmem:[#allocation3 + $0x18] sm:$0xff] %v4727_v61  ;;  %v4754_v29 = vpack.c.bf16 %v4727_v61, %v4727_v61  ;;  %11223 = vst [vmem:[#allocation30_spill] sm:$0xff] %v10464_v42 }
 0x732   : > { %11226 = vst [vmem:[#allocation33_spill] sm:$0xff] %v10472_v25  ;;  %11228 = vst [vmem:[#allocation35_spill] sm:$0xff] %v10482_v14 }
 0x733   : > { %4980 = vmatmul.mubr.bf16.vlgmr.msra.gmra.mxu0 %v4754_v29  ;;  %5021 = vmatmul.mubr.bf16.vlgmr.msra.gmra.mxu1 %v4754_v29  ;;  %v5050_v29 = vld [vmem:[%s9138_s21 + $0xd0] sm:$0xff] }
 0x734   : > { %5231 = vmatpush1.bf16.msra.mxu0 %v10420_v21  ;;  %5272 = vmatpush1.bf16.msra.mxu1 %v10422_v26 }
 0x735   : > { %5232 = vmatprep.subr.bf16.mxu0 %v10436_v0  ;;  %5273 = vmatprep.subr.bf16.mxu1 %v10438_v24 }
 0x736   : > { %v8379_v58 = vpop.eup %8378  ;;  %5262 = vmatprep.mubr.bf16.mxu0 %v11186_v30  ;;  %5303 = vmatprep.mubr.bf16.mxu1 %v11186_v30 }
 0x737   : > { %v4730_v22 = vmul.f32 0.5, %v8379_v58  ;;  %v5052_v58 = vld [vmem:[%s9138_s21 + $0xf0] sm:$0xff] }
 0x738   : > { %v8381_v9 = vpop.eup %8380  ;;  %5233 = vmatpush1.bf16.msra.mxu0 %v10446_v46  ;;  %5274 = vmatpush1.bf16.msra.mxu1 %v10448_v8  ;;  %v5051_v8 = vld [vmem:[%s9138_s21 + $0xd8] sm:$0xff] }
 0x739   : > { %v4731_v63 = vadd.f32 0.5, %v4730_v22  ;;  %v4734_v61 = vmul.f32 0.5, %v8381_v9  ;;  %5234 = vmatprep.subr.bf16.mxu0 %v10452_v10  ;;  %5275 = vmatprep.subr.bf16.mxu1 %v10454_v43  ;;  %v8383_v47 = vpop.eup %8382  ;;  %v10484_v22 = vcombine.high %v5050_v29, %v5052_v58  ;;  %v10501_v13 = vcombine.low %v5051_v8, %v5053_v57 }
 0x73b   : > { %v4735_v55 = vadd.f32 0.5, %v4734_v61  ;;  %11229 = vst [vmem:[#allocation36_spill] sm:$0xff] %v10484_v22  ;;  %v4742_v43 = vmul.f32 %v8383_v47, %v4731_v63  ;;  %v10489_v61 = vcombine.high %v5051_v8, %v5053_v57  ;;  %v5044_v47 = vld [vmem:[%s9138_s21 + $0x70] sm:$0xff]  ;;  %v10518_v57 = vcombine.low %v5047_v28, %v5049_v52 }
 0x73c   : > { %5235 = vmatpush1.bf16.msra.mxu0 %v10464_v42  ;;  %5276 = vmatpush1.bf16.msra.mxu1 %v10466_v34  ;;  %v5046_v42 = vld [vmem:[%s9138_s21 + $0x90] sm:$0xff] }
 0x73d   : > { %v4741_v9 = vmul.f32 %v4735_v55, %v10263_v3  ;;  %5236 = vmatprep.subr.bf16.mxu0 %v10468_v60  ;;  %5277 = vmatprep.subr.bf16.mxu1 %v10472_v25  ;;  %11230 = vst [vmem:[#allocation37_spill] sm:$0xff] %v10489_v61  ;;  %v5048_v34 = vld [vmem:[%s9138_s21 + $0xb0] sm:$0xff]  ;;  %v10499_v3 = vcombine.low %v5050_v29, %v5052_v58  ;;  %v5043_v29 = vld [vmem:[%s9138_s21 + $0x58] sm:$0xff]  ;;  %11233 = vst [vmem:[#allocation40_spill] sm:$0xff] %v10518_v57 }
 0x73e   : > { %v10506_v63 = vcombine.high %v5046_v42, %v5048_v34  ;;  %v5042_v55 = vld [vmem:[%s9138_s21 + $0x50] sm:$0xff]  ;;  %v5045_v58 = vld [vmem:[%s9138_s21 + $0x78] sm:$0xff]  ;;  %v10516_v8 = vcombine.low %v5046_v42, %v5048_v34 }
 0x73f   : > { %v10495_v40 = vadd.f32 %v4742_v43, %v4741_v9  ;;  %v10508_v43 = vcombine.high %v5047_v28, %v5049_v52  ;;  %v10522_v9 = vcombine.high %v5042_v55, %v5044_v47  ;;  %v5039_v25 = vld [vmem:[%s9138_s21 + $0x18] sm:$0xff]  ;;  %v10532_v42 = vcombine.low %v5042_v55, %v5044_v47 }
 0x740   : > { %5237 = vmatpush1.bf16.msra.mxu0 %v10480_v59  ;;  %5278 = vmatpush1.bf16.msra.mxu1 %v10482_v14  ;;  %11232 = vst [vmem:[#allocation39_spill] sm:$0xff] %v10516_v8  ;;  %v8385_v14 = vpop.eup %8384  ;;  %v5040_v59 = vld [vmem:[%s9138_s21 + $0x30] sm:$0xff]  ;;  %v5041_v60 = vld [vmem:[%s9138_s21 + $0x38] sm:$0xff]  ;;  %v10534_v34 = vcombine.low %v5043_v29, %v5045_v58 }
 0x741   : > { %8386 = vtanh.f32 %v10495_v40  ;;  %5238 = vmatprep.subr.bf16.mxu0 %v10484_v22  ;;  %5279 = vmatprep.subr.bf16.mxu1 %v10489_v61  ;;  %11231 = vst [vmem:[#allocation38_spill] sm:$0xff] %v10508_v43  ;;  %v10524_v61 = vcombine.high %v5043_v29, %v5045_v58  ;;  %v5038_v22 = vld [vmem:[%s9138_s21 + $0x10] sm:$0xff]  ;;  %v4739_v28 = vmul.f32 0.5, %v8385_v14 }
 0x742   : > { %v10538_v52 = vcombine.high %v5038_v22, %v5040_v59 }
 0x743   : > { %v4740_v55 = vadd.f32 0.5, %v4739_v28  ;;  %v5035_v28 = vld [vmem:[#allocation2 + $0xf0] sm:$0xff] }
 0x744   : > { %5239 = vmatpush1.bf16.msra.mxu0 %v10499_v3  ;;  %5280 = vmatpush1.bf16.msra.mxu1 %v10501_v13 }
 0x745   : > { %5240 = vmatprep.subr.bf16.mxu0 %v10506_v63  ;;  %5281 = vmatprep.subr.bf16.mxu1 %v10508_v43  ;;  %v10540_v43 = vcombine.high %v5039_v25, %v5041_v60 }
 0x748   : > { %5241 = vmatpush1.bf16.msra.mxu0 %v10516_v8  ;;  %5282 = vmatpush1.bf16.msra.mxu1 %v10518_v57  ;;  %v10544_v8 = vcombine.low %v5038_v22, %v5040_v59  ;;  %v10546_v57 = vcombine.low %v5039_v25, %v5041_v60 }
 0x749   : > { %5242 = vmatprep.subr.bf16.mxu0 %v10522_v9  ;;  %5283 = vmatprep.subr.bf16.mxu1 %v10524_v61 }
 0x74c   : > { %5243 = vmatpush1.bf16.msra.mxu0 %v10532_v42  ;;  %5284 = vmatpush1.bf16.msra.mxu1 %v10534_v34 }
 0x74d   : > { %5244 = vmatprep.subr.bf16.mxu0 %v10538_v52  ;;  %5285 = vmatprep.subr.bf16.mxu1 %v10540_v43 }
 0x74e   : > { %v8387_v14 = vpop.eup %8386 }
 0x74f   : > { %v4745_v47 = vmul.f32 %v8387_v14, %v4740_v55 }
 0x750   : > { %5245 = vmatpush1.bf16.msra.mxu0 %v10544_v8  ;;  %5286 = vmatpush1.bf16.msra.mxu1 %v10546_v57 }
 0x751   : > { %4749 = vst [vmem:[#allocation3 + $0x20] sm:$0xff] %v4745_v47  ;;  %v5037_v29 = vpack.c.bf16 %v4745_v47, %v4745_v47  ;;  %5551 = vmatprep.subr.bf16.mxu0 %v10289_v44  ;;  %5592 = vmatprep.subr.bf16.mxu1 %v10296_v19  ;;  %v4750_v44 = vld [vmem:[#allocation2 + $0x148] sm:$0xff]  ;;  %v4751_v19 = vld [vmem:[#allocation2 + $0x1d0] sm:$0xff] }
 0x753   : > { %5263 = vmatmul.mubr.bf16.vlgmr.msra.gmra.mxu0 %v5037_v29  ;;  %5304 = vmatmul.mubr.bf16.vlgmr.msra.gmra.mxu1 %v5037_v29 }
 0x754   : > { %5552 = vmatpush1.bf16.msra.mxu0 %v10292_v5  ;;  %5593 = vmatpush1.bf16.msra.mxu1 %v10294_v50 }
 0x755   : > { %5553 = vmatprep.subr.bf16.mxu0 %v10305_v16  ;;  %5594 = vmatprep.subr.bf16.mxu1 %v10312_v7 }
 0x756   : > { %5583 = vmatprep.mubr.bf16.mxu0 %v11186_v30  ;;  %5624 = vmatprep.mubr.bf16.mxu1 %v11186_v30 }
 0x758   : > { %5554 = vmatpush1.bf16.msra.mxu0 %v10308_v62  ;;  %5595 = vmatpush1.bf16.msra.mxu1 %v10310_v48 }
 0x759   : > { %5555 = vmatprep.subr.bf16.mxu0 %v10321_v4  ;;  %5596 = vmatprep.subr.bf16.mxu1 %v10328_v54 }
 0x75c   : > { %5556 = vmatpush1.bf16.msra.mxu0 %v10324_v53  ;;  %5597 = vmatpush1.bf16.msra.mxu1 %v10326_v41  ;;  %v4752_v53 = vld [vmem:[#allocation2 + $0x100] sm:$0xff] }
 0x75d   : > { %5557 = vmatprep.subr.bf16.mxu0 %v10337_v39  ;;  %5598 = vmatprep.subr.bf16.mxu1 %v10344_v37 }
 0x760   : > { %5558 = vmatpush1.bf16.msra.mxu0 %v10340_v38  ;;  %5599 = vmatpush1.bf16.msra.mxu1 %v10342_v17 }
 0x761   : > { %5559 = vmatprep.subr.bf16.mxu0 %v10353_v15  ;;  %5600 = vmatprep.subr.bf16.mxu1 %v10360_v23  ;;  %v4753_v15 = vld [vmem:[#allocation2 + $0xc8] sm:$0xff] }
 0x764   : > { %5560 = vmatpush1.bf16.msra.mxu0 %v10356_v45  ;;  %5601 = vmatpush1.bf16.msra.mxu1 %v10358_v35 }
 0x765   : > { %5561 = vmatprep.subr.bf16.mxu0 %v10372_v1  ;;  %5602 = vmatprep.subr.bf16.mxu1 %v10376_v51 }
 0x768   : > { %5562 = vmatpush1.bf16.msra.mxu0 %v10370_v56  ;;  %5603 = vmatpush1.bf16.msra.mxu1 %v10374_v2 }
 0x769   : > { %5563 = vmatprep.subr.bf16.mxu0 %v10385_v11  ;;  %5604 = vmatprep.subr.bf16.mxu1 %v10392_v27 }
 0x76c   : > { %5564 = vmatpush1.bf16.msra.mxu0 %v10388_v6  ;;  %5605 = vmatpush1.bf16.msra.mxu1 %v10390_v12 }
 0x76d   : > { %5565 = vmatprep.subr.bf16.mxu0 %v10401_v33  ;;  %5606 = vmatprep.subr.bf16.mxu1 %v10408_v31 }
 0x770   : > { %5566 = vmatpush1.bf16.msra.mxu0 %v10404_v36  ;;  %5607 = vmatpush1.bf16.msra.mxu1 %v10406_v18  ;;  %v5033_v36 = vld [vmem:[#allocation2 + $0x1e0] sm:$0xff] }
 0x771   : > { %5834 = vmatprep.subr.bf16.mxu0 %v10417_v49  ;;  %5875 = vmatprep.subr.bf16.mxu1 %v10424_v20  ;;  %v5034_v49 = vld [vmem:[#allocation2] sm:$0xff] }
 0x7f3   : > { %v4981_v5 = vpop.f32.mrf.mxu0  ;;  %v5022_v50 = vpop.f32.mrf.mxu1 }
 0x7f4   : > { %v5029_v16 = vadd.f32 %v4981_v5, %v4750_v44  ;;  %v5031_v37 = vadd.f32 %v5022_v50, %v4752_v53 }
 0x7f5   : > { %v4983_v62 = vpop.f32.mrf.mxu0  ;;  %v5024_v48 = vpop.f32.mrf.mxu1 }
 0x7f6   : > { %v5316_v7 = vmul.f32 0.5, %v5029_v16  ;;  %v5030_v4 = vadd.f32 %v4983_v62, %v4751_v19  ;;  %v5032_v45 = vadd.f32 %v5024_v48, %v4753_v15  ;;  %v5036_v16 = vld [vmem:[#allocation2 + $0x8] sm:$0xff] }
 0x7f7   : > { %v4985_v41 = vpop.f32.mrf.mxu0  ;;  %v5026_v54 = vpop.f32.mrf.mxu1 }
 0x7f8   : > { %8388 = vtanh.f32 %v5316_v7  ;;  %v5320_v39 = vmul.f32 0.5, %v5030_v4  ;;  %v5325_v35 = vmul.f32 0.5, %v5032_v45 }
 0x7f9   : > { %v4986_v38 = vpop.f32.mrf.mxu0  ;;  %v5027_v17 = vpop.f32.mrf.mxu1 }
 0x7fa   : > { %8390 = vtanh.f32 %v5320_v39  ;;  %v11234_v39 = vld [vmem:[#allocation28_spill] sm:$0xff]  ;;  %v11236_v17 = vld [vmem:[#allocation30_spill] sm:$0xff] }
 0x7fb   : > { %8392 = vtanh.f32 %v5031_v37  ;;  %v11237_v37 = vld [vmem:[#allocation31_spill] sm:$0xff] }
 0x7fc   : > { %8394 = vtanh.f32 %v5325_v35  ;;  %v11238_v35 = vld [vmem:[#allocation32_spill] sm:$0xff] }
 0x805   : > { %v8389_v23 = vpop.eup %8388 }
 0x806   : > { %v5318_v56 = vmul.f32 0.5, %v8389_v23 }
 0x807   : > { %v8391_v1 = vpop.eup %8390 }
 0x808   : > { %v5319_v2 = vadd.f32 0.5, %v5318_v56  ;;  %v5322_v51 = vmul.f32 0.5, %v8391_v1  ;;  %v8393_v6 = vpop.eup %8392  ;;  %v11240_v56 = vld [vmem:[#allocation34_spill] sm:$0xff]  ;;  %v11242_v1 = vld [vmem:[#allocation36_spill] sm:$0xff] }
 0x809   : > { %v8395_v60 = vpop.eup %8394 }
 0x80a   : > { %v5323_v11 = vadd.f32 0.5, %v5322_v51  ;;  %v5330_v27 = vmul.f32 %v8393_v6, %v5319_v2  ;;  %v5327_v47 = vmul.f32 0.5, %v8395_v60  ;;  %v11243_v2 = vld [vmem:[#allocation37_spill] sm:$0xff]  ;;  %v11246_v6 = vld [vmem:[#allocation40_spill] sm:$0xff] }
 0x80c   : > { %v5329_v12 = vmul.f32 %v5323_v11, %v10429_v32  ;;  %v5328_v50 = vadd.f32 0.5, %v5327_v47  ;;  %v11245_v11 = vld [vmem:[#allocation39_spill] sm:$0xff] }
 0x80e   : > { %v10589_v33 = vadd.f32 %v5330_v27, %v5329_v12 }
 0x810   : > { %8396 = vtanh.f32 %v10589_v33 }
 0x813   : > { %v5264_v18 = vpop.f32.mrf.mxu0  ;;  %v5305_v31 = vpop.f32.mrf.mxu1 }
 0x814   : > { %v5312_v20 = vadd.f32 %v5264_v18, %v5033_v36  ;;  %v5314_v5 = vadd.f32 %v5305_v31, %v5035_v28  ;;  %v5987_v36 = vld [vmem:[%s9138_s21 + $0x180] sm:$0xff]  ;;  %v5988_v31 = vld [vmem:[%s9138_s21 + $0x188] sm:$0xff] }
 0x815   : > { %v5266_v25 = vpop.f32.mrf.mxu0  ;;  %v5307_v59 = vpop.f32.mrf.mxu1  ;;  %v5989_v18 = vld [vmem:[%s9138_s21 + $0x1a0] sm:$0xff]  ;;  %v5984_v28 = vld [vmem:[%s9138_s21 + $0x148] sm:$0xff] }
 0x816   : > { %v5334_v22 = vmul.f32 0.5, %v5312_v20  ;;  %v5313_v58 = vadd.f32 %v5266_v25, %v5034_v49  ;;  %v5315_v48 = vadd.f32 %v5307_v59, %v5036_v16  ;;  %v10649_v49 = vcombine.high %v5987_v36, %v5989_v18  ;;  %v5990_v20 = vld [vmem:[%s9138_s21 + $0x1a8] sm:$0xff] }
 0x817   : > { %v5268_v55 = vpop.f32.mrf.mxu0  ;;  %v5309_v14 = vpop.f32.mrf.mxu1  ;;  %v10652_v60 = vcombine.low %v5987_v36, %v5989_v18  ;;  %v10654_v25 = vcombine.low %v5988_v31, %v5990_v20  ;;  %v10656_v59 = vcombine.high %v5988_v31, %v5990_v20  ;;  %v5982_v16 = vld [vmem:[%s9138_s21 + $0x128] sm:$0xff]  ;;  %v6276_v36 = vld [vmem:[%s9138_s21 + $0x1f0] sm:$0xff]  ;;  %v6275_v18 = vld [vmem:[%s9138_s21 + $0x1d8] sm:$0xff] }
 0x818   : > { %8398 = vtanh.f32 %v5334_v22  ;;  %v5338_v32 = vmul.f32 0.5, %v5313_v58  ;;  %v5343_v4 = vmul.f32 0.5, %v5315_v48  ;;  %v5983_v22 = vld [vmem:[%s9138_s21 + $0x140] sm:$0xff]  ;;  %v5986_v14 = vld [vmem:[%s9138_s21 + $0x168] sm:$0xff]  ;;  %v6277_v20 = vld [vmem:[%s9138_s21 + $0x1f8] sm:$0xff] }
 0x819   : > { %v5269_v29 = vpop.f32.mrf.mxu0  ;;  %v5310_v44 = vpop.f32.mrf.mxu1  ;;  %v5985_v58 = vld [vmem:[%s9138_s21 + $0x160] sm:$0xff] }
 0x81a   : > { %8400 = vtanh.f32 %v5338_v32  ;;  %v10665_v55 = vcombine.high %v5983_v22, %v5985_v58  ;;  %v10668_v47 = vcombine.low %v5983_v22, %v5985_v58  ;;  %v10670_v32 = vcombine.low %v5984_v28, %v5986_v14  ;;  %v5979_v44 = vld [vmem:[%s9138_s21 + $0x100] sm:$0xff] }
 0x81b   : > { %8402 = vtanh.f32 %v5314_v5  ;;  %v10672_v29 = vcombine.high %v5984_v28, %v5986_v14  ;;  %v5981_v5 = vld [vmem:[%s9138_s21 + $0x120] sm:$0xff]  ;;  %v10766_v58 = vcombine.low %v6275_v18, %v6277_v20  ;;  %v10768_v28 = vcombine.high %v6275_v18, %v6277_v20 }
 0x81c   : > { %8404 = vtanh.f32 %v5343_v4  ;;  %v5975_v4 = vld [vmem:[%s9138_s21 + $0xc0] sm:$0xff] }
 0x81d   : > { %v8397_v19 = vpop.eup %8396  ;;  %v5354_v14 = vld [vmem:[#allocation2 + $0x1a0] sm:$0xff] }
 0x81e   : > { %v5333_v62 = vmul.f32 %v8397_v19, %v5328_v50  ;;  %v5980_v50 = vld [vmem:[%s9138_s21 + $0x108] sm:$0xff]  ;;  %v10681_v19 = vcombine.high %v5979_v44, %v5981_v5 }
 0x81f   : > { %v10686_v48 = vcombine.low %v5980_v50, %v5982_v16 }
 0x820   : > { %5352 = vst [vmem:[#allocation3 + $0x48] sm:$0xff] %v5333_v62  ;;  %v5358_v7 = vpack.c.bf16 %v5333_v62, %v5333_v62  ;;  %v10684_v62 = vcombine.low %v5979_v44, %v5981_v5 }
 0x822   : > { %5584 = vmatmul.mubr.bf16.vlgmr.msra.gmra.mxu0 %v5358_v7  ;;  %5625 = vmatmul.mubr.bf16.vlgmr.msra.gmra.mxu1 %v5358_v7  ;;  %v10688_v7 = vcombine.high %v5980_v50, %v5982_v16  ;;  %v5355_v50 = vld [vmem:[#allocation2 + $0x1f0] sm:$0xff] }
 0x823   : > { %5835 = vmatpush1.bf16.msra.mxu0 %v10420_v21  ;;  %5876 = vmatpush1.bf16.msra.mxu1 %v10422_v26  ;;  %v11235_v26 = vld [vmem:[#allocation29_spill] sm:$0xff] }
 0x824   : > { %5836 = vmatprep.subr.bf16.mxu0 %v10436_v0  ;;  %5877 = vmatprep.subr.bf16.mxu1 %v10438_v24 }
 0x825   : > { %v8399_v53 = vpop.eup %8398  ;;  %5866 = vmatprep.mubr.bf16.mxu0 %v11186_v30  ;;  %5907 = vmatprep.mubr.bf16.mxu1 %v11186_v30 }
 0x826   : > { %v5336_v41 = vmul.f32 0.5, %v8399_v53  ;;  %v5977_v53 = vld [vmem:[%s9138_s21 + $0xe0] sm:$0xff] }
 0x827   : > { %v8401_v54 = vpop.eup %8400  ;;  %5837 = vmatpush1.bf16.msra.mxu0 %v10446_v46  ;;  %5878 = vmatpush1.bf16.msra.mxu1 %v11234_v39  ;;  %v11239_v46 = vld [vmem:[#allocation33_spill] sm:$0xff]  ;;  %v5978_v39 = vld [vmem:[%s9138_s21 + $0xe8] sm:$0xff] }
 0x828   : > { %v5337_v38 = vadd.f32 0.5, %v5336_v41  ;;  %v5340_v21 = vmul.f32 0.5, %v8401_v54  ;;  %5838 = vmatprep.subr.bf16.mxu0 %v10452_v10  ;;  %5879 = vmatprep.subr.bf16.mxu1 %v11235_v26  ;;  %v8403_v24 = vpop.eup %8402  ;;  %v11241_v10 = vld [vmem:[#allocation35_spill] sm:$0xff]  ;;  %v10697_v54 = vcombine.high %v5975_v4, %v5977_v53 }
 0x829   : > { %v8405_v51 = vpop.eup %8404  ;;  %v5976_v41 = vld [vmem:[%s9138_s21 + $0xc8] sm:$0xff] }
 0x82a   : > { %v5341_v0 = vadd.f32 0.5, %v5340_v21  ;;  %v5348_v45 = vmul.f32 %v8403_v24, %v5337_v38  ;;  %v5345_v12 = vmul.f32 0.5, %v8405_v51  ;;  %v10700_v38 = vcombine.low %v5975_v4, %v5977_v53  ;;  %v5973_v24 = vld [vmem:[%s9138_s21 + $0xa0] sm:$0xff] }
 0x82b   : > { %5839 = vmatpush1.bf16.msra.mxu0 %v11236_v17  ;;  %5880 = vmatpush1.bf16.msra.mxu1 %v11237_v37  ;;  %v10702_v21 = vcombine.low %v5976_v41, %v5978_v39  ;;  %v10704_v26 = vcombine.high %v5976_v41, %v5978_v39  ;;  %v5972_v17 = vld [vmem:[%s9138_s21 + $0x88] sm:$0xff] }
 0x82c   : > { %v5347_v15 = vmul.f32 %v5341_v0, %v10495_v40  ;;  %5840 = vmatprep.subr.bf16.mxu0 %v11238_v35  ;;  %5881 = vmatprep.subr.bf16.mxu1 %v11239_v46  ;;  %v11244_v40 = vld [vmem:[#allocation38_spill] sm:$0xff]  ;;  %v5974_v37 = vld [vmem:[%s9138_s21 + $0xa8] sm:$0xff] }
 0x82d   : > { %v5971_v0 = vld [vmem:[%s9138_s21 + $0x80] sm:$0xff]  ;;  %v10718_v35 = vcombine.low %v5972_v17, %v5974_v37  ;;  %v10720_v46 = vcombine.high %v5972_v17, %v5974_v37 }
 0x82e   : > { %v10607_v23 = vadd.f32 %v5348_v45, %v5347_v15  ;;  %v10714_v15 = vcombine.low %v5971_v0, %v5973_v24  ;;  %v10716_v45 = vcombine.high %v5971_v0, %v5973_v24  ;;  %v5356_v0 = vld [vmem:[#allocation2 + $0xe8] sm:$0xff] }
 0x82f   : > { %5841 = vmatpush1.bf16.msra.mxu0 %v11240_v56  ;;  %5882 = vmatpush1.bf16.msra.mxu1 %v11241_v10  ;;  %v5967_v56 = vld [vmem:[%s9138_s21 + $0x40] sm:$0xff] }
 0x830   : > { %8406 = vtanh.f32 %v10607_v23  ;;  %5842 = vmatprep.subr.bf16.mxu0 %v11242_v1  ;;  %5883 = vmatprep.subr.bf16.mxu1 %v11243_v2  ;;  %v5969_v10 = vld [vmem:[%s9138_s21 + $0x60] sm:$0xff]  ;;  %v5968_v1 = vld [vmem:[%s9138_s21 + $0x48] sm:$0xff] }
 0x831   : > { %v10729_v2 = vcombine.high %v5967_v56, %v5969_v10  ;;  %v10732_v51 = vcombine.low %v5967_v56, %v5969_v10 }
 0x833   : > { %5843 = vmatpush1.bf16.msra.mxu0 %v10499_v3  ;;  %5884 = vmatpush1.bf16.msra.mxu1 %v10501_v13  ;;  %v5346_v3 = vadd.f32 0.5, %v5345_v12  ;;  %v5963_v12 = vld [vmem:[%s9138_s21] sm:$0xff] }
 0x834   : > { %5844 = vmatprep.subr.bf16.mxu0 %v10506_v63  ;;  %5885 = vmatprep.subr.bf16.mxu1 %v11244_v40  ;;  %v5970_v40 = vld [vmem:[%s9138_s21 + $0x68] sm:$0xff] }
 0x837   : > { %5845 = vmatpush1.bf16.msra.mxu0 %v11245_v11  ;;  %5886 = vmatpush1.bf16.msra.mxu1 %v11246_v6  ;;  %v10734_v11 = vcombine.low %v5968_v1, %v5970_v40  ;;  %v10736_v6 = vcombine.high %v5968_v1, %v5970_v40  ;;  %v5357_v40 = vld [vmem:[#allocation2 + $0x78] sm:$0xff] }
 0x838   : > { %5846 = vmatprep.subr.bf16.mxu0 %v10522_v9  ;;  %5887 = vmatprep.subr.bf16.mxu1 %v10524_v61  ;;  %v5991_v9 = vld [vmem:[%s9138_s21 + $0x1c0] sm:$0xff] }
 0x83b   : > { %5847 = vmatpush1.bf16.msra.mxu0 %v10532_v42  ;;  %5888 = vmatpush1.bf16.msra.mxu1 %v10534_v34  ;;  %v5992_v42 = vld [vmem:[%s9138_s21 + $0x1c8] sm:$0xff] }
 0x83c   : > { %5848 = vmatprep.subr.bf16.mxu0 %v10538_v52  ;;  %5889 = vmatprep.subr.bf16.mxu1 %v10540_v43  ;;  %v5993_v43 = vld [vmem:[%s9138_s21 + $0x1e0] sm:$0xff] }
 0x83d   : > { %v8407_v13 = vpop.eup %8406  ;;  %v10633_v34 = vcombine.high %v5991_v9, %v5993_v43  ;;  %v10636_v52 = vcombine.low %v5991_v9, %v5993_v43 }
 0x83e   : > { %v5351_v63 = vmul.f32 %v8407_v13, %v5346_v3  ;;  %v5965_v3 = vld [vmem:[%s9138_s21 + $0x20] sm:$0xff]  ;;  %v5964_v13 = vld [vmem:[%s9138_s21 + $0x8] sm:$0xff] }
 0x83f   : > { %5849 = vmatpush1.bf16.msra.mxu0 %v10544_v8  ;;  %5890 = vmatpush1.bf16.msra.mxu1 %v10546_v57  ;;  %v5994_v8 = vld [vmem:[%s9138_s21 + $0x1e8] sm:$0xff]  ;;  %v10748_v9 = vcombine.low %v5963_v12, %v5965_v3 }
 0x840   : > { %5353 = vst [vmem:[#allocation3 + $0x30] sm:$0xff] %v5351_v63  ;;  %v5641_v61 = vpack.c.bf16 %v5351_v63, %v5351_v63  ;;  %v10638_v57 = vcombine.low %v5992_v42, %v5994_v8  ;;  %v10640_v27 = vcombine.high %v5992_v42, %v5994_v8  ;;  %6155 = vmatprep.subr.bf16.mxu0 %v10633_v34  ;;  %v6274_v8 = vld [vmem:[%s9138_s21 + $0x1d0] sm:$0xff] }
 0x841   : > { %v10745_v63 = vcombine.high %v5963_v12, %v5965_v3  ;;  %v10761_v31 = vcombine.high %v6274_v8, %v6276_v36  ;;  %v10764_v22 = vcombine.low %v6274_v8, %v6276_v36 }
 0x842   : > { %5867 = vmatmul.mubr.bf16.vlgmr.msra.gmra.mxu0 %v5641_v61  ;;  %5908 = vmatmul.mubr.bf16.vlgmr.msra.gmra.mxu1 %v5641_v61  ;;  %v5966_v61 = vld [vmem:[%s9138_s21 + $0x28] sm:$0xff] }
 0x843   : > { %6187 = vmatprep.mubr.bf16.mxu0 %v11186_v30  ;;  %6228 = vmatprep.mubr.bf16.mxu1 %v11186_v30  ;;  %v10750_v43 = vcombine.low %v5964_v13, %v5966_v61  ;;  %v10752_v42 = vcombine.high %v5964_v13, %v5966_v61 }
 0x844   : > { %6196 = vmatprep.subr.bf16.mxu1 %v10640_v27  ;;  %6156 = vmatpush1.bf16.msra.mxu0 %v10636_v52 }
 0x845   : > { %6197 = vmatpush1.bf16.msra.mxu1 %v10638_v57  ;;  %6157 = vmatprep.subr.bf16.mxu0 %v10649_v49 }
 0x846   : > { %6198 = vmatprep.subr.bf16.mxu1 %v10656_v59 }
 0x848   : > { %6158 = vmatpush1.bf16.msra.mxu0 %v10652_v60 }
 0x849   : > { %6199 = vmatpush1.bf16.msra.mxu1 %v10654_v25  ;;  %6159 = vmatprep.subr.bf16.mxu0 %v10665_v55 }
 0x84a   : > { %6200 = vmatprep.subr.bf16.mxu1 %v10672_v29 }
 0x84c   : > { %6160 = vmatpush1.bf16.msra.mxu0 %v10668_v47 }
 0x84d   : > { %6201 = vmatpush1.bf16.msra.mxu1 %v10670_v32  ;;  %6161 = vmatprep.subr.bf16.mxu0 %v10681_v19 }
 0x84e   : > { %6202 = vmatprep.subr.bf16.mxu1 %v10688_v7 }
 0x850   : > { %6162 = vmatpush1.bf16.msra.mxu0 %v10684_v62 }
 0x851   : > { %6203 = vmatpush1.bf16.msra.mxu1 %v10686_v48  ;;  %6163 = vmatprep.subr.bf16.mxu0 %v10697_v54 }
 0x852   : > { %6204 = vmatprep.subr.bf16.mxu1 %v10704_v26 }
 0x854   : > { %6164 = vmatpush1.bf16.msra.mxu0 %v10700_v38 }
 0x855   : > { %6205 = vmatpush1.bf16.msra.mxu1 %v10702_v21  ;;  %6165 = vmatprep.subr.bf16.mxu0 %v10716_v45 }
 0x856   : > { %6206 = vmatprep.subr.bf16.mxu1 %v10720_v46 }
 0x858   : > { %6166 = vmatpush1.bf16.msra.mxu0 %v10714_v15 }
 0x859   : > { %6207 = vmatpush1.bf16.msra.mxu1 %v10718_v35  ;;  %6167 = vmatprep.subr.bf16.mxu0 %v10729_v2 }
 0x85a   : > { %6208 = vmatprep.subr.bf16.mxu1 %v10736_v6 }
 0x85c   : > { %6168 = vmatpush1.bf16.msra.mxu0 %v10732_v51 }
 0x85d   : > { %6209 = vmatpush1.bf16.msra.mxu1 %v10734_v11  ;;  %6169 = vmatprep.subr.bf16.mxu0 %v10745_v63 }
 0x85e   : > { %6210 = vmatprep.subr.bf16.mxu1 %v10752_v42 }
 0x860   : > { %6170 = vmatpush1.bf16.msra.mxu0 %v10748_v9 }
 0x861   : > { %6211 = vmatpush1.bf16.msra.mxu1 %v10750_v43  ;;  %6438 = vmatprep.subr.bf16.mxu0 %v10761_v31 }
 0x862   : > { %6479 = vmatprep.subr.bf16.mxu1 %v10768_v28 }
 0x8e2   : > { %v5585_v44 = vpop.f32.mrf.mxu0  ;;  %v5626_v5 = vpop.f32.mrf.mxu1 }
 0x8e3   : > { %v5633_v16 = vadd.f32 %v5585_v44, %v5354_v14  ;;  %v5635_v1 = vadd.f32 %v5626_v5, %v5356_v0  ;;  %v5637_v5 = vld [vmem:[#allocation2 + $0x80] sm:$0xff] }
 0x8e4   : > { %v5587_v4 = vpop.f32.mrf.mxu0  ;;  %v5628_v53 = vpop.f32.mrf.mxu1 }
 0x8e5   : > { %v5920_v41 = vmul.f32 0.5, %v5633_v16  ;;  %v5634_v39 = vadd.f32 %v5587_v4, %v5355_v50  ;;  %v5636_v12 = vadd.f32 %v5628_v53, %v5357_v40  ;;  %v5638_v53 = vld [vmem:[#allocation2 + $0x1a8] sm:$0xff] }
 0x8e6   : > { %v5589_v24 = vpop.f32.mrf.mxu0  ;;  %v5630_v17 = vpop.f32.mrf.mxu1 }
 0x8e7   : > { %8408 = vtanh.f32 %v5920_v41  ;;  %v5924_v37 = vmul.f32 0.5, %v5634_v39  ;;  %v5929_v3 = vmul.f32 0.5, %v5636_v12 }
 0x8e8   : > { %v5590_v56 = vpop.f32.mrf.mxu0  ;;  %v5631_v10 = vpop.f32.mrf.mxu1 }
 0x8e9   : > { %8410 = vtanh.f32 %v5924_v37  ;;  %v5639_v10 = vld [vmem:[#allocation2 + $0x1b8] sm:$0xff] }
 0x8ea   : > { %8412 = vtanh.f32 %v5635_v1 }
 0x8eb   : > { %8414 = vtanh.f32 %v5929_v3 }
 0x8f4   : > { %v8409_v13 = vpop.eup %8408 }
 0x8f5   : > { %v5922_v61 = vmul.f32 0.5, %v8409_v13 }
 0x8f6   : > { %v8411_v8 = vpop.eup %8410 }
 0x8f7   : > { %v5923_v36 = vadd.f32 0.5, %v5922_v61  ;;  %v5926_v18 = vmul.f32 0.5, %v8411_v8  ;;  %v8413_v14 = vpop.eup %8412 }
 0x8f8   : > { %v8415_v0 = vpop.eup %8414 }
 0x8f9   : > { %v5927_v20 = vadd.f32 0.5, %v5926_v18  ;;  %v5934_v50 = vmul.f32 %v8413_v14, %v5923_v36  ;;  %v5931_v40 = vmul.f32 0.5, %v8415_v0  ;;  %v5640_v36 = vld [vmem:[#allocation2 + $0x28] sm:$0xff]  ;;  %v6270_v18 = vld [vmem:[%s9138_s21 + $0x190] sm:$0xff] }
 0x8fa   : > { %v6272_v14 = vld [vmem:[%s9138_s21 + $0x1b0] sm:$0xff] }
 0x8fb   : > { %v5933_v44 = vmul.f32 %v5927_v20, %v10589_v33  ;;  %v5932_v8 = vadd.f32 0.5, %v5931_v40  ;;  %v6266_v0 = vld [vmem:[%s9138_s21 + $0x150] sm:$0xff] }
 0x8fd   : > { %v10773_v16 = vadd.f32 %v5934_v50, %v5933_v44  ;;  %v6271_v44 = vld [vmem:[%s9138_s21 + $0x198] sm:$0xff] }
 0x8fe   : > { %v6273_v50 = vld [vmem:[%s9138_s21 + $0x1b8] sm:$0xff] }
 0x8ff   : > { %8416 = vtanh.f32 %v10773_v16 }
 0x902   : > { %v5868_v4 = vpop.f32.mrf.mxu0  ;;  %v5909_v41 = vpop.f32.mrf.mxu1 }
 0x903   : > { %v5916_v39 = vadd.f32 %v5868_v4, %v5637_v5  ;;  %v5918_v61 = vadd.f32 %v5909_v41, %v5639_v10  ;;  %v10782_v41 = vcombine.high %v6271_v44, %v6273_v50  ;;  %v10792_v10 = vcombine.low %v6271_v44, %v6273_v50 }
 0x904   : > { %v5870_v24 = vpop.f32.mrf.mxu0  ;;  %v5911_v17 = vpop.f32.mrf.mxu1 }
 0x905   : > { %v5938_v37 = vmul.f32 0.5, %v5916_v39  ;;  %v5917_v56 = vadd.f32 %v5870_v24, %v5638_v53  ;;  %v5919_v4 = vadd.f32 %v5911_v17, %v5640_v36  ;;  %v10780_v39 = vcombine.high %v6270_v18, %v6272_v14  ;;  %v6268_v24 = vld [vmem:[%s9138_s21 + $0x170] sm:$0xff]  ;;  %11247 = vst [vmem:[#allocation28_spill] sm:$0xff] %v10792_v10 }
 0x906   : > { %v5872_v33 = vpop.f32.mrf.mxu0  ;;  %v5913_v1 = vpop.f32.mrf.mxu1  ;;  %v10790_v17 = vcombine.low %v6270_v18, %v6272_v14 }
 0x907   : > { %8418 = vtanh.f32 %v5938_v37  ;;  %v5942_v12 = vmul.f32 0.5, %v5917_v56  ;;  %v6267_v37 = vld [vmem:[%s9138_s21 + $0x158] sm:$0xff]  ;;  %v5947_v33 = vmul.f32 0.5, %v5919_v4  ;;  %v10796_v1 = vcombine.high %v6266_v0, %v6268_v24 }
 0x908   : > { %v5873_v3 = vpop.f32.mrf.mxu0  ;;  %v5914_v13 = vpop.f32.mrf.mxu1  ;;  %v6269_v56 = vld [vmem:[%s9138_s21 + $0x178] sm:$0xff] }
 0x909   : > { %8420 = vtanh.f32 %v5942_v12  ;;  %v10798_v40 = vcombine.high %v6267_v37, %v6269_v56  ;;  %v6262_v12 = vld [vmem:[%s9138_s21 + $0x110] sm:$0xff]  ;;  %v10810_v14 = vcombine.low %v6267_v37, %v6269_v56 }
 0x90a   : > { %8422 = vtanh.f32 %v5918_v61  ;;  %v6264_v3 = vld [vmem:[%s9138_s21 + $0x130] sm:$0xff]  ;;  %v6263_v61 = vld [vmem:[%s9138_s21 + $0x118] sm:$0xff] }
 0x90b   : > { %11248 = vst [vmem:[#allocation29_spill] sm:$0xff] %v10798_v40  ;;  %11250 = vst [vmem:[#allocation31_spill] sm:$0xff] %v10810_v14  ;;  %v10812_v44 = vcombine.high %v6262_v12, %v6264_v3  ;;  %8424 = vtanh.f32 %v5947_v33  ;;  %v10824_v56 = vcombine.low %v6262_v12, %v6264_v3  ;;  %v6255_v12 = vld [vmem:[%s9138_s21 + $0x98] sm:$0xff] }
 0x90c   : > { %v8417_v20 = vpop.eup %8416  ;;  %v6257_v3 = vld [vmem:[%s9138_s21 + $0xb8] sm:$0xff] }
 0x90d   : > { %v5937_v5 = vmul.f32 %v8417_v20, %v5932_v8  ;;  %v6265_v8 = vld [vmem:[%s9138_s21 + $0x138] sm:$0xff]  ;;  %v10808_v20 = vcombine.low %v6266_v0, %v6268_v24  ;;  %11251 = vst [vmem:[#allocation32_spill] sm:$0xff] %v10812_v44  ;;  %11253 = vst [vmem:[#allocation34_spill] sm:$0xff] %v10824_v56 }
 0x90e   : > { %v10816_v4 = vcombine.high %v6263_v61, %v6265_v8  ;;  %v6261_v0 = vld [vmem:[%s9138_s21 + $0xf8] sm:$0xff]  ;;  %v10826_v33 = vcombine.low %v6263_v61, %v6265_v8 }
 0x90f   : > { %5956 = vst [vmem:[#allocation3 + $0x10] sm:$0xff] %v5937_v5  ;;  %v5962_v53 = vpack.c.bf16 %v5937_v5, %v5937_v5  ;;  %11249 = vst [vmem:[#allocation30_spill] sm:$0xff] %v10808_v20 }
 0x910   : > { %11252 = vst [vmem:[#allocation33_spill] sm:$0xff] %v10816_v4  ;;  %11254 = vst [vmem:[#allocation35_spill] sm:$0xff] %v10826_v33 }
 0x911   : > { %6188 = vmatmul.mubr.bf16.vlgmr.msra.gmra.mxu0 %v5962_v53  ;;  %6229 = vmatmul.mubr.bf16.vlgmr.msra.gmra.mxu1 %v5962_v53  ;;  %v6258_v53 = vld [vmem:[%s9138_s21 + $0xd0] sm:$0xff] }
 0x912   : > { %6439 = vmatpush1.bf16.msra.mxu0 %v10764_v22  ;;  %6480 = vmatpush1.bf16.msra.mxu1 %v10766_v58 }
 0x913   : > { %6440 = vmatprep.subr.bf16.mxu0 %v10780_v39  ;;  %6481 = vmatprep.subr.bf16.mxu1 %v10782_v41 }
 0x914   : > { %v8419_v13 = vpop.eup %8418  ;;  %6470 = vmatprep.mubr.bf16.mxu0 %v11186_v30  ;;  %6511 = vmatprep.mubr.bf16.mxu1 %v11186_v30 }
 0x915   : > { %v5940_v36 = vmul.f32 0.5, %v8419_v13  ;;  %v6260_v13 = vld [vmem:[%s9138_s21 + $0xf0] sm:$0xff] }
 0x916   : > { %v8421_v18 = vpop.eup %8420  ;;  %6441 = vmatpush1.bf16.msra.mxu0 %v10790_v17  ;;  %6482 = vmatpush1.bf16.msra.mxu1 %v10792_v10  ;;  %v6259_v10 = vld [vmem:[%s9138_s21 + $0xd8] sm:$0xff] }
 0x917   : > { %v5941_v50 = vadd.f32 0.5, %v5940_v36  ;;  %v5944_v5 = vmul.f32 0.5, %v8421_v18  ;;  %6442 = vmatprep.subr.bf16.mxu0 %v10796_v1  ;;  %6483 = vmatprep.subr.bf16.mxu1 %v10798_v40  ;;  %v8423_v37 = vpop.eup %8422  ;;  %v10828_v36 = vcombine.high %v6258_v53, %v6260_v13  ;;  %v10845_v8 = vcombine.low %v6259_v10, %v6261_v0 }
 0x919   : > { %v5945_v24 = vadd.f32 0.5, %v5944_v5  ;;  %11255 = vst [vmem:[#allocation36_spill] sm:$0xff] %v10828_v36  ;;  %v5952_v40 = vmul.f32 %v8423_v37, %v5941_v50  ;;  %v10833_v5 = vcombine.high %v6259_v10, %v6261_v0  ;;  %v6252_v37 = vld [vmem:[%s9138_s21 + $0x70] sm:$0xff]  ;;  %v10862_v0 = vcombine.low %v6255_v12, %v6257_v3 }
 0x91a   : > { %6443 = vmatpush1.bf16.msra.mxu0 %v10808_v20  ;;  %6484 = vmatpush1.bf16.msra.mxu1 %v10810_v14  ;;  %v6254_v20 = vld [vmem:[%s9138_s21 + $0x90] sm:$0xff] }
 0x91b   : > { %v5951_v18 = vmul.f32 %v5945_v24, %v10607_v23  ;;  %6444 = vmatprep.subr.bf16.mxu0 %v10812_v44  ;;  %6485 = vmatprep.subr.bf16.mxu1 %v10816_v4  ;;  %11256 = vst [vmem:[#allocation37_spill] sm:$0xff] %v10833_v5  ;;  %v6256_v14 = vld [vmem:[%s9138_s21 + $0xb0] sm:$0xff]  ;;  %v10843_v23 = vcombine.low %v6258_v53, %v6260_v13  ;;  %v6251_v53 = vld [vmem:[%s9138_s21 + $0x58] sm:$0xff]  ;;  %11259 = vst [vmem:[#allocation40_spill] sm:$0xff] %v10862_v0 }
 0x91c   : > { %v10850_v50 = vcombine.high %v6254_v20, %v6256_v14  ;;  %v6250_v24 = vld [vmem:[%s9138_s21 + $0x50] sm:$0xff]  ;;  %v6253_v13 = vld [vmem:[%s9138_s21 + $0x78] sm:$0xff]  ;;  %v10860_v10 = vcombine.low %v6254_v20, %v6256_v14 }
 0x91d   : > { %v10839_v61 = vadd.f32 %v5952_v40, %v5951_v18  ;;  %v10852_v40 = vcombine.high %v6255_v12, %v6257_v3  ;;  %v10866_v18 = vcombine.high %v6250_v24, %v6252_v37  ;;  %v6247_v4 = vld [vmem:[%s9138_s21 + $0x18] sm:$0xff]  ;;  %v10876_v20 = vcombine.low %v6250_v24, %v6252_v37 }
 0x91e   : > { %6445 = vmatpush1.bf16.msra.mxu0 %v10824_v56  ;;  %6486 = vmatpush1.bf16.msra.mxu1 %v10826_v33  ;;  %11258 = vst [vmem:[#allocation39_spill] sm:$0xff] %v10860_v10  ;;  %v8425_v33 = vpop.eup %8424  ;;  %v6248_v56 = vld [vmem:[%s9138_s21 + $0x30] sm:$0xff]  ;;  %v6249_v44 = vld [vmem:[%s9138_s21 + $0x38] sm:$0xff]  ;;  %v10878_v14 = vcombine.low %v6251_v53, %v6253_v13 }
 0x91f   : > { %8426 = vtanh.f32 %v10839_v61  ;;  %6446 = vmatprep.subr.bf16.mxu0 %v10828_v36  ;;  %6487 = vmatprep.subr.bf16.mxu1 %v10833_v5  ;;  %11257 = vst [vmem:[#allocation38_spill] sm:$0xff] %v10852_v40  ;;  %v10868_v5 = vcombine.high %v6251_v53, %v6253_v13  ;;  %v6246_v36 = vld [vmem:[%s9138_s21 + $0x10] sm:$0xff]  ;;  %v5949_v12 = vmul.f32 0.5, %v8425_v33 }
 0x920   : > { %v10882_v3 = vcombine.high %v6246_v36, %v6248_v56 }
 0x921   : > { %v5950_v24 = vadd.f32 0.5, %v5949_v12  ;;  %v6243_v12 = vld [vmem:[#allocation2 + $0x108] sm:$0xff] }
 0x922   : > { %6447 = vmatpush1.bf16.msra.mxu0 %v10843_v23  ;;  %6488 = vmatpush1.bf16.msra.mxu1 %v10845_v8 }
 0x923   : > { %6448 = vmatprep.subr.bf16.mxu0 %v10850_v50  ;;  %6489 = vmatprep.subr.bf16.mxu1 %v10852_v40  ;;  %v10884_v40 = vcombine.high %v6247_v4, %v6249_v44 }
 0x926   : > { %6449 = vmatpush1.bf16.msra.mxu0 %v10860_v10  ;;  %6490 = vmatpush1.bf16.msra.mxu1 %v10862_v0  ;;  %v10888_v10 = vcombine.low %v6246_v36, %v6248_v56  ;;  %v10890_v0 = vcombine.low %v6247_v4, %v6249_v44 }
 0x927   : > { %6450 = vmatprep.subr.bf16.mxu0 %v10866_v18  ;;  %6491 = vmatprep.subr.bf16.mxu1 %v10868_v5 }
 0x92a   : > { %6451 = vmatpush1.bf16.msra.mxu0 %v10876_v20  ;;  %6492 = vmatpush1.bf16.msra.mxu1 %v10878_v14 }
 0x92b   : > { %6452 = vmatprep.subr.bf16.mxu0 %v10882_v3  ;;  %6493 = vmatprep.subr.bf16.mxu1 %v10884_v40 }
 0x92c   : > { %v8427_v33 = vpop.eup %8426 }
 0x92d   : > { %v5955_v37 = vmul.f32 %v8427_v33, %v5950_v24 }
 0x92e   : > { %6453 = vmatpush1.bf16.msra.mxu0 %v10888_v10  ;;  %6494 = vmatpush1.bf16.msra.mxu1 %v10890_v0 }
 0x92f   : > { %5957 = vst [vmem:[#allocation3 + $0x58] sm:$0xff] %v5955_v37  ;;  %v6245_v53 = vpack.c.bf16 %v5955_v37, %v5955_v37  ;;  %6759 = vmatprep.subr.bf16.mxu0 %v10633_v34  ;;  %6800 = vmatprep.subr.bf16.mxu1 %v10640_v27  ;;  %v5958_v34 = vld [vmem:[#allocation2 + $0xb8] sm:$0xff]  ;;  %v5959_v27 = vld [vmem:[#allocation2 + $0x88] sm:$0xff] }
 0x931   : > { %6471 = vmatmul.mubr.bf16.vlgmr.msra.gmra.mxu0 %v6245_v53  ;;  %6512 = vmatmul.mubr.bf16.vlgmr.msra.gmra.mxu1 %v6245_v53 }
 0x932   : > { %6760 = vmatpush1.bf16.msra.mxu0 %v10636_v52  ;;  %6801 = vmatpush1.bf16.msra.mxu1 %v10638_v57 }
 0x933   : > { %6761 = vmatprep.subr.bf16.mxu0 %v10649_v49  ;;  %6802 = vmatprep.subr.bf16.mxu1 %v10656_v59 }
 0x934   : > { %6791 = vmatprep.mubr.bf16.mxu0 %v11186_v30  ;;  %6832 = vmatprep.mubr.bf16.mxu1 %v11186_v30 }
 0x936   : > { %6762 = vmatpush1.bf16.msra.mxu0 %v10652_v60  ;;  %6803 = vmatpush1.bf16.msra.mxu1 %v10654_v25 }
 0x937   : > { %6763 = vmatprep.subr.bf16.mxu0 %v10665_v55  ;;  %6804 = vmatprep.subr.bf16.mxu1 %v10672_v29 }
 0x93a   : > { %6764 = vmatpush1.bf16.msra.mxu0 %v10668_v47  ;;  %6805 = vmatpush1.bf16.msra.mxu1 %v10670_v32  ;;  %v5960_v47 = vld [vmem:[#allocation2 + $0xa8] sm:$0xff] }
 0x93b   : > { %6765 = vmatprep.subr.bf16.mxu0 %v10681_v19  ;;  %6806 = vmatprep.subr.bf16.mxu1 %v10688_v7 }
 0x93e   : > { %6766 = vmatpush1.bf16.msra.mxu0 %v10684_v62  ;;  %6807 = vmatpush1.bf16.msra.mxu1 %v10686_v48 }
 0x93f   : > { %6767 = vmatprep.subr.bf16.mxu0 %v10697_v54  ;;  %6808 = vmatprep.subr.bf16.mxu1 %v10704_v26  ;;  %v5961_v54 = vld [vmem:[#allocation2 + $0x1c8] sm:$0xff] }
 0x942   : > { %6768 = vmatpush1.bf16.msra.mxu0 %v10700_v38  ;;  %6809 = vmatpush1.bf16.msra.mxu1 %v10702_v21 }
 0x943   : > { %6769 = vmatprep.subr.bf16.mxu0 %v10716_v45  ;;  %6810 = vmatprep.subr.bf16.mxu1 %v10720_v46 }
 0x946   : > { %6770 = vmatpush1.bf16.msra.mxu0 %v10714_v15  ;;  %6811 = vmatpush1.bf16.msra.mxu1 %v10718_v35 }
 0x947   : > { %6771 = vmatprep.subr.bf16.mxu0 %v10729_v2  ;;  %6812 = vmatprep.subr.bf16.mxu1 %v10736_v6 }
 0x94a   : > { %6772 = vmatpush1.bf16.msra.mxu0 %v10732_v51  ;;  %6813 = vmatpush1.bf16.msra.mxu1 %v10734_v11 }
 0x94b   : > { %6773 = vmatprep.subr.bf16.mxu0 %v10745_v63  ;;  %6814 = vmatprep.subr.bf16.mxu1 %v10752_v42 }
 0x94e   : > { %6774 = vmatpush1.bf16.msra.mxu0 %v10748_v9  ;;  %6815 = vmatpush1.bf16.msra.mxu1 %v10750_v43  ;;  %v6241_v9 = vld [vmem:[#allocation2 + $0x120] sm:$0xff] }
 0x94f   : > { %7042 = vmatprep.subr.bf16.mxu0 %v10761_v31  ;;  %7083 = vmatprep.subr.bf16.mxu1 %v10768_v28  ;;  %v6242_v31 = vld [vmem:[#allocation2 + $0x150] sm:$0xff] }
 0x9d1   : > { %v6189_v52 = vpop.f32.mrf.mxu0  ;;  %v6230_v57 = vpop.f32.mrf.mxu1 }
 0x9d2   : > { %v6237_v49 = vadd.f32 %v6189_v52, %v5958_v34  ;;  %v6239_v7 = vadd.f32 %v6230_v57, %v5960_v47 }
 0x9d3   : > { %v6191_v60 = vpop.f32.mrf.mxu0  ;;  %v6232_v25 = vpop.f32.mrf.mxu1 }
 0x9d4   : > { %v6524_v59 = vmul.f32 0.5, %v6237_v49  ;;  %v6238_v55 = vadd.f32 %v6191_v60, %v5959_v27  ;;  %v6240_v38 = vadd.f32 %v6232_v25, %v5961_v54  ;;  %v6244_v49 = vld [vmem:[#allocation2 + $0x60] sm:$0xff] }
 0x9d5   : > { %v6193_v32 = vpop.f32.mrf.mxu0  ;;  %v6234_v29 = vpop.f32.mrf.mxu1 }
 0x9d6   : > { %8428 = vtanh.f32 %v6524_v59  ;;  %v6528_v19 = vmul.f32 0.5, %v6238_v55  ;;  %v6533_v21 = vmul.f32 0.5, %v6240_v38  ;;  %v11264_v38 = vld [vmem:[#allocation32_spill] sm:$0xff] }
 0x9d7   : > { %v6194_v62 = vpop.f32.mrf.mxu0  ;;  %v6235_v48 = vpop.f32.mrf.mxu1 }
 0x9d8   : > { %8430 = vtanh.f32 %v6528_v19  ;;  %v11260_v19 = vld [vmem:[#allocation28_spill] sm:$0xff]  ;;  %v11262_v48 = vld [vmem:[#allocation30_spill] sm:$0xff] }
 0x9d9   : > { %8432 = vtanh.f32 %v6239_v7  ;;  %v11263_v7 = vld [vmem:[#allocation31_spill] sm:$0xff] }
 0x9da   : > { %8434 = vtanh.f32 %v6533_v21 }
 0x9e3   : > { %v8429_v26 = vpop.eup %8428 }
 0x9e4   : > { %v6526_v15 = vmul.f32 0.5, %v8429_v26  ;;  %v11266_v26 = vld [vmem:[#allocation34_spill] sm:$0xff] }
 0x9e5   : > { %v8431_v45 = vpop.eup %8430 }
 0x9e6   : > { %v6527_v35 = vadd.f32 0.5, %v6526_v15  ;;  %v6530_v46 = vmul.f32 0.5, %v8431_v45  ;;  %v8433_v51 = vpop.eup %8432  ;;  %v11268_v15 = vld [vmem:[#allocation36_spill] sm:$0xff]  ;;  %v11269_v45 = vld [vmem:[#allocation37_spill] sm:$0xff] }
 0x9e7   : > { %v8435_v44 = vpop.eup %8434 }
 0x9e8   : > { %v6531_v2 = vadd.f32 0.5, %v6530_v46  ;;  %v6538_v6 = vmul.f32 %v8433_v51, %v6527_v35  ;;  %v6535_v37 = vmul.f32 0.5, %v8435_v44  ;;  %v11271_v46 = vld [vmem:[#allocation39_spill] sm:$0xff] }
 0x9ea   : > { %v6537_v11 = vmul.f32 %v6531_v2, %v10773_v16  ;;  %v6536_v57 = vadd.f32 0.5, %v6535_v37  ;;  %v11272_v2 = vld [vmem:[#allocation40_spill] sm:$0xff] }
 0x9ec   : > { %v10933_v63 = vadd.f32 %v6538_v6, %v6537_v11  ;;  %v6563_v6 = vld [vmem:[#allocation2 + $0x38] sm:$0xff] }
 0x9ee   : > { %8436 = vtanh.f32 %v10933_v63 }
 0x9f1   : > { %v6472_v43 = vpop.f32.mrf.mxu0  ;;  %v6513_v42 = vpop.f32.mrf.mxu1 }
 0x9f2   : > { %v6520_v28 = vadd.f32 %v6472_v43, %v6241_v9  ;;  %v6522_v52 = vadd.f32 %v6513_v42, %v6243_v12 }
 0x9f3   : > { %v6474_v4 = vpop.f32.mrf.mxu0  ;;  %v6515_v56 = vpop.f32.mrf.mxu1 }
 0x9f4   : > { %v6542_v36 = vmul.f32 0.5, %v6520_v28  ;;  %v6521_v13 = vadd.f32 %v6474_v4, %v6242_v31  ;;  %v6523_v25 = vadd.f32 %v6515_v56, %v6244_v49  ;;  %v6565_v56 = vld [vmem:[#allocation2 + $0x1c0] sm:$0xff]  ;;  %v6845_v49 = vld [vmem:[#allocation2 + $0x50] sm:$0xff] }
 0x9f5   : > { %v6476_v24 = vpop.f32.mrf.mxu0  ;;  %v6517_v33 = vpop.f32.mrf.mxu1 }
 0x9f6   : > { %8438 = vtanh.f32 %v6542_v36  ;;  %v6546_v16 = vmul.f32 0.5, %v6521_v13  ;;  %v6551_v55 = vmul.f32 0.5, %v6523_v25 }
 0x9f7   : > { %v6477_v53 = vpop.f32.mrf.mxu0  ;;  %v6518_v34 = vpop.f32.mrf.mxu1 }
 0x9f8   : > { %8440 = vtanh.f32 %v6546_v16 }
 0x9f9   : > { %8442 = vtanh.f32 %v6522_v52 }
 0x9fa   : > { %8444 = vtanh.f32 %v6551_v55 }
 0x9fb   : > { %v8437_v27 = vpop.eup %8436 }
 0x9fc   : > { %v6541_v60 = vmul.f32 %v8437_v27, %v6536_v57 }
 0x9fe   : > { %6560 = vst [vmem:[#allocation3] sm:$0xff] %v6541_v60  ;;  %v6566_v59 = vpack.c.bf16 %v6541_v60, %v6541_v60 }
 0xa00   : > { %6792 = vmatmul.mubr.bf16.vlgmr.msra.gmra.mxu0 %v6566_v59  ;;  %6833 = vmatmul.mubr.bf16.vlgmr.msra.gmra.mxu1 %v6566_v59  ;;  %v6846_v59 = vld [vmem:[#allocation2 + $0x168] sm:$0xff] }
 0xa01   : > { %7043 = vmatpush1.bf16.msra.mxu0 %v10764_v22  ;;  %7084 = vmatpush1.bf16.msra.mxu1 %v10766_v58  ;;  %v11261_v58 = vld [vmem:[#allocation29_spill] sm:$0xff] }
 0xa02   : > { %7044 = vmatprep.subr.bf16.mxu0 %v10780_v39  ;;  %7085 = vmatprep.subr.bf16.mxu1 %v10782_v41 }
 0xa03   : > { %v8439_v47 = vpop.eup %8438  ;;  %7074 = vmatprep.mubr.bf16.mxu0 %v11186_v30  ;;  %7115 = vmatprep.mubr.bf16.mxu1 %v11186_v30 }
 0xa04   : > { %v6544_v32 = vmul.f32 0.5, %v8439_v47 }
 0xa05   : > { %v8441_v29 = vpop.eup %8440  ;;  %7045 = vmatpush1.bf16.msra.mxu0 %v10790_v17  ;;  %7086 = vmatpush1.bf16.msra.mxu1 %v11260_v19  ;;  %v11265_v17 = vld [vmem:[#allocation33_spill] sm:$0xff] }
 0xa06   : > { %v6545_v62 = vadd.f32 0.5, %v6544_v32  ;;  %v6548_v22 = vmul.f32 0.5, %v8441_v29  ;;  %7046 = vmatprep.subr.bf16.mxu0 %v10796_v1  ;;  %7087 = vmatprep.subr.bf16.mxu1 %v11261_v58  ;;  %v8443_v41 = vpop.eup %8442  ;;  %v11267_v1 = vld [vmem:[#allocation35_spill] sm:$0xff] }
 0xa07   : > { %v8445_v35 = vpop.eup %8444 }
 0xa08   : > { %v6549_v39 = vadd.f32 0.5, %v6548_v22  ;;  %v6556_v54 = vmul.f32 %v8443_v41, %v6545_v62  ;;  %v6553_v51 = vmul.f32 0.5, %v8445_v35  ;;  %v6847_v22 = vld [vmem:[#allocation2 + $0x130] sm:$0xff] }
 0xa09   : > { %7047 = vmatpush1.bf16.msra.mxu0 %v11262_v48  ;;  %7088 = vmatpush1.bf16.msra.mxu1 %v11263_v7 }
 0xa0a   : > { %v6555_v30 = vmul.f32 %v6549_v39, %v10839_v61  ;;  %7048 = vmatprep.subr.bf16.mxu0 %v11264_v38  ;;  %7089 = vmatprep.subr.bf16.mxu1 %v11265_v17  ;;  %v11270_v61 = vld [vmem:[#allocation38_spill] sm:$0xff]  ;;  %v6848_v17 = vld [vmem:[#allocation2 + $0x48] sm:$0xff] }
 0xa0c   : > { %v10951_v21 = vadd.f32 %v6556_v54, %v6555_v30 }
 0xa0d   : > { %7049 = vmatpush1.bf16.msra.mxu0 %v11266_v26  ;;  %7090 = vmatpush1.bf16.msra.mxu1 %v11267_v1 }
 0xa0e   : > { %8446 = vtanh.f32 %v10951_v21  ;;  %7050 = vmatprep.subr.bf16.mxu0 %v11268_v15  ;;  %7091 = vmatprep.subr.bf16.mxu1 %v11269_v45 }
 0xa11   : > { %7051 = vmatpush1.bf16.msra.mxu0 %v10843_v23  ;;  %7092 = vmatpush1.bf16.msra.mxu1 %v10845_v8  ;;  %v6554_v23 = vadd.f32 0.5, %v6553_v51 }
 0xa12   : > { %7052 = vmatprep.subr.bf16.mxu0 %v10850_v50  ;;  %7093 = vmatprep.subr.bf16.mxu1 %v11270_v61 }
 0xa15   : > { %7053 = vmatpush1.bf16.msra.mxu0 %v11271_v46  ;;  %7094 = vmatpush1.bf16.msra.mxu1 %v11272_v2 }
 0xa16   : > { %7054 = vmatprep.subr.bf16.mxu0 %v10866_v18  ;;  %7095 = vmatprep.subr.bf16.mxu1 %v10868_v5  ;;  %v6562_v5 = vld [vmem:[#allocation2 + $0x198] sm:$0xff] }
 0xa19   : > { %7055 = vmatpush1.bf16.msra.mxu0 %v10876_v20  ;;  %7096 = vmatpush1.bf16.msra.mxu1 %v10878_v14 }
 0xa1a   : > { %7056 = vmatprep.subr.bf16.mxu0 %v10882_v3  ;;  %7097 = vmatprep.subr.bf16.mxu1 %v10884_v40  ;;  %v6564_v40 = vld [vmem:[#allocation2 + $0xc0] sm:$0xff] }
 0xa1b   : > { %v8447_v8 = vpop.eup %8446 }
 0xa1c   : > { %v6559_v50 = vmul.f32 %v8447_v8, %v6554_v23 }
 0xa1d   : > { %7057 = vmatpush1.bf16.msra.mxu0 %v10888_v10  ;;  %7098 = vmatpush1.bf16.msra.mxu1 %v10890_v0 }
 0xa1e   : > { %6561 = vst [vmem:[#allocation3 + $0x60] sm:$0xff] %v6559_v50  ;;  %v6849_v11 = vpack.c.bf16 %v6559_v50, %v6559_v50 }
 0xa20   : > { %7075 = vmatmul.mubr.bf16.vlgmr.msra.gmra.mxu0 %v6849_v11  ;;  %7116 = vmatmul.mubr.bf16.vlgmr.msra.gmra.mxu1 %v6849_v11 }
 0xac0   : > { %v6793_v18 = vpop.f32.mrf.mxu0  ;;  %v6834_v20 = vpop.f32.mrf.mxu1 }
 0xac1   : > { %v6841_v14 = vadd.f32 %v6793_v18, %v6562_v5  ;;  %v6843_v4 = vadd.f32 %v6834_v20, %v6564_v40 }
 0xac2   : > { %v6795_v9 = vpop.f32.mrf.mxu0  ;;  %v6836_v43 = vpop.f32.mrf.mxu1 }
 0xac3   : > { %v7128_v3 = vmul.f32 0.5, %v6841_v14  ;;  %v6842_v42 = vadd.f32 %v6795_v9, %v6563_v6  ;;  %v6844_v36 = vadd.f32 %v6836_v43, %v6565_v56 }
 0xac4   : > { %v6797_v31 = vpop.f32.mrf.mxu0  ;;  %v6838_v28 = vpop.f32.mrf.mxu1 }
 0xac5   : > { %8448 = vtanh.f32 %v7128_v3  ;;  %v7132_v10 = vmul.f32 0.5, %v6842_v42  ;;  %v7137_v13 = vmul.f32 0.5, %v6844_v36 }
 0xac6   : > { %v6798_v44 = vpop.f32.mrf.mxu0  ;;  %v6839_v0 = vpop.f32.mrf.mxu1 }
 0xac7   : > { %8450 = vtanh.f32 %v7132_v10 }
 0xac8   : > { %8452 = vtanh.f32 %v6843_v4 }
 0xac9   : > { %8454 = vtanh.f32 %v7137_v13 }
 0xad2   : > { %v8449_v12 = vpop.eup %8448 }
 0xad3   : > { %v7130_v24 = vmul.f32 0.5, %v8449_v12 }
 0xad4   : > { %v8451_v33 = vpop.eup %8450 }
 0xad5   : > { %v7131_v37 = vadd.f32 0.5, %v7130_v24  ;;  %v7134_v16 = vmul.f32 0.5, %v8451_v33  ;;  %v8453_v34 = vpop.eup %8452 }
 0xad6   : > { %v8455_v47 = vpop.eup %8454 }
 0xad7   : > { %v7135_v53 = vadd.f32 0.5, %v7134_v16  ;;  %v7142_v57 = vmul.f32 %v8453_v34, %v7131_v37  ;;  %v7139_v41 = vmul.f32 0.5, %v8455_v47 }
 0xad9   : > { %v7141_v52 = vmul.f32 %v7135_v53, %v10933_v63  ;;  %v7140_v54 = vadd.f32 0.5, %v7139_v41 }
 0xadb   : > { %v7143_v27 = vadd.f32 %v7142_v57, %v7141_v52 }
 0xadd   : > { %8456 = vtanh.f32 %v7143_v27  ;;  %7167 = vst [vmem:[%s9150_s26] sm:$0xff] %v7143_v27 }
 0xae0   : > { %v7076_v60 = vpop.f32.mrf.mxu0  ;;  %v7117_v25 = vpop.f32.mrf.mxu1 }
 0xae1   : > { %v7124_v55 = vadd.f32 %v7076_v60, %v6845_v49  ;;  %v7126_v30 = vadd.f32 %v7117_v25, %v6847_v22 }
 0xae2   : > { %v7078_v32 = vpop.f32.mrf.mxu0  ;;  %v7119_v29 = vpop.f32.mrf.mxu1 }
 0xae3   : > { %v7146_v19 = vmul.f32 0.5, %v7124_v55  ;;  %v7125_v62 = vadd.f32 %v7078_v32, %v6846_v59  ;;  %v7127_v1 = vadd.f32 %v7119_v29, %v6848_v17 }
 0xae4   : > { %v7080_v58 = vpop.f32.mrf.mxu0  ;;  %v7121_v39 = vpop.f32.mrf.mxu1 }
 0xae5   : > { %8458 = vtanh.f32 %v7146_v19  ;;  %v7150_v63 = vmul.f32 0.5, %v7125_v62  ;;  %v7155_v15 = vmul.f32 0.5, %v7127_v1 }
 0xae6   : > { %v7081_v48 = vpop.f32.mrf.mxu0  ;;  %v7122_v7 = vpop.f32.mrf.mxu1 }
 0xae7   : > { %8460 = vtanh.f32 %v7150_v63 }
 0xae8   : > { %8462 = vtanh.f32 %v7126_v30 }
 0xae9   : > { %8464 = vtanh.f32 %v7155_v15 }
 0xaea   : > { %v8457_v38 = vpop.eup %8456 }
 0xaeb   : > { %v7145_v26 = vmul.f32 %v8457_v38, %v7140_v54 }
 0xaed   : > { %7164 = vst [vmem:[#allocation3 + $0x38] sm:$0xff] %v7145_v26  ;;  %7166 = vst [vmem:[%s9147_s2] sm:$0xff] %v7145_v26 }
 0xaf2   : > { %v8459_v45 = vpop.eup %8458 }
 0xaf3   : > { %v7148_v61 = vmul.f32 0.5, %v8459_v45 }
 0xaf4   : > { %v8461_v35 = vpop.eup %8460 }
 0xaf5   : > { %v7149_v46 = vadd.f32 0.5, %v7148_v61  ;;  %v7152_v2 = vmul.f32 0.5, %v8461_v35  ;;  %v8463_v23 = vpop.eup %8462 }
 0xaf6   : > { %v8465_v5 = vpop.eup %8464 }
 0xaf7   : > { %v7153_v51 = vadd.f32 0.5, %v7152_v2  ;;  %v7160_v50 = vmul.f32 %v8463_v23, %v7149_v46  ;;  %v7157_v18 = vmul.f32 0.5, %v8465_v5 }
 0xaf9   : > { %v7159_v8 = vmul.f32 %v7153_v51, %v10951_v21  ;;  %v7158_v20 = vadd.f32 0.5, %v7157_v18 }
 0xafb   : > { %v7161_v11 = vadd.f32 %v7160_v50, %v7159_v8 }
 0xafd   : > { %8466 = vtanh.f32 %v7161_v11  ;;  %8190 = vst [vmem:[%s9150_s26 + $0x8] sm:$0xff] %v7161_v11 }
 0xb09   : > { %7175 = sbr.rel (%p8191_p6) target bundleno = 2839 (0xb17), region = 80 }
 0xb0a   : > { %v8467_v6 = vpop.eup %8466 }
 0xb0b   : > { %v7163_v14 = vmul.f32 %v8467_v6, %v7158_v20 }
 0xb0d   : > { %7165 = vst [vmem:[#allocation3 + $0x50] sm:$0xff] %v7163_v14  ;;  %8189 = vst [vmem:[%s9147_s2 + $0x8] sm:$0xff] %v7163_v14 }
 0xb0e   : > { %v7176_v9 = vld [vmem:[#allocation3 + $0x68] sm:$0xff]  ;;  %v7178_v3 = vld [vmem:[#allocation3 + $0x70] sm:$0xff]  ;;  %v7179_v21 = vld [vmem:[#allocation3 + $0x60] sm:$0xff] }
 0xb0f   : > { %7192 = vst [vmem:[#allocation15] sm:$0xff] %v7176_v9  ;;  %7194 = vst [vmem:[#allocation15 + $0x10] sm:$0xff] %v7178_v3  ;;  %v7180_v42 = vld [vmem:[#allocation3 + $0x8] sm:$0xff]  ;;  %v7181_v40 = vld [vmem:[#allocation3 + $0x58] sm:$0xff] }
 0xb10   : > { %7195 = vst [vmem:[#allocation15 + $0x18] sm:$0xff] %v7179_v21  ;;  %7196 = vst [vmem:[#allocation15 + $0x20] sm:$0xff] %v7180_v42  ;;  %v7182_v31 = vld [vmem:[#allocation3 + $0x18] sm:$0xff]  ;;  %v7183_v28 = vld [vmem:[#allocation3 + $0x30] sm:$0xff] }
 0xb11   : > { %7197 = vst [vmem:[#allocation15 + $0x28] sm:$0xff] %v7181_v40  ;;  %v7184_v10 = vld [vmem:[#allocation3 + $0x48] sm:$0xff]  ;;  %7198 = vst [vmem:[#allocation15 + $0x30] sm:$0xff] %v7182_v31  ;;  %v7185_v44 = vld [vmem:[#allocation3 + $0x20] sm:$0xff] }
 0xb12   : > { %7199 = vst [vmem:[#allocation15 + $0x38] sm:$0xff] %v7183_v28  ;;  %7200 = vst [vmem:[#allocation15 + $0x40] sm:$0xff] %v7184_v10  ;;  %v7186_v0 = vld [vmem:[#allocation3 + $0x10] sm:$0xff]  ;;  %v7187_v4 = vld [vmem:[#allocation3 + $0x40] sm:$0xff] }
 0xb13   : > { %7201 = vst [vmem:[#allocation15 + $0x48] sm:$0xff] %v7185_v44  ;;  %7202 = vst [vmem:[#allocation15 + $0x50] sm:$0xff] %v7186_v0  ;;  %v7188_v56 = vld [vmem:[#allocation3] sm:$0xff]  ;;  %v7189_v36 = vld [vmem:[#allocation3 + $0x78] sm:$0xff] }
 0xb14   : > { %v7177_v43 = vld [vmem:[#allocation3 + $0x50] sm:$0xff]  ;;  %7203 = vst [vmem:[#allocation15 + $0x58] sm:$0xff] %v7187_v4  ;;  %v7190_v13 = vld [vmem:[#allocation3 + $0x38] sm:$0xff]  ;;  %7204 = vst [vmem:[#allocation15 + $0x60] sm:$0xff] %v7188_v56 }
 0xb15   : > { %7193 = vst [vmem:[#allocation15 + $0x8] sm:$0xff] %v7177_v43  ;;  %7205 = vst [vmem:[#allocation15 + $0x68] sm:$0xff] %v7189_v36  ;;  %v7191_v12 = vld [vmem:[#allocation3 + $0x28] sm:$0xff] }
 0xb16   : > { %7206 = vst [vmem:[#allocation15 + $0x70] sm:$0xff] %v7190_v13  ;;  %7207 = vst [vmem:[#allocation15 + $0x78] sm:$0xff] %v7191_v12 }
 0xb17 PF: > { %s8207_s1 = sshll.u32 %s8966_s24, 8  ;;  %s7240_s19 = sshll.u32 %s9147_s2, 4  ;;  %s10986_s19 = int_to_ptr.vmem [resolvable:$true] %s7240_s19 }
 0xb18   : > { %s10983_s10 = scalar_lea.hbm %s11077_s7, %s8207_s1  ;;  %s10991_s12 = scalar_lea.hbm %s11078_s8, %s8207_s1 }
 0xb19   : > { %s7209_s18 = scalar_lea.sflag [#allocation17], %s9119_s11  ;;  %s8634_s17 = scalar_lea.vmem %s10986_s19, 256 }
 0xb1a   : > { %p8635_p8 = scmp.ne.s32.totalorder %s10986_s19, %s8634_s17  ;;  %p11273_p12 = scmp.ne.s32.totalorder %s11160_s9, 0 }
 0xb1b   : > { %s8778_s23 = smov [#allocation16]  }
 0xb1c   : > { %p8636_p10 = pnand %p8635_p8, %p11273_p12  ;;  %s8638_s3 = sshll.u32 %s8778_s23, 4  ;;  %s8639_s3 = int_to_ptr.vmem [resolvable:$false] %s8638_s3 }
 0xb1d   : > { %s8640_s20 = scalar_lea.vmem %s8639_s3, 512  ;;  %p8641_p2 = scmp.lt.s32.totalorder %s10986_s19, %s8639_s3 }
 0xb1e   : > { %p8637_p11 = pneg %p8636_p10  ;;  %p8642_p4 = scmp.lt.s32.totalorder %s8640_s20, %s8634_s17 }
 0xb20   : > { %p8643_p0 = por %p8642_p4, %p8641_p2 }
 0xb22   : > { %p8644_p9 = pnand %p8643_p0, %p8637_p11 }
 0xb24   : > { %8647 = shalt.err (!%p8644_p9)
}
 0xb25   : > { %s8648_s29 = scalar_lea.hbm %s10983_s10, 256  ;;  %s8652_s25 = scalar_lea.hbm %s11077_s7, 768 }
 0xb26   : > { %p8649_p3 = scmp.ne.s32.totalorder %s10983_s10, %s8648_s29  ;;  %p8653_p13 = scmp.lt.s32.totalorder %s10983_s10, %s11077_s7 }
 0xb27   : > { %p8654_p1 = scmp.lt.s32.totalorder %s8652_s25, %s8648_s29 }
 0xb28   : > { %p8650_p7 = pnand %p8649_p3, %p11273_p12 }
 0xb29   : > { %p8655_p6 = por %p8654_p1, %p8653_p13 }
 0xb2a   : > { %p8651_p5 = pneg %p8650_p7 }
 0xb2c   : > { %p8656_p8 = pnand %p8655_p6, %p8651_p5 }
 0xb2e   : > { %8659 = shalt.err (!%p8656_p8)
}
 0xb2f   : > { %s8779_s14 = smov 128   ;;  %s8780_s16 = smov 8  }
 0xb30   : > { %8225 = dma.vmem_to_hbm [thread:$0]  (%p11273_p12), %s10986_s19, 256, %s10983_s10, %s7209_s18, %s8779_s14, %s8779_s14, %s8780_s16  }
 0xb31   : > { %s8781_s13 = smov [#allocation15]   ;;  %s7256_s17 = sshll.u32 %s9150_s26, 4  ;;  %s7257_s17 = int_to_ptr.vmem [resolvable:$true] %s7256_s17 }
 0xb32   : > { %s7224_s22 = sshll.u32 %s8781_s13, 4  ;;  %p11274_p11 = scmp.eq.s32.totalorder %s8966_s24, 2  ;;  %s7225_s22 = int_to_ptr.vmem [resolvable:$true] %s7224_s22 }
 0xb33   : > { %s8660_s23 = scalar_lea.vmem %s7225_s22, 2048  ;;  %p8667_p0 = scmp.lt.s32.totalorder %s7225_s22, %s7225_s22 }
 0xb34   : > { %p8661_p10 = scmp.ne.s32.totalorder %s7225_s22, %s8660_s23  ;;  %p8668_p9 = scmp.lt.s32.totalorder %s8660_s23, %s8660_s23 }
 0xb36   : > { %p8662_p2 = pnand %p8661_p10, %p11274_p11  ;;  %p8669_p3 = por %p8668_p9, %p8667_p0 }
 0xb38   : > { %p8663_p4 = pneg %p8662_p2 }
 0xb3a   : > { %p8670_p7 = pnand %p8669_p3, %p8663_p4 }
 0xb3c   : > { %8673 = shalt.err (!%p8670_p7)
}
 0xb3d   : > { %s8782_s3 = smov 256   ;;  %s8783_s20 = smov 16  }
 0xb3e   : > { %p11275_p5 = pmov %p11274_p11  ;;  %s8684_s26 = scalar_lea.vmem %s7257_s17, 256 }
 0xb3f   : > { %p8685_p13 = scmp.ne.s32.totalorder %s7257_s17, %s8684_s26  ;;  %s8784_s29 = smov [#allocation18]  }
 0xb40   : > { %8224 = dma.vmem_to_hbm [thread:$0]  (%p11275_p5), %s7225_s22, 2048, %s11076_s6, [#allocation6], %s8782_s3, %s8782_s3, %s8783_s20  }
 0xb41   : > { %p8686_p1 = pnand %p8685_p13, %p11273_p12  ;;  %s8688_s21 = sshll.u32 %s8784_s29, 4  ;;  %s8689_s21 = int_to_ptr.vmem [resolvable:$false] %s8688_s21 }
 0xb42   : > { %s8690_s15 = scalar_lea.vmem %s8689_s21, 512  ;;  %p8691_p8 = scmp.lt.s32.totalorder %s7257_s17, %s8689_s21 }
 0xb43   : > { %p8687_p6 = pneg %p8686_p1  ;;  %p8692_p10 = scmp.lt.s32.totalorder %s8690_s15, %s8684_s26 }
 0xb45   : > { %p8693_p11 = por %p8692_p10, %p8691_p8 }
 0xb47   : > { %p8694_p2 = pnand %p8693_p11, %p8687_p6 }
 0xb49   : > { %8697 = shalt.err (!%p8694_p2)
}
 0xb4a   : > { %s8698_s25 = scalar_lea.hbm %s10991_s12, 256  ;;  %s8702_s13 = scalar_lea.hbm %s11078_s8, 768 }
 0xb4b   : > { %p8699_p4 = scmp.ne.s32.totalorder %s10991_s12, %s8698_s25  ;;  %p8703_p3 = scmp.lt.s32.totalorder %s10991_s12, %s11078_s8 }
 0xb4c   : > { %p8704_p7 = scmp.lt.s32.totalorder %s8702_s13, %s8698_s25 }
 0xb4d   : > { %p8700_p0 = pnand %p8699_p4, %p11273_p12 }
 0xb4e   : > { %p8705_p5 = por %p8704_p7, %p8703_p3 }
 0xb4f   : > { %p8701_p9 = pneg %p8700_p0 }
 0xb51   : > { %p8706_p13 = pnand %p8705_p5, %p8701_p9 }
 0xb53   : > { %8709 = shalt.err (!%p8706_p13)
}
 0xb54   : > { %8226 = dma.vmem_to_hbm [thread:$0]  (%p11273_p12), %s7257_s17, 256, %s10991_s12, %s7209_s18, %s8779_s14, %s8779_s14, %s8780_s16  }
 0xb55   : > { %p11276_p1 = scmp.eq.s32.totalorder %s8966_s24, 2 }
 0xb57   : > { %8743 = dma.done.wait (%p11276_p1), [#allocation6], 2048   ;;  %p11277_p6 = pmov %p11276_p1 }
 0xb59   : > { %8745 = vsyncadd (%p11277_p6), [#allocation6], 4294965248 }
 0xb5a PF: > { %p8263_p8 = scmp.ge.s32.totalorder %s8764_s30, 2  ;;  %s11278_s3 = sadd.s32 4294967294, %s8764_s30  }
 0xb5b   : > { %s7275_s9 = sand.u32 1, %s11278_s3   ;;  %p11279_p10 = scmp.ne.s32.totalorder %s11161_s27, 0 }
 0xb5c   : > { %s7276_s20 = scalar_lea.sflag [#allocation17], %s7275_s9 }
 0xb5d   : > { %p8252_p11 = pnand %p8263_p8, %p11279_p10 }
 0xb5f   : > { %p8253_p2 = pneg %p8252_p11 }
 0xb61   : > { %8747 = dma.done.wait (%p8253_p2), %s7276_s20, 512  }
 0xb62   : > { %8749 = vsyncadd (%p8253_p2), %s7276_s20, 4294966784  ;;  %s11280_s30 = sld [smem:[#allocation26_spill]]  ;;  %s11283_s27 = smov %s8756_s28 }
 0xb63   : > { %s11281_s11 = sld [smem:[#allocation25_spill]] }
 0xb64   : > { %s11282_s29 = sld [smem:[#allocation27_spill]] }
 0xb68   : > { %p30_p12 = scmp.ge.s32.totalorder %s11280_s30, 5  }
 0xb69   : > { %s11284_s28 = smov %s11281_s11 }
 0xb6a   :  { %32 = sbr.rel (!%p30_p12) target bundleno = 15 (0xf), region = 196 }
 0xb6f   :  { %7290 = vsyncpa [#allocation5], 1 }
 0xb70   :  { %7292 = vsyncpa [#allocation5 + $0x1], 1 }
 0xb71   :  { %7293 = vsyncpa [#allocation8], 1 }
 0xb72   :  { %7295 = vsyncpa [#allocation8 + $0x1], 1 }
 0xb73   :  { %7296 = vsyncpa [#allocation11], 1 }
 0xb74   :  { %7298 = vsyncpa [#allocation11 + $0x1], 1 }
 0xb75   :  { %7299 = vsyncpa [#allocation14], 1 }
 0xb76   :  { %7301 = vsyncpa [#allocation14 + $0x1], 1 }
 0xb77   :  { %7302 = vsyncpa [#allocation6], 1 }
 0xb78   :  { %7304 = vsyncpa [#allocation6 + $0x1], 1 }
 0xb79   :  { %7305 = vsyncpa [#allocation17], 1 }
 0xb7a   :  { %7307 = vsyncpa [#allocation17 + $0x1], 1 }

</bundles_post_ra>
